<compile_context>
chip_gen: v7x
topology: tpu7x:2x2x1
jax: 0.10.0
libtpu: 0.0.40
codegen_flags: <defaults>
</compile_context>

<pallas_src>
import functools

import jax
import jax.numpy as jnp
from jax.experimental import pallas as pl
from jax.experimental.pallas import tpu as pltpu

H = W = 28
HP = WP = 30            # zero-padded spatial extent (padding=1)
SEG = 1024              # per-image flattened segment length (>= 30*30, mult of 128)
MARGIN = 128            # lane halo so centered tap offsets (+-31) stay in bounds
NUM_CLASSES = 10
C1, C2, C3 = 4, 8, 4    # conv output channels


def model_kernel(x_ref, m_ref, w1_ref, b1_ref, w2_ref, b2_ref, w3_ref, b3_ref,
                 out_ref, a1_ref, a2_ref, *, bt):
    """One batch tile: conv1 -> conv2 -> conv3 in the flat-segment layout."""
    L = bt * SEG

    # Zero ONLY the halo lanes of the activation scratch; the interior is
    # fully overwritten (and its padding lanes mask-zeroed) every step.
    # Not gated on program_id: with ("parallel",) each TensorCore owns its
    # own scratch and must initialize its own halos.
    a1_ref[:, 0:MARGIN] = jnp.zeros((C1, MARGIN), jnp.bfloat16)
    a1_ref[:, MARGIN + L:] = jnp.zeros((C1, MARGIN), jnp.bfloat16)
    a2_ref[:, 0:MARGIN] = jnp.zeros((C2, MARGIN), jnp.bfloat16)
    a2_ref[:, MARGIN + L:] = jnp.zeros((C2, MARGIN), jnp.bfloat16)

    mask = m_ref[...]                      # (1, SEG) f32, 1.0 at valid pixels

    def conv_layer(read_in, cin, w_ref, b_ref, write_out):
        """3x3 conv + bias + ReLU + pad-lane re-zeroing, one image at a time.

        Nine accumulated per-tap dots (bf16 operands, f32 accumulation); no
        im2col patch buffer.  read_in(o) returns the (cin, SEG) input slice at
        lane offset o; write_out(img, y) stores the (cout, SEG) result.
        """
        w_taps = [w_ref[t] for t in range(9)]   # hoisted (cout, cin) bf16 loads
        b = b_ref[...]                          # (cout, 1) f32
        cout = b.shape[0]
        for img in range(bt):
            acc = jnp.zeros((cout, SEG), jnp.float32)
            t = 0
            for dy in range(3):
                for dx in range(3):
                    o = img * SEG + (dy - 1) * WP + (dx - 1)
                    xs = read_in(o)             # (cin, SEG) bf16, static slice
                    if cin == 1:                # K=1: outer product on the VPU
                        acc = acc + (w_taps[t].astype(jnp.float32) *
                                     xs.astype(jnp.float32))
                    else:                       # bf16 MXU matmul, f32 accumulate
                        acc = acc + jnp.dot(w_taps[t], xs,
                                            preferred_element_type=jnp.float32)
                    t += 1
            y = jnp.maximum(acc + b, 0.0) * mask    # pad/tail lanes -> exactly 0
            write_out(img, y)

    def read_x(o):
        return x_ref[0, :, MARGIN + o:MARGIN + o + SEG]

    def read_a1(o):
        return a1_ref[:, MARGIN + o:MARGIN + o + SEG]

    def read_a2(o):
        return a2_ref[:, MARGIN + o:MARGIN + o + SEG]

    def write_a1(img, y):
        a1_ref[:, MARGIN + img * SEG:MARGIN + (img + 1) * SEG] = y.astype(jnp.bfloat16)

    def write_a2(img, y):
        a2_ref[:, MARGIN + img * SEG:MARGIN + (img + 1) * SEG] = y.astype(jnp.bfloat16)

    def write_out(img, y):
        out_ref[0, :, img * SEG:(img + 1) * SEG] = y        # lane-dense f32 store

    conv_layer(read_x, 1, w1_ref, b1_ref, write_a1)         # 1 -> 4 channels
    conv_layer(read_a1, C1, w2_ref, b2_ref, write_a2)       # 4 -> 8 channels
    conv_layer(read_a2, C2, w3_ref, b3_ref, write_out)      # 8 -> 4 channels


def forward(x, params, *, block_b=8):
    w1, b1, w2, b2, w3, b3, wfc, bfc = params
    x = x.astype(jnp.float32)
    B = x.shape[0]
    bt = min(block_b, B)                 # images per grid step
    bpad = -(-B // bt) * bt
    n_steps = bpad // bt
    L = bt * SEG
    LBUF = L + 2 * MARGIN

    # ---- wrapper-side layout plumbing (lane-dense, zero-padded, bf16) ----
    xp = jnp.pad(x, ((0, bpad - B), (1, 1), (1, 1)))            # (bpad, 30, 30)
    xp = xp.reshape(bpad, HP * WP)
    xp = jnp.pad(xp, ((0, 0), (0, SEG - HP * WP)))              # (bpad, SEG)
    xflat = xp.reshape(n_steps, 1, L)
    xflat = jnp.pad(xflat, ((0, 0), (0, 0), (MARGIN, MARGIN)))  # (n_steps, 1, LBUF)
    xflat = xflat.astype(jnp.bfloat16)

    # 0/1 mask of valid (interior) lanes within one image segment.
    p = jnp.arange(SEG)
    hp, wp = p // WP, p % WP
    mask = ((hp >= 1) & (hp <= H) & (wp >= 1) & (wp <= W)).astype(jnp.float32)[None, :]

    # Conv weights -> (9, cout, cin) bf16, tap-major; biases -> (cout, 1) f32.
    def conv_w(w):
        co, ci = w.shape[0], w.shape[1]
        return jnp.transpose(w, (2, 3, 0, 1)).reshape(9, co, ci).astype(jnp.bfloat16)

    w1m, w2m, w3m = conv_w(w1), conv_w(w2), conv_w(w3)
    b1c = b1.reshape(-1, 1).astype(jnp.float32)
    b2c = b2.reshape(-1, 1).astype(jnp.float32)
    b3c = b3.reshape(-1, 1).astype(jnp.float32)

    kernel = functools.partial(model_kernel, bt=bt)
    y3 = pl.pallas_call(
        kernel,
        out_shape=jax.ShapeDtypeStruct((n_steps, C3, L), jnp.float32),
        grid=(n_steps,),
        in_specs=[
            pl.BlockSpec((1, 1, LBUF), lambda g: (g, 0, 0)),    # x, flat layout
            pl.BlockSpec((1, SEG), lambda g: (0, 0)),           # valid-pixel mask
            pl.BlockSpec((9, C1, 1), lambda g: (0, 0, 0)),      # conv1 w (taps)
            pl.BlockSpec((C1, 1), lambda g: (0, 0)),            # conv1 b
            pl.BlockSpec((9, C2, C1), lambda g: (0, 0, 0)),     # conv2 w (taps)
            pl.BlockSpec((C2, 1), lambda g: (0, 0)),            # conv2 b
            pl.BlockSpec((9, C3, C2), lambda g: (0, 0, 0)),     # conv3 w (taps)
            pl.BlockSpec((C3, 1), lambda g: (0, 0)),            # conv3 b
        ],
        out_specs=pl.BlockSpec((1, C3, L), lambda g: (g, 0, 0)),
        scratch_shapes=[
            pltpu.VMEM((C1, LBUF), jnp.bfloat16),    # conv1 activations (+halos)
            pltpu.VMEM((C2, LBUF), jnp.bfloat16),    # conv2 activations (+halos)
        ],
        compiler_params=pltpu.CompilerParams(
            dimension_semantics=("parallel",)),
    )(xflat, mask, w1m, b1c, w2m, b2c, w3m, b3c)

    # ---- FC + log_softmax(dim=0) in plain XLA (per perf review: the in-kernel
    # per-image regroup, the (4096,10) fc weight in VMEM and the masked (bt,10)
    # store were pure overhead; this GEMM is tiny). ----
    feat = y3.reshape(n_steps, C3, bt, SEG)
    feat = jnp.transpose(feat, (0, 2, 1, 3)).reshape(bpad, C3, SEG)[:B]
    feat = feat[:, :, :HP * WP].reshape(B, C3, HP, WP)[:, :, 1:1 + H, 1:1 + W]
    feat = feat.reshape(B, C3 * H * W)                       # (B, 3136), NCHW order
    logits = feat @ wfc.T + bfc
    return jax.nn.log_softmax(logits, axis=0)                # dim=0, as in torch


def reference(x, params):
    """Pure-JAX f32 reference reproducing the PyTorch forward (eval mode)."""
    w1, b1, w2, b2, w3, b3, wfc, bfc = params
    y = x.astype(jnp.float32)[:, None, :, :]                 # NCHW
    for w, b in ((w1, b1), (w2, b2), (w3, b3)):
        y = jax.lax.conv_general_dilated(
            y, w, window_strides=(1, 1), padding="SAME",
            dimension_numbers=("NCHW", "OIHW", "NCHW"))
        y = jnp.maximum(y + b[None, :, None, None], 0.0)
    yf = y.reshape(y.shape[0], -1)
    logits = yf @ wfc.T + bfc
    return jax.nn.log_softmax(logits, axis=0)                # dim=0, as in torch code


if __name__ == "__main__":
    B = 2
    key = jax.random.PRNGKey(0)
    kx, kp = jax.random.split(key)
    x = jax.random.normal(kx, (B, H, W), jnp.float32)        # pre-unsqueeze input

    ks = jax.random.split(kp, 8)
    w1 = jax.random.normal(ks[0], (C1, 1, 3, 3), jnp.float32) * 0.30
    b1 = jax.random.normal(ks[1], (C1,), jnp.float32) * 0.10
    w2 = jax.random.normal(ks[2], (C2, C1, 3, 3), jnp.float32) * 0.15
    b2 = jax.random.normal(ks[3], (C2,), jnp.float32) * 0.10
    w3 = jax.random.normal(ks[4], (C3, C2, 3, 3), jnp.float32) * 0.15
    b3 = jax.random.normal(ks[5], (C3,), jnp.float32) * 0.10
    wfc = jax.random.normal(ks[6], (NUM_CLASSES, C3 * H * W), jnp.float32) * 0.02
    bfc = jax.random.normal(ks[7], (NUM_CLASSES,), jnp.float32) * 0.10
    params = (w1, b1, w2, b2, w3, b3, wfc, bfc)

    out = jax.block_until_ready(forward(x, params))
    ref = reference(x, params)
    assert out.shape == (B, NUM_CLASSES)
    err = float(jnp.max(jnp.abs(out - ref)))
    # bf16 MXU operands (f32 accumulation) -> looser tolerance vs f32 reference.
    assert jnp.allclose(out, ref, atol=5e-2, rtol=5e-2), f"max abs diff {err}"
    print("KERNEL_OK")
</pallas_src>

<mosaic_0001>
module attributes {stable_mosaic.version = 11 : i64} {
  func.func @model_kernel(%arg0: i32, %arg1: memref<1x1x2304xbf16, #tpu.memory_space<vmem>>, %arg2: memref<1x1024xf32, #tpu.memory_space<vmem>>, %arg3: memref<9x4x1xbf16, #tpu.memory_space<vmem>>, %arg4: memref<4x1xf32, #tpu.memory_space<vmem>>, %arg5: memref<9x8x4xbf16, #tpu.memory_space<vmem>>, %arg6: memref<8x1xf32, #tpu.memory_space<vmem>>, %arg7: memref<9x4x8xbf16, #tpu.memory_space<vmem>>, %arg8: memref<4x1xf32, #tpu.memory_space<vmem>>, %arg9: memref<1x4x2048xf32, #tpu.memory_space<vmem>>, %arg10: memref<4x2304xbf16, #tpu.memory_space<vmem>>, %arg11: memref<8x2304xbf16, #tpu.memory_space<vmem>>) attributes {dimension_semantics = [#tpu.dimension_semantics<parallel>], iteration_bounds = array<i64: 1>, scalar_prefetch = 0 : i64, scratch_operands = 2 : i64, tpu.core_type = #tpu.core_type<tc>, window_params = [{transform_indices = @transform_0, window_bounds = array<i64: 1, 1, 2304>}, {pipeline_mode = #tpu.pipeline_mode<synchronous>, transform_indices = @transform_1, window_bounds = array<i64: 1, 1024>}, {pipeline_mode = #tpu.pipeline_mode<synchronous>, transform_indices = @transform_2, window_bounds = array<i64: 9, 4, 1>}, {pipeline_mode = #tpu.pipeline_mode<synchronous>, transform_indices = @transform_3, window_bounds = array<i64: 4, 1>}, {pipeline_mode = #tpu.pipeline_mode<synchronous>, transform_indices = @transform_4, window_bounds = array<i64: 9, 8, 4>}, {pipeline_mode = #tpu.pipeline_mode<synchronous>, transform_indices = @transform_5, window_bounds = array<i64: 8, 1>}, {pipeline_mode = #tpu.pipeline_mode<synchronous>, transform_indices = @transform_6, window_bounds = array<i64: 9, 4, 8>}, {pipeline_mode = #tpu.pipeline_mode<synchronous>, transform_indices = @transform_7, window_bounds = array<i64: 4, 1>}, {transform_indices = @transform_8, window_bounds = array<i64: 1, 4, 2048>}]} {
    %cst = arith.constant 0.000000e+00 : bf16
    %0 = vector.broadcast %cst : bf16 to vector<4x128xbf16>
    %c0 = arith.constant 0 : index
    %c0_0 = arith.constant 0 : index
    %1 = vector.load %arg10[%c0, %c0_0] : memref<4x2304xbf16, #tpu.memory_space<vmem>>, vector<4x128xbf16>
    tpu.vector_store %arg10[%c0, %c0_0], %0 {strides = array<i32>} : memref<4x2304xbf16, #tpu.memory_space<vmem>>, vector<4x128xbf16>,
    %cst_1 = arith.constant 0.000000e+00 : bf16
    %2 = vector.broadcast %cst_1 : bf16 to vector<4x128xbf16>
    %c0_2 = arith.constant 0 : index
    %c2176 = arith.constant 2176 : index
    %3 = vector.load %arg10[%c0_2, %c2176] : memref<4x2304xbf16, #tpu.memory_space<vmem>>, vector<4x128xbf16>
    tpu.vector_store %arg10[%c0_2, %c2176], %2 {strides = array<i32>} : memref<4x2304xbf16, #tpu.memory_space<vmem>>, vector<4x128xbf16>,
    %cst_3 = arith.constant 0.000000e+00 : bf16
    %4 = vector.broadcast %cst_3 : bf16 to vector<8x128xbf16>
    %c0_4 = arith.constant 0 : index
    %c0_5 = arith.constant 0 : index
    %5 = vector.load %arg11[%c0_4, %c0_5] : memref<8x2304xbf16, #tpu.memory_space<vmem>>, vector<8x128xbf16>
    tpu.vector_store %arg11[%c0_4, %c0_5], %4 {strides = array<i32>} : memref<8x2304xbf16, #tpu.memory_space<vmem>>, vector<8x128xbf16>,
    %cst_6 = arith.constant 0.000000e+00 : bf16
    %6 = vector.broadcast %cst_6 : bf16 to vector<8x128xbf16>
    %c0_7 = arith.constant 0 : index
    %c2176_8 = arith.constant 2176 : index
    %7 = vector.load %arg11[%c0_7, %c2176_8] : memref<8x2304xbf16, #tpu.memory_space<vmem>>, vector<8x128xbf16>
    tpu.vector_store %arg11[%c0_7, %c2176_8], %6 {strides = array<i32>} : memref<8x2304xbf16, #tpu.memory_space<vmem>>, vector<8x128xbf16>,
    %c0_9 = arith.constant 0 : index
    %c0_10 = arith.constant 0 : index
    %8 = vector.load %arg2[%c0_9, %c0_10] : memref<1x1024xf32, #tpu.memory_space<vmem>>, vector<1x1024xf32>
    %c0_11 = arith.constant 0 : index
    %c0_12 = arith.constant 0 : index
    %c0_13 = arith.constant 0 : index
    %9 = vector.load %arg3[%c0_11, %c0_12, %c0_13] : memref<9x4x1xbf16, #tpu.memory_space<vmem>>, vector<1x4x1xbf16>
    %10 = vector.shape_cast %9 : vector<1x4x1xbf16> to vector<4x1xbf16>
    %c1 = arith.constant 1 : index
    %c0_14 = arith.constant 0 : index
    %c0_15 = arith.constant 0 : index
    %11 = vector.load %arg3[%c1, %c0_14, %c0_15] : memref<9x4x1xbf16, #tpu.memory_space<vmem>>, vector<1x4x1xbf16>
    %12 = vector.shape_cast %11 : vector<1x4x1xbf16> to vector<4x1xbf16>
    %c2 = arith.constant 2 : index
    %c0_16 = arith.constant 0 : index
    %c0_17 = arith.constant 0 : index
    %13 = vector.load %arg3[%c2, %c0_16, %c0_17] : memref<9x4x1xbf16, #tpu.memory_space<vmem>>, vector<1x4x1xbf16>
    %14 = vector.shape_cast %13 : vector<1x4x1xbf16> to vector<4x1xbf16>
    %c3 = arith.constant 3 : index
    %c0_18 = arith.constant 0 : index
    %c0_19 = arith.constant 0 : index
    %15 = vector.load %arg3[%c3, %c0_18, %c0_19] : memref<9x4x1xbf16, #tpu.memory_space<vmem>>, vector<1x4x1xbf16>
    %16 = vector.shape_cast %15 : vector<1x4x1xbf16> to vector<4x1xbf16>
    %c4 = arith.constant 4 : index
    %c0_20 = arith.constant 0 : index
    %c0_21 = arith.constant 0 : index
    %17 = vector.load %arg3[%c4, %c0_20, %c0_21] : memref<9x4x1xbf16, #tpu.memory_space<vmem>>, vector<1x4x1xbf16>
    %18 = vector.shape_cast %17 : vector<1x4x1xbf16> to vector<4x1xbf16>
    %c5 = arith.constant 5 : index
    %c0_22 = arith.constant 0 : index
    %c0_23 = arith.constant 0 : index
    %19 = vector.load %arg3[%c5, %c0_22, %c0_23] : memref<9x4x1xbf16, #tpu.memory_space<vmem>>, vector<1x4x1xbf16>
    %20 = vector.shape_cast %19 : vector<1x4x1xbf16> to vector<4x1xbf16>
    %c6 = arith.constant 6 : index
    %c0_24 = arith.constant 0 : index
    %c0_25 = arith.constant 0 : index
    %21 = vector.load %arg3[%c6, %c0_24, %c0_25] : memref<9x4x1xbf16, #tpu.memory_space<vmem>>, vector<1x4x1xbf16>
    %22 = vector.shape_cast %21 : vector<1x4x1xbf16> to vector<4x1xbf16>
    %c7 = arith.constant 7 : index
    %c0_26 = arith.constant 0 : index
    %c0_27 = arith.constant 0 : index
    %23 = vector.load %arg3[%c7, %c0_26, %c0_27] : memref<9x4x1xbf16, #tpu.memory_space<vmem>>, vector<1x4x1xbf16>
    %24 = vector.shape_cast %23 : vector<1x4x1xbf16> to vector<4x1xbf16>
    %c8 = arith.constant 8 : index
    %c0_28 = arith.constant 0 : index
    %c0_29 = arith.constant 0 : index
    %25 = vector.load %arg3[%c8, %c0_28, %c0_29] : memref<9x4x1xbf16, #tpu.memory_space<vmem>>, vector<1x4x1xbf16>
    %26 = vector.shape_cast %25 : vector<1x4x1xbf16> to vector<4x1xbf16>
    %c0_30 = arith.constant 0 : index
    %c0_31 = arith.constant 0 : index
    %27 = vector.load %arg4[%c0_30, %c0_31] : memref<4x1xf32, #tpu.memory_space<vmem>>, vector<4x1xf32>
    %cst_32 = arith.constant 0.000000e+00 : f32
    %28 = vector.broadcast %cst_32 : f32 to vector<4x1024xf32>
    %c0_33 = arith.constant 0 : index
    %c0_34 = arith.constant 0 : index
    %c97 = arith.constant 97 : index
    %29 = vector.load %arg1[%c0_33, %c0_34, %c97] : memref<1x1x2304xbf16, #tpu.memory_space<vmem>>, vector<1x1x1024xbf16>
    %30 = vector.shape_cast %29 : vector<1x1x1024xbf16> to vector<1x1024xbf16>
    %31 = arith.extf %10 : vector<4x1xbf16> to vector<4x1xf32>
    %32 = arith.extf %30 : vector<1x1024xbf16> to vector<1x1024xf32>
    %33 = vector.broadcast %31 : vector<4x1xf32> to vector<4x1024xf32>
    %34 = vector.broadcast %32 : vector<1x1024xf32> to vector<4x1024xf32>
    %35 = arith.mulf %33, %34 : vector<4x1024xf32>
    %36 = arith.addf %28, %35 : vector<4x1024xf32>
    %c0_35 = arith.constant 0 : index
    %c0_36 = arith.constant 0 : index
    %c98 = arith.constant 98 : index
    %37 = vector.load %arg1[%c0_35, %c0_36, %c98] : memref<1x1x2304xbf16, #tpu.memory_space<vmem>>, vector<1x1x1024xbf16>
    %38 = vector.shape_cast %37 : vector<1x1x1024xbf16> to vector<1x1024xbf16>
    %39 = arith.extf %12 : vector<4x1xbf16> to vector<4x1xf32>
    %40 = arith.extf %38 : vector<1x1024xbf16> to vector<1x1024xf32>
    %41 = vector.broadcast %39 : vector<4x1xf32> to vector<4x1024xf32>
    %42 = vector.broadcast %40 : vector<1x1024xf32> to vector<4x1024xf32>
    %43 = arith.mulf %41, %42 : vector<4x1024xf32>
    %44 = arith.addf %36, %43 : vector<4x1024xf32>
    %c0_37 = arith.constant 0 : index
    %c0_38 = arith.constant 0 : index
    %c99 = arith.constant 99 : index
    %45 = vector.load %arg1[%c0_37, %c0_38, %c99] : memref<1x1x2304xbf16, #tpu.memory_space<vmem>>, vector<1x1x1024xbf16>
    %46 = vector.shape_cast %45 : vector<1x1x1024xbf16> to vector<1x1024xbf16>
    %47 = arith.extf %14 : vector<4x1xbf16> to vector<4x1xf32>
    %48 = arith.extf %46 : vector<1x1024xbf16> to vector<1x1024xf32>
    %49 = vector.broadcast %47 : vector<4x1xf32> to vector<4x1024xf32>
    %50 = vector.broadcast %48 : vector<1x1024xf32> to vector<4x1024xf32>
    %51 = arith.mulf %49, %50 : vector<4x1024xf32>
    %52 = arith.addf %44, %51 : vector<4x1024xf32>
    %c0_39 = arith.constant 0 : index
    %c0_40 = arith.constant 0 : index
    %c127 = arith.constant 127 : index
    %53 = vector.load %arg1[%c0_39, %c0_40, %c127] : memref<1x1x2304xbf16, #tpu.memory_space<vmem>>, vector<1x1x1024xbf16>
    %54 = vector.shape_cast %53 : vector<1x1x1024xbf16> to vector<1x1024xbf16>
    %55 = arith.extf %16 : vector<4x1xbf16> to vector<4x1xf32>
    %56 = arith.extf %54 : vector<1x1024xbf16> to vector<1x1024xf32>
    %57 = vector.broadcast %55 : vector<4x1xf32> to vector<4x1024xf32>
    %58 = vector.broadcast %56 : vector<1x1024xf32> to vector<4x1024xf32>
    %59 = arith.mulf %57, %58 : vector<4x1024xf32>
    %60 = arith.addf %52, %59 : vector<4x1024xf32>
    %c0_41 = arith.constant 0 : index
    %c0_42 = arith.constant 0 : index
    %c128 = arith.constant 128 : index
    %61 = vector.load %arg1[%c0_41, %c0_42, %c128] : memref<1x1x2304xbf16, #tpu.memory_space<vmem>>, vector<1x1x1024xbf16>
    %62 = vector.shape_cast %61 : vector<1x1x1024xbf16> to vector<1x1024xbf16>
    %63 = arith.extf %18 : vector<4x1xbf16> to vector<4x1xf32>
    %64 = arith.extf %62 : vector<1x1024xbf16> to vector<1x1024xf32>
    %65 = vector.broadcast %63 : vector<4x1xf32> to vector<4x1024xf32>
    %66 = vector.broadcast %64 : vector<1x1024xf32> to vector<4x1024xf32>
    %67 = arith.mulf %65, %66 : vector<4x1024xf32>
    %68 = arith.addf %60, %67 : vector<4x1024xf32>
    %c0_43 = arith.constant 0 : index
    %c0_44 = arith.constant 0 : index
    %c129 = arith.constant 129 : index
    %69 = vector.load %arg1[%c0_43, %c0_44, %c129] : memref<1x1x2304xbf16, #tpu.memory_space<vmem>>, vector<1x1x1024xbf16>
    %70 = vector.shape_cast %69 : vector<1x1x1024xbf16> to vector<1x1024xbf16>
    %71 = arith.extf %20 : vector<4x1xbf16> to vector<4x1xf32>
    %72 = arith.extf %70 : vector<1x1024xbf16> to vector<1x1024xf32>
    %73 = vector.broadcast %71 : vector<4x1xf32> to vector<4x1024xf32>
    %74 = vector.broadcast %72 : vector<1x1024xf32> to vector<4x1024xf32>
    %75 = arith.mulf %73, %74 : vector<4x1024xf32>
    %76 = arith.addf %68, %75 : vector<4x1024xf32>
    %c0_45 = arith.constant 0 : index
    %c0_46 = arith.constant 0 : index
    %c157 = arith.constant 157 : index
    %77 = vector.load %arg1[%c0_45, %c0_46, %c157] : memref<1x1x2304xbf16, #tpu.memory_space<vmem>>, vector<1x1x1024xbf16>
    %78 = vector.shape_cast %77 : vector<1x1x1024xbf16> to vector<1x1024xbf16>
    %79 = arith.extf %22 : vector<4x1xbf16> to vector<4x1xf32>
    %80 = arith.extf %78 : vector<1x1024xbf16> to vector<1x1024xf32>
    %81 = vector.broadcast %79 : vector<4x1xf32> to vector<4x1024xf32>
    %82 = vector.broadcast %80 : vector<1x1024xf32> to vector<4x1024xf32>
    %83 = arith.mulf %81, %82 : vector<4x1024xf32>
    %84 = arith.addf %76, %83 : vector<4x1024xf32>
    %c0_47 = arith.constant 0 : index
    %c0_48 = arith.constant 0 : index
    %c158 = arith.constant 158 : index
    %85 = vector.load %arg1[%c0_47, %c0_48, %c158] : memref<1x1x2304xbf16, #tpu.memory_space<vmem>>, vector<1x1x1024xbf16>
    %86 = vector.shape_cast %85 : vector<1x1x1024xbf16> to vector<1x1024xbf16>
    %87 = arith.extf %24 : vector<4x1xbf16> to vector<4x1xf32>
    %88 = arith.extf %86 : vector<1x1024xbf16> to vector<1x1024xf32>
    %89 = vector.broadcast %87 : vector<4x1xf32> to vector<4x1024xf32>
    %90 = vector.broadcast %88 : vector<1x1024xf32> to vector<4x1024xf32>
    %91 = arith.mulf %89, %90 : vector<4x1024xf32>
    %92 = arith.addf %84, %91 : vector<4x1024xf32>
    %c0_49 = arith.constant 0 : index
    %c0_50 = arith.constant 0 : index
    %c159 = arith.constant 159 : index
    %93 = vector.load %arg1[%c0_49, %c0_50, %c159] : memref<1x1x2304xbf16, #tpu.memory_space<vmem>>, vector<1x1x1024xbf16>
    %94 = vector.shape_cast %93 : vector<1x1x1024xbf16> to vector<1x1024xbf16>
    %95 = arith.extf %26 : vector<4x1xbf16> to vector<4x1xf32>
    %96 = arith.extf %94 : vector<1x1024xbf16> to vector<1x1024xf32>
    %97 = vector.broadcast %95 : vector<4x1xf32> to vector<4x1024xf32>
    %98 = vector.broadcast %96 : vector<1x1024xf32> to vector<4x1024xf32>
    %99 = arith.mulf %97, %98 : vector<4x1024xf32>
    %100 = arith.addf %92, %99 : vector<4x1024xf32>
    %101 = vector.broadcast %27 : vector<4x1xf32> to vector<4x1024xf32>
    %102 = arith.addf %100, %101 : vector<4x1024xf32>
    %cst_51 = arith.constant 0.000000e+00 : f32
    %103 = vector.broadcast %cst_51 : f32 to vector<4x1024xf32>
    %104 = arith.maximumf %102, %103 : vector<4x1024xf32>
    %105 = vector.broadcast %8 : vector<1x1024xf32> to vector<4x1024xf32>
    %106 = arith.mulf %104, %105 : vector<4x1024xf32>
    %107 = arith.truncf %106 : vector<4x1024xf32> to vector<4x1024xbf16>
    %c0_52 = arith.constant 0 : index
    %c128_53 = arith.constant 128 : index
    %108 = vector.load %arg10[%c0_52, %c128_53] : memref<4x2304xbf16, #tpu.memory_space<vmem>>, vector<4x1024xbf16>
    tpu.vector_store %arg10[%c0_52, %c128_53], %107 {strides = array<i32>} : memref<4x2304xbf16, #tpu.memory_space<vmem>>, vector<4x1024xbf16>,
    %cst_54 = arith.constant 0.000000e+00 : f32
    %109 = vector.broadcast %cst_54 : f32 to vector<4x1024xf32>
    %c0_55 = arith.constant 0 : index
    %c0_56 = arith.constant 0 : index
    %c1121 = arith.constant 1121 : index
    %110 = vector.load %arg1[%c0_55, %c0_56, %c1121] : memref<1x1x2304xbf16, #tpu.memory_space<vmem>>, vector<1x1x1024xbf16>
    %111 = vector.shape_cast %110 : vector<1x1x1024xbf16> to vector<1x1024xbf16>
    %112 = arith.extf %10 : vector<4x1xbf16> to vector<4x1xf32>
    %113 = arith.extf %111 : vector<1x1024xbf16> to vector<1x1024xf32>
    %114 = vector.broadcast %112 : vector<4x1xf32> to vector<4x1024xf32>
    %115 = vector.broadcast %113 : vector<1x1024xf32> to vector<4x1024xf32>
    %116 = arith.mulf %114, %115 : vector<4x1024xf32>
    %117 = arith.addf %109, %116 : vector<4x1024xf32>
    %c0_57 = arith.constant 0 : index
    %c0_58 = arith.constant 0 : index
    %c1122 = arith.constant 1122 : index
    %118 = vector.load %arg1[%c0_57, %c0_58, %c1122] : memref<1x1x2304xbf16, #tpu.memory_space<vmem>>, vector<1x1x1024xbf16>
    %119 = vector.shape_cast %118 : vector<1x1x1024xbf16> to vector<1x1024xbf16>
    %120 = arith.extf %12 : vector<4x1xbf16> to vector<4x1xf32>
    %121 = arith.extf %119 : vector<1x1024xbf16> to vector<1x1024xf32>
    %122 = vector.broadcast %120 : vector<4x1xf32> to vector<4x1024xf32>
    %123 = vector.broadcast %121 : vector<1x1024xf32> to vector<4x1024xf32>
    %124 = arith.mulf %122, %123 : vector<4x1024xf32>
    %125 = arith.addf %117, %124 : vector<4x1024xf32>
    %c0_59 = arith.constant 0 : index
    %c0_60 = arith.constant 0 : index
    %c1123 = arith.constant 1123 : index
    %126 = vector.load %arg1[%c0_59, %c0_60, %c1123] : memref<1x1x2304xbf16, #tpu.memory_space<vmem>>, vector<1x1x1024xbf16>
    %127 = vector.shape_cast %126 : vector<1x1x1024xbf16> to vector<1x1024xbf16>
    %128 = arith.extf %14 : vector<4x1xbf16> to vector<4x1xf32>
    %129 = arith.extf %127 : vector<1x1024xbf16> to vector<1x1024xf32>
    %130 = vector.broadcast %128 : vector<4x1xf32> to vector<4x1024xf32>
    %131 = vector.broadcast %129 : vector<1x1024xf32> to vector<4x1024xf32>
    %132 = arith.mulf %130, %131 : vector<4x1024xf32>
    %133 = arith.addf %125, %132 : vector<4x1024xf32>
    %c0_61 = arith.constant 0 : index
    %c0_62 = arith.constant 0 : index
    %c1151 = arith.constant 1151 : index
    %134 = vector.load %arg1[%c0_61, %c0_62, %c1151] : memref<1x1x2304xbf16, #tpu.memory_space<vmem>>, vector<1x1x1024xbf16>
    %135 = vector.shape_cast %134 : vector<1x1x1024xbf16> to vector<1x1024xbf16>
    %136 = arith.extf %16 : vector<4x1xbf16> to vector<4x1xf32>
    %137 = arith.extf %135 : vector<1x1024xbf16> to vector<1x1024xf32>
    %138 = vector.broadcast %136 : vector<4x1xf32> to vector<4x1024xf32>
    %139 = vector.broadcast %137 : vector<1x1024xf32> to vector<4x1024xf32>
    %140 = arith.mulf %138, %139 : vector<4x1024xf32>
    %141 = arith.addf %133, %140 : vector<4x1024xf32>
    %c0_63 = arith.constant 0 : index
    %c0_64 = arith.constant 0 : index
    %c1152 = arith.constant 1152 : index
    %142 = vector.load %arg1[%c0_63, %c0_64, %c1152] : memref<1x1x2304xbf16, #tpu.memory_space<vmem>>, vector<1x1x1024xbf16>
    %143 = vector.shape_cast %142 : vector<1x1x1024xbf16> to vector<1x1024xbf16>
    %144 = arith.extf %18 : vector<4x1xbf16> to vector<4x1xf32>
    %145 = arith.extf %143 : vector<1x1024xbf16> to vector<1x1024xf32>
    %146 = vector.broadcast %144 : vector<4x1xf32> to vector<4x1024xf32>
    %147 = vector.broadcast %145 : vector<1x1024xf32> to vector<4x1024xf32>
    %148 = arith.mulf %146, %147 : vector<4x1024xf32>
    %149 = arith.addf %141, %148 : vector<4x1024xf32>
    %c0_65 = arith.constant 0 : index
    %c0_66 = arith.constant 0 : index
    %c1153 = arith.constant 1153 : index
    %150 = vector.load %arg1[%c0_65, %c0_66, %c1153] : memref<1x1x2304xbf16, #tpu.memory_space<vmem>>, vector<1x1x1024xbf16>
    %151 = vector.shape_cast %150 : vector<1x1x1024xbf16> to vector<1x1024xbf16>
    %152 = arith.extf %20 : vector<4x1xbf16> to vector<4x1xf32>
    %153 = arith.extf %151 : vector<1x1024xbf16> to vector<1x1024xf32>
    %154 = vector.broadcast %152 : vector<4x1xf32> to vector<4x1024xf32>
    %155 = vector.broadcast %153 : vector<1x1024xf32> to vector<4x1024xf32>
    %156 = arith.mulf %154, %155 : vector<4x1024xf32>
    %157 = arith.addf %149, %156 : vector<4x1024xf32>
    %c0_67 = arith.constant 0 : index
    %c0_68 = arith.constant 0 : index
    %c1181 = arith.constant 1181 : index
    %158 = vector.load %arg1[%c0_67, %c0_68, %c1181] : memref<1x1x2304xbf16, #tpu.memory_space<vmem>>, vector<1x1x1024xbf16>
    %159 = vector.shape_cast %158 : vector<1x1x1024xbf16> to vector<1x1024xbf16>
    %160 = arith.extf %22 : vector<4x1xbf16> to vector<4x1xf32>
    %161 = arith.extf %159 : vector<1x1024xbf16> to vector<1x1024xf32>
    %162 = vector.broadcast %160 : vector<4x1xf32> to vector<4x1024xf32>
    %163 = vector.broadcast %161 : vector<1x1024xf32> to vector<4x1024xf32>
    %164 = arith.mulf %162, %163 : vector<4x1024xf32>
    %165 = arith.addf %157, %164 : vector<4x1024xf32>
    %c0_69 = arith.constant 0 : index
    %c0_70 = arith.constant 0 : index
    %c1182 = arith.constant 1182 : index
    %166 = vector.load %arg1[%c0_69, %c0_70, %c1182] : memref<1x1x2304xbf16, #tpu.memory_space<vmem>>, vector<1x1x1024xbf16>
    %167 = vector.shape_cast %166 : vector<1x1x1024xbf16> to vector<1x1024xbf16>
    %168 = arith.extf %24 : vector<4x1xbf16> to vector<4x1xf32>
    %169 = arith.extf %167 : vector<1x1024xbf16> to vector<1x1024xf32>
    %170 = vector.broadcast %168 : vector<4x1xf32> to vector<4x1024xf32>
    %171 = vector.broadcast %169 : vector<1x1024xf32> to vector<4x1024xf32>
    %172 = arith.mulf %170, %171 : vector<4x1024xf32>
    %173 = arith.addf %165, %172 : vector<4x1024xf32>
    %c0_71 = arith.constant 0 : index
    %c0_72 = arith.constant 0 : index
    %c1183 = arith.constant 1183 : index
    %174 = vector.load %arg1[%c0_71, %c0_72, %c1183] : memref<1x1x2304xbf16, #tpu.memory_space<vmem>>, vector<1x1x1024xbf16>
    %175 = vector.shape_cast %174 : vector<1x1x1024xbf16> to vector<1x1024xbf16>
    %176 = arith.extf %26 : vector<4x1xbf16> to vector<4x1xf32>
    %177 = arith.extf %175 : vector<1x1024xbf16> to vector<1x1024xf32>
    %178 = vector.broadcast %176 : vector<4x1xf32> to vector<4x1024xf32>
    %179 = vector.broadcast %177 : vector<1x1024xf32> to vector<4x1024xf32>
    %180 = arith.mulf %178, %179 : vector<4x1024xf32>
    %181 = arith.addf %173, %180 : vector<4x1024xf32>
    %182 = vector.broadcast %27 : vector<4x1xf32> to vector<4x1024xf32>
    %183 = arith.addf %181, %182 : vector<4x1024xf32>
    %cst_73 = arith.constant 0.000000e+00 : f32
    %184 = vector.broadcast %cst_73 : f32 to vector<4x1024xf32>
    %185 = arith.maximumf %183, %184 : vector<4x1024xf32>
    %186 = vector.broadcast %8 : vector<1x1024xf32> to vector<4x1024xf32>
    %187 = arith.mulf %185, %186 : vector<4x1024xf32>
    %188 = arith.truncf %187 : vector<4x1024xf32> to vector<4x1024xbf16>
    %c0_74 = arith.constant 0 : index
    %c1152_75 = arith.constant 1152 : index
    %189 = vector.load %arg10[%c0_74, %c1152_75] : memref<4x2304xbf16, #tpu.memory_space<vmem>>, vector<4x1024xbf16>
    tpu.vector_store %arg10[%c0_74, %c1152_75], %188 {strides = array<i32>} : memref<4x2304xbf16, #tpu.memory_space<vmem>>, vector<4x1024xbf16>,
    %c0_76 = arith.constant 0 : index
    %c0_77 = arith.constant 0 : index
    %c0_78 = arith.constant 0 : index
    %190 = vector.load %arg5[%c0_76, %c0_77, %c0_78] : memref<9x8x4xbf16, #tpu.memory_space<vmem>>, vector<1x8x4xbf16>
    %191 = vector.shape_cast %190 : vector<1x8x4xbf16> to vector<8x4xbf16>
    %c1_79 = arith.constant 1 : index
    %c0_80 = arith.constant 0 : index
    %c0_81 = arith.constant 0 : index
    %192 = vector.load %arg5[%c1_79, %c0_80, %c0_81] : memref<9x8x4xbf16, #tpu.memory_space<vmem>>, vector<1x8x4xbf16>
    %193 = vector.shape_cast %192 : vector<1x8x4xbf16> to vector<8x4xbf16>
    %c2_82 = arith.constant 2 : index
    %c0_83 = arith.constant 0 : index
    %c0_84 = arith.constant 0 : index
    %194 = vector.load %arg5[%c2_82, %c0_83, %c0_84] : memref<9x8x4xbf16, #tpu.memory_space<vmem>>, vector<1x8x4xbf16>
    %195 = vector.shape_cast %194 : vector<1x8x4xbf16> to vector<8x4xbf16>
    %c3_85 = arith.constant 3 : index
    %c0_86 = arith.constant 0 : index
    %c0_87 = arith.constant 0 : index
    %196 = vector.load %arg5[%c3_85, %c0_86, %c0_87] : memref<9x8x4xbf16, #tpu.memory_space<vmem>>, vector<1x8x4xbf16>
    %197 = vector.shape_cast %196 : vector<1x8x4xbf16> to vector<8x4xbf16>
    %c4_88 = arith.constant 4 : index
    %c0_89 = arith.constant 0 : index
    %c0_90 = arith.constant 0 : index
    %198 = vector.load %arg5[%c4_88, %c0_89, %c0_90] : memref<9x8x4xbf16, #tpu.memory_space<vmem>>, vector<1x8x4xbf16>
    %199 = vector.shape_cast %198 : vector<1x8x4xbf16> to vector<8x4xbf16>
    %c5_91 = arith.constant 5 : index
    %c0_92 = arith.constant 0 : index
    %c0_93 = arith.constant 0 : index
    %200 = vector.load %arg5[%c5_91, %c0_92, %c0_93] : memref<9x8x4xbf16, #tpu.memory_space<vmem>>, vector<1x8x4xbf16>
    %201 = vector.shape_cast %200 : vector<1x8x4xbf16> to vector<8x4xbf16>
    %c6_94 = arith.constant 6 : index
    %c0_95 = arith.constant 0 : index
    %c0_96 = arith.constant 0 : index
    %202 = vector.load %arg5[%c6_94, %c0_95, %c0_96] : memref<9x8x4xbf16, #tpu.memory_space<vmem>>, vector<1x8x4xbf16>
    %203 = vector.shape_cast %202 : vector<1x8x4xbf16> to vector<8x4xbf16>
    %c7_97 = arith.constant 7 : index
    %c0_98 = arith.constant 0 : index
    %c0_99 = arith.constant 0 : index
    %204 = vector.load %arg5[%c7_97, %c0_98, %c0_99] : memref<9x8x4xbf16, #tpu.memory_space<vmem>>, vector<1x8x4xbf16>
    %205 = vector.shape_cast %204 : vector<1x8x4xbf16> to vector<8x4xbf16>
    %c8_100 = arith.constant 8 : index
    %c0_101 = arith.constant 0 : index
    %c0_102 = arith.constant 0 : index
    %206 = vector.load %arg5[%c8_100, %c0_101, %c0_102] : memref<9x8x4xbf16, #tpu.memory_space<vmem>>, vector<1x8x4xbf16>
    %207 = vector.shape_cast %206 : vector<1x8x4xbf16> to vector<8x4xbf16>
    %c0_103 = arith.constant 0 : index
    %c0_104 = arith.constant 0 : index
    %208 = vector.load %arg6[%c0_103, %c0_104] : memref<8x1xf32, #tpu.memory_space<vmem>>, vector<8x1xf32>
    %cst_105 = arith.constant 0.000000e+00 : f32
    %209 = vector.broadcast %cst_105 : f32 to vector<8x1024xf32>
    %c0_106 = arith.constant 0 : index
    %c97_107 = arith.constant 97 : index
    %210 = vector.load %arg10[%c0_106, %c97_107] : memref<4x2304xbf16, #tpu.memory_space<vmem>>, vector<4x1024xbf16>
    %cst_108 = arith.constant dense<0.000000e+00> : vector<8x1024xf32>
    %211 = tpu.matmul %191, %210, %cst_108 {dimension_numbers = #tpu.dot_dimension_numbers<[1], [0], [0], [1], [0, 0, 1, 1], [], []>} : vector<8x4xbf16>, vector<4x1024xbf16>, vector<8x1024xf32> -> vector<8x1024xf32>
    %212 = arith.addf %209, %211 : vector<8x1024xf32>
    %c0_109 = arith.constant 0 : index
    %c98_110 = arith.constant 98 : index
    %213 = vector.load %arg10[%c0_109, %c98_110] : memref<4x2304xbf16, #tpu.memory_space<vmem>>, vector<4x1024xbf16>
    %cst_111 = arith.constant dense<0.000000e+00> : vector<8x1024xf32>
    %214 = tpu.matmul %193, %213, %cst_111 {dimension_numbers = #tpu.dot_dimension_numbers<[1], [0], [0], [1], [0, 0, 1, 1], [], []>} : vector<8x4xbf16>, vector<4x1024xbf16>, vector<8x1024xf32> -> vector<8x1024xf32>
    %215 = arith.addf %212, %214 : vector<8x1024xf32>
    %c0_112 = arith.constant 0 : index
    %c99_113 = arith.constant 99 : index
    %216 = vector.load %arg10[%c0_112, %c99_113] : memref<4x2304xbf16, #tpu.memory_space<vmem>>, vector<4x1024xbf16>
    %cst_114 = arith.constant dense<0.000000e+00> : vector<8x1024xf32>
    %217 = tpu.matmul %195, %216, %cst_114 {dimension_numbers = #tpu.dot_dimension_numbers<[1], [0], [0], [1], [0, 0, 1, 1], [], []>} : vector<8x4xbf16>, vector<4x1024xbf16>, vector<8x1024xf32> -> vector<8x1024xf32>
    %218 = arith.addf %215, %217 : vector<8x1024xf32>
    %c0_115 = arith.constant 0 : index
    %c127_116 = arith.constant 127 : index
    %219 = vector.load %arg10[%c0_115, %c127_116] : memref<4x2304xbf16, #tpu.memory_space<vmem>>, vector<4x1024xbf16>
    %cst_117 = arith.constant dense<0.000000e+00> : vector<8x1024xf32>
    %220 = tpu.matmul %197, %219, %cst_117 {dimension_numbers = #tpu.dot_dimension_numbers<[1], [0], [0], [1], [0, 0, 1, 1], [], []>} : vector<8x4xbf16>, vector<4x1024xbf16>, vector<8x1024xf32> -> vector<8x1024xf32>
    %221 = arith.addf %218, %220 : vector<8x1024xf32>
    %c0_118 = arith.constant 0 : index
    %c128_119 = arith.constant 128 : index
    %222 = vector.load %arg10[%c0_118, %c128_119] : memref<4x2304xbf16, #tpu.memory_space<vmem>>, vector<4x1024xbf16>
    %cst_120 = arith.constant dense<0.000000e+00> : vector<8x1024xf32>
    %223 = tpu.matmul %199, %222, %cst_120 {dimension_numbers = #tpu.dot_dimension_numbers<[1], [0], [0], [1], [0, 0, 1, 1], [], []>} : vector<8x4xbf16>, vector<4x1024xbf16>, vector<8x1024xf32> -> vector<8x1024xf32>
    %224 = arith.addf %221, %223 : vector<8x1024xf32>
    %c0_121 = arith.constant 0 : index
    %c129_122 = arith.constant 129 : index
    %225 = vector.load %arg10[%c0_121, %c129_122] : memref<4x2304xbf16, #tpu.memory_space<vmem>>, vector<4x1024xbf16>
    %cst_123 = arith.constant dense<0.000000e+00> : vector<8x1024xf32>
    %226 = tpu.matmul %201, %225, %cst_123 {dimension_numbers = #tpu.dot_dimension_numbers<[1], [0], [0], [1], [0, 0, 1, 1], [], []>} : vector<8x4xbf16>, vector<4x1024xbf16>, vector<8x1024xf32> -> vector<8x1024xf32>
    %227 = arith.addf %224, %226 : vector<8x1024xf32>
    %c0_124 = arith.constant 0 : index
    %c157_125 = arith.constant 157 : index
    %228 = vector.load %arg10[%c0_124, %c157_125] : memref<4x2304xbf16, #tpu.memory_space<vmem>>, vector<4x1024xbf16>
    %cst_126 = arith.constant dense<0.000000e+00> : vector<8x1024xf32>
    %229 = tpu.matmul %203, %228, %cst_126 {dimension_numbers = #tpu.dot_dimension_numbers<[1], [0], [0], [1], [0, 0, 1, 1], [], []>} : vector<8x4xbf16>, vector<4x1024xbf16>, vector<8x1024xf32> -> vector<8x1024xf32>
    %230 = arith.addf %227, %229 : vector<8x1024xf32>
    %c0_127 = arith.constant 0 : index
    %c158_128 = arith.constant 158 : index
    %231 = vector.load %arg10[%c0_127, %c158_128] : memref<4x2304xbf16, #tpu.memory_space<vmem>>, vector<4x1024xbf16>
    %cst_129 = arith.constant dense<0.000000e+00> : vector<8x1024xf32>
    %232 = tpu.matmul %205, %231, %cst_129 {dimension_numbers = #tpu.dot_dimension_numbers<[1], [0], [0], [1], [0, 0, 1, 1], [], []>} : vector<8x4xbf16>, vector<4x1024xbf16>, vector<8x1024xf32> -> vector<8x1024xf32>
    %233 = arith.addf %230, %232 : vector<8x1024xf32>
    %c0_130 = arith.constant 0 : index
    %c159_131 = arith.constant 159 : index
    %234 = vector.load %arg10[%c0_130, %c159_131] : memref<4x2304xbf16, #tpu.memory_space<vmem>>, vector<4x1024xbf16>
    %cst_132 = arith.constant dense<0.000000e+00> : vector<8x1024xf32>
    %235 = tpu.matmul %207, %234, %cst_132 {dimension_numbers = #tpu.dot_dimension_numbers<[1], [0], [0], [1], [0, 0, 1, 1], [], []>} : vector<8x4xbf16>, vector<4x1024xbf16>, vector<8x1024xf32> -> vector<8x1024xf32>
    %236 = arith.addf %233, %235 : vector<8x1024xf32>
    %237 = vector.broadcast %208 : vector<8x1xf32> to vector<8x1024xf32>
    %238 = arith.addf %236, %237 : vector<8x1024xf32>
    %cst_133 = arith.constant 0.000000e+00 : f32
    %239 = vector.broadcast %cst_133 : f32 to vector<8x1024xf32>
    %240 = arith.maximumf %238, %239 : vector<8x1024xf32>
    %241 = vector.broadcast %8 : vector<1x1024xf32> to vector<8x1024xf32>
    %242 = arith.mulf %240, %241 : vector<8x1024xf32>
    %243 = arith.truncf %242 : vector<8x1024xf32> to vector<8x1024xbf16>
    %c0_134 = arith.constant 0 : index
    %c128_135 = arith.constant 128 : index
    %244 = vector.load %arg11[%c0_134, %c128_135] : memref<8x2304xbf16, #tpu.memory_space<vmem>>, vector<8x1024xbf16>
    tpu.vector_store %arg11[%c0_134, %c128_135], %243 {strides = array<i32>} : memref<8x2304xbf16, #tpu.memory_space<vmem>>, vector<8x1024xbf16>,
    %cst_136 = arith.constant 0.000000e+00 : f32
    %245 = vector.broadcast %cst_136 : f32 to vector<8x1024xf32>
    %c0_137 = arith.constant 0 : index
    %c1121_138 = arith.constant 1121 : index
    %246 = vector.load %arg10[%c0_137, %c1121_138] : memref<4x2304xbf16, #tpu.memory_space<vmem>>, vector<4x1024xbf16>
    %cst_139 = arith.constant dense<0.000000e+00> : vector<8x1024xf32>
    %247 = tpu.matmul %191, %246, %cst_139 {dimension_numbers = #tpu.dot_dimension_numbers<[1], [0], [0], [1], [0, 0, 1, 1], [], []>} : vector<8x4xbf16>, vector<4x1024xbf16>, vector<8x1024xf32> -> vector<8x1024xf32>
    %248 = arith.addf %245, %247 : vector<8x1024xf32>
    %c0_140 = arith.constant 0 : index
    %c1122_141 = arith.constant 1122 : index
    %249 = vector.load %arg10[%c0_140, %c1122_141] : memref<4x2304xbf16, #tpu.memory_space<vmem>>, vector<4x1024xbf16>
    %cst_142 = arith.constant dense<0.000000e+00> : vector<8x1024xf32>
    %250 = tpu.matmul %193, %249, %cst_142 {dimension_numbers = #tpu.dot_dimension_numbers<[1], [0], [0], [1], [0, 0, 1, 1], [], []>} : vector<8x4xbf16>, vector<4x1024xbf16>, vector<8x1024xf32> -> vector<8x1024xf32>
    %251 = arith.addf %248, %250 : vector<8x1024xf32>
    %c0_143 = arith.constant 0 : index
    %c1123_144 = arith.constant 1123 : index
    %252 = vector.load %arg10[%c0_143, %c1123_144] : memref<4x2304xbf16, #tpu.memory_space<vmem>>, vector<4x1024xbf16>
    %cst_145 = arith.constant dense<0.000000e+00> : vector<8x1024xf32>
    %253 = tpu.matmul %195, %252, %cst_145 {dimension_numbers = #tpu.dot_dimension_numbers<[1], [0], [0], [1], [0, 0, 1, 1], [], []>} : vector<8x4xbf16>, vector<4x1024xbf16>, vector<8x1024xf32> -> vector<8x1024xf32>
    %254 = arith.addf %251, %253 : vector<8x1024xf32>
    %c0_146 = arith.constant 0 : index
    %c1151_147 = arith.constant 1151 : index
    %255 = vector.load %arg10[%c0_146, %c1151_147] : memref<4x2304xbf16, #tpu.memory_space<vmem>>, vector<4x1024xbf16>
    %cst_148 = arith.constant dense<0.000000e+00> : vector<8x1024xf32>
    %256 = tpu.matmul %197, %255, %cst_148 {dimension_numbers = #tpu.dot_dimension_numbers<[1], [0], [0], [1], [0, 0, 1, 1], [], []>} : vector<8x4xbf16>, vector<4x1024xbf16>, vector<8x1024xf32> -> vector<8x1024xf32>
    %257 = arith.addf %254, %256 : vector<8x1024xf32>
    %c0_149 = arith.constant 0 : index
    %c1152_150 = arith.constant 1152 : index
    %258 = vector.load %arg10[%c0_149, %c1152_150] : memref<4x2304xbf16, #tpu.memory_space<vmem>>, vector<4x1024xbf16>
    %cst_151 = arith.constant dense<0.000000e+00> : vector<8x1024xf32>
    %259 = tpu.matmul %199, %258, %cst_151 {dimension_numbers = #tpu.dot_dimension_numbers<[1], [0], [0], [1], [0, 0, 1, 1], [], []>} : vector<8x4xbf16>, vector<4x1024xbf16>, vector<8x1024xf32> -> vector<8x1024xf32>
    %260 = arith.addf %257, %259 : vector<8x1024xf32>
    %c0_152 = arith.constant 0 : index
    %c1153_153 = arith.constant 1153 : index
    %261 = vector.load %arg10[%c0_152, %c1153_153] : memref<4x2304xbf16, #tpu.memory_space<vmem>>, vector<4x1024xbf16>
    %cst_154 = arith.constant dense<0.000000e+00> : vector<8x1024xf32>
    %262 = tpu.matmul %201, %261, %cst_154 {dimension_numbers = #tpu.dot_dimension_numbers<[1], [0], [0], [1], [0, 0, 1, 1], [], []>} : vector<8x4xbf16>, vector<4x1024xbf16>, vector<8x1024xf32> -> vector<8x1024xf32>
    %263 = arith.addf %260, %262 : vector<8x1024xf32>
    %c0_155 = arith.constant 0 : index
    %c1181_156 = arith.constant 1181 : index
    %264 = vector.load %arg10[%c0_155, %c1181_156] : memref<4x2304xbf16, #tpu.memory_space<vmem>>, vector<4x1024xbf16>
    %cst_157 = arith.constant dense<0.000000e+00> : vector<8x1024xf32>
    %265 = tpu.matmul %203, %264, %cst_157 {dimension_numbers = #tpu.dot_dimension_numbers<[1], [0], [0], [1], [0, 0, 1, 1], [], []>} : vector<8x4xbf16>, vector<4x1024xbf16>, vector<8x1024xf32> -> vector<8x1024xf32>
    %266 = arith.addf %263, %265 : vector<8x1024xf32>
    %c0_158 = arith.constant 0 : index
    %c1182_159 = arith.constant 1182 : index
    %267 = vector.load %arg10[%c0_158, %c1182_159] : memref<4x2304xbf16, #tpu.memory_space<vmem>>, vector<4x1024xbf16>
    %cst_160 = arith.constant dense<0.000000e+00> : vector<8x1024xf32>
    %268 = tpu.matmul %205, %267, %cst_160 {dimension_numbers = #tpu.dot_dimension_numbers<[1], [0], [0], [1], [0, 0, 1, 1], [], []>} : vector<8x4xbf16>, vector<4x1024xbf16>, vector<8x1024xf32> -> vector<8x1024xf32>
    %269 = arith.addf %266, %268 : vector<8x1024xf32>
    %c0_161 = arith.constant 0 : index
    %c1183_162 = arith.constant 1183 : index
    %270 = vector.load %arg10[%c0_161, %c1183_162] : memref<4x2304xbf16, #tpu.memory_space<vmem>>, vector<4x1024xbf16>
    %cst_163 = arith.constant dense<0.000000e+00> : vector<8x1024xf32>
    %271 = tpu.matmul %207, %270, %cst_163 {dimension_numbers = #tpu.dot_dimension_numbers<[1], [0], [0], [1], [0, 0, 1, 1], [], []>} : vector<8x4xbf16>, vector<4x1024xbf16>, vector<8x1024xf32> -> vector<8x1024xf32>
    %272 = arith.addf %269, %271 : vector<8x1024xf32>
    %273 = vector.broadcast %208 : vector<8x1xf32> to vector<8x1024xf32>
    %274 = arith.addf %272, %273 : vector<8x1024xf32>
    %cst_164 = arith.constant 0.000000e+00 : f32
    %275 = vector.broadcast %cst_164 : f32 to vector<8x1024xf32>
    %276 = arith.maximumf %274, %275 : vector<8x1024xf32>
    %277 = vector.broadcast %8 : vector<1x1024xf32> to vector<8x1024xf32>
    %278 = arith.mulf %276, %277 : vector<8x1024xf32>
    %279 = arith.truncf %278 : vector<8x1024xf32> to vector<8x1024xbf16>
    %c0_165 = arith.constant 0 : index
    %c1152_166 = arith.constant 1152 : index
    %280 = vector.load %arg11[%c0_165, %c1152_166] : memref<8x2304xbf16, #tpu.memory_space<vmem>>, vector<8x1024xbf16>
    tpu.vector_store %arg11[%c0_165, %c1152_166], %279 {strides = array<i32>} : memref<8x2304xbf16, #tpu.memory_space<vmem>>, vector<8x1024xbf16>,
    %c0_167 = arith.constant 0 : index
    %c0_168 = arith.constant 0 : index
    %c0_169 = arith.constant 0 : index
    %281 = vector.load %arg7[%c0_167, %c0_168, %c0_169] : memref<9x4x8xbf16, #tpu.memory_space<vmem>>, vector<1x4x8xbf16>
    %282 = vector.shape_cast %281 : vector<1x4x8xbf16> to vector<4x8xbf16>
    %c1_170 = arith.constant 1 : index
    %c0_171 = arith.constant 0 : index
    %c0_172 = arith.constant 0 : index
    %283 = vector.load %arg7[%c1_170, %c0_171, %c0_172] : memref<9x4x8xbf16, #tpu.memory_space<vmem>>, vector<1x4x8xbf16>
    %284 = vector.shape_cast %283 : vector<1x4x8xbf16> to vector<4x8xbf16>
    %c2_173 = arith.constant 2 : index
    %c0_174 = arith.constant 0 : index
    %c0_175 = arith.constant 0 : index
    %285 = vector.load %arg7[%c2_173, %c0_174, %c0_175] : memref<9x4x8xbf16, #tpu.memory_space<vmem>>, vector<1x4x8xbf16>
    %286 = vector.shape_cast %285 : vector<1x4x8xbf16> to vector<4x8xbf16>
    %c3_176 = arith.constant 3 : index
    %c0_177 = arith.constant 0 : index
    %c0_178 = arith.constant 0 : index
    %287 = vector.load %arg7[%c3_176, %c0_177, %c0_178] : memref<9x4x8xbf16, #tpu.memory_space<vmem>>, vector<1x4x8xbf16>
    %288 = vector.shape_cast %287 : vector<1x4x8xbf16> to vector<4x8xbf16>
    %c4_179 = arith.constant 4 : index
    %c0_180 = arith.constant 0 : index
    %c0_181 = arith.constant 0 : index
    %289 = vector.load %arg7[%c4_179, %c0_180, %c0_181] : memref<9x4x8xbf16, #tpu.memory_space<vmem>>, vector<1x4x8xbf16>
    %290 = vector.shape_cast %289 : vector<1x4x8xbf16> to vector<4x8xbf16>
    %c5_182 = arith.constant 5 : index
    %c0_183 = arith.constant 0 : index
    %c0_184 = arith.constant 0 : index
    %291 = vector.load %arg7[%c5_182, %c0_183, %c0_184] : memref<9x4x8xbf16, #tpu.memory_space<vmem>>, vector<1x4x8xbf16>
    %292 = vector.shape_cast %291 : vector<1x4x8xbf16> to vector<4x8xbf16>
    %c6_185 = arith.constant 6 : index
    %c0_186 = arith.constant 0 : index
    %c0_187 = arith.constant 0 : index
    %293 = vector.load %arg7[%c6_185, %c0_186, %c0_187] : memref<9x4x8xbf16, #tpu.memory_space<vmem>>, vector<1x4x8xbf16>
    %294 = vector.shape_cast %293 : vector<1x4x8xbf16> to vector<4x8xbf16>
    %c7_188 = arith.constant 7 : index
    %c0_189 = arith.constant 0 : index
    %c0_190 = arith.constant 0 : index
    %295 = vector.load %arg7[%c7_188, %c0_189, %c0_190] : memref<9x4x8xbf16, #tpu.memory_space<vmem>>, vector<1x4x8xbf16>
    %296 = vector.shape_cast %295 : vector<1x4x8xbf16> to vector<4x8xbf16>
    %c8_191 = arith.constant 8 : index
    %c0_192 = arith.constant 0 : index
    %c0_193 = arith.constant 0 : index
    %297 = vector.load %arg7[%c8_191, %c0_192, %c0_193] : memref<9x4x8xbf16, #tpu.memory_space<vmem>>, vector<1x4x8xbf16>
    %298 = vector.shape_cast %297 : vector<1x4x8xbf16> to vector<4x8xbf16>
    %c0_194 = arith.constant 0 : index
    %c0_195 = arith.constant 0 : index
    %299 = vector.load %arg8[%c0_194, %c0_195] : memref<4x1xf32, #tpu.memory_space<vmem>>, vector<4x1xf32>
    %cst_196 = arith.constant 0.000000e+00 : f32
    %300 = vector.broadcast %cst_196 : f32 to vector<4x1024xf32>
    %c0_197 = arith.constant 0 : index
    %c97_198 = arith.constant 97 : index
    %301 = vector.load %arg11[%c0_197, %c97_198] : memref<8x2304xbf16, #tpu.memory_space<vmem>>, vector<8x1024xbf16>
    %cst_199 = arith.constant dense<0.000000e+00> : vector<4x1024xf32>
    %302 = tpu.matmul %282, %301, %cst_199 {dimension_numbers = #tpu.dot_dimension_numbers<[1], [0], [0], [1], [0, 0, 1, 1], [], []>} : vector<4x8xbf16>, vector<8x1024xbf16>, vector<4x1024xf32> -> vector<4x1024xf32>
    %303 = arith.addf %300, %302 : vector<4x1024xf32>
    %c0_200 = arith.constant 0 : index
    %c98_201 = arith.constant 98 : index
    %304 = vector.load %arg11[%c0_200, %c98_201] : memref<8x2304xbf16, #tpu.memory_space<vmem>>, vector<8x1024xbf16>
    %cst_202 = arith.constant dense<0.000000e+00> : vector<4x1024xf32>
    %305 = tpu.matmul %284, %304, %cst_202 {dimension_numbers = #tpu.dot_dimension_numbers<[1], [0], [0], [1], [0, 0, 1, 1], [], []>} : vector<4x8xbf16>, vector<8x1024xbf16>, vector<4x1024xf32> -> vector<4x1024xf32>
    %306 = arith.addf %303, %305 : vector<4x1024xf32>
    %c0_203 = arith.constant 0 : index
    %c99_204 = arith.constant 99 : index
    %307 = vector.load %arg11[%c0_203, %c99_204] : memref<8x2304xbf16, #tpu.memory_space<vmem>>, vector<8x1024xbf16>
    %cst_205 = arith.constant dense<0.000000e+00> : vector<4x1024xf32>
    %308 = tpu.matmul %286, %307, %cst_205 {dimension_numbers = #tpu.dot_dimension_numbers<[1], [0], [0], [1], [0, 0, 1, 1], [], []>} : vector<4x8xbf16>, vector<8x1024xbf16>, vector<4x1024xf32> -> vector<4x1024xf32>
    %309 = arith.addf %306, %308 : vector<4x1024xf32>
    %c0_206 = arith.constant 0 : index
    %c127_207 = arith.constant 127 : index
    %310 = vector.load %arg11[%c0_206, %c127_207] : memref<8x2304xbf16, #tpu.memory_space<vmem>>, vector<8x1024xbf16>
    %cst_208 = arith.constant dense<0.000000e+00> : vector<4x1024xf32>
    %311 = tpu.matmul %288, %310, %cst_208 {dimension_numbers = #tpu.dot_dimension_numbers<[1], [0], [0], [1], [0, 0, 1, 1], [], []>} : vector<4x8xbf16>, vector<8x1024xbf16>, vector<4x1024xf32> -> vector<4x1024xf32>
    %312 = arith.addf %309, %311 : vector<4x1024xf32>
    %c0_209 = arith.constant 0 : index
    %c128_210 = arith.constant 128 : index
    %313 = vector.load %arg11[%c0_209, %c128_210] : memref<8x2304xbf16, #tpu.memory_space<vmem>>, vector<8x1024xbf16>
    %cst_211 = arith.constant dense<0.000000e+00> : vector<4x1024xf32>
    %314 = tpu.matmul %290, %313, %cst_211 {dimension_numbers = #tpu.dot_dimension_numbers<[1], [0], [0], [1], [0, 0, 1, 1], [], []>} : vector<4x8xbf16>, vector<8x1024xbf16>, vector<4x1024xf32> -> vector<4x1024xf32>
    %315 = arith.addf %312, %314 : vector<4x1024xf32>
    %c0_212 = arith.constant 0 : index
    %c129_213 = arith.constant 129 : index
    %316 = vector.load %arg11[%c0_212, %c129_213] : memref<8x2304xbf16, #tpu.memory_space<vmem>>, vector<8x1024xbf16>
    %cst_214 = arith.constant dense<0.000000e+00> : vector<4x1024xf32>
    %317 = tpu.matmul %292, %316, %cst_214 {dimension_numbers = #tpu.dot_dimension_numbers<[1], [0], [0], [1], [0, 0, 1, 1], [], []>} : vector<4x8xbf16>, vector<8x1024xbf16>, vector<4x1024xf32> -> vector<4x1024xf32>
    %318 = arith.addf %315, %317 : vector<4x1024xf32>
    %c0_215 = arith.constant 0 : index
    %c157_216 = arith.constant 157 : index
    %319 = vector.load %arg11[%c0_215, %c157_216] : memref<8x2304xbf16, #tpu.memory_space<vmem>>, vector<8x1024xbf16>
    %cst_217 = arith.constant dense<0.000000e+00> : vector<4x1024xf32>
    %320 = tpu.matmul %294, %319, %cst_217 {dimension_numbers = #tpu.dot_dimension_numbers<[1], [0], [0], [1], [0, 0, 1, 1], [], []>} : vector<4x8xbf16>, vector<8x1024xbf16>, vector<4x1024xf32> -> vector<4x1024xf32>
    %321 = arith.addf %318, %320 : vector<4x1024xf32>
    %c0_218 = arith.constant 0 : index
    %c158_219 = arith.constant 158 : index
    %322 = vector.load %arg11[%c0_218, %c158_219] : memref<8x2304xbf16, #tpu.memory_space<vmem>>, vector<8x1024xbf16>
    %cst_220 = arith.constant dense<0.000000e+00> : vector<4x1024xf32>
    %323 = tpu.matmul %296, %322, %cst_220 {dimension_numbers = #tpu.dot_dimension_numbers<[1], [0], [0], [1], [0, 0, 1, 1], [], []>} : vector<4x8xbf16>, vector<8x1024xbf16>, vector<4x1024xf32> -> vector<4x1024xf32>
    %324 = arith.addf %321, %323 : vector<4x1024xf32>
    %c0_221 = arith.constant 0 : index
    %c159_222 = arith.constant 159 : index
    %325 = vector.load %arg11[%c0_221, %c159_222] : memref<8x2304xbf16, #tpu.memory_space<vmem>>, vector<8x1024xbf16>
    %cst_223 = arith.constant dense<0.000000e+00> : vector<4x1024xf32>
    %326 = tpu.matmul %298, %325, %cst_223 {dimension_numbers = #tpu.dot_dimension_numbers<[1], [0], [0], [1], [0, 0, 1, 1], [], []>} : vector<4x8xbf16>, vector<8x1024xbf16>, vector<4x1024xf32> -> vector<4x1024xf32>
    %327 = arith.addf %324, %326 : vector<4x1024xf32>
    %328 = vector.broadcast %299 : vector<4x1xf32> to vector<4x1024xf32>
    %329 = arith.addf %327, %328 : vector<4x1024xf32>
    %cst_224 = arith.constant 0.000000e+00 : f32
    %330 = vector.broadcast %cst_224 : f32 to vector<4x1024xf32>
    %331 = arith.maximumf %329, %330 : vector<4x1024xf32>
    %332 = vector.broadcast %8 : vector<1x1024xf32> to vector<4x1024xf32>
    %333 = arith.mulf %331, %332 : vector<4x1024xf32>
    %c0_225 = arith.constant 0 : index
    %c0_226 = arith.constant 0 : index
    %c0_227 = arith.constant 0 : index
    %334 = vector.load %arg9[%c0_225, %c0_226, %c0_227] : memref<1x4x2048xf32, #tpu.memory_space<vmem>>, vector<1x4x1024xf32>
    %335 = vector.shape_cast %334 : vector<1x4x1024xf32> to vector<4x1024xf32>
    %336 = vector.shape_cast %333 : vector<4x1024xf32> to vector<1x4x1024xf32>
    tpu.vector_store %arg9[%c0_225, %c0_226, %c0_227], %336 {strides = array<i32>} : memref<1x4x2048xf32, #tpu.memory_space<vmem>>, vector<1x4x1024xf32>,
    %cst_228 = arith.constant 0.000000e+00 : f32
    %337 = vector.broadcast %cst_228 : f32 to vector<4x1024xf32>
    %c0_229 = arith.constant 0 : index
    %c1121_230 = arith.constant 1121 : index
    %338 = vector.load %arg11[%c0_229, %c1121_230] : memref<8x2304xbf16, #tpu.memory_space<vmem>>, vector<8x1024xbf16>
    %cst_231 = arith.constant dense<0.000000e+00> : vector<4x1024xf32>
    %339 = tpu.matmul %282, %338, %cst_231 {dimension_numbers = #tpu.dot_dimension_numbers<[1], [0], [0], [1], [0, 0, 1, 1], [], []>} : vector<4x8xbf16>, vector<8x1024xbf16>, vector<4x1024xf32> -> vector<4x1024xf32>
    %340 = arith.addf %337, %339 : vector<4x1024xf32>
    %c0_232 = arith.constant 0 : index
    %c1122_233 = arith.constant 1122 : index
    %341 = vector.load %arg11[%c0_232, %c1122_233] : memref<8x2304xbf16, #tpu.memory_space<vmem>>, vector<8x1024xbf16>
    %cst_234 = arith.constant dense<0.000000e+00> : vector<4x1024xf32>
    %342 = tpu.matmul %284, %341, %cst_234 {dimension_numbers = #tpu.dot_dimension_numbers<[1], [0], [0], [1], [0, 0, 1, 1], [], []>} : vector<4x8xbf16>, vector<8x1024xbf16>, vector<4x1024xf32> -> vector<4x1024xf32>
    %343 = arith.addf %340, %342 : vector<4x1024xf32>
    %c0_235 = arith.constant 0 : index
    %c1123_236 = arith.constant 1123 : index
    %344 = vector.load %arg11[%c0_235, %c1123_236] : memref<8x2304xbf16, #tpu.memory_space<vmem>>, vector<8x1024xbf16>
    %cst_237 = arith.constant dense<0.000000e+00> : vector<4x1024xf32>
    %345 = tpu.matmul %286, %344, %cst_237 {dimension_numbers = #tpu.dot_dimension_numbers<[1], [0], [0], [1], [0, 0, 1, 1], [], []>} : vector<4x8xbf16>, vector<8x1024xbf16>, vector<4x1024xf32> -> vector<4x1024xf32>
    %346 = arith.addf %343, %345 : vector<4x1024xf32>
    %c0_238 = arith.constant 0 : index
    %c1151_239 = arith.constant 1151 : index
    %347 = vector.load %arg11[%c0_238, %c1151_239] : memref<8x2304xbf16, #tpu.memory_space<vmem>>, vector<8x1024xbf16>
    %cst_240 = arith.constant dense<0.000000e+00> : vector<4x1024xf32>
    %348 = tpu.matmul %288, %347, %cst_240 {dimension_numbers = #tpu.dot_dimension_numbers<[1], [0], [0], [1], [0, 0, 1, 1], [], []>} : vector<4x8xbf16>, vector<8x1024xbf16>, vector<4x1024xf32> -> vector<4x1024xf32>
    %349 = arith.addf %346, %348 : vector<4x1024xf32>
    %c0_241 = arith.constant 0 : index
    %c1152_242 = arith.constant 1152 : index
    %350 = vector.load %arg11[%c0_241, %c1152_242] : memref<8x2304xbf16, #tpu.memory_space<vmem>>, vector<8x1024xbf16>
    %cst_243 = arith.constant dense<0.000000e+00> : vector<4x1024xf32>
    %351 = tpu.matmul %290, %350, %cst_243 {dimension_numbers = #tpu.dot_dimension_numbers<[1], [0], [0], [1], [0, 0, 1, 1], [], []>} : vector<4x8xbf16>, vector<8x1024xbf16>, vector<4x1024xf32> -> vector<4x1024xf32>
    %352 = arith.addf %349, %351 : vector<4x1024xf32>
    %c0_244 = arith.constant 0 : index
    %c1153_245 = arith.constant 1153 : index
    %353 = vector.load %arg11[%c0_244, %c1153_245] : memref<8x2304xbf16, #tpu.memory_space<vmem>>, vector<8x1024xbf16>
    %cst_246 = arith.constant dense<0.000000e+00> : vector<4x1024xf32>
    %354 = tpu.matmul %292, %353, %cst_246 {dimension_numbers = #tpu.dot_dimension_numbers<[1], [0], [0], [1], [0, 0, 1, 1], [], []>} : vector<4x8xbf16>, vector<8x1024xbf16>, vector<4x1024xf32> -> vector<4x1024xf32>
    %355 = arith.addf %352, %354 : vector<4x1024xf32>
    %c0_247 = arith.constant 0 : index
    %c1181_248 = arith.constant 1181 : index
    %356 = vector.load %arg11[%c0_247, %c1181_248] : memref<8x2304xbf16, #tpu.memory_space<vmem>>, vector<8x1024xbf16>
    %cst_249 = arith.constant dense<0.000000e+00> : vector<4x1024xf32>
    %357 = tpu.matmul %294, %356, %cst_249 {dimension_numbers = #tpu.dot_dimension_numbers<[1], [0], [0], [1], [0, 0, 1, 1], [], []>} : vector<4x8xbf16>, vector<8x1024xbf16>, vector<4x1024xf32> -> vector<4x1024xf32>
    %358 = arith.addf %355, %357 : vector<4x1024xf32>
    %c0_250 = arith.constant 0 : index
    %c1182_251 = arith.constant 1182 : index
    %359 = vector.load %arg11[%c0_250, %c1182_251] : memref<8x2304xbf16, #tpu.memory_space<vmem>>, vector<8x1024xbf16>
    %cst_252 = arith.constant dense<0.000000e+00> : vector<4x1024xf32>
    %360 = tpu.matmul %296, %359, %cst_252 {dimension_numbers = #tpu.dot_dimension_numbers<[1], [0], [0], [1], [0, 0, 1, 1], [], []>} : vector<4x8xbf16>, vector<8x1024xbf16>, vector<4x1024xf32> -> vector<4x1024xf32>
    %361 = arith.addf %358, %360 : vector<4x1024xf32>
    %c0_253 = arith.constant 0 : index
    %c1183_254 = arith.constant 1183 : index
    %362 = vector.load %arg11[%c0_253, %c1183_254] : memref<8x2304xbf16, #tpu.memory_space<vmem>>, vector<8x1024xbf16>
    %cst_255 = arith.constant dense<0.000000e+00> : vector<4x1024xf32>
    %363 = tpu.matmul %298, %362, %cst_255 {dimension_numbers = #tpu.dot_dimension_numbers<[1], [0], [0], [1], [0, 0, 1, 1], [], []>} : vector<4x8xbf16>, vector<8x1024xbf16>, vector<4x1024xf32> -> vector<4x1024xf32>
    %364 = arith.addf %361, %363 : vector<4x1024xf32>
    %365 = vector.broadcast %299 : vector<4x1xf32> to vector<4x1024xf32>
    %366 = arith.addf %364, %365 : vector<4x1024xf32>
    %cst_256 = arith.constant 0.000000e+00 : f32
    %367 = vector.broadcast %cst_256 : f32 to vector<4x1024xf32>
    %368 = arith.maximumf %366, %367 : vector<4x1024xf32>
    %369 = vector.broadcast %8 : vector<1x1024xf32> to vector<4x1024xf32>
    %370 = arith.mulf %368, %369 : vector<4x1024xf32>
    %c0_257 = arith.constant 0 : index
    %c0_258 = arith.constant 0 : index
    %c1024 = arith.constant 1024 : index
    %371 = vector.load %arg9[%c0_257, %c0_258, %c1024] : memref<1x4x2048xf32, #tpu.memory_space<vmem>>, vector<1x4x1024xf32>
    %372 = vector.shape_cast %371 : vector<1x4x1024xf32> to vector<4x1024xf32>
    %373 = vector.shape_cast %370 : vector<4x1024xf32> to vector<1x4x1024xf32>
    tpu.vector_store %arg9[%c0_257, %c0_258, %c1024], %373 {strides = array<i32>} : memref<1x4x2048xf32, #tpu.memory_space<vmem>>, vector<1x4x1024xf32>,
    return
  }
  func.func @transform_0(%arg0: i32) -> (i32, i32, i32) {
    %c0_i32 = arith.constant 0 : i32
    %c0_i32_0 = arith.constant 0 : i32
    %c0_i32_1 = arith.constant 0 : i32
    return %arg0, %c0_i32, %c0_i32_0 : i32, i32, i32
  }
  func.func @transform_1(%arg0: i32) -> (i32, i32) {
    %c0_i32 = arith.constant 0 : i32
    %c0_i32_0 = arith.constant 0 : i32
    %c0_i32_1 = arith.constant 0 : i32
    return %c0_i32, %c0_i32_0 : i32, i32
  }
  func.func @transform_2(%arg0: i32) -> (i32, i32, i32) {
    %c0_i32 = arith.constant 0 : i32
    %c0_i32_0 = arith.constant 0 : i32
    %c0_i32_1 = arith.constant 0 : i32
    %c0_i32_2 = arith.constant 0 : i32
    return %c0_i32, %c0_i32_0, %c0_i32_1 : i32, i32, i32
  }
  func.func @transform_3(%arg0: i32) -> (i32, i32) {
    %c0_i32 = arith.constant 0 : i32
    %c0_i32_0 = arith.constant 0 : i32
    %c0_i32_1 = arith.constant 0 : i32
    return %c0_i32, %c0_i32_0 : i32, i32
  }
  func.func @transform_4(%arg0: i32) -> (i32, i32, i32) {
    %c0_i32 = arith.constant 0 : i32
    %c0_i32_0 = arith.constant 0 : i32
    %c0_i32_1 = arith.constant 0 : i32
    %c0_i32_2 = arith.constant 0 : i32
    return %c0_i32, %c0_i32_0, %c0_i32_1 : i32, i32, i32
  }
  func.func @transform_5(%arg0: i32) -> (i32, i32) {
    %c0_i32 = arith.constant 0 : i32
    %c0_i32_0 = arith.constant 0 : i32
    %c0_i32_1 = arith.constant 0 : i32
    return %c0_i32, %c0_i32_0 : i32, i32
  }
  func.func @transform_6(%arg0: i32) -> (i32, i32, i32) {
    %c0_i32 = arith.constant 0 : i32
    %c0_i32_0 = arith.constant 0 : i32
    %c0_i32_1 = arith.constant 0 : i32
    %c0_i32_2 = arith.constant 0 : i32
    return %c0_i32, %c0_i32_0, %c0_i32_1 : i32, i32, i32
  }
  func.func @transform_7(%arg0: i32) -> (i32, i32) {
    %c0_i32 = arith.constant 0 : i32
    %c0_i32_0 = arith.constant 0 : i32
    %c0_i32_1 = arith.constant 0 : i32
    return %c0_i32, %c0_i32_0 : i32, i32
  }
  func.func @transform_8(%arg0: i32) -> (i32, i32, i32) {
    %c0_i32 = arith.constant 0 : i32
    %c0_i32_0 = arith.constant 0 : i32
    %c0_i32_1 = arith.constant 0 : i32
    return %arg0, %c0_i32, %c0_i32_0 : i32, i32, i32
  }
}

</mosaic_0001>

<bundles_post_ra>
// kernel: tpu_custom_call.1
= control target key start
LH: loop header
LB: loop body
LE: loop exit
PB: predicated region body
PF: predicated region fallthrough
CT: control target
= control target key end

     0   :  { %v68_v3 = vlaneseq  ;;  %v14980_v4 = vmov 0   ;;  %s14971_s0 = inlined_call_operand.vmem [shape: bf16[1,1,2304], index: 0, kind: input, shape index: {}]   ;;  %s14972_s1 = inlined_call_operand.vmem [shape: f32[1,1024], index: 1, kind: input, shape index: {}]   ;;  %s14973_s2 = inlined_call_operand.vmem [shape: bf16[9,4,1], index: 2, kind: input, shape index: {}]   ;;  %s14974_s3 = inlined_call_operand.vmem [shape: f32[4,1], index: 3, kind: input, shape index: {}]   ;;  %s14975_s4 = inlined_call_operand.vmem [shape: bf16[9,8,4], index: 4, kind: input, shape index: {}]   ;;  %s14976_s5 = inlined_call_operand.vmem [shape: f32[8,1], index: 5, kind: input, shape index: {}]   ;;  %s14977_s6 = inlined_call_operand.vmem [shape: bf16[9,4,8], index: 6, kind: input, shape index: {}]   ;;  %s14978_s7 = inlined_call_operand.vmem [shape: f32[4,1], index: 7, kind: input, shape index: {}]   ;;  %s14979_s8 = inlined_call_operand.hbm [shape: f32[1,4,2048], index: 8, kind: output, shape index: {}]  }
   0x1   :  { %v36_v0 = vld [vmem:[%s14973_s2] sm:$0x3]  ;;  %v11141_v1 = vld [vmem:[%s14973_s2 + $0x2] sm:$0x3]  ;;  %11555 = vset.pattern.permute.xlu0 %v14980_v4  ;;  %31 = vst [vmem:[#allocation2] sm:$0x3] %v14980_v4  ;;  %11571 = vset.pattern.permute.xlu1 %v14980_v4 }
   0x2   :  { %v54_v2 = vld [vmem:[%s14971_s0] sm:$0xff]  ;;  %32 = vst [vmem:[#allocation2 + $0x22] sm:$0x3] %v14980_v4  ;;  %33 = vst [vmem:[#allocation3] sm:$0xf] %v14980_v4  ;;  %v56_v5 = vunpack.c.l.bf16 %v36_v0  ;;  %v208_v6 = vunpack.c.l.bf16 %v11141_v1  ;;  %v11749_v13 = vshrl.u32 %v68_v3, 7  ;;  %2243 = vmatprep.mubr.bf16.mxu0 %v14980_v4  ;;  %2284 = vmatprep.mubr.bf16.mxu1 %v14980_v4 }
   0x3   :  { %34 = vst [vmem:[#allocation3 + $0x44] sm:$0xf] %v14980_v4  ;;  %v11142_v7 = vld [vmem:[%s14973_s2 + $0x4] sm:$0x3]  ;;  %v11143_v8 = vld [vmem:[%s14973_s2 + $0x6] sm:$0x3]  ;;  %v57_v9 = vunpack.c.l.bf16 %v54_v2  ;;  %v58_v12 = vunpack.c.h.bf16 %v54_v2 }
   0x4   :  { %v359_v10 = vunpack.c.l.bf16 %v11142_v7  ;;  %v510_v11 = vunpack.c.l.bf16 %v11143_v8  ;;  %v11556_v14 = vpack.i.bf16 %v208_v6, %v56_v5  ;;  %v11754_v15 = vsub.s32 0, %v11749_v13 }
   0x5   :  { %v11757_v16 = vsub.s32 2, %v11749_v13  ;;  %v11760_v17 = vsub.s32 4, %v11749_v13  ;;  %v11763_v19 = vsub.s32 6, %v11749_v13 }
   0x6   :  { %15031 = vst [vmem:[#allocation7_spill] sm:$0xff] %v11754_v15  ;;  %11557 = vperm.xlu0 %11555, %v11556_v14   ;;  %v11561_v18 = vpack.i.bf16 %v510_v11, %v359_v10  ;;  %v78_v20 = vrot.slane %v57_v9, %v11754_v15  ;;  %v94_v22 = vrot.slane %v58_v12, %v11754_v15 }
   0x7   :  { %v82_v21 = vrot.slane %v57_v9, %v11757_v16  ;;  %v98_v23 = vrot.slane %v58_v12, %v11757_v16  ;;  %v86_v24 = vrot.slane %v57_v9, %v11760_v17  ;;  %v90_v25 = vrot.slane %v57_v9, %v11763_v19 }
   0x8   :  { %v123_v26 = vrot.slane %v78_v20, %v11754_v15  ;;  %v139_v28 = vrot.slane %v94_v22, %v11754_v15 }
   0x9   :  { %v127_v27 = vrot.slane %v82_v21, %v11754_v15  ;;  %v143_v29 = vrot.slane %v98_v23, %v11754_v15  ;;  %v131_v30 = vrot.slane %v86_v24, %v11754_v15  ;;  %v135_v31 = vrot.slane %v90_v25, %v11754_v15 }
   0xa   :  { %11562 = vperm.xlu0 %11555, %v11561_v18  }
   0xb   :  { %13 = vsyncpa [#allocation5], 0  ;;  %v165_v32 = vcombine.low %v123_v26, %v127_v27  ;;  %v167_v33 = vcombine.low %v139_v28, %v143_v29  ;;  %v11144_v34 = vld [vmem:[%s14973_s2 + $0x8] sm:$0x3]  ;;  %v11145_v35 = vld [vmem:[%s14973_s2 + $0xa] sm:$0x3]  ;;  %v166_v36 = vcombine.low %v131_v30, %v135_v31  ;;  %v102_v40 = vrot.slane %v58_v12, %v11760_v17 }
   0xc   :  { %s11672_s19 = smov 31   ;;  %v660_v37 = vunpack.c.l.bf16 %v11144_v34  ;;  %v775_v38 = vunpack.c.l.bf16 %v11145_v35  ;;  %s11673_s20 = smov 30   ;;  %v106_v41 = vrot.slane %v58_v12, %v11763_v19  ;;  %v773_v42 = vld [vmem:[%s14971_s0 + $0x1] sm:$0xff]  ;;  %v11146_v45 = vld [vmem:[%s14973_s2 + $0xc] sm:$0x3]  ;;  %vm184_vm0 = vcmask 1043456  }
   0xd   :  { %169 = vrot.lane.b32.xlu1 %v165_v32, %s11672_s19  ;;  %s11674_s21 = smov 29   ;;  %s11675_s24 = smov 1   ;;  %v147_v43 = vrot.slane %v102_v40, %v11754_v15  ;;  %v11147_v46 = vld [vmem:[%s14973_s2 + $0xe] sm:$0x3]  ;;  %v55_v47 = vld [vmem:[%s14971_s0 + $0x8] sm:$0x1]  ;;  %v776_v48 = vunpack.c.l.bf16 %v773_v42  ;;  %v926_v49 = vunpack.c.l.bf16 %v11146_v45  ;;  %v777_v56 = vunpack.c.h.bf16 %v773_v42 }
   0xe   :  { %173 = vrot.lane.b32.xlu0 %v167_v33, %s11672_s19  ;;  %v11566_v39 = vpack.i.bf16 %v775_v38, %v660_v37  ;;  %v151_v44 = vrot.slane %v106_v41, %v11754_v15  ;;  %v1077_v50 = vunpack.c.l.bf16 %v11147_v46  ;;  %v59_v51 = vunpack.c.l.bf16 %v55_v47  ;;  %v207_v55 = vld [vmem:[%s14971_s0 + $0x8] sm:$0x1]  ;;  %s11676_s11 = smov 127   ;;  %v11148_v20 = vld [vmem:[%s14973_s2 + $0x10] sm:$0x3]  ;;  %s11677_s18 = smov 99  }
   0xf   :  { %v797_v53 = vrot.slane %v776_v48, %v11754_v15  ;;  %v801_v54 = vrot.slane %v776_v48, %v11757_v16  ;;  %v211_v59 = vunpack.c.l.bf16 %v207_v55  ;;  %v813_v62 = vrot.slane %v777_v56, %v11754_v15  ;;  %v358_v12 = vld [vmem:[%s14971_s0 + $0x8] sm:$0x1]  ;;  %s11678_s2 = smov 98   ;;  %v53_v30 = vld [vmem:[%s14974_s3] sm:$0xf]  ;;  %s11679_s27 = smov 97  }
  0x10   :  { %v168_v52 = vcombine.low %v147_v43, %v151_v44  ;;  %v11572_v57 = vpack.i.bf16 %v1077_v50, %v926_v49  ;;  %v110_v58 = vrot.slane %v59_v51, %v11754_v15  ;;  %v817_v63 = vrot.slane %v777_v56, %v11757_v16  ;;  %v509_v21 = vld [vmem:[%s14971_s0 + $0x8] sm:$0x1]  ;;  %v1076_v40 = vld [vmem:[%s14971_s0 + $0x9] sm:$0x1] }
  0x11   :  { %171 = vrot.lane.b32.xlu1 %v166_v36, %s11672_s19  ;;  %v842_v60 = vrot.slane %v797_v53, %v11754_v15  ;;  %v846_v61 = vrot.slane %v801_v54, %v11754_v15  ;;  %v262_v1 = vrot.slane %v211_v59, %v11754_v15  ;;  %v805_v2 = vrot.slane %v776_v48, %v11760_v17  ;;  %v1516_v37 = vld [vmem:[%s14971_s0 + $0x8] sm:$0xff] }
  0x12   :  { %323 = vrot.lane.b32.xlu0 %v166_v36, %s11673_s20  ;;  %v155_v0 = vrot.slane %v110_v58, %v11754_v15  ;;  %v809_v3 = vrot.slane %v776_v48, %v11763_v19  ;;  %v858_v6 = vrot.slane %v813_v62, %v11754_v15  ;;  %v862_v7 = vrot.slane %v817_v63, %v11754_v15  ;;  %v1227_v47 = vld [vmem:[%s14971_s0 + $0x9] sm:$0x1] }
  0x13   :  { %v11827_v5 = vcombine.low %v842_v60, %v846_v61  ;;  %v307_v8 = vrot.slane %v262_v1, %v11754_v15  ;;  %v850_v9 = vrot.slane %v805_v2, %v11754_v15  ;;  %v362_v18 = vunpack.c.l.bf16 %v358_v12 }
  0x14   :  { %v854_v10 = vrot.slane %v809_v3, %v11754_v15  ;;  %v11837_v11 = vcombine.low %v858_v6, %v862_v7  ;;  %v1228_v22 = vunpack.c.l.bf16 %v11148_v20  ;;  %v513_v24 = vunpack.c.l.bf16 %v509_v21 }
  0x15   :  { %321 = vrot.lane.b32.xlu1 %v165_v32, %s11673_s20  ;;  %v413_v23 = vrot.slane %v362_v18, %v11754_v15  ;;  %v821_v28 = vrot.slane %v777_v56, %v11760_v17  ;;  %v825_v29 = vrot.slane %v777_v56, %v11763_v19  ;;  %v1518_v41 = vunpack.c.l.bf16 %v1516_v37 }
  0x16   :  { %11567 = vperm.xlu0 %11555, %v11566_v39   ;;  %v11843_v14 = vcombine.low %v850_v9, %v854_v10  ;;  %v564_v26 = vrot.slane %v513_v24, %v11754_v15  ;;  %v1080_v44 = vunpack.c.l.bf16 %v1076_v40  ;;  %v1231_v50 = vunpack.c.l.bf16 %v1227_v47 }
  0x17   :  { %v458_v25 = vrot.slane %v413_v23, %v11754_v15  ;;  %v866_v31 = vrot.slane %v821_v28, %v11754_v15  ;;  %v1535_v45 = vrot.slane %v1518_v41, %v11760_v17  ;;  %v1539_v46 = vrot.slane %v1518_v41, %v11763_v19  ;;  %v1517_v23 = vld [vmem:[%s14971_s0 + $0x10] sm:$0x1] }
  0x18   :  { %v609_v27 = vrot.slane %v564_v26, %v11754_v15  ;;  %v1131_v49 = vrot.slane %v1080_v44, %v11754_v15  ;;  %v1527_v51 = vrot.slane %v1518_v41, %v11754_v15  ;;  %v1531_v54 = vrot.slane %v1518_v41, %v11757_v16 }
  0x19   :  { %325 = vrot.lane.b32.xlu1 %v167_v33, %s11673_s20  ;;  %v1584_v53 = vrot.slane %v1539_v46, %v11754_v15  ;;  %v1519_v55 = vunpack.c.h.bf16 %v1516_v37  ;;  %v1520_v28 = vunpack.c.l.bf16 %v1517_v23  ;;  %vm186_vm1 = vcmask 252928  }
  0x1a   :  { %474 = vrot.lane.b32.xlu0 %v166_v36, %s11674_s21  ;;  %v1176_v56 = vrot.slane %v1131_v49, %v11754_v15  ;;  %v1572_v58 = vrot.slane %v1527_v51, %v11754_v15  ;;  %v1576_v60 = vrot.slane %v1531_v54, %v11754_v15  ;;  %vm337_vm2 = vcmask 244736  }
  0x1b   :  { %v1543_v61 = vrot.slane %v1519_v55, %v11754_v15  ;;  %v1547_v62 = vrot.slane %v1519_v55, %v11757_v16  ;;  %v1551_v6 = vrot.slane %v1519_v55, %v11760_v17  ;;  %v1555_v7 = vrot.slane %v1519_v55, %v11763_v19 }
  0x1c   :  { %vm488_vm3 = vcmask 236544   ;;  %vm639_vm4 = vcmask 7168   ;;  %vm904_vm5 = vcmask 1039360   ;;  %vm1055_vm6 = vcmask 809984  }
  0x1d   :  { %472 = vrot.lane.b32.xlu1 %v165_v32, %s11674_s21  ;;  %v1588_v1 = vrot.slane %v1543_v61, %v11754_v15  ;;  %v1592_v2 = vrot.slane %v1547_v62, %v11754_v15  ;;  %v1596_v9 = vrot.slane %v1551_v6, %v11754_v15  ;;  %v1600_v10 = vrot.slane %v1555_v7, %v11754_v15 }
  0x1e   :  { %623 = vrot.lane.b32.xlu0 %v165_v32, %s11675_s24  ;;  %v870_v32 = vrot.slane %v825_v29, %v11754_v15  ;;  %vm1206_vm7 = vcmask 801792   ;;  %vm1357_vm8 = vcmask 793600   ;;  %vm2186_vm9 = vcmask 1041408  }
  0x1f   :  { %v1616_v3 = vcombine.low %v1588_v1, %v1592_v2  ;;  %v11952_v18 = vcombine.low %v1596_v9, %v1600_v10  ;;  %vm2182_vm10 = vcmask 31744   ;;  %vm6988_vm11 = vcmask 64512  }
  0x20   :  { %v11887_v35 = vcombine.low %v866_v31, %v870_v32  ;;  %v1559_v32 = vrot.slane %v1520_v28, %v11754_v15 }
  0x21   :  { %476 = vrot.lane.b32.xlu1 %v167_v33, %s11674_s21 }
  0x22   :  { %627 = vrot.lane.b32.xlu0 %v167_v33, %s11675_s24  ;;  %v774_v33 = vld [vmem:[%s14971_s0 + $0x9] sm:$0x1] }
  0x23   :  { %v778_v34 = vunpack.c.l.bf16 %v774_v33 }
  0x25   :  { %625 = vrot.lane.b32.xlu1 %v166_v36, %s11675_s24  ;;  %v925_v36 = vld [vmem:[%s14971_s0 + $0x9] sm:$0x1]  ;;  %v829_v38 = vrot.slane %v778_v34, %v11754_v15 }
  0x26   :  { %175 = vrot.lane.b32.xlu0 %v168_v52, %s11672_s19  ;;  %v929_v39 = vunpack.c.l.bf16 %v925_v36 }
  0x27   :  { %v874_v42 = vrot.slane %v829_v38, %v11754_v15  ;;  %v11989_v38 = vrot.slane %v1559_v32, %v11754_v15 }
  0x28   :  { %v980_v43 = vrot.slane %v929_v39, %v11754_v15 }
  0x29   :  { %11573 = vperm.xlu1 %11571, %v11572_v57   ;;  %v1282_v57 = vrot.slane %v1231_v50, %v11754_v15 }
  0x2a   :  { %327 = vrot.lane.b32.xlu0 %v168_v52, %s11673_s20  ;;  %v1025_v48 = vrot.slane %v980_v43, %v11754_v15 }
  0x2b   :  { %v1327_v63 = vrot.slane %v1282_v57, %v11754_v15 }
  0x2d   :  { %177 = vrot.lane.b32.xlu1 %v155_v0, %s11672_s19  ;;  %v1614_v0 = vcombine.low %v1572_v58, %v1576_v60  ;;  %v11680_v58 = vmov 839922192  }
  0x2e   :  { %888 = vrot.lane.b32.xlu0 %v11827_v5, %s11676_s11 }
  0x31   :  { %329 = vrot.lane.b32.xlu1 %v307_v8, %s11673_s20  ;;  %v1758_v8 = vld [vmem:[%s14971_s0 + $0x9] sm:$0xff] }
  0x32   :  { %892 = vrot.lane.b32.xlu0 %v11837_v11, %s11676_s11  ;;  %v1759_v12 = vunpack.c.l.bf16 %v1758_v8 }
  0x34   :  { %v1766_v20 = vrot.slane %v1759_v12, %v11754_v15  ;;  %v1770_v21 = vrot.slane %v1759_v12, %v11757_v16  ;;  %v1774_v36 = vrot.slane %v1759_v12, %v11760_v17  ;;  %v1778_v37 = vrot.slane %v1759_v12, %v11763_v19 }
  0x35   :  { %890 = vrot.lane.b32.xlu1 %v11843_v14, %s11676_s11 }
  0x36   :  { %478 = vrot.lane.b32.xlu0 %v168_v52, %s11674_s21  ;;  %v1806_v24 = vrot.slane %v1766_v20, %v11754_v15  ;;  %v1814_v39 = vrot.slane %v1774_v36, %v11754_v15  ;;  %v1818_v40 = vrot.slane %v1778_v37, %v11754_v15 }
  0x38   :  { %v12003_v43 = vcombine.low %v1814_v39, %v1818_v40 }
  0x39   :  { %1234 = vperm.xlu1 %11571, %v1228_v22   ;;  %v11956_v22 = vunpack.c.h.bf16 %v1758_v8 }
  0x3a   :  { %1039 = vrot.lane.b32.xlu0 %v11827_v5, %s11677_s18 }
  0x3b   :  { %15032 = vst [vmem:[#allocation8_spill] sm:$0xff] %v11956_v22  ;;  %v1782_v26 = vrot.slane %v11956_v22, %v11754_v15 }
  0x3d   :  { %480 = vrot.lane.b32.xlu1 %v458_v25, %s11674_s21  ;;  %v1810_v25 = vrot.slane %v1770_v21, %v11754_v15 }
  0x3e   :  { %1043 = vrot.lane.b32.xlu0 %v11837_v11, %s11677_s18 }
  0x3f   :  { %v11973_v29 = vcombine.low %v1806_v24, %v1810_v25 }
  0x41   :  { %1041 = vrot.lane.b32.xlu1 %v11843_v14, %s11677_s18 }
  0x42   :  { %631 = vrot.lane.b32.xlu0 %v609_v27, %s11675_s24  ;;  %v1786_v27 = vrot.slane %v11956_v22, %v11757_v16 }
  0x44   :  { %v1826_v31 = vrot.slane %v1786_v27, %v11754_v15 }
  0x45   :  { %629 = vrot.lane.b32.xlu1 %v168_v52, %s11675_s24  ;;  %v1580_v52 = vrot.slane %v1535_v45, %v11754_v15 }
  0x46   :  { %1192 = vrot.lane.b32.xlu0 %v11843_v14, %s11678_s2 }
  0x47   :  { %v1615_v59 = vcombine.low %v1580_v52, %v1584_v53 }
  0x49   :  { %1190 = vrot.lane.b32.xlu1 %v11827_v5, %s11678_s2 }
  0x4a   :  { %1379 = vperm.xlu0 %11555, %v53_v30   ;;  %v1822_v30 = vrot.slane %v1782_v26, %v11754_v15 }
  0x4c   :  { %v11981_v33 = vcombine.low %v1822_v30, %v1826_v31 }
  0x4d   :  { %1194 = vrot.lane.b32.xlu1 %v11837_v11, %s11678_s2 }
  0x4e   :  { %1343 = vrot.lane.b32.xlu0 %v11843_v14, %s11679_s27  ;;  %15033 = vst [vmem:[#allocation9_spill] sm:$0xff] %v11981_v33 }
  0x51   :  { %1341 = vrot.lane.b32.xlu1 %v11827_v5, %s11679_s27 }
  0x52   :  { %894 = vrot.lane.b32.xlu0 %v11887_v35, %s11676_s11 }
  0x55   :  { %1345 = vrot.lane.b32.xlu1 %v11837_v11, %s11679_s27 }
  0x56   :  { %1045 = vrot.lane.b32.xlu0 %v11887_v35, %s11677_s18 }
  0x59   :  { %896 = vrot.lane.b32.xlu1 %v874_v42, %s11676_s11 }
  0x5a   :  { %1196 = vrot.lane.b32.xlu0 %v11887_v35, %s11678_s2 }
  0x5d   :  { %1047 = vrot.lane.b32.xlu1 %v1025_v48, %s11677_s18 }
  0x5e   :  { %1347 = vrot.lane.b32.xlu0 %v11887_v35, %s11679_s27 }
  0x61   :  { %1198 = vrot.lane.b32.xlu1 %v1176_v56, %s11678_s2 }
  0x62   :  { %1620 = vrot.lane.b32.xlu0 %v1615_v59, %s11672_s19 }
  0x65   :  { %1349 = vrot.lane.b32.xlu1 %v1327_v63, %s11679_s27 }
  0x66   :  { %1653 = vrot.lane.b32.xlu0 %v1614_v0, %s11673_s20 }
  0x69   :  { %1618 = vrot.lane.b32.xlu1 %v1614_v0, %s11672_s19 }
  0x6a   :  { %1657 = vrot.lane.b32.xlu0 %v1616_v3, %s11673_s20 }
  0x6d   :  { %1622 = vrot.lane.b32.xlu1 %v1616_v3, %s11672_s19 }
  0x6e   :  { %1690 = vrot.lane.b32.xlu0 %v1615_v59, %s11674_s21 }
  0x71   :  { %1655 = vrot.lane.b32.xlu1 %v1615_v59, %s11673_s20 }
  0x72   :  { %1725 = vrot.lane.b32.xlu0 %v1615_v59, %s11675_s24  ;;  %v66_v59 = vunpack.c.l.s4 %v11680_v58 }
  0x74   :  { %v67_v62 = vunpack.c.0.s8 %v66_v59 }
  0x75   :  { %1688 = vrot.lane.b32.xlu1 %v1614_v0, %s11674_s21 }
  0x76   :  { %1624 = vrot.lane.b32.xlu0 %v11952_v18, %s11672_s19  ;;  %v12049_v7 = vsub.s32 %v67_v62, %v11749_v13 }
  0x79   :  { %1692 = vrot.lane.b32.xlu1 %v1616_v3, %s11674_s21 }
  0x7a   :  { %1659 = vrot.lane.b32.xlu0 %v11952_v18, %s11673_s20 }
  0x7d   :  { %1723 = vrot.lane.b32.xlu1 %v1614_v0, %s11675_s24  ;;  %v11681_v0 = vmov 1983009808  }
  0x7e   :  { %1872 = vrot.lane.b32.xlu0 %v11973_v29, %s11676_s11  ;;  %v12043_v1 = vunpack.c.l.s4 %v11681_v0 }
  0x7f   :  { %v11983_v34 = vpop.permute.xlu1 %169 }
  0x80   :  { %v179_v12 = vrot.slane %v11983_v34, 4 }
  0x81   :  { %1727 = vrot.lane.b32.xlu1 %v1616_v3, %s11675_s24 }
  0x82   :  { %1876 = vrot.lane.b32.xlu0 %v11981_v33, %s11676_s11 }
  0x83   :  { %v11999_v42 = vpop.permute.xlu1 %171 }
  0x84   :  { %v180_v6 = vrot.slane %v11999_v42, 4 }
  0x85   :  { %v11995_v41 = vpop.permute.xlu0 %11557  ;;  %1626 = vrot.lane.b32.xlu1 %v11989_v38, %s11672_s19 }
  0x86   :  { %1696 = vrot.lane.b32.xlu0 %v11989_v38, %s11674_s21  ;;  %v11560_v20 = vunpack.i.h.bf16 %v11995_v41  ;;  %v11559_v24 = vunpack.i.l.bf16 %v11995_v41  ;;  %v185_v36 = vsel %vm184_vm0, %v179_v12, %v180_v6 }
  0x87   :  { %v322_v45 = vpop.permute.xlu1 %321 }
  0x88   :  { %v331_v8 = vrot.slane %v322_v45, 4  ;;  %v12074_v58 = vrot.slane %v11560_v20, %v12049_v7  ;;  %v1482_v20 = vunpack.c.0.s8 %v12043_v1 }
  0x89   :  { %v12005_v44 = vpop.permute.xlu0 %11562  ;;  %1661 = vrot.lane.b32.xlu1 %v11989_v38, %s11673_s20 }
  0x8a   :  { %1909 = vrot.lane.b32.xlu0 %v12003_v43, %s11677_s18  ;;  %v11564_v37 = vunpack.i.l.bf16 %v12005_v44 }
  0x8b   :  { %v12017_v48 = vpop.permute.xlu1 %325 }
  0x8c   :  { %v333_v21 = vrot.slane %v12017_v48, 4 }
  0x8d   :  { %v12011_v46 = vpop.permute.xlu0 %173  ;;  %1874 = vrot.lane.b32.xlu1 %v12003_v43, %s11676_s11 }
  0x8e   :  { %v181_v23 = vrot.slane %v12011_v46, 4 }
  0x8f   :  { %v473_v50 = vpop.permute.xlu1 %472 }
  0x90   :  { %v482_v25 = vrot.slane %v473_v50, 4  ;;  %v188_v59 = vsel %vm184_vm0, %v180_v6, %v181_v23 }
  0x91   :  { %v324_v47 = vpop.permute.xlu0 %323  ;;  %1694 = vrot.lane.b32.xlu1 %v11952_v18, %s11674_s21 }
  0x92   :  { %v332_v2 = vrot.slane %v324_v47, 4 }
  0x93   :  { %v12027_v53 = vpop.permute.xlu1 %476 }
  0x94   :  { %v336_v26 = vsel %vm184_vm0, %v331_v8, %v332_v2  ;;  %v339_v28 = vsel %vm184_vm0, %v332_v2, %v333_v21  ;;  %v14983_v30 = vrot.slane %v12027_v53, 4  ;;  %v12082_v2 = vrot.slane %v11559_v24, %v12049_v7 }
  0x95   :  { %v12019_v49 = vpop.permute.xlu0 %11567  ;;  %1907 = vrot.lane.b32.xlu1 %v11973_v29, %s11677_s18  ;;  %v338_v62 = vsel %vm337_vm2, %v322_v45, %v336_v26  ;;  %v11565_v8 = vunpack.i.h.bf16 %v12005_v44  ;;  %v340_v12 = vsel %vm337_vm2, %v324_v47, %v339_v28  ;;  %v12096_v24 = vrot.slane %v11564_v37, %v12049_v7 }
  0x96   :  { %v189_v44 = vsel %vm186_vm1, %v11999_v42, %v188_v59  ;;  %v349_v47 = vmul.f32 %v338_v62, %v12074_v58  ;;  %v350_v28 = vmul.f32 %v340_v12, %v12074_v58  ;;  %v11569_v37 = vunpack.i.l.bf16 %v12019_v49 }
  0x97   :  { %v12031_v55 = vpop.permute.xlu1 %625  ;;  %v199_v62 = vmul.f32 %v189_v44, %v12082_v2 }
  0x98   :  { %v634_v39 = vrot.slane %v12031_v55, 4  ;;  %v12139_v44 = vrot.slane %v11569_v37, %v12049_v7 }
  0x99   :  { %v475_v51 = vpop.permute.xlu0 %474  ;;  %1911 = vrot.lane.b32.xlu1 %v11981_v33, %s11677_s18 }
  0x9a   :  { %v483_v9 = vrot.slane %v475_v51, 4 }
  0x9c   :  { %v487_v40 = vsel %vm184_vm0, %v482_v25, %v483_v9  ;;  %v490_v0 = vsel %vm184_vm0, %v483_v9, %v14983_v30  ;;  %v1404_v9 = vsub.s32 1, %v11749_v13 }
  0x9d   :  { %v12025_v52 = vpop.permute.xlu0 %623  ;;  %v489_v4 = vsel %vm488_vm3, %v473_v50, %v487_v40  ;;  %v491_v1 = vsel %vm488_vm3, %v475_v51, %v490_v0  ;;  %v12107_v50 = vld [vmem:[%s14972_s1] sm:$0xff] }
  0x9e   :  { %v633_v27 = vrot.slane %v12025_v52, 4  ;;  %v500_v40 = vmul.f32 %v489_v4, %v12096_v24  ;;  %v12135_v4 = vrot.slane %v12107_v50, %v1404_v9 }
  0xa0   :  { %v638_v25 = vsel %vm184_vm0, %v633_v27, %v634_v39  ;;  %v187_v27 = vsel %vm186_vm1, %v11983_v34, %v185_v36  ;;  %v501_v34 = vmul.f32 %v491_v1, %v12096_v24  ;;  %15035 = vst [vmem:[#allocation11_spill] sm:$0xff] %v12135_v4 }
  0xa1   :  { %v12029_v54 = vpop.permute.xlu0 %627  ;;  %v640_v42 = vsel %vm639_vm4, %v12025_v52, %v638_v25  ;;  %v198_v51 = vmul.f32 %v187_v27, %v12082_v2  ;;  %v12129_v52 = vrot.slane %v12107_v50, %v11754_v15 }
  0xa2   :  { %v14982_v31 = vrot.slane %v12029_v54, 4 }
  0xa3   :  { %15034 = vst [vmem:[#allocation10_spill] sm:$0xff] %v12129_v52 }
  0xa4   :  { %v641_v45 = vsel %vm184_vm0, %v634_v39, %v14982_v31  ;;  %v12116_v39 = vrot.slane %v11565_v8, %v12049_v7  ;;  %v353_v8 = vadd.f32 %v349_v47, %v198_v51  ;;  %v12144_v31 = vsub.s32 %v1482_v20, %v11749_v13 }
  0xa5   :  { %v12033_v56 = vpop.permute.xlu0 %175  ;;  %v642_v59 = vsel %vm639_vm4, %v12031_v55, %v641_v45  ;;  %v1412_v55 = vsub.s32 3, %v11749_v13  ;;  %v354_v45 = vadd.f32 %v350_v28, %v199_v62  ;;  %v12159_v20 = vrot.slane %v12107_v50, %v11757_v16 }
  0xa6   :  { %v182_v36 = vrot.slane %v12033_v56, 4  ;;  %v651_v12 = vmul.f32 %v640_v42, %v12116_v39  ;;  %v652_v1 = vmul.f32 %v642_v59, %v12116_v39  ;;  %15036 = vst [vmem:[#allocation12_spill] sm:$0xff] %v12144_v31  ;;  %v504_v47 = vadd.f32 %v500_v40, %v353_v8 }
  0xa7   :  { %v11570_v42 = vunpack.i.h.bf16 %v12019_v49  ;;  %v505_v51 = vadd.f32 %v501_v34, %v354_v45  ;;  %v12155_v59 = vcombine.low %v12129_v52, %v12135_v4  ;;  %15038 = vst [vmem:[#allocation14_spill] sm:$0xff] %v12159_v20  ;;  %v765_v49 = vmul.f32 %v11827_v5, %v12139_v44 }
  0xa8   :  { %v12035_v57 = vpop.permute.xlu1 %11573  ;;  %v190_v9 = vsel %vm184_vm0, %v181_v23, %v182_v36  ;;  %v655_v28 = vadd.f32 %v651_v12, %v504_v47  ;;  %v12167_v34 = vrot.slane %v12107_v50, %v1412_v55 }
  0xa9   :  { %v12037_v60 = vpop.permute.xlu0 %327  ;;  %15037 = vst [vmem:[#allocation13_spill] sm:$0xff] %v12155_v59  ;;  %v656_v40 = vadd.f32 %v652_v1, %v505_v51  ;;  %v191_v8 = vsel %vm186_vm1, %v12011_v46, %v190_v9  ;;  %v11576_v12 = vunpack.i.h.bf16 %v12035_v57  ;;  %v12175_v5 = vrot.slane %v11570_v42, %v12049_v7 }
  0xaa   :  { %v334_v27 = vrot.slane %v12037_v60, 4  ;;  %15039 = vst [vmem:[#allocation15_spill] sm:$0xff] %v12167_v34  ;;  %v12184_v46 = vmul.f32 %v11837_v11, %v12139_v44  ;;  %v769_v1 = vadd.f32 %v765_v49, %v655_v28  ;;  %v11575_v4 = vunpack.i.l.bf16 %v12035_v57 }
  0xab   :  { %v12195_v11 = vrot.slane %v11576_v12, %v12049_v7 }
  0xac   :  { %v12039_v61 = vpop.permute.xlu1 %177  ;;  %v341_v23 = vsel %vm184_vm0, %v333_v21, %v334_v27  ;;  %v766_v21 = vmul.f32 %v11843_v14, %v12139_v44 }
  0xad   :  { %v12041_v63 = vpop.permute.xlu0 %888  ;;  %v183_v45 = vrot.slane %v12039_v61, 4  ;;  %v342_v61 = vsel %vm337_vm2, %v12017_v48, %v341_v23 }
  0xae   :  { %v898_v16 = vrot.slane %v12041_v63, 4  ;;  %v770_v49 = vadd.f32 %v766_v21, %v656_v40  ;;  %v351_v23 = vmul.f32 %v342_v61, %v12074_v58  ;;  %v12216_v61 = vrot.slane %v11575_v4, %v12049_v7 }
  0xaf   :  { %v192_v28 = vsel %vm184_vm0, %v182_v36, %v183_v45 }
  0xb0   :  { %v12045_v3 = vpop.permute.xlu1 %329  ;;  %v193_v21 = vsel %vm186_vm1, %v12033_v56, %v192_v28 }
  0xb1   :  { %v12051_v10 = vpop.permute.xlu0 %892  ;;  %v335_v47 = vrot.slane %v12045_v3, 4  ;;  %v200_v3 = vmul.f32 %v191_v8, %v12082_v2  ;;  %v201_v22 = vmul.f32 %v193_v21, %v12082_v2 }
  0xb2   :  { %v14992_v14 = vrot.slane %v12051_v10, 4 }
  0xb3   :  { %v355_v56 = vadd.f32 %v351_v23, %v200_v3 }
  0xb4   :  { %v12065_v32 = vpop.permute.xlu1 %890 }
  0xb5   :  { %v12071_v41 = vpop.permute.xlu0 %478  ;;  %v899_v37 = vrot.slane %v12065_v32, 4 }
  0xb6   :  { %v485_v52 = vrot.slane %v12071_v41, 4 }
  0xb7   :  { %v903_v51 = vsel %vm184_vm0, %v898_v16, %v899_v37  ;;  %v343_v16 = vsel %vm184_vm0, %v334_v27, %v335_v47  ;;  %v906_v57 = vsel %vm184_vm0, %v899_v37, %v14992_v14  ;;  %v15040_v27 = vrot.slane %v12027_v53, 4 }
  0xb8   :  { %v12092_v6 = vpop.permute.xlu1 %1234  ;;  %v905_v8 = vsel %vm904_vm5, %v12041_v63, %v903_v51  ;;  %v344_v51 = vsel %vm337_vm2, %v12037_v60, %v343_v16 }
  0xb9   :  { %v12102_v26 = vpop.permute.xlu0 %1039  ;;  %v492_v63 = vsel %vm184_vm0, %v15040_v27, %v485_v52  ;;  %v916_v28 = vmul.f32 %v905_v8, %v12175_v5 }
  0xba   :  { %v1049_v48 = vrot.slane %v12102_v26, 4  ;;  %v493_v60 = vsel %vm488_vm3, %v12027_v53, %v492_v63 }
  0xbb   :  { %v502_v63 = vmul.f32 %v493_v60, %v12096_v24 }
  0xbc   :  { %v12125_v0 = vpop.permute.xlu1 %480 }
  0xbd   :  { %v12132_v25 = vpop.permute.xlu0 %1043  ;;  %v486_v47 = vrot.slane %v12125_v0, 4 }
  0xbe   :  { %v1051_v37 = vrot.slane %v12132_v25, 4 }
  0xc0   :  { %v12148_v30 = vpop.permute.xlu1 %1041 }
  0xc1   :  { %v12151_v62 = vpop.permute.xlu0 %631  ;;  %v1050_v42 = vrot.slane %v12148_v30, 4 }
  0xc3   :  { %v1054_v12 = vsel %vm184_vm0, %v1049_v48, %v1050_v42  ;;  %v907_v48 = vsel %vm904_vm5, %v12065_v32, %v906_v57  ;;  %v1057_v0 = vsel %vm184_vm0, %v1050_v42, %v1051_v37  ;;  %v15041_v32 = vrot.slane %v12029_v54, 4 }
  0xc4   :  { %v12180_v55 = vpop.permute.xlu1 %629  ;;  %v1056_v27 = vsel %vm1055_vm6, %v12102_v26, %v1054_v12  ;;  %v352_v26 = vmul.f32 %v344_v51, %v12074_v58  ;;  %v917_v8 = vmul.f32 %v907_v48, %v12175_v5  ;;  %v494_v42 = vsel %vm184_vm0, %v485_v52, %v486_v47 }
  0xc5   :  { %v1193_v9 = vpop.permute.xlu0 %1192  ;;  %v636_v33 = vrot.slane %v12180_v55, 4  ;;  %v1058_v12 = vsel %vm1055_vm6, %v12148_v30, %v1057_v0  ;;  %v1067_v53 = vmul.f32 %v1056_v27, %v12216_v61  ;;  %v12251_v51 = vrot.slane %v12092_v6, %v12049_v7 }
  0xc6   :  { %v1201_v36 = vrot.slane %v1193_v9, 4  ;;  %v637_v30 = vrot.slane %v12151_v62, 4  ;;  %v921_v0 = vadd.f32 %v917_v8, %v770_v49  ;;  %v495_v60 = vsel %vm488_vm3, %v12071_v41, %v494_v42 }
  0xc7   :  { %v643_v3 = vsel %vm184_vm0, %v15041_v32, %v636_v33  ;;  %v1068_v6 = vmul.f32 %v1058_v12, %v12216_v61  ;;  %v15042_v49 = vrot.slane %v12051_v10, 4 }
  0xc8   :  { %v1191_v15 = vpop.permute.xlu1 %1190  ;;  %v644_v52 = vsel %vm639_vm4, %v12029_v54, %v643_v3 }
  0xc9   :  { %v1200_v40 = vrot.slane %v1191_v15, 4  ;;  %v1380_v45 = vpop.permute.xlu0 %1379  ;;  %v653_v54 = vmul.f32 %v644_v52, %v12116_v39 }
  0xcb   :  { %v1205_v14 = vsel %vm184_vm0, %v1200_v40, %v1201_v36 }
  0xcc   :  { %v12229_v4 = vpop.permute.xlu1 %1194  ;;  %v1207_v57 = vsel %vm1206_vm7, %v1191_v15, %v1205_v14  ;;  %v920_v15 = vadd.f32 %v916_v28, %v769_v1  ;;  %v506_v28 = vadd.f32 %v502_v63, %v355_v56  ;;  %v1072_v56 = vadd.f32 %v1068_v6, %v921_v0 }
  0xcd   :  { %v14995_v23 = vrot.slane %v12229_v4, 4  ;;  %v1344_v16 = vpop.permute.xlu0 %1343  ;;  %v1218_v47 = vmul.f32 %v1207_v57, %v12195_v11 }
  0xce   :  { %v1352_v21 = vrot.slane %v1344_v16, 4  ;;  %v1071_v1 = vadd.f32 %v1067_v53, %v920_v15  ;;  %v657_v15 = vadd.f32 %v653_v54, %v506_v28 }
  0xcf   :  { %v1208_v40 = vsel %vm184_vm0, %v1201_v36, %v14995_v23  ;;  %v645_v23 = vsel %vm184_vm0, %v636_v33, %v637_v30 }
  0xd0   :  { %v1342_v14 = vpop.permute.xlu1 %1341  ;;  %v1209_v48 = vsel %vm1206_vm7, %v1193_v9, %v1208_v40  ;;  %v1222_v42 = vadd.f32 %v1218_v47, %v1071_v1  ;;  %v503_v40 = vmul.f32 %v495_v60, %v12096_v24  ;;  %v646_v63 = vsel %vm639_vm4, %v12180_v55, %v645_v23 }
  0xd1   :  { %v1351_v27 = vrot.slane %v1342_v14, 4  ;;  %v895_v36 = vpop.permute.xlu0 %894  ;;  %v1219_v3 = vmul.f32 %v1209_v48, %v12195_v11  ;;  %v654_v54 = vmul.f32 %v646_v63, %v12116_v39 }
  0xd2   :  { %v901_v32 = vrot.slane %v895_v36, 4 }
  0xd3   :  { %v1356_v62 = vsel %vm184_vm0, %v1351_v27, %v1352_v21  ;;  %v1223_v48 = vadd.f32 %v1219_v3, %v1072_v56 }
  0xd4   :  { %v1358_v9 = vsel %vm1357_vm8, %v1342_v14, %v1356_v62  ;;  %v908_v8 = vsel %vm184_vm0, %v15042_v49, %v901_v32  ;;  %v1346_v41 = vpop.permute.xlu1 %1345  ;;  %v12276_v14 = vrot.slane %v1380_v45, %v12049_v7 }
  0xd5   :  { %v1369_v57 = vmul.f32 %v1358_v9, %v12251_v51  ;;  %v909_v33 = vsel %vm904_vm5, %v12051_v10, %v908_v8  ;;  %v1353_v12 = vrot.slane %v1346_v41, 4  ;;  %v1046_v53 = vpop.permute.xlu0 %1045  ;;  %v1420_v8 = vsub.s32 5, %v11749_v13 }
  0xd6   :  { %v1052_v52 = vrot.slane %v1046_v53, 4  ;;  %15043 = vst [vmem:[#allocation16_spill] sm:$0xff] %v12276_v14  ;;  %v918_v27 = vmul.f32 %v909_v33, %v12175_v5 }
  0xd7   :  { %v1373_v30 = vadd.f32 %v1369_v57, %v1222_v42  ;;  %v1359_v47 = vsel %vm184_vm0, %v1352_v21, %v1353_v12  ;;  %v356_v21 = vadd.f32 %v352_v26, %v201_v22 }
  0xd8   :  { %v1360_v10 = vsel %vm1357_vm8, %v1344_v16, %v1359_v47  ;;  %v1059_v0 = vsel %vm184_vm0, %v1051_v37, %v1052_v52  ;;  %v897_v60 = vpop.permute.xlu1 %896  ;;  %v12291_v16 = vcombine.low %v12159_v20, %v12167_v34  ;;  %v771_v37 = vadd.f32 %v12184_v46, %v657_v15 }
  0xd9   :  { %v1389_v55 = vadd.f32 %v12276_v14, %v1373_v30  ;;  %v1370_v23 = vmul.f32 %v1360_v10, %v12251_v51  ;;  %v1060_v7 = vsel %vm1055_vm6, %v12132_v25, %v1059_v0  ;;  %v902_v45 = vrot.slane %v897_v60, 4  ;;  %v1197_v6 = vpop.permute.xlu0 %1196 }
  0xda   :  { %15044 = vst [vmem:[#allocation17_spill] sm:$0xff] %v12291_v16  ;;  %v1203_v1 = vrot.slane %v1197_v6, 4  ;;  %v507_v9 = vadd.f32 %v503_v40, %v356_v21  ;;  %v1069_v49 = vmul.f32 %v1060_v7, %v12216_v61  ;;  %v15045_v25 = vrot.slane %v12229_v4, 4 }
  0xdb   :  { %v1393_v62 = vmax.f32 %v1389_v55, 0.0  ;;  %v1374_v28 = vadd.f32 %v1370_v23, %v1223_v48  ;;  %v910_v3 = vsel %vm184_vm0, %v901_v32, %v902_v45  ;;  %v922_v57 = vadd.f32 %v918_v27, %v771_v37 }
  0xdc   :  { %v1210_v22 = vsel %vm184_vm0, %v15045_v25, %v1203_v1  ;;  %v1048_v26 = vpop.permute.xlu1 %1047  ;;  %v911_v32 = vsel %vm904_vm5, %v895_v36, %v910_v3  ;;  %v658_v30 = vadd.f32 %v654_v54, %v507_v9  ;;  %v12308_v10 = vrot.slane %v12107_v50, %v11760_v17 }
  0xdd   :  { %v1446_v42 = vmul.f32 %v12155_v59, %v1393_v62  ;;  %v1390_v33 = vadd.f32 %v12276_v14, %v1374_v28  ;;  %v1211_v46 = vsel %vm1206_vm7, %v12229_v4, %v1210_v22  ;;  %v1348_v56 = vpop.permute.xlu0 %1347  ;;  %v1053_v63 = vrot.slane %v1048_v26, 4 }
  0xde   :  { %v1220_v40 = vmul.f32 %v1211_v46, %v12195_v11  ;;  %v1354_v15 = vrot.slane %v1348_v56, 4  ;;  %15046 = vst [vmem:[#allocation18_spill] sm:$0xff] %v12308_v10  ;;  %v768_v27 = vmul.f32 %v11887_v35, %v12139_v44  ;;  %v1073_v0 = vadd.f32 %v1069_v49, %v922_v57 }
  0xdf   :  { %v1454_v47 = vcombine.high %v1446_v42, %v1446_v42  ;;  %v1394_v48 = vmax.f32 %v1390_v33, 0.0  ;;  %v1061_v4 = vsel %vm184_vm0, %v1052_v52, %v1053_v63  ;;  %v919_v23 = vmul.f32 %v911_v32, %v12175_v5 }
  0xe0   :  { %v1361_v60 = vsel %vm184_vm0, %v1353_v12, %v1354_v15  ;;  %v1199_v36 = vpop.permute.xlu1 %1198  ;;  %v1062_v7 = vsel %vm1055_vm6, %v1046_v53, %v1061_v4  ;;  %v1224_v21 = vadd.f32 %v1220_v40, %v1073_v0  ;;  %v12319_v54 = vrot.slane %v12107_v50, %v1420_v8 }
  0xe1   :  { %v1447_v55 = vmul.f32 %v12291_v16, %v1394_v48  ;;  %v1362_v45 = vsel %vm1357_vm8, %v1346_v41, %v1361_v60  ;;  %v1204_v62 = vrot.slane %v1199_v36, 4  ;;  %v772_v37 = vadd.f32 %v768_v27, %v658_v30 }
  0xe2   :  { %15047 = vst [vmem:[#allocation19_spill] sm:$0xff] %v12319_v54  ;;  %v1371_v35 = vmul.f32 %v1362_v45, %v12251_v51  ;;  %v11149_v52 = vpack.c.bf16 %v1454_v47, %v1446_v42  ;;  %v1070_v12 = vmul.f32 %v1062_v7, %v12216_v61  ;;  %v1428_v49 = vsub.s32 7, %v11749_v13 }
  0xe3   :  { %v1455_v28 = vcombine.high %v1447_v55, %v1447_v55  ;;  %v1212_v9 = vsel %vm184_vm0, %v1203_v1, %v1204_v62  ;;  %v923_v41 = vadd.f32 %v919_v23, %v772_v37  ;;  %v12328_v8 = vcombine.low %v12308_v10, %v12319_v54 }
  0xe4   :  { %v1375_v3 = vadd.f32 %v1371_v35, %v1224_v21  ;;  %v1350_v53 = vpop.permute.xlu1 %1349  ;;  %v1213_v22 = vsel %vm1206_vm7, %v1197_v6, %v1212_v9  ;;  %v1486_v33 = vrot.slane %v11149_v52, %v12144_v31  ;;  %v12339_v6 = vrot.slane %v12107_v50, %v11763_v19 }
  0xe5   :  { %v11150_v25 = vpack.c.bf16 %v1455_v28, %v1447_v55  ;;  %v1355_v26 = vrot.slane %v1350_v53, 4  ;;  %15048 = vst [vmem:[#allocation20_spill] sm:$0xff] %v12328_v8  ;;  %v1221_v57 = vmul.f32 %v1213_v22, %v12195_v11  ;;  %v1074_v13 = vadd.f32 %v1070_v12, %v923_v41  ;;  %v1859_v41 = vld [vmem:[%s14971_s0 + $0x11] sm:$0x1] }
  0xe6   :  { %v1391_v42 = vadd.f32 %v12276_v14, %v1375_v3  ;;  %15049 = vst [vmem:[#allocation21_spill] sm:$0xff] %v12339_v6  ;;  %v12346_v47 = vrot.slane %v12107_v50, %v1428_v49 }
  0xe7   :  { %v12334_v1 = vrot.slane %v11150_v25, %v12144_v31  ;;  %v1363_v46 = vsel %vm184_vm0, %v1354_v15, %v1355_v26  ;;  %v1225_v30 = vadd.f32 %v1221_v57, %v1074_v13  ;;  %v12390_v25 = vpop.permute.xlu0 %1620  ;;  %v1860_v26 = vunpack.c.l.bf16 %v1859_v41  ;;  %v15053_v13 = vld [vmem:[#allocation9_spill] sm:$0xff] }
  0xe8   :  { %v1395_v32 = vmax.f32 %v1391_v42, 0.0  ;;  %v1364_v40 = vsel %vm1357_vm8, %v1348_v56, %v1363_v46  ;;  %15050 = vst [vmem:[#allocation22_spill] sm:$0xff] %v12346_v47  ;;  %v12353_v0 = vcombine.low %v12339_v6, %v12346_v47  ;;  %v12399_v22 = vpop.permute.xlu1 %1618  ;;  %v15054_v46 = vld [vmem:[#allocation7_spill] sm:$0xff] }
  0xe9   :  { %v12343_v63 = vcombine.low %v1486_v33, %v12334_v1  ;;  %v1372_v48 = vmul.f32 %v1364_v40, %v12251_v51 }
  0xea   :  { %v1448_v15 = vmul.f32 %v12328_v8, %v1395_v32  ;;  %15051 = vst [vmem:[#allocation23_spill] sm:$0xff] %v12353_v0  ;;  %v1865_v32 = vrot.slane %v1860_v26, %v15054_v46 }
  0xeb   :  { %1514 = vst [vmem:[#allocation2 + $0x2] sm:$0xff] %v12343_v63  ;;  %v1376_v27 = vadd.f32 %v1372_v48, %v1225_v30  ;;  %v12405_v42 = vpop.permute.xlu0 %1653 }
  0xec   :  { %v1456_v4 = vcombine.high %v1448_v15, %v1448_v15  ;;  %v12411_v33 = vpop.permute.xlu1 %1622 }
  0xed   :  { %v1392_v56 = vadd.f32 %v12276_v14, %v1376_v27 }
  0xee   :  { %v11151_v50 = vpack.c.bf16 %v1456_v4, %v1448_v15 }
  0xef   :  { %v1396_v60 = vmax.f32 %v1392_v56, 0.0  ;;  %v12420_v48 = vpop.permute.xlu0 %1657 }
  0xf0   :  { %v1503_v21 = vrot.slane %v11151_v50, %v12144_v31 }
  0xf1   :  { %v1449_v36 = vmul.f32 %v12353_v0, %v1396_v60  ;;  %v15063_v0 = vmov 0  }
  0xf2   :  { %v2108_v55 = vld [vmem:[#allocation2] sm:$0xff] }
  0xf3   :  { %v1457_v23 = vcombine.high %v1449_v36, %v1449_v36  ;;  %v2121_v7 = vrot.slane %v2108_v55, %v12144_v31  ;;  %v2114_v28 = vcombine.high %v2108_v55, %v2108_v55  ;;  %v12434_v27 = vpop.permute.xlu0 %1690 }
  0xf5   :  { %v11152_v45 = vpack.c.bf16 %v1457_v23, %v1449_v36  ;;  %2155 = vrot.lane.b32.xlu0 %v2121_v7, %s11673_s20  ;;  %v2129_v12 = vcombine.high %v2121_v7, %v2121_v7  ;;  %v2128_v3 = vrot.slane %v2114_v28, %v12144_v31 }
  0xf7   :  { %v12361_v35 = vrot.slane %v11152_v45, %v12144_v31  ;;  %v2130_v4 = vcombine.high %v2128_v3, %v2128_v3  ;;  %v12441_v60 = vpop.permute.xlu0 %1725 }
  0xf9   :  { %v12364_v62 = vcombine.low %v1503_v21, %v12361_v35  ;;  %2375 = vrot.lane.b32.xlu0 %v2121_v7, %s11672_s19 }
  0xfb   :  { %1515 = vst [vmem:[#allocation2 + $0xa] sm:$0xff] %v12364_v62  ;;  %v12449_v55 = vpop.permute.xlu0 %1624 }
  0xfd   :  { %2640 = vrot.lane.b32.xlu0 %v2121_v7, %s11674_s21 }
  0xff   :  { %v12456_v23 = vpop.permute.xlu0 %1659 }
 0x102   :  { %v2109_v37 = vld [vmem:[#allocation2 + $0x8] sm:$0xff]  ;;  %v11165_v21 = vld.sshfl [vmem:[#allocation2 + $0x10] sm:$0x3 pattern:$0x76325410] }
 0x103   :  { %v2138_v52 = vrot.slane %v2109_v37, %v12144_v31  ;;  %v2131_v9 = vcombine.high %v2109_v37, %v2109_v37  ;;  %v12463_v37 = vpop.permute.xlu0 %1872 }
 0x105   :  { %2163 = vrot.lane.b32.xlu1 %v2138_v52, %s11673_s20  ;;  %2648 = vrot.lane.b32.xlu0 %v2138_v52, %s11674_s21  ;;  %v2145_v49 = vrot.slane %v2131_v9, %v12144_v31  ;;  %v2146_v53 = vcombine.high %v2138_v52, %v2138_v52 }
 0x107   :  { %v2147_v45 = vcombine.high %v2145_v49, %v2145_v49  ;;  %v12471_v28 = vpop.permute.xlu0 %1876 }
 0x109   :  { %2383 = vrot.lane.b32.xlu1 %v2138_v52, %s11672_s19  ;;  %2913 = vrot.lane.b32.xlu0 %v2121_v7, %s11675_s24 }
 0x10b   :  { %v12491_v41 = vpop.permute.xlu0 %1696 }
 0x10d   :  { %2157 = vrot.lane.b32.xlu1 %v2129_v12, %s11673_s20  ;;  %2159 = vrot.lane.b32.xlu0 %v2128_v3, %s11673_s20 }
 0x111   :  { %2167 = vrot.lane.b32.xlu1 %v2145_v49, %s11673_s20  ;;  %2165 = vrot.lane.b32.xlu0 %v2146_v53, %s11673_s20 }
 0x115   :  { %2377 = vrot.lane.b32.xlu1 %v2129_v12, %s11672_s19  ;;  %2379 = vrot.lane.b32.xlu0 %v2128_v3, %s11672_s19 }
 0x119   :  { %2387 = vrot.lane.b32.xlu1 %v2145_v49, %s11672_s19  ;;  %2385 = vrot.lane.b32.xlu0 %v2146_v53, %s11672_s19 }
 0x11d   :  { %2642 = vrot.lane.b32.xlu1 %v2129_v12, %s11674_s21  ;;  %2644 = vrot.lane.b32.xlu0 %v2128_v3, %s11674_s21 }
 0x121   :  { %2650 = vrot.lane.b32.xlu1 %v2146_v53, %s11674_s21  ;;  %2652 = vrot.lane.b32.xlu0 %v2145_v49, %s11674_s21 }
 0x125   :  { %2915 = vrot.lane.b32.xlu1 %v2129_v12, %s11675_s24  ;;  %2917 = vrot.lane.b32.xlu0 %v2128_v3, %s11675_s24  ;;  %v12475_v12 = vrot.slane %v12343_v63, %v12144_v31  ;;  %v11627_v3 = vcombine.low %v12334_v1, %v12334_v1  ;;  %v12499_v1 = vrot.slane %v12364_v62, %v12144_v31 }
 0x126   :  { %v11628_v63 = vcombine.low %v12361_v35, %v12361_v35 }
 0x129   :  { %1729 = vrot.lane.b32.xlu1 %v11952_v18, %s11675_s24  ;;  %1731 = vrot.lane.b32.xlu0 %v11989_v38, %s11675_s24  ;;  %v15052_v18 = vld [vmem:[#allocation8_spill] sm:$0xff] }
 0x12a   :  { %v1790_v57 = vrot.slane %v15052_v18, %v11760_v17  ;;  %v1794_v38 = vrot.slane %v15052_v18, %v11763_v19  ;;  %v1870_v17 = vrot.slane %v1865_v32, %v15054_v46  ;;  %v12427_v19 = vpop.permute.xlu1 %1655  ;;  %v12508_v18 = vpop.permute.xlu0 %1909 }
 0x12c   :  { %v1830_v40 = vrot.slane %v1790_v57, %v15054_v46  ;;  %v1834_v30 = vrot.slane %v1794_v38, %v15054_v46  ;;  %v12511_v57 = vrot.slane %v11628_v63, %v12144_v31  ;;  %v12515_v38 = vcombine.high %v12499_v1, %v12499_v1 }
 0x12d   :  { %1942 = vrot.lane.b32.xlu1 %v11973_v29, %s11678_s2  ;;  %1944 = vrot.lane.b32.xlu0 %v12003_v43, %s11678_s2 }
 0x12e   :  { %v12429_v15 = vcombine.low %v1830_v40, %v1834_v30  ;;  %v12436_v56 = vpop.permute.xlu1 %1688  ;;  %15056 = vst [vmem:[#allocation9_spill] sm:$0xff] %v12511_v57 }
 0x130   :  { %15055 = vst [vmem:[#allocation8_spill] sm:$0xff] %v12429_v15 }
 0x131   :  { %1946 = vrot.lane.b32.xlu1 %v15053_v13, %s11678_s2  ;;  %1977 = vrot.lane.b32.xlu0 %v11973_v29, %s11679_s27 }
 0x132   :  { %v12445_v36 = vpop.permute.xlu1 %1692 }
 0x135   :  { %1979 = vrot.lane.b32.xlu1 %v12003_v43, %s11679_s27  ;;  %1981 = vrot.lane.b32.xlu0 %v15053_v13, %s11679_s27 }
 0x136   :  { %v12451_v50 = vpop.permute.xlu1 %1723 }
 0x139   :  { %1878 = vrot.lane.b32.xlu1 %v12429_v15, %s11676_s11  ;;  %1880 = vrot.lane.b32.xlu0 %v1870_v17, %s11676_s11 }
 0x13a   :  { %v12461_v7 = vpop.permute.xlu1 %1727 }
 0x13d   :  { %1913 = vrot.lane.b32.xlu1 %v12429_v15, %s11677_s18  ;;  %1915 = vrot.lane.b32.xlu0 %v1870_v17, %s11677_s18 }
 0x141   :  { %2921 = vrot.lane.b32.xlu0 %v2138_v52, %s11675_s24  ;;  %2161 = vrot.lane.b32.xlu1 %v2130_v4, %s11673_s20  ;;  %v12467_v52 = vpop.permute.xlu1 %1626 }
 0x145   :  { %2925 = vrot.lane.b32.xlu0 %v2145_v49, %s11675_s24  ;;  %2923 = vrot.lane.b32.xlu1 %v2146_v53, %s11675_s24  ;;  %v12482_v9 = vpop.permute.xlu1 %1661  ;;  %v12485_v49 = vrot.slane %v11627_v3, %v12144_v31  ;;  %v12489_v53 = vcombine.high %v12475_v12, %v12475_v12 }
 0x149   :  { %1950 = vrot.lane.b32.xlu0 %v1870_v17, %s11678_s2  ;;  %1948 = vrot.lane.b32.xlu1 %v12429_v15, %s11678_s2  ;;  %v12503_v26 = vpop.permute.xlu1 %1874 }
 0x14d   :  { %1985 = vrot.lane.b32.xlu0 %v1870_v17, %s11679_s27  ;;  %1983 = vrot.lane.b32.xlu1 %v12429_v15, %s11679_s27  ;;  %v12521_v35 = vpop.permute.xlu1 %1694 }
 0x151   :  { %2171 = vrot.lane.b32.xlu0 %v11165_v21, %s11673_s20  ;;  %2169 = vrot.lane.b32.xlu1 %v2147_v45, %s11673_s20  ;;  %v12525_v46 = vpop.permute.xlu1 %1907 }
 0x155   :  { %2389 = vrot.lane.b32.xlu0 %v2147_v45, %s11672_s19  ;;  %2381 = vrot.lane.b32.xlu1 %v2130_v4, %s11672_s19  ;;  %v12534_v40 = vpop.permute.xlu1 %1911 }
 0x159   :  { %3423 = vrot.lane.b32.xlu0 %v12475_v12, %s11676_s11  ;;  %2391 = vrot.lane.b32.xlu1 %v11165_v21, %s11672_s19 }
 0x15d   :  { %3427 = vrot.lane.b32.xlu0 %v12485_v49, %s11676_s11  ;;  %3425 = vrot.lane.b32.xlu1 %v12489_v53, %s11676_s11 }
 0x161   :  { %3431 = vrot.lane.b32.xlu0 %v12499_v1, %s11676_s11  ;;  %2646 = vrot.lane.b32.xlu1 %v2130_v4, %s11674_s21 }
 0x165   :  { %3435 = vrot.lane.b32.xlu0 %v12511_v57, %s11676_s11  ;;  %3433 = vrot.lane.b32.xlu1 %v12515_v38, %s11676_s11 }
 0x167   :  { %v2156_v62 = vpop.permute.xlu0 %2155 }
 0x169   :  { %2656 = vrot.lane.b32.xlu0 %v11165_v21, %s11674_s21  ;;  %2654 = vrot.lane.b32.xlu1 %v2147_v45, %s11674_s21 }
 0x16b   :  { %v2376_v32 = vpop.permute.xlu0 %2375 }
 0x16d   :  { %3698 = vrot.lane.b32.xlu0 %v12489_v53, %s11677_s18  ;;  %3696 = vrot.lane.b32.xlu1 %v12475_v12, %s11677_s18 }
 0x16f   :  { %v12536_v30 = vpop.permute.xlu0 %2640 }
 0x171   :  { %2919 = vrot.lane.b32.xlu0 %v2130_v4, %s11675_s24  ;;  %3700 = vrot.lane.b32.xlu1 %v12485_v49, %s11677_s18 }
 0x175   :  { %3706 = vrot.lane.b32.xlu0 %v12515_v38, %s11677_s18  ;;  %3704 = vrot.lane.b32.xlu1 %v12499_v1, %s11677_s18 }
 0x177   :  { %v12542_v17 = vpop.permute.xlu1 %2163  ;;  %v12544_v3 = vpop.permute.xlu0 %2648 }
 0x178   :  { %15057 = vst [vmem:[#allocation7_spill] sm:$0xff] %v12542_v17 }
 0x179   :  { %2927 = vrot.lane.b32.xlu0 %v2147_v45, %s11675_s24  ;;  %3708 = vrot.lane.b32.xlu1 %v12511_v57, %s11677_s18 }
 0x17b   :  { %v12549_v4 = vpop.permute.xlu1 %2383  ;;  %v12551_v63 = vpop.permute.xlu0 %2913 }
 0x17c   :  { %15058 = vst [vmem:[#allocation24_spill] sm:$0xff] %v12549_v4 }
 0x17d   :  { %3969 = vrot.lane.b32.xlu0 %v12475_v12, %s11678_s2  ;;  %2929 = vrot.lane.b32.xlu1 %v11165_v21, %s11675_s24  ;;  %v12570_v21 = vld [vmem:[%s14975_s4 + $0x4] sm:$0xf] }
 0x17e   :  { %15060 = vst [vmem:[#allocation26_spill] sm:$0xff] %v12570_v21 }
 0x17f   :  { %v2158_v47 = vpop.permute.xlu1 %2157  ;;  %v12556_v6 = vpop.permute.xlu0 %2159 }
 0x180   :  { %15059 = vst [vmem:[#allocation25_spill] sm:$0xff] %v12556_v6  ;;  %v2175_v34 = vsel %vm337_vm2, %v2158_v47, %v12556_v6  ;;  %v2174_v45 = vsel %vm337_vm2, %v2156_v62, %v2158_v47 }
 0x181   :  { %3973 = vrot.lane.b32.xlu0 %v12485_v49, %s11678_s2  ;;  %11166 = vmatprep.subr.msk.bf16.mxu0 %vm2186_vm9, %v2175_v34  ;;  %v2188_v20 = vsel %vm2186_vm9, %v2174_v45, 0 }
 0x182   :  { %3971 = vrot.lane.b32.xlu1 %v12489_v53, %s11678_s2  ;;  %2212 = vmatpush1.bf16.msra.mxu0 %v2188_v20 }
 0x183   :  { %v12572_v54 = vpop.permute.xlu1 %2167  ;;  %v2166_v47 = vpop.permute.xlu0 %2165 }
 0x184   :  { %15061 = vst [vmem:[#allocation27_spill] sm:$0xff] %v12572_v54  ;;  %v2178_v62 = vsel %vm337_vm2, %v12542_v17, %v2166_v47  ;;  %v2179_v34 = vsel %vm337_vm2, %v2166_v47, %v12572_v54  ;;  %v1664_v54 = vrot.slane %v12427_v19, 4  ;;  %v1698_v17 = vrot.slane %v12436_v56, 4 }
 0x185   :  { %3979 = vrot.lane.b32.xlu0 %v12515_v38, %s11678_s2  ;;  %11167 = vmatmul.mubr.msk.bf16.vlgmr.msra.gmra.mrb[0].mxu0 %vm2182_vm10, %v12570_v21  ;;  %v2200_v20 = vsel %vm2186_vm9, %v2178_v62, 0  ;;  %v1629_v62 = vrot.slane %v12390_v25, 4 }
 0x186   :  { %11170 = vmatprep.subr.msk.bf16.mxu0 %vm2186_vm9, %v2179_v34  ;;  %3977 = vrot.lane.b32.xlu1 %v12499_v1, %s11678_s2  ;;  %v1628_v34 = vrot.slane %v12399_v22, 4 }
 0x187   :  { %2294 = vmatpush1.bf16.msra.mxu0 %v2200_v20  ;;  %v2378_v45 = vpop.permute.xlu1 %2377  ;;  %v12586_v10 = vpop.permute.xlu0 %2379  ;;  %2325 = vmatprep.mubr.bf16.mxu0 %v15063_v0  ;;  %v1663_v20 = vrot.slane %v12405_v42, 4 }
 0x188   :  { %15062 = vst [vmem:[#allocation28_spill] sm:$0xff] %v12586_v10  ;;  %v2395_v47 = vsel %vm186_vm1, %v2378_v45, %v12586_v10  ;;  %v2394_v8 = vsel %vm186_vm1, %v2376_v32, %v2378_v45  ;;  %v1633_v45 = vsel %vm184_vm0, %v1628_v34, %v1629_v62  ;;  %v15068_v34 = vrot.slane %v12420_v48, 4 }
 0x189   :  { %4242 = vrot.lane.b32.xlu0 %v12475_v12, %s11679_s27  ;;  %11174 = vmatprep.subr.msk.bf16.mxu0 %vm2186_vm9, %v2395_v47  ;;  %v2406_v32 = vsel %vm2186_vm9, %v2394_v8, 0  ;;  %v1668_v47 = vsel %vm184_vm0, %v1663_v20, %v1664_v54  ;;  %v1734_v8 = vrot.slane %v12441_v60, 4  ;;  %v1634_v20 = vsel %vm186_vm1, %v12399_v22, %v1633_v45  ;;  %v12649_v22 = vld [vmem:[%s14975_s4] sm:$0xf] }
 0x18a   :  { %3981 = vrot.lane.b32.xlu1 %v12511_v57, %s11678_s2  ;;  %v1669_v59 = vsel %vm337_vm2, %v12405_v42, %v1668_v47  ;;  %v1670_v14 = vsel %vm184_vm0, %v1664_v54, %v15068_v34  ;;  %v12654_v42 = vmul.f32 %v11973_v29, %v12139_v44  ;;  %v15069_v45 = vrot.slane %v12445_v36, 4 }
 0x18b   :  { %v12601_v15 = vpop.permute.xlu1 %2387  ;;  %v2386_v10 = vpop.permute.xlu0 %2385 }
 0x18c   :  { %15064 = vst [vmem:[#allocation29_spill] sm:$0xff] %v12601_v15  ;;  %v2399_v12 = vsel %vm186_vm1, %v2386_v10, %v12601_v15  ;;  %v1699_v15 = vrot.slane %v12434_v27, 4  ;;  %v2398_v31 = vsel %vm186_vm1, %v12549_v4, %v2386_v10  ;;  %v1645_v10 = vmul.f32 %v1634_v20, %v12082_v2 }
 0x18d   :  { %4246 = vrot.lane.b32.xlu0 %v12485_v49, %s11679_s27  ;;  %11171 = vmatmul.mubr.msk.bf16.vlgmr.msra.gmra.mrb[4].mxu0 %vm2182_vm10, %v12570_v21 }
 0x18e   :  { %2430 = vmatpush1.bf16.msra.mxu0 %v2406_v32  ;;  %4244 = vrot.lane.b32.xlu1 %v12489_v53, %s11679_s27  ;;  %v1733_v32 = vrot.slane %v12451_v50, 4  ;;  %v12627_v53 = vcombine.high %v12485_v49, %v12485_v49  ;;  %v1705_v34 = vsel %vm184_vm0, %v1699_v15, %v15069_v45  ;;  %v12667_v49 = vmul.f32 %v12003_v43, %v12139_v44 }
 0x18f   :  { %11178 = vmatprep.subr.msk.bf16.mxu0 %vm2186_vm9, %v2399_v12  ;;  %v2643_v16 = vpop.permute.xlu1 %2642  ;;  %v12619_v21 = vpop.permute.xlu0 %2644  ;;  %2461 = vmatprep.mubr.bf16.mxu0 %v15063_v0  ;;  %v15067_v12 = vrot.slane %v12411_v33, 4 }
 0x190   :  { %15065 = vst [vmem:[#allocation30_spill] sm:$0xff] %v12619_v21  ;;  %15066 = vst [vmem:[#allocation31_spill] sm:$0xff] %v12627_v53 }
 0x191   :  { %v1635_v6 = vsel %vm184_vm0, %v1629_v62, %v15067_v12  ;;  %4250 = vrot.lane.b32.xlu0 %v12499_v1, %s11679_s27  ;;  %v1703_v62 = vsel %vm184_vm0, %v1698_v17, %v1699_v15  ;;  %v1738_v12 = vsel %vm184_vm0, %v1733_v32, %v1734_v8  ;;  %v1671_v17 = vsel %vm337_vm2, %v12427_v19, %v1670_v14 }
 0x192   :  { %3429 = vrot.lane.b32.xlu1 %v12627_v53, %s11676_s11  ;;  %v1636_v29 = vsel %vm186_vm1, %v12390_v25, %v1635_v6  ;;  %v1680_v53 = vmul.f32 %v1669_v59, %v12074_v58  ;;  %v2418_v15 = vsel %vm2186_vm9, %v2398_v31, 0  ;;  %v1704_v43 = vsel %vm488_vm3, %v12436_v56, %v1703_v62 }
 0x193   :  { %v12656_v54 = vpop.permute.xlu1 %2650  ;;  %v12658_v47 = vpop.permute.xlu0 %2652  ;;  %v15070_v32 = vrot.slane %v12461_v7, 4  ;;  %v2660_v59 = vsel %vm488_vm3, %v2643_v16, %v12619_v21  ;;  %v1706_v14 = vsel %vm488_vm3, %v12434_v27, %v1705_v34  ;;  %v1739_v31 = vsel %vm639_vm4, %v12451_v50, %v1738_v12 }
 0x194   :  { %v1882_v25 = vrot.slane %v12463_v37, 4  ;;  %v1883_v19 = vrot.slane %v12503_v26, 4  ;;  %v1646_v20 = vmul.f32 %v1636_v29, %v12082_v2  ;;  %v1681_v62 = vmul.f32 %v1671_v17, %v12074_v58 }
 0x195   :  { %4254 = vrot.lane.b32.xlu0 %v12511_v57, %s11679_s27  ;;  %11175 = vmatmul.mubr.msk.bf16.vlgmr.msra.gmra.mrb[8].mxu0 %vm2182_vm10, %v12649_v22  ;;  %v1740_v6 = vsel %vm184_vm0, %v1734_v8, %v15070_v32  ;;  %v1631_v27 = vrot.slane %v12449_v55, 4  ;;  %v12705_v50 = vcombine.high %v12511_v57, %v12511_v57  ;;  %v1715_v45 = vmul.f32 %v1704_v43, %v12096_v24 }
 0x196   :  { %2512 = vmatpush1.bf16.msra.mxu0 %v2418_v15  ;;  %4252 = vrot.lane.b32.xlu1 %v12515_v38, %s11679_s27  ;;  %v1666_v34 = vrot.slane %v12456_v23, 4  ;;  %v1741_v12 = vsel %vm639_vm4, %v12441_v60, %v1740_v6  ;;  %v1684_v32 = vadd.f32 %v1680_v53, %v1645_v10  ;;  %v1716_v29 = vmul.f32 %v1706_v14, %v12096_v24 }
 0x197   :  { %11183 = vmatprep.subr.msk.bf16.mxu0 %vm2186_vm9, %v2660_v59  ;;  %v12695_v56 = vpop.permute.xlu1 %2915  ;;  %v12697_v8 = vpop.permute.xlu0 %2917  ;;  %2543 = vmatprep.mubr.bf16.mxu0 %v15063_v0  ;;  %15071 = vst [vmem:[#allocation32_spill] sm:$0xff] %v12705_v50  ;;  %v1750_v17 = vmul.f32 %v1739_v31, %v12116_v39  ;;  %v2659_v59 = vsel %vm488_vm3, %v12536_v30, %v2643_v16  ;;  %v1917_v57 = vrot.slane %v12525_v46, 4  ;;  %v1918_v21 = vrot.slane %v12508_v18, 4 }
 0x198   :  { %v1887_v43 = vsel %vm184_vm0, %v1882_v25, %v1883_v19  ;;  %v1685_v10 = vadd.f32 %v1681_v62, %v1646_v20  ;;  %v15072_v14 = vrot.slane %v12411_v33, 4  ;;  %v1751_v30 = vmul.f32 %v1741_v12, %v12116_v39 }
 0x199   :  { %v12732_v31 = vmul.f32 %v15053_v13, %v12139_v44  ;;  %v1719_v25 = vadd.f32 %v1715_v45, %v1684_v32  ;;  %v15073_v15 = vrot.slane %v12420_v48, 4  ;;  %v2671_v20 = vsel %vm2186_vm9, %v2659_v59, 0 }
 0x19a   :  { %3437 = vrot.lane.b32.xlu1 %v12705_v50, %s11676_s11  ;;  %v1637_v16 = vsel %vm184_vm0, %v15072_v14, %v1631_v27  ;;  %v15074_v50 = vrot.slane %v12471_v28, 4  ;;  %v1720_v62 = vadd.f32 %v1716_v29, %v1685_v10  ;;  %v1888_v12 = vsel %vm904_vm5, %v12463_v37, %v1887_v43 }
 0x19b   :  { %v12722_v6 = vpop.permute.xlu1 %1729  ;;  %v12724_v53 = vpop.permute.xlu0 %1731  ;;  %v1672_v60 = vsel %vm184_vm0, %v15073_v15, %v1666_v34  ;;  %v2664_v13 = vsel %vm488_vm3, %v12656_v54, %v12658_v47  ;;  %v1754_v45 = vadd.f32 %v1750_v17, %v1719_v25  ;;  %v1632_v15 = vrot.slane %v12467_v52, 4 }
 0x19c   :  { %v1889_v4 = vsel %vm184_vm0, %v1883_v19, %v15074_v50  ;;  %v1922_v19 = vsel %vm184_vm0, %v1917_v57, %v1918_v21  ;;  %v15075_v50 = vrot.slane %v12534_v40, 4  ;;  %v1755_v59 = vadd.f32 %v1751_v30, %v1720_v62 }
 0x19d   :  { %11179 = vmatmul.mubr.msk.bf16.vlgmr.msra.gmra.mrb[12].mxu0 %vm2182_vm10, %v12649_v22  ;;  %v1890_v43 = vsel %vm904_vm5, %v12503_v26, %v1889_v4  ;;  %v1638_v17 = vsel %vm186_vm1, %v12411_v33, %v1637_v16  ;;  %v1673_v52 = vsel %vm337_vm2, %v12420_v48, %v1672_v60  ;;  %v1667_v57 = vrot.slane %v12482_v9, 4  ;;  %v12774_v33 = vld [vmem:[%s14975_s4 + $0x8] sm:$0xf] }
 0x19e   :  { %2695 = vmatpush1.bf16.msra.mxu0 %v2671_v20  ;;  %2726 = vmatprep.mubr.bf16.mxu0 %v15063_v0  ;;  %v1924_v32 = vsel %vm184_vm0, %v1918_v21, %v15075_v50  ;;  %v1899_v21 = vmul.f32 %v1888_v12, %v12175_v5  ;;  %v1923_v25 = vsel %vm1055_vm6, %v12525_v46, %v1922_v19  ;;  %v1701_v46 = vrot.slane %v12521_v35, 4 }
 0x19f   :  { %11187 = vmatprep.subr.msk.bf16.mxu0 %vm2186_vm9, %v2664_v13  ;;  %v1943_v29 = vpop.permute.xlu1 %1942  ;;  %v1945_v37 = vpop.permute.xlu0 %1944  ;;  %v1925_v30 = vsel %vm1055_vm6, %v12508_v18, %v1924_v32  ;;  %v2663_v26 = vsel %vm488_vm3, %v12544_v3, %v12656_v54  ;;  %v1855_v48 = vadd.f32 %v12654_v42, %v1754_v45  ;;  %v1900_v9 = vmul.f32 %v1890_v43, %v12175_v5 }
 0x1a0   :  { %v1952_v10 = vrot.slane %v1943_v29, 4  ;;  %v1953_v14 = vrot.slane %v1945_v37, 4  ;;  %v1702_v60 = vrot.slane %v12491_v41, 4  ;;  %v1639_v54 = vsel %vm184_vm0, %v1631_v27, %v1632_v15 }
 0x1a1   :  { %v1856_v20 = vadd.f32 %v12667_v49, %v1755_v59  ;;  %v1674_v13 = vsel %vm184_vm0, %v1666_v34, %v1667_v57  ;;  %v1934_v42 = vmul.f32 %v1923_v25, %v12216_v61  ;;  %v1935_v45 = vmul.f32 %v1925_v30, %v12216_v61 }
 0x1a2   :  { %v1957_v4 = vsel %vm184_vm0, %v1952_v10, %v1953_v14  ;;  %v2683_v41 = vsel %vm2186_vm9, %v2663_v26, 0  ;;  %v1903_v19 = vadd.f32 %v1899_v21, %v1855_v48  ;;  %v2933_v27 = vsel %vm639_vm4, %v12695_v56, %v12697_v8 }
 0x1a3   :  { %v12780_v18 = vpop.permute.xlu1 %1946  ;;  %v1978_v16 = vpop.permute.xlu0 %1977  ;;  %v1958_v62 = vsel %vm1206_vm7, %v1943_v29, %v1957_v4  ;;  %v1904_v34 = vadd.f32 %v1900_v9, %v1856_v20  ;;  %v15076_v15 = vrot.slane %v12445_v36, 4  ;;  %v1675_v25 = vsel %vm337_vm2, %v12456_v23, %v1674_v13 }
 0x1a4   :  { %v1954_v12 = vrot.slane %v12780_v18, 4  ;;  %v1969_v32 = vmul.f32 %v1958_v62, %v12195_v11  ;;  %v1709_v30 = vsel %vm184_vm0, %v1701_v46, %v1702_v60  ;;  %v1938_v26 = vadd.f32 %v1934_v42, %v1903_v19  ;;  %v12820_v62 = vld [vmem:[#allocation2 + $0x2] sm:$0xff] }
 0x1a5   :  { %11184 = vmatmul.mubr.msk.bf16.vlgmr.msra.gmra.mrb[16].mxu0 %vm2182_vm10, %v12774_v33  ;;  %v1707_v50 = vsel %vm184_vm0, %v15076_v15, %v1701_v46  ;;  %v1939_v4 = vadd.f32 %v1935_v45, %v1904_v34  ;;  %v1736_v48 = vrot.slane %v12722_v6, 4  ;;  %v1737_v46 = vrot.slane %v12724_v53, 4  ;;  %v15077_v53 = vld [vmem:[#allocation12_spill] sm:$0xff] }
 0x1a6   :  { %v1959_v49 = vsel %vm184_vm0, %v1953_v14, %v1954_v12  ;;  %2777 = vmatpush1.bf16.msra.mxu0 %v2683_v41  ;;  %2808 = vmatprep.mubr.bf16.mxu0 %v15063_v0  ;;  %v1987_v14 = vrot.slane %v1978_v16, 4  ;;  %v1708_v23 = vsel %vm488_vm3, %v12445_v36, %v1707_v50  ;;  %v1973_v42 = vadd.f32 %v1969_v32, %v1938_v26 }
 0x1a7   :  { %v1960_v29 = vsel %vm1206_vm7, %v1945_v37, %v1959_v49  ;;  %11192 = vmatprep.subr.msk.bf16.mxu0 %vm2186_vm9, %v2933_v27  ;;  %v1980_v59 = vpop.permute.xlu1 %1979  ;;  %v12805_v43 = vpop.permute.xlu0 %1981  ;;  %v2932_v37 = vsel %vm639_vm4, %v12551_v63, %v12695_v56  ;;  %v1647_v49 = vmul.f32 %v1638_v17, %v12082_v2  ;;  %v1682_v27 = vmul.f32 %v1673_v52, %v12074_v58 }
 0x1a8   :  { %v1970_v10 = vmul.f32 %v1960_v29, %v12195_v11  ;;  %v1988_v57 = vrot.slane %v1980_v59, 4  ;;  %v1989_v21 = vrot.slane %v12805_v43, 4  ;;  %v2944_v36 = vsel %vm2186_vm9, %v2932_v37, 0 }
 0x1a9   :  { %v1640_v34 = vsel %vm186_vm1, %v12449_v55, %v1639_v54  ;;  %v15078_v15 = vrot.slane %v12461_v7, 4  ;;  %v1683_v52 = vmul.f32 %v1675_v25, %v12074_v58  ;;  %v1717_v29 = vmul.f32 %v1708_v23, %v12096_v24  ;;  %v15079_v55 = vld [vmem:[#allocation16_spill] sm:$0xff] }
 0x1aa   :  { %v1992_v9 = vsel %vm184_vm0, %v1987_v14, %v1988_v57  ;;  %v1994_v20 = vsel %vm184_vm0, %v1988_v57, %v1989_v21  ;;  %v1974_v45 = vadd.f32 %v1970_v10, %v1939_v4  ;;  %v1744_v10 = vsel %vm184_vm0, %v1736_v48, %v1737_v46  ;;  %v12861_v46 = vld [vmem:[%s14975_s4 + $0xc] sm:$0xf] }
 0x1ab   :  { %v1993_v60 = vsel %vm1357_vm8, %v1978_v16, %v1992_v9  ;;  %v1995_v13 = vsel %vm1357_vm8, %v1980_v59, %v1994_v20  ;;  %v1879_v63 = vpop.permute.xlu1 %1878  ;;  %v1881_v56 = vpop.permute.xlu0 %1880  ;;  %v12836_v16 = vrot.slane %v12820_v62, %v15077_v53  ;;  %v1742_v50 = vsel %vm184_vm0, %v15078_v15, %v1736_v48 }
 0x1ac   :  { %v2004_v41 = vmul.f32 %v1993_v60, %v12251_v51  ;;  %v2005_v19 = vmul.f32 %v1995_v13, %v12251_v51  ;;  %v1710_v59 = vsel %vm488_vm3, %v12521_v35, %v1709_v30  ;;  %v1885_v4 = vrot.slane %v1879_v63, 4 }
 0x1ad   :  { %11188 = vmatmul.mubr.msk.bf16.vlgmr.msra.gmra.mrb[20].mxu0 %vm2182_vm10, %v12774_v33  ;;  %v1886_v37 = vrot.slane %v1881_v56, 4  ;;  %v1686_v9 = vadd.f32 %v1682_v27, %v1647_v49  ;;  %v1648_v58 = vmul.f32 %v1640_v34, %v12082_v2  ;;  %v1743_v25 = vsel %vm639_vm4, %v12461_v7, %v1742_v50  ;;  %v15083_v50 = vld [vmem:[#allocation7_spill] sm:$0xff] }
 0x1ae   :  { %v2008_v32 = vadd.f32 %v2004_v41, %v1973_v42  ;;  %v2009_v17 = vadd.f32 %v2005_v19, %v1974_v45  ;;  %2968 = vmatpush1.bf16.msra.mxu0 %v2944_v36  ;;  %2999 = vmatprep.mubr.bf16.mxu0 %v15063_v0  ;;  %v3158_v35 = vcombine.high %v12836_v16, %v12836_v16  ;;  %v15080_v45 = vld [vmem:[#allocation13_spill] sm:$0xff]  ;;  %v15082_v49 = vrot.slane %v12471_v28, 4 }
 0x1af   :  { %v1914_v14 = vpop.permute.xlu1 %1913  ;;  %v1916_v57 = vpop.permute.xlu0 %1915  ;;  %v1745_v30 = vsel %vm639_vm4, %v12722_v6, %v1744_v10  ;;  %v1687_v60 = vadd.f32 %v1683_v52, %v1648_v58  ;;  %v1721_v13 = vadd.f32 %v1717_v29, %v1686_v9  ;;  %v1718_v2 = vmul.f32 %v1710_v59, %v12096_v24  ;;  %v15081_v19 = vld [vmem:[#allocation17_spill] sm:$0xff] }
 0x1b0   :  { %v2012_v54 = vadd.f32 %v2008_v32, %v15079_v55  ;;  %v2013_v26 = vadd.f32 %v2009_v17, %v15079_v55  ;;  %v1920_v23 = vrot.slane %v1914_v14, 4  ;;  %v1921_v56 = vrot.slane %v1916_v57, 4  ;;  %v15084_v32 = vld [vmem:[#allocation25_spill] sm:$0xff] }
 0x1b1   :  { %v1891_v27 = vsel %vm184_vm0, %v15082_v49, %v1885_v4  ;;  %v1893_v36 = vsel %vm184_vm0, %v1885_v4, %v1886_v37  ;;  %v1752_v34 = vmul.f32 %v1743_v25, %v12116_v39  ;;  %v1753_v15 = vmul.f32 %v1745_v30, %v12116_v39 }
 0x1b2   :  { %v2016_v48 = vmax.f32 %v2012_v54, 0.0  ;;  %v2017_v20 = vmax.f32 %v2013_v26, 0.0  ;;  %v15085_v59 = vrot.slane %v12534_v40, 4  ;;  %v1722_v39 = vadd.f32 %v1718_v2, %v1687_v60 }
 0x1b3   :  { %v12864_v7 = vpop.permute.xlu0 %2921  ;;  %v2162_v42 = vpop.permute.xlu1 %2161  ;;  %v1892_v54 = vsel %vm904_vm5, %v12471_v28, %v1891_v27  ;;  %v1894_v26 = vsel %vm904_vm5, %v1879_v63, %v1893_v36  ;;  %v1928_v4 = vsel %vm184_vm0, %v1920_v23, %v1921_v56  ;;  %v3181_v36 = vsel %vm2186_vm9, %v12836_v16, 0 }
 0x1b4   :  { %v2020_v41 = vmul.f32 %v2016_v48, %v15080_v45  ;;  %v2021_v6 = vmul.f32 %v2017_v20, %v15081_v19  ;;  %v2177_v24 = vsel %vm337_vm2, %v2162_v42, %v15083_v50  ;;  %v2176_v17 = vsel %vm337_vm2, %v15084_v32, %v2162_v42  ;;  %v15086_v42 = vld [vmem:[#allocation26_spill] sm:$0xff] }
 0x1b5   :  { %11193 = vmatmul.mubr.msk.bf16.vlgmr.msra.gmra.mrb[24].mxu0 %vm2182_vm10, %v12861_v46  ;;  %v1926_v10 = vsel %vm184_vm0, %v15085_v59, %v1920_v23  ;;  %11168 = vmatprep.subr.msk.bf16.mxu1 %vm2186_vm9, %v2177_v24  ;;  %v2194_v57 = vsel %vm2186_vm9, %v2176_v17, 0  ;;  %v1756_v20 = vadd.f32 %v1752_v34, %v1721_v13  ;;  %v1757_v60 = vadd.f32 %v1753_v15, %v1722_v39 }
 0x1b6   :  { %v2028_v52 = vcombine.high %v2020_v41, %v2020_v41  ;;  %v2029_v29 = vcombine.high %v2021_v6, %v2021_v6  ;;  %3081 = vmatprep.mubr.bf16.mxu0 %v15063_v0  ;;  %2253 = vmatpush1.bf16.msra.mxu1 %v2194_v57  ;;  %v1927_v28 = vsel %vm1055_vm6, %v12534_v40, %v1926_v10 }
 0x1b7   :  { %v12890_v37 = vpop.permute.xlu0 %2925  ;;  %v2924_v9 = vpop.permute.xlu1 %2923  ;;  %v1929_v56 = vsel %vm1055_vm6, %v1914_v14, %v1928_v4  ;;  %v1901_v13 = vmul.f32 %v1892_v54, %v12175_v5  ;;  %v1902_v45 = vmul.f32 %v1894_v26, %v12175_v5  ;;  %v1857_v34 = vadd.f32 %v12732_v31, %v1756_v20  ;;  %v12943_v54 = vld [vmem:[%s14975_s4 + $0x10] sm:$0xf] }
 0x1b8   :  { %v11153_v58 = vpack.c.bf16 %v2028_v52, %v2020_v41  ;;  %v11154_v25 = vpack.c.bf16 %v2029_v29, %v2021_v6  ;;  %v2936_v30 = vsel %vm639_vm4, %v12864_v7, %v2924_v9  ;;  %v2937_v48 = vsel %vm639_vm4, %v2924_v9, %v12890_v37  ;;  %v15087_v41 = vld [vmem:[#allocation8_spill] sm:$0xff] }
 0x1b9   :  { %11196 = vmatprep.subr.msk.bf16.mxu0 %vm2186_vm9, %v2937_v48  ;;  %v2956_v63 = vsel %vm2186_vm9, %v2936_v30, 0  ;;  %11169 = vmatmul.mubr.msk.bf16.vlgmr.msra.gmra.mrb[0].mxu1 %vm2182_vm10, %v15086_v42  ;;  %v1854_v19 = vmul.f32 %v15087_v41, %v12139_v44  ;;  %v1936_v5 = vmul.f32 %v1927_v28, %v12216_v61  ;;  %v1905_v31 = vadd.f32 %v1901_v13, %v1857_v34  ;;  %v15088_v48 = vld [vmem:[#allocation27_spill] sm:$0xff] }
 0x1ba   :  { %v2060_v23 = vrot.slane %v11153_v58, %v15077_v53  ;;  %v12902_v2 = vrot.slane %v11154_v25, %v15077_v53  ;;  %3050 = vmatpush1.bf16.msra.mxu0 %v2956_v63  ;;  %2366 = vmatprep.mubr.bf16.mxu1 %v15063_v0 }
 0x1bb   :  { %v1951_v40 = vpop.permute.xlu0 %1950  ;;  %11200 = vmatprep.subr.msk.bf16.mxu0 %vm2186_vm9, %v3158_v35  ;;  %v1949_v6 = vpop.permute.xlu1 %1948  ;;  %v1937_v35 = vmul.f32 %v1929_v56, %v12216_v61  ;;  %v1858_v15 = vadd.f32 %v1854_v19, %v1757_v60  ;;  %v1940_v10 = vadd.f32 %v1936_v5, %v1905_v31  ;;  %v15089_v19 = vld [vmem:[#allocation28_spill] sm:$0xff] }
 0x1bc   :  { %v12914_v49 = vcombine.low %v2060_v23, %v12902_v2  ;;  %v1956_v14 = vrot.slane %v1951_v40, 4  ;;  %v1955_v27 = vrot.slane %v1949_v6, 4 }
 0x1bd   :  { %11197 = vmatmul.mubr.msk.bf16.vlgmr.msra.gmra.mrb[28].mxu0 %vm2182_vm10, %v12861_v46  ;;  %v1906_v16 = vadd.f32 %v1902_v45, %v1858_v15 }
 0x1be   :  { %2088 = vst [vmem:[#allocation2 + $0x12] sm:$0xff] %v12914_v49  ;;  %v1961_v44 = vsel %vm184_vm0, %v1954_v12, %v1955_v27  ;;  %v1963_v50 = vsel %vm184_vm0, %v1955_v27, %v1956_v14  ;;  %3205 = vmatpush1.bf16.msra.mxu0 %v3181_v36  ;;  %3236 = vmatprep.mubr.bf16.mxu0 %v15063_v0  ;;  %v15090_v14 = vld [vmem:[#allocation24_spill] sm:$0xff] }
 0x1bf   :  { %v1962_v61 = vsel %vm1206_vm7, %v12780_v18, %v1961_v44  ;;  %v1964_v24 = vsel %vm1206_vm7, %v1949_v6, %v1963_v50  ;;  %v1986_v32 = vpop.permute.xlu0 %1985  ;;  %11204 = vmatprep.subr.msk.bf16.mxu0 %vm2186_vm9, %v12515_v38  ;;  %v1984_v17 = vpop.permute.xlu1 %1983  ;;  %v1941_v57 = vadd.f32 %v1937_v35, %v1906_v16  ;;  %v3193_v38 = vsel %vm2186_vm9, %v12499_v1, 0  ;;  %v15091_v50 = vld [vmem:[#allocation20_spill] sm:$0xff]  ;;  %v15092_v16 = vld [vmem:[#allocation23_spill] sm:$0xff] }
 0x1c0   :  { %v1971_v52 = vmul.f32 %v1962_v61, %v12195_v11  ;;  %v1972_v12 = vmul.f32 %v1964_v24, %v12195_v11  ;;  %v1991_v29 = vrot.slane %v1986_v32, 4  ;;  %v1990_v59 = vrot.slane %v1984_v17, 4 }
 0x1c2   :  { %v1996_v39 = vsel %vm184_vm0, %v1989_v21, %v1990_v59  ;;  %v1998_v18 = vsel %vm184_vm0, %v1990_v59, %v1991_v29  ;;  %v1975_v26 = vadd.f32 %v1971_v52, %v1940_v10  ;;  %v1976_v11 = vadd.f32 %v1972_v12, %v1941_v57  ;;  %v15094_v12 = vld [vmem:[#allocation31_spill] sm:$0xff] }
 0x1c3   :  { %v1997_v4 = vsel %vm1357_vm8, %v12805_v43, %v1996_v39  ;;  %v1999_v9 = vsel %vm1357_vm8, %v1984_v17, %v1998_v18  ;;  %v2172_v58 = vpop.permute.xlu0 %2171  ;;  %v2170_v25 = vpop.permute.xlu1 %2169  ;;  %v15093_v17 = vld [vmem:[#allocation29_spill] sm:$0xff] }
 0x1c4   :  { %v2006_v21 = vmul.f32 %v1997_v4, %v12251_v51  ;;  %v2007_v30 = vmul.f32 %v1999_v9, %v12251_v51  ;;  %v2180_v20 = vsel %vm337_vm2, %v15088_v48, %v2170_v25  ;;  %v2181_v60 = vsel %vm337_vm2, %v2170_v25, %v2172_v58  ;;  %v13019_v9 = vld [vmem:[%s14975_s4 + $0x14] sm:$0xf]  ;;  %v15095_v48 = vld [vmem:[#allocation30_spill] sm:$0xff] }
 0x1c5   :  { %11172 = vmatprep.subr.msk.bf16.mxu1 %vm2186_vm9, %v2181_v60  ;;  %11201 = vmatmul.mubr.msk.bf16.vlgmr.msra.gmra.mrb[32].mxu0 %vm2182_vm10, %v12943_v54  ;;  %v12958_v1 = vld.sshfl [vmem:[#allocation2 + $0x12] sm:$0x3 pattern:$0x76325410]  ;;  %v2206_v43 = vsel %vm2186_vm9, %v2180_v20, 0 }
 0x1c6   :  { %v4533_v28 = vld [vmem:[#allocation2 + $0x10] sm:$0xff]  ;;  %v2010_v63 = vadd.f32 %v2006_v21, %v1975_v26  ;;  %v2011_v23 = vadd.f32 %v2007_v30, %v1976_v11  ;;  %3287 = vmatpush1.bf16.msra.mxu0 %v3193_v38  ;;  %3439 = vrot.lane.b32.xlu0 %v12958_v1, %s11676_s11 }
 0x1c7   :  { %v12964_v51 = vrot.slane %v4533_v28, %v15077_v53  ;;  %2335 = vmatpush1.bf16.msra.mxu1 %v2206_v43  ;;  %v2390_v56 = vpop.permute.xlu0 %2389  ;;  %v2382_v13 = vpop.permute.xlu1 %2381  ;;  %v4539_v45 = vcombine.high %v4533_v28, %v4533_v28  ;;  %3318 = vmatprep.mubr.bf16.mxu0 %v15063_v0 }
 0x1c8   :  { %v2014_v40 = vadd.f32 %v2010_v63, %v15079_v55  ;;  %v2015_v41 = vadd.f32 %v2011_v23, %v15079_v55  ;;  %v2396_v6 = vsel %vm186_vm1, %v15089_v19, %v2382_v13  ;;  %v2397_v27 = vsel %vm186_vm1, %v2382_v13, %v15090_v14 }
 0x1c9   :  { %4580 = vrot.lane.b32.xlu1 %v12964_v51, %s11673_s20  ;;  %v12977_v36 = vcombine.high %v12964_v51, %v12964_v51  ;;  %v2412_v34 = vsel %vm2186_vm9, %v2396_v6, 0  ;;  %11176 = vmatprep.subr.msk.bf16.mxu1 %vm2186_vm9, %v2397_v27  ;;  %v12984_v55 = vrot.slane %v4539_v45, %v15077_v53  ;;  %v2400_v52 = vsel %vm186_vm1, %v15093_v17, %v2390_v56 }
 0x1ca   :  { %v2018_v5 = vmax.f32 %v2014_v40, 0.0  ;;  %v2019_v35 = vmax.f32 %v2015_v41, 0.0  ;;  %11173 = vmatmul.mubr.msk.bf16.vlgmr.msra.gmra.mrb[4].mxu1 %vm2182_vm10, %v15086_v42  ;;  %v2424_v4 = vsel %vm2186_vm9, %v2400_v52, 0 }
 0x1cb   :  { %4582 = vrot.lane.b32.xlu0 %v12977_v36, %s11673_s20  ;;  %2471 = vmatpush1.bf16.msra.mxu1 %v2412_v34  ;;  %v3424_v15 = vpop.permute.xlu0 %3423  ;;  %v2392_v44 = vpop.permute.xlu1 %2391 }
 0x1cc   :  { %v2022_v31 = vmul.f32 %v2018_v5, %v15091_v50  ;;  %v2023_v61 = vmul.f32 %v2019_v35, %v15092_v16  ;;  %v2401_v24 = vsel %vm186_vm1, %v2390_v56, %v2392_v44  ;;  %2502 = vmatprep.mubr.bf16.mxu1 %v15063_v0  ;;  %v15096_v16 = vld [vmem:[#allocation32_spill] sm:$0xff] }
 0x1cd   :  { %4584 = vrot.lane.b32.xlu1 %v12984_v55, %s11673_s20  ;;  %11180 = vmatprep.subr.msk.bf16.mxu1 %vm2186_vm9, %v2401_v24 }
 0x1ce   :  { %11205 = vmatmul.mubr.msk.bf16.vlgmr.msra.gmra.mrb[36].mxu0 %vm2182_vm10, %v12943_v54  ;;  %v2030_v42 = vcombine.high %v2022_v31, %v2022_v31  ;;  %v2031_v32 = vcombine.high %v2023_v61, %v2023_v61 }
 0x1cf   :  { %3509 = vmatprep.mubr.bf16.mxu0 %v15063_v0  ;;  %3702 = vrot.lane.b32.xlu0 %v15094_v12, %s11677_s18  ;;  %v13002_v29 = vpop.permute.xlu0 %3427  ;;  %v3426_v59 = vpop.permute.xlu1 %3425 }
 0x1d0   :  { %v11155_v10 = vpack.c.bf16 %v2030_v42, %v2022_v31  ;;  %v11156_v57 = vpack.c.bf16 %v2031_v32, %v2023_v61  ;;  %v3442_v39 = vsel %vm904_vm5, %v3424_v15, %v3426_v59  ;;  %v3443_v18 = vsel %vm904_vm5, %v3426_v59, %v13002_v29  ;;  %v13090_v61 = vld [vmem:[%s14975_s4 + $0x18] sm:$0xf] }
 0x1d1   :  { %11209 = vmatprep.subr.msk.bf16.mxu0 %vm2186_vm9, %v3443_v18  ;;  %v3454_v38 = vsel %vm2186_vm9, %v3442_v39, 0 }
 0x1d2   :  { %v2077_v26 = vrot.slane %v11155_v10, %v15077_v53  ;;  %v13011_v11 = vrot.slane %v11156_v57, %v15077_v53  ;;  %11177 = vmatmul.mubr.msk.bf16.vlgmr.msra.gmra.mrb[8].mxu1 %vm2182_vm10, %v12649_v22  ;;  %3478 = vmatpush1.bf16.msra.mxu0 %v3454_v38 }
 0x1d3   :  { %2553 = vmatpush1.bf16.msra.mxu1 %v2424_v4  ;;  %v13021_v58 = vpop.permute.xlu0 %3431  ;;  %v2647_v25 = vpop.permute.xlu1 %2646  ;;  %2584 = vmatprep.mubr.bf16.mxu1 %v15063_v0 }
 0x1d4   :  { %v13025_v21 = vcombine.low %v2077_v26, %v13011_v11  ;;  %v2662_v30 = vsel %vm488_vm3, %v2647_v25, %v12544_v3  ;;  %v2661_v20 = vsel %vm488_vm3, %v15095_v48, %v2647_v25 }
 0x1d5   :  { %11185 = vmatprep.subr.msk.bf16.mxu1 %vm2186_vm9, %v2662_v30  ;;  %v2677_v23 = vsel %vm2186_vm9, %v2661_v20, 0 }
 0x1d6   :  { %11210 = vmatmul.mubr.msk.bf16.vlgmr.msra.gmra.mrb[40].mxu0 %vm2182_vm10, %v13019_v9  ;;  %2089 = vst [vmem:[#allocation2 + $0x1a] sm:$0xff] %v13025_v21 }
 0x1d7   :  { %3591 = vmatprep.mubr.bf16.mxu0 %v15063_v0  ;;  %v13036_v60 = vpop.permute.xlu0 %3435  ;;  %v3434_v43 = vpop.permute.xlu1 %3433 }
 0x1d8   :  { %v3446_v28 = vsel %vm904_vm5, %v13021_v58, %v3434_v43  ;;  %v3447_v3 = vsel %vm904_vm5, %v3434_v43, %v13036_v60 }
 0x1d9   :  { %11213 = vmatprep.subr.msk.bf16.mxu0 %vm2186_vm9, %v3447_v3  ;;  %v3466_v63 = vsel %vm2186_vm9, %v3446_v28, 0  ;;  %v13152_v28 = vld [vmem:[%s14975_s4 + $0x1c] sm:$0xf] }
 0x1da   :  { %11181 = vmatmul.mubr.msk.bf16.vlgmr.msra.gmra.mrb[12].mxu1 %vm2182_vm10, %v12649_v22  ;;  %3560 = vmatpush1.bf16.msra.mxu0 %v3466_v63 }
 0x1db   :  { %2736 = vmatpush1.bf16.msra.mxu1 %v2677_v23  ;;  %v2657_v56 = vpop.permute.xlu0 %2656  ;;  %v2655_v13 = vpop.permute.xlu1 %2654  ;;  %2767 = vmatprep.mubr.bf16.mxu1 %v15063_v0 }
 0x1dc   :  { %v2666_v45 = vsel %vm488_vm3, %v2655_v13, %v2657_v56  ;;  %v2665_v19 = vsel %vm488_vm3, %v12658_v47, %v2655_v13 }
 0x1dd   :  { %11189 = vmatprep.subr.msk.bf16.mxu1 %vm2186_vm9, %v2666_v45  ;;  %v4534_v40 = vld [vmem:[#allocation2 + $0x18] sm:$0xff]  ;;  %v2689_v5 = vsel %vm2186_vm9, %v2665_v19, 0 }
 0x1de   :  { %11214 = vmatmul.mubr.msk.bf16.vlgmr.msra.gmra.mrb[44].mxu0 %vm2182_vm10, %v13019_v9  ;;  %v13053_v41 = vrot.slane %v4534_v40, %v15077_v53  ;;  %v4556_v22 = vcombine.high %v4534_v40, %v4534_v40 }
 0x1df   :  { %3782 = vmatprep.mubr.bf16.mxu0 %v15063_v0  ;;  %v3699_v6 = vpop.permute.xlu0 %3698  ;;  %v3697_v14 = vpop.permute.xlu1 %3696 }
 0x1e0   :  { %4588 = vrot.lane.b32.xlu1 %v13053_v41, %s11673_s20  ;;  %v13062_v27 = vcombine.high %v13053_v41, %v13053_v41  ;;  %v3715_v34 = vsel %vm1055_vm6, %v3697_v14, %v3699_v6  ;;  %v13071_v47 = vrot.slane %v4556_v22, %v15077_v53  ;;  %v15097_v14 = vld [vmem:[#allocation9_spill] sm:$0xff] }
 0x1e1   :  { %v3727_v31 = vsel %vm2186_vm9, %v3715_v34, 0  ;;  %v3199_v34 = vsel %vm2186_vm9, %v15097_v14, 0 }
 0x1e2   :  { %11186 = vmatmul.mubr.msk.bf16.vlgmr.msra.gmra.mrb[16].mxu1 %vm2182_vm10, %v12774_v33  ;;  %4590 = vrot.lane.b32.xlu0 %v13062_v27, %s11673_s20 }
 0x1e3   :  { %2818 = vmatpush1.bf16.msra.mxu1 %v2689_v5  ;;  %v2920_v35 = vpop.permute.xlu0 %2919  ;;  %v13073_v15 = vpop.permute.xlu1 %3700  ;;  %2849 = vmatprep.mubr.bf16.mxu1 %v15063_v0 }
 0x1e4   :  { %4592 = vrot.lane.b32.xlu1 %v13071_v47, %s11673_s20  ;;  %v2935_v44 = vsel %vm639_vm4, %v2920_v35, %v12864_v7  ;;  %v3716_v50 = vsel %vm1055_vm6, %v3699_v6, %v13073_v15  ;;  %v2934_v7 = vsel %vm639_vm4, %v12697_v8, %v2920_v35  ;;  %v3143_v8 = vcombine.high %v12820_v62, %v12820_v62 }
 0x1e5   :  { %11194 = vmatprep.subr.msk.bf16.mxu1 %vm2186_vm9, %v2935_v44  ;;  %11218 = vmatprep.subr.msk.bf16.mxu0 %vm2186_vm9, %v3716_v50  ;;  %v2950_v17 = vsel %vm2186_vm9, %v2934_v7, 0 }
 0x1e6   :  { %3710 = vrot.lane.b32.xlu0 %v15096_v16, %s11677_s18  ;;  %3751 = vmatpush1.bf16.msra.mxu0 %v3727_v31  ;;  %v3157_v62 = vrot.slane %v3143_v8, %v15077_v53 }
 0x1e7   :  { %v3707_v24 = vpop.permute.xlu0 %3706  ;;  %v13094_v42 = vpop.permute.xlu1 %3704 }
 0x1e8   :  { %3712 = vrot.lane.b32.xlu1 %v12958_v1, %s11677_s18  ;;  %v3719_v32 = vsel %vm1055_vm6, %v13094_v42, %v3707_v24  ;;  %v3159_v26 = vcombine.high %v3157_v62, %v3157_v62  ;;  %v3187_v63 = vsel %vm2186_vm9, %v3157_v62, 0 }
 0x1e9   :  { %11219 = vmatmul.mubr.msk.bf16.vlgmr.msra.gmra.mrb[48].mxu0 %vm2182_vm10, %v13090_v61  ;;  %v3739_v10 = vsel %vm2186_vm9, %v3719_v32, 0 }
 0x1ea   :  { %11190 = vmatmul.mubr.msk.bf16.vlgmr.msra.gmra.mrb[20].mxu1 %vm2182_vm10, %v12774_v33  ;;  %4794 = vrot.lane.b32.xlu0 %v12964_v51, %s11672_s19 }
 0x1eb   :  { %3009 = vmatpush1.bf16.msra.mxu1 %v2950_v17  ;;  %v2928_v52 = vpop.permute.xlu0 %2927  ;;  %v13109_v59 = vpop.permute.xlu1 %3708  ;;  %3040 = vmatprep.mubr.bf16.mxu1 %v15063_v0 }
 0x1ec   :  { %4796 = vrot.lane.b32.xlu1 %v12977_v36, %s11672_s19  ;;  %v3720_v33 = vsel %vm1055_vm6, %v3707_v24, %v13109_v59  ;;  %3864 = vmatprep.mubr.bf16.mxu0 %v15063_v0  ;;  %v2938_v57 = vsel %vm639_vm4, %v12890_v37, %v2928_v52 }
 0x1ed   :  { %11222 = vmatprep.subr.msk.bf16.mxu0 %vm2186_vm9, %v3720_v33  ;;  %v2962_v37 = vsel %vm2186_vm9, %v2938_v57, 0 }
 0x1ee   :  { %4798 = vrot.lane.b32.xlu0 %v12984_v55, %s11672_s19  ;;  %3833 = vmatpush1.bf16.msra.mxu0 %v3739_v10 }
 0x1ef   :  { %v3970_v39 = vpop.permute.xlu0 %3969  ;;  %v2930_v18 = vpop.permute.xlu1 %2929 }
 0x1f0   :  { %v2939_v38 = vsel %vm639_vm4, %v2928_v52, %v2930_v18  ;;  %3975 = vrot.lane.b32.xlu1 %v15094_v12, %s11678_s2 }
 0x1f1   :  { %11198 = vmatprep.subr.msk.bf16.mxu1 %vm2186_vm9, %v2939_v38  ;;  %11223 = vmatmul.mubr.msk.bf16.vlgmr.msra.gmra.mrb[52].mxu0 %vm2182_vm10, %v13090_v61 }
 0x1f2   :  { %11195 = vmatmul.mubr.msk.bf16.vlgmr.msra.gmra.mrb[24].mxu1 %vm2182_vm10, %v12861_v46  ;;  %4802 = vrot.lane.b32.xlu0 %v13053_v41, %s11672_s19 }
 0x1f3   :  { %3091 = vmatpush1.bf16.msra.mxu1 %v2962_v37  ;;  %v13135_v4 = vpop.permute.xlu0 %3973  ;;  %3122 = vmatprep.mubr.bf16.mxu1 %v15063_v0 }
 0x1f4   :  { %11202 = vmatprep.subr.msk.bf16.mxu1 %vm2186_vm9, %v3159_v26  ;;  %v3972_v25 = vpop.permute.xlu1 %3971  ;;  %4804 = vrot.lane.b32.xlu1 %v13062_v27, %s11672_s19 }
 0x1f5   :  { %v3988_v30 = vsel %vm1206_vm7, %v3970_v39, %v3972_v25  ;;  %v3989_v48 = vsel %vm1206_vm7, %v3972_v25, %v13135_v4  ;;  %4055 = vmatprep.mubr.bf16.mxu0 %v15063_v0  ;;  %v13343_v25 = vld [vmem:[%s14975_s4 + $0x4] sm:$0xf] }
 0x1f6   :  { %11227 = vmatprep.subr.msk.bf16.mxu0 %vm2186_vm9, %v3989_v48  ;;  %4806 = vrot.lane.b32.xlu0 %v13071_v47, %s11672_s19  ;;  %v4000_v20 = vsel %vm2186_vm9, %v3988_v30, 0 }
 0x1f7   :  { %4024 = vmatpush1.bf16.msra.mxu0 %v4000_v20  ;;  %v3980_v43 = vpop.permute.xlu0 %3979 }
 0x1f8   :  { %v13154_v3 = vpop.permute.xlu1 %3977  ;;  %3983 = vrot.lane.b32.xlu1 %v15096_v16, %s11678_s2 }
 0x1f9   :  { %v3992_v23 = vsel %vm1206_vm7, %v13154_v3, %v3980_v43 }
 0x1fa   :  { %11199 = vmatmul.mubr.msk.bf16.vlgmr.msra.gmra.mrb[28].mxu1 %vm2182_vm10, %v12861_v46  ;;  %11228 = vmatmul.mubr.msk.bf16.vlgmr.msra.gmra.mrb[56].mxu0 %vm2182_vm10, %v13152_v28  ;;  %v4012_v45 = vsel %vm2186_vm9, %v3992_v23, 0 }
 0x1fb   :  { %3246 = vmatpush1.bf16.msra.mxu1 %v3187_v63  ;;  %3985 = vrot.lane.b32.xlu0 %v12958_v1, %s11678_s2  ;;  %v4243_v56 = vpop.permute.xlu0 %4242 }
 0x1fc   :  { %11206 = vmatprep.subr.msk.bf16.mxu1 %vm2186_vm9, %v15096_v16  ;;  %v13169_v13 = vpop.permute.xlu1 %3981  ;;  %5055 = vrot.lane.b32.xlu1 %v12964_v51, %s11674_s21 }
 0x1fd   :  { %v3993_v46 = vsel %vm1206_vm7, %v3980_v43, %v13169_v13  ;;  %3277 = vmatprep.mubr.bf16.mxu1 %v15063_v0  ;;  %4137 = vmatprep.mubr.bf16.mxu0 %v15063_v0 }
 0x1fe   :  { %11231 = vmatprep.subr.msk.bf16.mxu0 %vm2186_vm9, %v3993_v46 }
 0x1ff   :  { %5057 = vrot.lane.b32.xlu0 %v12977_v36, %s11674_s21  ;;  %4106 = vmatpush1.bf16.msra.mxu0 %v4012_v45  ;;  %v13181_v40 = vpop.permute.xlu0 %4246 }
 0x200   :  { %v4245_v22 = vpop.permute.xlu1 %4244  ;;  %5059 = vrot.lane.b32.xlu1 %v12984_v55, %s11674_s21 }
 0x201   :  { %v4261_v19 = vsel %vm1357_vm8, %v4243_v56, %v4245_v22  ;;  %v4262_v6 = vsel %vm1357_vm8, %v4245_v22, %v13181_v40 }
 0x202   :  { %11203 = vmatmul.mubr.msk.bf16.vlgmr.msra.gmra.mrb[32].mxu1 %vm2182_vm10, %v12943_v54  ;;  %11232 = vmatmul.mubr.msk.bf16.vlgmr.msra.gmra.mrb[60].mxu0 %vm2182_vm10, %v13152_v28  ;;  %v4273_v5 = vsel %vm2186_vm9, %v4261_v19, 0 }
 0x203   :  { %3328 = vmatpush1.bf16.msra.mxu1 %v3199_v34  ;;  %11236 = vmatprep.subr.msk.bf16.mxu0 %vm2186_vm9, %v4262_v6  ;;  %v13196_v35 = vpop.permute.xlu0 %4250 }
 0x204   :  { %4248 = vrot.lane.b32.xlu0 %v15094_v12, %s11679_s27  ;;  %4297 = vmatpush1.bf16.msra.mxu0 %v4273_v5  ;;  %v3430_v44 = vpop.permute.xlu1 %3429  ;;  %v13214_v12 = vld [vmem:[%s14975_s4 + $0x20] sm:$0xf] }
 0x205   :  { %5063 = vrot.lane.b32.xlu1 %v13053_v41, %s11674_s21  ;;  %v3445_v50 = vsel %vm904_vm5, %v3430_v44, %v13021_v58  ;;  %3359 = vmatprep.mubr.bf16.mxu1 %v15063_v0  ;;  %v3444_v31 = vsel %vm904_vm5, %v13002_v29, %v3430_v44 }
 0x206   :  { %11211 = vmatprep.subr.msk.bf16.mxu1 %vm2186_vm9, %v3445_v50  ;;  %4328 = vmatprep.mubr.bf16.mxu0 %v15063_v0  ;;  %v3460_v32 = vsel %vm2186_vm9, %v3444_v31, 0  ;;  %v13398_v50 = vld.sshfl [vmem:[#allocation2 + $0x22] sm:$0x3 pattern:$0x76325410] }
 0x207   :  { %v13209_v7 = vpop.permute.xlu0 %4254 }
 0x208   :  { %5065 = vrot.lane.b32.xlu0 %v13062_v27, %s11674_s21  ;;  %v4253_v58 = vpop.permute.xlu1 %4252 }
 0x209   :  { %v4265_v24 = vsel %vm1357_vm8, %v13196_v35, %v4253_v58  ;;  %5067 = vrot.lane.b32.xlu1 %v13071_v47, %s11674_s21  ;;  %v4266_v29 = vsel %vm1357_vm8, %v4253_v58, %v13209_v7 }
 0x20a   :  { %11207 = vmatmul.mubr.msk.bf16.vlgmr.msra.gmra.mrb[36].mxu1 %vm2182_vm10, %v12943_v54  ;;  %11237 = vmatmul.mubr.msk.bf16.vlgmr.msra.gmra.mrb[64].mxu0 %vm2182_vm10, %v13214_v12  ;;  %v4285_v17 = vsel %vm2186_vm9, %v4265_v24, 0  ;;  %v4555_v54 = vcombine.high %v12984_v55, %v12984_v55 }
 0x20b   :  { %3519 = vmatpush1.bf16.msra.mxu1 %v3460_v32  ;;  %11240 = vmatprep.subr.msk.bf16.mxu0 %vm2186_vm9, %v4266_v29 }
 0x20c   :  { %4256 = vrot.lane.b32.xlu0 %v15096_v16, %s11679_s27  ;;  %4379 = vmatpush1.bf16.msra.mxu0 %v4285_v17  ;;  %v3438_v16 = vpop.permute.xlu1 %3437 }
 0x20d   :  { %4258 = vrot.lane.b32.xlu1 %v12958_v1, %s11679_s27  ;;  %3550 = vmatprep.mubr.bf16.mxu1 %v15063_v0  ;;  %v4572_v1 = vcombine.high %v13071_v47, %v13071_v47 }
 0x20e   :  { %4410 = vmatprep.mubr.bf16.mxu0 %v15063_v0 }
 0x210   :  { %5324 = vrot.lane.b32.xlu0 %v12964_v51, %s11675_s24  ;;  %v11248_v51 = vld.sshfl [vmem:[#allocation2 + $0x20] sm:$0x3 pattern:$0x76325410] }
 0x211   :  { %5326 = vrot.lane.b32.xlu1 %v12977_v36, %s11675_s24  ;;  %v13265_v36 = vrot.slane %v12914_v49, %v15077_v53 }
 0x212   :  { %11212 = vmatmul.mubr.msk.bf16.vlgmr.msra.gmra.mrb[40].mxu1 %vm2182_vm10, %v13019_v9  ;;  %11241 = vmatmul.mubr.msk.bf16.vlgmr.msra.gmra.mrb[68].mxu0 %vm2182_vm10, %v13214_v12 }
 0x213   :  { %3632 = vmatprep.mubr.bf16.mxu1 %v15063_v0  ;;  %4662 = vmatprep.mubr.bf16.mxu0 %v15063_v0 }
 0x214   :  { %5328 = vrot.lane.b32.xlu0 %v12984_v55, %s11675_s24  ;;  %v11629_v55 = vcombine.low %v12902_v2, %v12902_v2  ;;  %v11630_v2 = vcombine.low %v13011_v11, %v13011_v11  ;;  %v3448_v11 = vsel %vm904_vm5, %v13036_v60, %v3438_v16 }
 0x215   :  { %4586 = vrot.lane.b32.xlu1 %v4555_v54, %s11673_s20  ;;  %v3472_v10 = vsel %vm2186_vm9, %v3448_v11, 0 }
 0x216   :  { %v13280_v49 = vrot.slane %v11629_v55, %v15077_v53 }
 0x218   :  { %5332 = vrot.lane.b32.xlu0 %v13053_v41, %s11675_s24  ;;  %v13273_v41 = vcombine.high %v13265_v36, %v13265_v36  ;;  %v13384_v6 = vcombine.high %v13280_v49, %v13280_v49 }
 0x219   :  { %5334 = vrot.lane.b32.xlu1 %v13062_v27, %s11675_s24  ;;  %v13284_v27 = vrot.slane %v13025_v21, %v15077_v53  ;;  %v13300_v21 = vrot.slane %v11630_v2, %v15077_v53 }
 0x21b   :  { %v13394_v5 = vcombine.high %v13300_v21, %v13300_v21 }
 0x21c   :  { %5336 = vrot.lane.b32.xlu0 %v13071_v47, %s11675_s24  ;;  %v13293_v47 = vcombine.high %v13284_v27, %v13284_v27 }
 0x21d   :  { %4594 = vrot.lane.b32.xlu1 %v4572_v1, %s11673_s20 }
 0x220   :  { %4596 = vrot.lane.b32.xlu0 %v11248_v51, %s11673_s20 }
 0x221   :  { %4800 = vrot.lane.b32.xlu1 %v4555_v54, %s11672_s19 }
 0x224   :  { %4808 = vrot.lane.b32.xlu0 %v4572_v1, %s11672_s19 }
 0x225   :  { %4810 = vrot.lane.b32.xlu1 %v11248_v51, %s11672_s19 }
 0x228   :  { %5827 = vrot.lane.b32.xlu0 %v13265_v36, %s11676_s11 }
 0x229   :  { %5829 = vrot.lane.b32.xlu1 %v13273_v41, %s11676_s11 }
 0x22c   :  { %5831 = vrot.lane.b32.xlu0 %v13280_v49, %s11676_s11 }
 0x22d   :  { %5061 = vrot.lane.b32.xlu1 %v4555_v54, %s11674_s21 }
 0x230   :  { %5835 = vrot.lane.b32.xlu0 %v13284_v27, %s11676_s11 }
 0x231   :  { %5837 = vrot.lane.b32.xlu1 %v13293_v47, %s11676_s11 }
 0x234   :  { %5839 = vrot.lane.b32.xlu0 %v13300_v21, %s11676_s11 }
 0x235   :  { %5069 = vrot.lane.b32.xlu1 %v4572_v1, %s11674_s21 }
 0x238   :  { %5071 = vrot.lane.b32.xlu0 %v11248_v51, %s11674_s21  ;;  %v3440_v8 = vpop.permute.xlu0 %3439 }
 0x239   :  { %v3449_v52 = vsel %vm904_vm5, %v3438_v16, %v3440_v8  ;;  %6096 = vrot.lane.b32.xlu1 %v13265_v36, %s11677_s18 }
 0x23a   :  { %11215 = vmatprep.subr.msk.bf16.mxu1 %vm2186_vm9, %v3449_v52 }
 0x23b   :  { %v4581_v33 = vpop.permute.xlu1 %4580  ;;  %3601 = vmatpush1.bf16.msra.mxu1 %v3472_v10 }
 0x23c   :  { %6098 = vrot.lane.b32.xlu0 %v13273_v41, %s11677_s18 }
 0x23d   :  { %v4583_v62 = vpop.permute.xlu0 %4582  ;;  %6100 = vrot.lane.b32.xlu1 %v13280_v49, %s11677_s18 }
 0x23e   :  { %v4598_v60 = vsel %vm337_vm2, %v4581_v33, %v4583_v62  ;;  %11216 = vmatmul.mubr.msk.bf16.vlgmr.msra.gmra.mrb[44].mxu1 %vm2182_vm10, %v13019_v9 }
 0x23f   :  { %v13320_v57 = vpop.permute.xlu1 %4584  ;;  %3823 = vmatprep.mubr.bf16.mxu1 %v15063_v0  ;;  %v4607_v18 = vsel %vm2186_vm9, %v4598_v60, 0 }
 0x240   :  { %v4599_v39 = vsel %vm337_vm2, %v4583_v62, %v13320_v57  ;;  %5330 = vrot.lane.b32.xlu0 %v4555_v54, %s11675_s24 }
 0x241   :  { %11249 = vmatprep.subr.msk.bf16.mxu0 %vm2186_vm9, %v4599_v39  ;;  %v3703_v38 = vpop.permute.xlu0 %3702  ;;  %6104 = vrot.lane.b32.xlu1 %v13284_v27, %s11677_s18 }
 0x242   :  { %4631 = vmatpush1.bf16.msra.mxu0 %v4607_v18  ;;  %v3717_v9 = vsel %vm1055_vm6, %v13073_v15, %v3703_v38  ;;  %v3718_v37 = vsel %vm1055_vm6, %v3703_v38, %v13094_v42 }
 0x243   :  { %11220 = vmatprep.subr.msk.bf16.mxu1 %vm2186_vm9, %v3718_v37  ;;  %v3733_v26 = vsel %vm2186_vm9, %v3717_v9, 0 }
 0x244   :  { %6106 = vrot.lane.b32.xlu0 %v13293_v47, %s11677_s18  ;;  %3792 = vmatpush1.bf16.msra.mxu1 %v3733_v26 }
 0x245   :  { %6108 = vrot.lane.b32.xlu1 %v13300_v21, %s11677_s18  ;;  %11250 = vmatmul.mubr.msk.bf16.vlgmr.msra.gmra.mrb[72].mxu0 %vm2182_vm10, %v13343_v25 }
 0x246   :  { %4744 = vmatprep.mubr.bf16.mxu0 %v15063_v0 }
 0x247   :  { %11221 = vmatmul.mubr.msk.bf16.vlgmr.msra.gmra.mrb[48].mxu1 %vm2182_vm10, %v13090_v61 }
 0x248   :  { %5338 = vrot.lane.b32.xlu0 %v4572_v1, %s11675_s24  ;;  %3905 = vmatprep.mubr.bf16.mxu1 %v15063_v0 }
 0x249   :  { %5340 = vrot.lane.b32.xlu1 %v11248_v51, %s11675_s24 }
 0x24c   :  { %6365 = vrot.lane.b32.xlu0 %v13265_v36, %s11678_s2 }
 0x24d   :  { %6367 = vrot.lane.b32.xlu1 %v13273_v41, %s11678_s2 }
 0x250   :  { %6369 = vrot.lane.b32.xlu0 %v13280_v49, %s11678_s2 }
 0x251   :  { %6373 = vrot.lane.b32.xlu1 %v13284_v27, %s11678_s2 }
 0x252   :  { %v13361_v15 = vpop.permute.xlu1 %4588 }
 0x254   :  { %6375 = vrot.lane.b32.xlu0 %v13293_v47, %s11678_s2  ;;  %v4591_v42 = vpop.permute.xlu0 %4590 }
 0x255   :  { %v4602_v30 = vsel %vm337_vm2, %v13361_v15, %v4591_v42  ;;  %6377 = vrot.lane.b32.xlu1 %v13300_v21, %s11678_s2 }
 0x256   :  { %v13369_v48 = vpop.permute.xlu1 %4592  ;;  %v4619_v63 = vsel %vm2186_vm9, %v4602_v30, 0 }
 0x257   :  { %v4603_v20 = vsel %vm337_vm2, %v4591_v42, %v13369_v48 }
 0x258   :  { %6634 = vrot.lane.b32.xlu0 %v13265_v36, %s11679_s27  ;;  %v3711_v43 = vpop.permute.xlu0 %3710  ;;  %11253 = vmatprep.subr.msk.bf16.mxu0 %vm2186_vm9, %v4603_v20  ;;  %v2245_v23 = vpop.f32.mrb[0].mxu0 }
 0x259   :  { %v3721_v56 = vsel %vm1055_vm6, %v13109_v59, %v3711_v43  ;;  %6636 = vrot.lane.b32.xlu1 %v13273_v41, %s11679_s27  ;;  %4713 = vmatpush1.bf16.msra.mxu0 %v4619_v63  ;;  %v2247_v46 = vpop.f32.mrb[1].mxu0 }
 0x25a   :  { %v3713_v45 = vpop.permute.xlu1 %3712  ;;  %v2249_v22 = vpop.f32.mrb[2].mxu0  ;;  %v3745_v59 = vsel %vm2186_vm9, %v3721_v56, 0 }
 0x25b   :  { %v3722_v19 = vsel %vm1055_vm6, %v3711_v43, %v3713_v45  ;;  %v2250_v14 = vpop.f32.mrb[3].mxu0 }
 0x25c   :  { %6638 = vrot.lane.b32.xlu0 %v13280_v49, %s11679_s27  ;;  %v4795_v34 = vpop.permute.xlu0 %4794  ;;  %11224 = vmatprep.subr.msk.bf16.mxu1 %vm2186_vm9, %v3722_v19 }
 0x25d   :  { %5833 = vrot.lane.b32.xlu1 %v13384_v6, %s11676_s11  ;;  %3874 = vmatpush1.bf16.msra.mxu1 %v3745_v59  ;;  %v13498_v59 = vld [vmem:[%s14975_s4 + $0x8] sm:$0xf] }
 0x25e   :  { %11254 = vmatmul.mubr.msk.bf16.vlgmr.msra.gmra.mrb[76].mxu0 %vm2182_vm10, %v13343_v25  ;;  %v4797_v44 = vpop.permute.xlu1 %4796 }
 0x25f   :  { %v4812_v31 = vsel %vm186_vm1, %v4795_v34, %v4797_v44  ;;  %4876 = vmatprep.mubr.bf16.mxu0 %v15063_v0 }
 0x260   :  { %5841 = vrot.lane.b32.xlu0 %v13394_v5, %s11676_s11  ;;  %v13404_v58 = vpop.permute.xlu0 %4798  ;;  %11225 = vmatmul.mubr.msk.bf16.vlgmr.msra.gmra.mrb[52].mxu1 %vm2182_vm10, %v13090_v61  ;;  %v2327_v24 = vpop.f32.mrb[4].mxu0  ;;  %v4821_v54 = vsel %vm2186_vm9, %v4812_v31, 0 }
 0x261   :  { %5843 = vrot.lane.b32.xlu1 %v13398_v50, %s11676_s11  ;;  %v4813_v29 = vsel %vm186_vm1, %v4797_v44, %v13404_v58  ;;  %4096 = vmatprep.mubr.bf16.mxu1 %v15063_v0  ;;  %v2329_v32 = vpop.f32.mrb[5].mxu0 }
 0x262   :  { %11257 = vmatprep.subr.msk.bf16.mxu0 %vm2186_vm9, %v4813_v29  ;;  %v3976_v17 = vpop.permute.xlu1 %3975  ;;  %v2331_v1 = vpop.f32.mrb[6].mxu0 }
 0x263   :  { %v3990_v51 = vsel %vm1206_vm7, %v13135_v4, %v3976_v17  ;;  %4845 = vmatpush1.bf16.msra.mxu0 %v4821_v54  ;;  %v3991_v61 = vsel %vm1206_vm7, %v3976_v17, %v13154_v3  ;;  %v2332_v36 = vpop.f32.mrb[7].mxu0  ;;  %v13430_v4 = vld [vmem:[%s14975_s4] sm:$0xf] }
 0x264   :  { %6102 = vrot.lane.b32.xlu0 %v13384_v6, %s11677_s18  ;;  %v13421_v55 = vpop.permute.xlu0 %4802  ;;  %11229 = vmatprep.subr.msk.bf16.mxu1 %vm2186_vm9, %v3991_v61  ;;  %v4006_v41 = vsel %vm2186_vm9, %v3990_v51, 0 }
 0x265   :  { %6110 = vrot.lane.b32.xlu1 %v13394_v5, %s11677_s18  ;;  %4065 = vmatpush1.bf16.msra.mxu1 %v4006_v41 }
 0x266   :  { %11258 = vmatmul.mubr.msk.bf16.vlgmr.msra.gmra.mrb[80].mxu0 %vm2182_vm10, %v13430_v4  ;;  %v4805_v3 = vpop.permute.xlu1 %4804 }
 0x267   :  { %v4816_v49 = vsel %vm186_vm1, %v13421_v55, %v4805_v3  ;;  %4958 = vmatprep.mubr.bf16.mxu0 %v15063_v0 }
 0x268   :  { %6112 = vrot.lane.b32.xlu0 %v13398_v50, %s11677_s18  ;;  %v13439_v2 = vpop.permute.xlu0 %4806  ;;  %11230 = vmatmul.mubr.msk.bf16.vlgmr.msra.gmra.mrb[56].mxu1 %vm2182_vm10, %v13152_v28  ;;  %v2463_v16 = vpop.f32.mrb[8].mxu0  ;;  %v4833_v10 = vsel %vm2186_vm9, %v4816_v49, 0 }
 0x269   :  { %6371 = vrot.lane.b32.xlu1 %v13384_v6, %s11678_s2  ;;  %v4817_v11 = vsel %vm186_vm1, %v4805_v3, %v13439_v2  ;;  %4178 = vmatprep.mubr.bf16.mxu1 %v15063_v0  ;;  %v2464_v8 = vadd.f32 %v2463_v16, %v2245_v23  ;;  %v2465_v52 = vpop.f32.mrb[9].mxu0 }
 0x26a   :  { %11261 = vmatprep.subr.msk.bf16.mxu0 %vm2186_vm9, %v4817_v11  ;;  %v3984_v33 = vpop.permute.xlu1 %3983  ;;  %v2466_v62 = vadd.f32 %v2465_v52, %v2247_v46  ;;  %v2467_v60 = vpop.f32.mrb[10].mxu0 }
 0x26b   :  { %4927 = vmatpush1.bf16.msra.mxu0 %v4833_v10  ;;  %v2468_v39 = vpop.f32.mrb[11].mxu0  ;;  %v3994_v18 = vsel %vm1206_vm7, %v13169_v13, %v3984_v33 }
 0x26c   :  { %6379 = vrot.lane.b32.xlu0 %v13394_v5, %s11678_s2  ;;  %v4018_v26 = vsel %vm2186_vm9, %v3994_v18, 0 }
 0x26d   :  { %v3986_v38 = vpop.permute.xlu0 %3985  ;;  %6381 = vrot.lane.b32.xlu1 %v13398_v50, %s11678_s2 }
 0x26e   :  { %v3995_v9 = vsel %vm1206_vm7, %v3984_v33, %v3986_v38  ;;  %11262 = vmatmul.mubr.msk.bf16.vlgmr.msra.gmra.mrb[84].mxu0 %vm2182_vm10, %v13430_v4  ;;  %v5056_v37 = vpop.permute.xlu1 %5055 }
 0x26f   :  { %11233 = vmatprep.subr.msk.bf16.mxu1 %vm2186_vm9, %v3995_v9  ;;  %5137 = vmatprep.mubr.bf16.mxu0 %v15063_v0  ;;  %v13538_v9 = vld [vmem:[#allocation2 + $0x12] sm:$0xff] }
 0x270   :  { %6640 = vrot.lane.b32.xlu0 %v13384_v6, %s11679_s27  ;;  %4147 = vmatpush1.bf16.msra.mxu1 %v4018_v26  ;;  %v2545_v13 = vpop.f32.mrb[12].mxu0 }
 0x271   :  { %v5058_v42 = vpop.permute.xlu0 %5057  ;;  %6642 = vrot.lane.b32.xlu1 %v13284_v27, %s11679_s27  ;;  %v2546_v30 = vadd.f32 %v2545_v13, %v2327_v24  ;;  %v2547_v20 = vpop.f32.mrb[13].mxu0 }
 0x272   :  { %v5073_v43 = vsel %vm488_vm3, %v5056_v37, %v5058_v42  ;;  %v13467_v63 = vpop.permute.xlu1 %5059  ;;  %v2548_v23 = vadd.f32 %v2547_v20, %v2329_v32  ;;  %v2549_v56 = vpop.f32.mrb[14].mxu0 }
 0x273   :  { %11234 = vmatmul.mubr.msk.bf16.vlgmr.msra.gmra.mrb[60].mxu1 %vm2182_vm10, %v13152_v28  ;;  %v5074_v46 = vsel %vm488_vm3, %v5058_v42, %v13467_v63  ;;  %v2550_v45 = vpop.f32.mrb[15].mxu0  ;;  %v5082_v27 = vsel %vm2186_vm9, %v5073_v43, 0  ;;  %v5557_v43 = vrot.slane %v13538_v9, %v15077_v53  ;;  %v13556_v56 = vld [vmem:[#allocation2 + $0x1a] sm:$0xff] }
 0x274   :  { %6644 = vrot.lane.b32.xlu0 %v13293_v47, %s11679_s27  ;;  %11266 = vmatprep.subr.msk.bf16.mxu0 %vm2186_vm9, %v5074_v46 }
 0x275   :  { %6646 = vrot.lane.b32.xlu1 %v13300_v21, %s11679_s27  ;;  %5106 = vmatpush1.bf16.msra.mxu0 %v5082_v27 }
 0x276   :  { %v4249_v22 = vpop.permute.xlu0 %4248  ;;  %4369 = vmatprep.mubr.bf16.mxu1 %v15063_v0 }
 0x277   :  { %v4263_v28 = vsel %vm1357_vm8, %v13181_v40, %v4249_v22  ;;  %v4264_v19 = vsel %vm1357_vm8, %v4249_v22, %v13196_v35  ;;  %v13484_v6 = vpop.permute.xlu1 %5063  ;;  %v2107_v40 = vld [vmem:[%s14976_s5] sm:$0xff] }
 0x278   :  { %6648 = vrot.lane.b32.xlu0 %v13394_v5, %s11679_s27  ;;  %11238 = vmatprep.subr.msk.bf16.mxu1 %vm2186_vm9, %v4264_v19  ;;  %v4279_v47 = vsel %vm2186_vm9, %v4263_v28, 0  ;;  %v2728_v21 = vpop.f32.mrb[16].mxu0 }
 0x279   :  { %4338 = vmatpush1.bf16.msra.mxu1 %v4279_v47  ;;  %6650 = vrot.lane.b32.xlu1 %v13398_v50, %s11679_s27  ;;  %v2858_v14 = vadd.f32 %v2728_v21, %v2464_v8  ;;  %v2730_v35 = vpop.f32.mrb[17].mxu0  ;;  %v5565_v21 = vcombine.high %v5557_v43, %v5557_v43 }
 0x27a   :  { %v5066_v34 = vpop.permute.xlu0 %5065  ;;  %11267 = vmatmul.mubr.msk.bf16.vlgmr.msra.gmra.mrb[88].mxu0 %vm2182_vm10, %v13498_v59  ;;  %v2859_v5 = vadd.f32 %v2730_v35, %v2466_v62  ;;  %v2732_v44 = vpop.f32.mrb[18].mxu0 }
 0x27b   :  { %v5077_v50 = vsel %vm488_vm3, %v13484_v6, %v5066_v34  ;;  %v13504_v31 = vpop.permute.xlu1 %5067  ;;  %5219 = vmatprep.mubr.bf16.mxu0 %v15063_v0  ;;  %v2733_v24 = vpop.f32.mrb[19].mxu0 }
 0x27c   :  { %4470 = vperm.xlu0 %11555, %v2107_v40   ;;  %11239 = vmatmul.mubr.msk.bf16.vlgmr.msra.gmra.mrb[64].mxu1 %vm2182_vm10, %v13214_v12  ;;  %v5078_v29 = vsel %vm488_vm3, %v5066_v34, %v13504_v31  ;;  %v5094_v32 = vsel %vm2186_vm9, %v5077_v50, 0  ;;  %v5574_v40 = vrot.slane %v13556_v56, %v15077_v53 }
 0x27d   :  { %11270 = vmatprep.subr.msk.bf16.mxu0 %vm2186_vm9, %v5078_v29  ;;  %4451 = vmatprep.mubr.bf16.mxu1 %v15063_v0 }
 0x27e   :  { %v4257_v17 = vpop.permute.xlu0 %4256  ;;  %5188 = vmatpush1.bf16.msra.mxu0 %v5094_v32 }
 0x27f   :  { %v4267_v54 = vsel %vm1357_vm8, %v13209_v7, %v4257_v17  ;;  %v4259_v1 = vpop.permute.xlu1 %4258 }
 0x280   :  { %v4268_v51 = vsel %vm1357_vm8, %v4257_v17, %v4259_v1  ;;  %v2810_v61 = vpop.f32.mrb[20].mxu0  ;;  %v4291_v36 = vsel %vm2186_vm9, %v4267_v54, 0 }
 0x281   :  { %11242 = vmatprep.subr.msk.bf16.mxu1 %vm2186_vm9, %v4268_v51  ;;  %v2862_v41 = vadd.f32 %v2810_v61, %v2546_v30  ;;  %v2812_v3 = vpop.f32.mrb[21].mxu0  ;;  %v5582_v61 = vcombine.high %v5574_v40, %v5574_v40 }
 0x282   :  { %v5325_v49 = vpop.permute.xlu0 %5324  ;;  %11271 = vmatmul.mubr.msk.bf16.vlgmr.msra.gmra.mrb[92].mxu0 %vm2182_vm10, %v13498_v59  ;;  %4420 = vmatpush1.bf16.msra.mxu1 %v4291_v36  ;;  %v2863_v16 = vadd.f32 %v2812_v3, %v2548_v23  ;;  %v2814_v11 = vpop.f32.mrb[22].mxu0 }
 0x283   :  { %v5327_v8 = vpop.permute.xlu1 %5326  ;;  %5406 = vmatprep.mubr.bf16.mxu0 %v15063_v0  ;;  %v2815_v7 = vpop.f32.mrb[23].mxu0 }
 0x284   :  { %v5342_v52 = vsel %vm639_vm4, %v5325_v49, %v5327_v8 }
 0x285   :  { %11243 = vmatmul.mubr.msk.bf16.vlgmr.msra.gmra.mrb[68].mxu1 %vm2182_vm10, %v13214_v12  ;;  %v5351_v39 = vsel %vm2186_vm9, %v5342_v52, 0 }
 0x286   :  { %v13525_v33 = vpop.permute.xlu0 %5328  ;;  %4703 = vmatprep.mubr.bf16.mxu1 %v15063_v0 }
 0x287   :  { %v5343_v10 = vsel %vm639_vm4, %v5327_v8, %v13525_v33  ;;  %v4587_v62 = vpop.permute.xlu1 %4586 }
 0x288   :  { %11275 = vmatprep.subr.msk.bf16.mxu0 %vm2186_vm9, %v5343_v10  ;;  %v4600_v60 = vsel %vm337_vm2, %v13320_v57, %v4587_v62  ;;  %v4601_v18 = vsel %vm337_vm2, %v4587_v62, %v13361_v15  ;;  %v3001_v38 = vpop.f32.mrb[24].mxu0  ;;  %v13545_v15 = vld [vmem:[%s14975_s4 + $0xc] sm:$0xf] }
 0x289   :  { %5375 = vmatpush1.bf16.msra.mxu0 %v5351_v39  ;;  %11251 = vmatprep.subr.msk.bf16.mxu1 %vm2186_vm9, %v4601_v18  ;;  %v4613_v12 = vsel %vm2186_vm9, %v4600_v60, 0  ;;  %v3003_v37 = vpop.f32.mrb[25].mxu0  ;;  %v3131_v26 = vadd.f32 %v3001_v38, %v2858_v14  ;;  %v5597_v60 = vsel %vm2186_vm9, %v5574_v40, 0 }
 0x28a   :  { %v13540_v13 = vpop.permute.xlu0 %5332  ;;  %4672 = vmatpush1.bf16.msra.mxu1 %v4613_v12  ;;  %v3005_v42 = vpop.f32.mrb[26].mxu0  ;;  %v3132_v57 = vadd.f32 %v3003_v37, %v2859_v5 }
 0x28b   :  { %v5335_v30 = vpop.permute.xlu1 %5334  ;;  %v3006_v20 = vpop.f32.mrb[27].mxu0 }
 0x28c   :  { %11276 = vmatmul.mubr.msk.bf16.vlgmr.msra.gmra.mrb[96].mxu0 %vm2182_vm10, %v13545_v15  ;;  %v5346_v23 = vsel %vm639_vm4, %v13540_v13, %v5335_v30  ;;  %v13558_v46 = vpop.f32.mrb[0].mxu1 }
 0x28d   :  { %11252 = vmatmul.mubr.msk.bf16.vlgmr.msra.gmra.mrb[72].mxu1 %vm2182_vm10, %v13343_v25  ;;  %5488 = vmatprep.mubr.bf16.mxu0 %v15063_v0  ;;  %v13563_v27 = vpop.f32.mrb[1].mxu1  ;;  %v5363_v47 = vsel %vm2186_vm9, %v5346_v23, 0 }
 0x28e   :  { %v13560_v45 = vpop.permute.xlu0 %5336  ;;  %4785 = vmatprep.mubr.bf16.mxu1 %v15063_v0  ;;  %v2290_v19 = vpop.f32.mrb[2].mxu1 }
 0x28f   :  { %v5347_v22 = vsel %vm639_vm4, %v5335_v30, %v13560_v45  ;;  %v4595_v28 = vpop.permute.xlu1 %4594  ;;  %v2291_v35 = vpop.f32.mrb[3].mxu1 }
 0x290   :  { %11279 = vmatprep.subr.msk.bf16.mxu0 %vm2186_vm9, %v5347_v22  ;;  %v3083_v14 = vpop.f32.mrb[28].mxu0  ;;  %v4604_v34 = vsel %vm337_vm2, %v13369_v48, %v4595_v28  ;;  %v5585_v48 = vsel %vm2186_vm9, %v5557_v43, 0 }
 0x291   :  { %5457 = vmatpush1.bf16.msra.mxu0 %v5363_v47  ;;  %v3085_v5 = vpop.f32.mrb[29].mxu0  ;;  %v3135_v44 = vadd.f32 %v3083_v14, %v2862_v41  ;;  %v4625_v1 = vsel %vm2186_vm9, %v4604_v34, 0 }
 0x292   :  { %v4597_v50 = vpop.permute.xlu0 %4596  ;;  %11283 = vmatprep.subr.msk.bf16.mxu0 %vm2186_vm9, %v5565_v21  ;;  %v3087_v24 = vpop.f32.mrb[30].mxu0  ;;  %v3136_v29 = vadd.f32 %v3085_v5, %v2863_v16 }
 0x293   :  { %v4605_v32 = vsel %vm337_vm2, %v4595_v28, %v4597_v50  ;;  %v4801_v17 = vpop.permute.xlu1 %4800  ;;  %v3088_v54 = vpop.f32.mrb[31].mxu0 }
 0x294   :  { %11255 = vmatprep.subr.msk.bf16.mxu1 %vm2186_vm9, %v4605_v32  ;;  %11280 = vmatmul.mubr.msk.bf16.vlgmr.msra.gmra.mrb[100].mxu0 %vm2182_vm10, %v13545_v15  ;;  %v4815_v51 = vsel %vm186_vm1, %v4801_v17, %v13421_v55  ;;  %v4814_v36 = vsel %vm186_vm1, %v13404_v58, %v4801_v17 }
 0x295   :  { %4754 = vmatpush1.bf16.msra.mxu1 %v4625_v1  ;;  %5609 = vmatpush1.bf16.msra.mxu0 %v5585_v48  ;;  %v4827_v55 = vsel %vm2186_vm9, %v4814_v36, 0 }
 0x296   :  { %v4809_v41 = vpop.permute.xlu0 %4808  ;;  %11259 = vmatprep.subr.msk.bf16.mxu1 %vm2186_vm9, %v4815_v51  ;;  %11287 = vmatprep.subr.msk.bf16.mxu0 %vm2186_vm9, %v5582_v61 }
 0x297   :  { %v4811_v3 = vpop.permute.xlu1 %4810  ;;  %5640 = vmatprep.mubr.bf16.mxu0 %v15063_v0  ;;  %v4818_v39 = vsel %vm186_vm1, %v13439_v2, %v4809_v41 }
 0x298   :  { %11256 = vmatmul.mubr.msk.bf16.vlgmr.msra.gmra.mrb[76].mxu1 %vm2182_vm10, %v13343_v25  ;;  %v4819_v49 = vsel %vm186_vm1, %v4809_v41, %v4811_v3  ;;  %v3238_v16 = vpop.f32.mrb[32].mxu0  ;;  %v13596_v25 = vld [vmem:[%s14975_s4 + $0x10] sm:$0xf]  ;;  %v13647_v3 = vld [vmem:[%s14975_s4 + $0x14] sm:$0xf] }
 0x299   :  { %4886 = vmatpush1.bf16.msra.mxu1 %v4827_v55  ;;  %4917 = vmatprep.mubr.bf16.mxu1 %v15063_v0  ;;  %v3368_v58 = vadd.f32 %v3238_v16, %v3131_v26  ;;  %v3240_v11 = vpop.f32.mrb[33].mxu0 }
 0x29a   :  { %v5828_v8 = vpop.permute.xlu0 %5827  ;;  %11263 = vmatprep.subr.msk.bf16.mxu1 %vm2186_vm9, %v4819_v49  ;;  %v3369_v7 = vadd.f32 %v3240_v11, %v3132_v57  ;;  %v3242_v52 = vpop.f32.mrb[34].mxu0  ;;  %v4839_v57 = vsel %vm2186_vm9, %v4818_v39, 0 }
 0x29b   :  { %v5830_v10 = vpop.permute.xlu1 %5829  ;;  %v3243_v62 = vpop.f32.mrb[35].mxu0 }
 0x29c   :  { %11284 = vmatmul.mubr.msk.bf16.vlgmr.msra.gmra.mrb[104].mxu0 %vm2182_vm10, %v13596_v25  ;;  %v5845_v43 = vsel %vm904_vm5, %v5828_v8, %v5830_v10 }
 0x29d   :  { %5691 = vmatpush1.bf16.msra.mxu0 %v5597_v60  ;;  %5722 = vmatprep.mubr.bf16.mxu0 %v15063_v0  ;;  %v2368_v18 = vpop.f32.mrb[4].mxu1 }
 0x29e   :  { %v13604_v38 = vpop.permute.xlu0 %5831  ;;  %v2370_v12 = vpop.f32.mrb[5].mxu1 }
 0x29f   :  { %v5846_v37 = vsel %vm904_vm5, %v5830_v10, %v13604_v38  ;;  %v5062_v26 = vpop.permute.xlu1 %5061  ;;  %v2372_v42 = vpop.f32.mrb[6].mxu1 }
 0x2a0   :  { %11260 = vmatmul.mubr.msk.bf16.vlgmr.msra.gmra.mrb[80].mxu1 %vm2182_vm10, %v13430_v4  ;;  %11292 = vmatprep.subr.msk.bf16.mxu0 %vm2186_vm9, %v5846_v37  ;;  %v5076_v2 = vsel %vm488_vm3, %v5062_v26, %v13484_v6  ;;  %v2373_v20 = vpop.f32.mrb[7].mxu1  ;;  %v5854_v6 = vsel %vm2186_vm9, %v5845_v43, 0  ;;  %v5075_v14 = vsel %vm488_vm3, %v13467_v63, %v5062_v26 }
 0x2a1   :  { %v3320_v30 = vpop.f32.mrb[36].mxu0  ;;  %4968 = vmatpush1.bf16.msra.mxu1 %v4839_v57  ;;  %4999 = vmatprep.mubr.bf16.mxu1 %v15063_v0  ;;  %v5088_v63 = vsel %vm2186_vm9, %v5075_v14, 0 }
 0x2a2   :  { %v3372_v23 = vadd.f32 %v3320_v30, %v3135_v44  ;;  %v3322_v22 = vpop.f32.mrb[37].mxu0  ;;  %v13616_v28 = vpop.permute.xlu0 %5835  ;;  %11268 = vmatprep.subr.msk.bf16.mxu1 %vm2186_vm9, %v5076_v2 }
 0x2a3   :  { %v3373_v19 = vadd.f32 %v3322_v22, %v3136_v29  ;;  %v3324_v47 = vpop.f32.mrb[38].mxu0  ;;  %v5838_v21 = vpop.permute.xlu1 %5837 }
 0x2a4   :  { %v3325_v40 = vpop.f32.mrb[39].mxu0  ;;  %11288 = vmatmul.mubr.msk.bf16.vlgmr.msra.gmra.mrb[108].mxu0 %vm2182_vm10, %v13596_v25 }
 0x2a5   :  { %5878 = vmatpush1.bf16.msra.mxu0 %v5854_v6  ;;  %5909 = vmatprep.mubr.bf16.mxu0 %v15063_v0  ;;  %v2504_v35 = vpop.f32.mrb[8].mxu1 }
 0x2a6   :  { %v13625_v34 = vpop.permute.xlu0 %5839  ;;  %v2505_v5 = vadd.f32 %v2504_v35, %v13558_v46  ;;  %v2506_v44 = vpop.f32.mrb[9].mxu1  ;;  %v5849_v46 = vsel %vm904_vm5, %v13616_v28, %v5838_v21  ;;  %v5550_v35 = vcombine.high %v13538_v9, %v13538_v9 }
 0x2a7   :  { %v5850_v50 = vsel %vm904_vm5, %v5838_v21, %v13625_v34  ;;  %v5070_v24 = vpop.permute.xlu1 %5069  ;;  %v2507_v29 = vadd.f32 %v2506_v44, %v13563_v27  ;;  %v2508_v32 = vpop.f32.mrb[10].mxu1  ;;  %v5866_v49 = vsel %vm2186_vm9, %v5849_v46, 0 }
 0x2a8   :  { %11264 = vmatmul.mubr.msk.bf16.vlgmr.msra.gmra.mrb[84].mxu1 %vm2182_vm10, %v13430_v4  ;;  %11296 = vmatprep.subr.msk.bf16.mxu0 %vm2186_vm9, %v5850_v50  ;;  %v2509_v54 = vpop.f32.mrb[11].mxu1  ;;  %v5079_v55 = vsel %vm488_vm3, %v13504_v31, %v5070_v24 }
 0x2a9   :  { %v3511_v17 = vpop.f32.mrb[40].mxu0  ;;  %5147 = vmatpush1.bf16.msra.mxu1 %v5088_v63  ;;  %5178 = vmatprep.mubr.bf16.mxu1 %v15063_v0  ;;  %v5100_v62 = vsel %vm2186_vm9, %v5079_v55, 0  ;;  %v5564_v63 = vrot.slane %v5550_v35, %v15077_v53  ;;  %v5567_v55 = vcombine.high %v13556_v56, %v13556_v56 }
 0x2aa   :  { %v13637_v1 = vadd.f32 %v3511_v17, %v3368_v58  ;;  %v3513_v48 = vpop.f32.mrb[41].mxu0  ;;  %v5072_v27 = vpop.permute.xlu0 %5071 }
 0x2ab   :  { %v13640_v51 = vadd.f32 %v3513_v48, %v3369_v7  ;;  %v3515_v61 = vpop.f32.mrb[42].mxu0  ;;  %v5080_v4 = vsel %vm488_vm3, %v5070_v24, %v5072_v27  ;;  %v6097_v36 = vpop.permute.xlu1 %6096 }
 0x2ac   :  { %v3516_v41 = vpop.f32.mrb[43].mxu0  ;;  %11272 = vmatprep.subr.msk.bf16.mxu1 %vm2186_vm9, %v5080_v4  ;;  %11293 = vmatmul.mubr.msk.bf16.vlgmr.msra.gmra.mrb[112].mxu0 %vm2182_vm10, %v13647_v3 }
 0x2ad   :  { %5960 = vmatpush1.bf16.msra.mxu0 %v5866_v49  ;;  %5991 = vmatprep.mubr.bf16.mxu0 %v15063_v0  ;;  %v2586_v16 = vpop.f32.mrb[12].mxu1 }
 0x2ae   :  { %v6099_v58 = vpop.permute.xlu0 %6098  ;;  %v2587_v11 = vadd.f32 %v2586_v16, %v2368_v18  ;;  %v2588_v8 = vpop.f32.mrb[13].mxu1 }
 0x2af   :  { %v13655_v7 = vpop.permute.xlu1 %6100  ;;  %v13657_v52 = vadd.f32 %v2588_v8, %v2370_v12  ;;  %v2590_v10 = vpop.f32.mrb[14].mxu1  ;;  %v6114_v37 = vsel %vm1055_vm6, %v6097_v36, %v6099_v58 }
 0x2b0   :  { %11269 = vmatmul.mubr.msk.bf16.vlgmr.msra.gmra.mrb[88].mxu1 %vm2182_vm10, %v13498_v59  ;;  %v6115_v31 = vsel %vm1055_vm6, %v6099_v58, %v13655_v7  ;;  %v2591_v39 = vpop.f32.mrb[15].mxu1  ;;  %v6123_v43 = vsel %vm2186_vm9, %v6114_v37, 0 }
 0x2b1   :  { %v3593_v60 = vpop.f32.mrb[44].mxu0  ;;  %5229 = vmatpush1.bf16.msra.mxu1 %v5100_v62  ;;  %11301 = vmatprep.subr.msk.bf16.mxu0 %vm2186_vm9, %v6115_v31  ;;  %v5581_v31 = vrot.slane %v5567_v55, %v15077_v53  ;;  %v5591_v53 = vsel %vm2186_vm9, %v5564_v63, 0 }
 0x2b2   :  { %v13665_v18 = vadd.f32 %v3593_v60, %v3372_v23  ;;  %v3595_v12 = vpop.f32.mrb[45].mxu0  ;;  %v5331_v26 = vpop.permute.xlu0 %5330  ;;  %5260 = vmatprep.mubr.bf16.mxu1 %v15063_v0 }
 0x2b3   :  { %v13668_v42 = vadd.f32 %v3595_v12, %v3373_v19  ;;  %v3597_v57 = vpop.f32.mrb[46].mxu0  ;;  %v5345_v2 = vsel %vm639_vm4, %v5331_v26, %v13540_v13  ;;  %v13673_v30 = vpop.permute.xlu1 %6104  ;;  %v5344_v23 = vsel %vm639_vm4, %v13525_v33, %v5331_v26 }
 0x2b4   :  { %v3598_v20 = vpop.f32.mrb[47].mxu0  ;;  %11277 = vmatprep.subr.msk.bf16.mxu1 %vm2186_vm9, %v5345_v2  ;;  %11297 = vmatmul.mubr.msk.bf16.vlgmr.msra.gmra.mrb[116].mxu0 %vm2182_vm10, %v13647_v3  ;;  %v5357_v14 = vsel %vm2186_vm9, %v5344_v23, 0 }
 0x2b5   :  { %6147 = vmatpush1.bf16.msra.mxu0 %v6123_v43  ;;  %6178 = vmatprep.mubr.bf16.mxu0 %v15063_v0  ;;  %v2769_v22 = vpop.f32.mrb[16].mxu1 }
 0x2b6   :  { %v6107_v19 = vpop.permute.xlu0 %6106  ;;  %v13682_v47 = vadd.f32 %v2769_v22, %v2505_v5  ;;  %v2771_v13 = vpop.f32.mrb[17].mxu1 }
 0x2b7   :  { %v13684_v21 = vpop.permute.xlu1 %6108  ;;  %v13686_v40 = vadd.f32 %v2771_v13, %v2507_v29  ;;  %v2773_v6 = vpop.f32.mrb[18].mxu1  ;;  %v6118_v5 = vsel %vm1055_vm6, %v13673_v30, %v6107_v19 }
 0x2b8   :  { %11273 = vmatmul.mubr.msk.bf16.vlgmr.msra.gmra.mrb[92].mxu1 %vm2182_vm10, %v13498_v59  ;;  %v6119_v33 = vsel %vm1055_vm6, %v6107_v19, %v13684_v21  ;;  %v2774_v44 = vpop.f32.mrb[19].mxu1  ;;  %v13702_v59 = vld [vmem:[%s14975_s4 + $0x18] sm:$0xf]  ;;  %v6135_v9 = vsel %vm2186_vm9, %v6118_v5, 0 }
 0x2b9   :  { %5416 = vmatpush1.bf16.msra.mxu1 %v5357_v14  ;;  %11305 = vmatprep.subr.msk.bf16.mxu0 %vm2186_vm9, %v6119_v33  ;;  %v13763_v33 = vld [vmem:[%s14975_s4 + $0x1c] sm:$0xf] }
 0x2ba   :  { %v5339_v50 = vpop.permute.xlu0 %5338  ;;  %5447 = vmatprep.mubr.bf16.mxu1 %v15063_v0 }
 0x2bb   :  { %v5341_v24 = vpop.permute.xlu1 %5340  ;;  %v5348_v17 = vsel %vm639_vm4, %v13560_v45, %v5339_v50 }
 0x2bc   :  { %11302 = vmatmul.mubr.msk.bf16.vlgmr.msra.gmra.mrb[120].mxu0 %vm2182_vm10, %v13702_v59  ;;  %v5349_v29 = vsel %vm639_vm4, %v5339_v50, %v5341_v24  ;;  %v3784_v32 = vpop.f32.mrb[48].mxu0  ;;  %v5369_v45 = vsel %vm2186_vm9, %v5348_v17, 0 }
 0x2bd   :  { %6229 = vmatpush1.bf16.msra.mxu0 %v6135_v9  ;;  %v13712_v54 = vadd.f32 %v3784_v32, %v13637_v1  ;;  %11281 = vmatprep.subr.msk.bf16.mxu1 %vm2186_vm9, %v5349_v29  ;;  %v3786_v46 = vpop.f32.mrb[49].mxu0  ;;  %v2851_v48 = vpop.f32.mrb[20].mxu1  ;;  %v5566_v1 = vcombine.high %v5564_v63, %v5564_v63 }
 0x2be   :  { %v6366_v27 = vpop.permute.xlu0 %6365  ;;  %v13716_v61 = vadd.f32 %v3786_v46, %v13640_v51  ;;  %6260 = vmatprep.mubr.bf16.mxu0 %v15063_v0  ;;  %v3788_v4 = vpop.f32.mrb[50].mxu0  ;;  %v2864_v36 = vadd.f32 %v2851_v48, %v2587_v11  ;;  %v5603_v46 = vsel %vm2186_vm9, %v5581_v31, 0 }
 0x2bf   :  { %v6368_v41 = vpop.permute.xlu1 %6367  ;;  %v3789_v49 = vpop.f32.mrb[51].mxu0 }
 0x2c0   :  { %11278 = vmatmul.mubr.msk.bf16.vlgmr.msra.gmra.mrb[96].mxu1 %vm2182_vm10, %v13545_v15  ;;  %v2853_v16 = vpop.f32.mrb[21].mxu1  ;;  %v6383_v51 = vsel %vm1206_vm7, %v6366_v27, %v6368_v41 }
 0x2c1   :  { %5498 = vmatpush1.bf16.msra.mxu1 %v5369_v45  ;;  %5529 = vmatprep.mubr.bf16.mxu1 %v15063_v0  ;;  %v13727_v58 = vadd.f32 %v2853_v16, %v13657_v52  ;;  %v2855_v11 = vpop.f32.mrb[22].mxu1  ;;  %v6392_v56 = vsel %vm2186_vm9, %v6383_v51, 0 }
 0x2c2   :  { %11285 = vmatprep.subr.msk.bf16.mxu1 %vm2186_vm9, %v5566_v1  ;;  %v13730_v8 = vpop.permute.xlu0 %6369  ;;  %v2856_v10 = vpop.f32.mrb[23].mxu1 }
 0x2c3   :  { %v6384_v62 = vsel %vm1206_vm7, %v6368_v41, %v13730_v8  ;;  %v13734_v60 = vpop.permute.xlu1 %6373 }
 0x2c4   :  { %11306 = vmatmul.mubr.msk.bf16.vlgmr.msra.gmra.mrb[124].mxu0 %vm2182_vm10, %v13702_v59  ;;  %11310 = vmatprep.subr.msk.bf16.mxu0 %vm2186_vm9, %v6384_v62  ;;  %v3866_v52 = vpop.f32.mrb[52].mxu0 }
 0x2c5   :  { %6416 = vmatpush1.bf16.msra.mxu0 %v6392_v56  ;;  %v13742_v39 = vadd.f32 %v3866_v52, %v13665_v18  ;;  %v3868_v37 = vpop.f32.mrb[53].mxu0  ;;  %6447 = vmatprep.mubr.bf16.mxu0 %v15063_v0  ;;  %v3042_v12 = vpop.f32.mrb[24].mxu1  ;;  %v5583_v18 = vcombine.high %v5581_v31, %v5581_v31 }
 0x2c6   :  { %v6376_v26 = vpop.permute.xlu0 %6375  ;;  %v3919_v57 = vadd.f32 %v3868_v37, %v13668_v42  ;;  %v3870_v2 = vpop.f32.mrb[54].mxu0  ;;  %v3133_v20 = vadd.f32 %v3042_v12, %v13682_v47 }
 0x2c7   :  { %v13747_v43 = vpop.permute.xlu1 %6377  ;;  %v3871_v23 = vpop.f32.mrb[55].mxu0  ;;  %v6387_v13 = vsel %vm1206_vm7, %v13734_v60, %v6376_v26 }
 0x2c8   :  { %11282 = vmatmul.mubr.msk.bf16.vlgmr.msra.gmra.mrb[100].mxu1 %vm2182_vm10, %v13545_v15  ;;  %v6388_v22 = vsel %vm1206_vm7, %v6376_v26, %v13747_v43  ;;  %v3044_v19 = vpop.f32.mrb[25].mxu1  ;;  %v6404_v35 = vsel %vm2186_vm9, %v6387_v13, 0 }
 0x2c9   :  { %5650 = vmatpush1.bf16.msra.mxu1 %v5591_v53  ;;  %11314 = vmatprep.subr.msk.bf16.mxu0 %vm2186_vm9, %v6388_v22  ;;  %v3046_v42 = vpop.f32.mrb[26].mxu1  ;;  %v3134_v47 = vadd.f32 %v3044_v19, %v13686_v40 }
 0x2ca   :  { %11289 = vmatprep.subr.msk.bf16.mxu1 %vm2186_vm9, %v5583_v18  ;;  %v6635_v6 = vpop.permute.xlu0 %6634  ;;  %5681 = vmatprep.mubr.bf16.mxu1 %v15063_v0  ;;  %v3047_v15 = vpop.f32.mrb[27].mxu1 }
 0x2cb   :  { %v6637_v14 = vpop.permute.xlu1 %6636 }
 0x2cc   :  { %11311 = vmatmul.mubr.msk.bf16.vlgmr.msra.gmra.mrb[128].mxu0 %vm2182_vm10, %v13763_v33  ;;  %v6652_v4 = vsel %vm1357_vm8, %v6635_v6, %v6637_v14 }
 0x2cd   :  { %6498 = vmatpush1.bf16.msra.mxu0 %v6404_v35  ;;  %v4057_v44 = vpop.f32.mrb[56].mxu0  ;;  %6529 = vmatprep.mubr.bf16.mxu0 %v15063_v0  ;;  %v3124_v40 = vpop.f32.mrb[28].mxu1 }
 0x2ce   :  { %v13769_v5 = vpop.permute.xlu0 %6638  ;;  %v4187_v50 = vadd.f32 %v4057_v44, %v13712_v54  ;;  %v4059_v24 = vpop.f32.mrb[57].mxu0  ;;  %v3137_v9 = vadd.f32 %v3124_v40, %v2864_v36 }
 0x2cf   :  { %v4188_v29 = vadd.f32 %v4059_v24, %v13716_v61  ;;  %v6653_v32 = vsel %vm1357_vm8, %v6637_v14, %v13769_v5  ;;  %v5834_v63 = vpop.permute.xlu1 %5833  ;;  %v4061_v17 = vpop.f32.mrb[58].mxu0 }
 0x2d0   :  { %11286 = vmatmul.mubr.msk.bf16.vlgmr.msra.gmra.mrb[104].mxu1 %vm2182_vm10, %v13596_v25  ;;  %11319 = vmatprep.subr.msk.bf16.mxu0 %vm2186_vm9, %v6653_v32  ;;  %v5848_v48 = vsel %vm904_vm5, %v5834_v63, %v13616_v28  ;;  %v3126_v54 = vpop.f32.mrb[29].mxu1  ;;  %v4062_v27 = vpop.f32.mrb[59].mxu0  ;;  %v6661_v28 = vsel %vm2186_vm9, %v6652_v4, 0  ;;  %v5847_v1 = vsel %vm904_vm5, %v13604_v38, %v5834_v63 }
 0x2d1   :  { %5732 = vmatpush1.bf16.msra.mxu1 %v5603_v46  ;;  %v3128_v61 = vpop.f32.mrb[30].mxu1  ;;  %5763 = vmatprep.mubr.bf16.mxu1 %v15063_v0  ;;  %v3138_v36 = vadd.f32 %v3126_v54, %v13727_v58  ;;  %v5860_v31 = vsel %vm2186_vm9, %v5847_v1, 0 }
 0x2d2   :  { %v5842_v41 = vpop.permute.xlu0 %5841  ;;  %11294 = vmatprep.subr.msk.bf16.mxu1 %vm2186_vm9, %v5848_v48  ;;  %v3129_v49 = vpop.f32.mrb[31].mxu1 }
 0x2d3   :  { %v5844_v45 = vpop.permute.xlu1 %5843 }
 0x2d4   :  { %11315 = vmatmul.mubr.msk.bf16.vlgmr.msra.gmra.mrb[132].mxu0 %vm2182_vm10, %v13763_v33  ;;  %v5852_v26 = vsel %vm904_vm5, %v5842_v41, %v5844_v45 }
 0x2d5   :  { %6685 = vmatpush1.bf16.msra.mxu0 %v6661_v28  ;;  %v4139_v55 = vpop.f32.mrb[60].mxu0  ;;  %v3279_v16 = vpop.f32.mrb[32].mxu1  ;;  %6716 = vmatprep.mubr.bf16.mxu0 %v15063_v0 }
 0x2d6   :  { %v6103_v51 = vpop.permute.xlu0 %6102  ;;  %v4191_v58 = vadd.f32 %v4139_v55, %v13742_v39  ;;  %v4141_v11 = vpop.f32.mrb[61].mxu0  ;;  %v3370_v10 = vadd.f32 %v3279_v16, %v3133_v20  ;;  %v5851_v20 = vsel %vm904_vm5, %v13625_v34, %v5842_v41 }
 0x2d7   :  { %v4192_v62 = vadd.f32 %v4141_v11, %v3919_v57  ;;  %v13792_v56 = vpop.permute.xlu1 %6110  ;;  %v3281_v52 = vpop.f32.mrb[33].mxu1  ;;  %v5872_v14 = vsel %vm2186_vm9, %v5851_v20, 0  ;;  %v6117_v40 = vsel %vm1055_vm6, %v6103_v51, %v13673_v30  ;;  %v6116_v32 = vsel %vm1055_vm6, %v13655_v7, %v6103_v51 }
 0x2d8   :  { %11290 = vmatmul.mubr.msk.bf16.vlgmr.msra.gmra.mrb[108].mxu1 %vm2182_vm10, %v13596_v25  ;;  %v3371_v38 = vadd.f32 %v3281_v52, %v3134_v47  ;;  %v4143_v37 = vpop.f32.mrb[62].mxu0  ;;  %v3283_v12 = vpop.f32.mrb[34].mxu1  ;;  %v13805_v25 = vld [vmem:[%s14975_s4 + $0x20] sm:$0xf]  ;;  %v6129_v7 = vsel %vm2186_vm9, %v6116_v32, 0 }
 0x2d9   :  { %5919 = vmatpush1.bf16.msra.mxu1 %v5860_v31  ;;  %v4144_v2 = vpop.f32.mrb[63].mxu0  ;;  %v3284_v23 = vpop.f32.mrb[35].mxu1  ;;  %5950 = vmatprep.mubr.bf16.mxu1 %v15063_v0 }
 0x2da   :  { %11298 = vmatprep.subr.msk.bf16.mxu1 %vm2186_vm9, %v5852_v26  ;;  %v6113_v39 = vpop.permute.xlu0 %6112 }
 0x2db   :  { %v13800_v57 = vpop.permute.xlu1 %6371  ;;  %v6121_v1 = vsel %vm1055_vm6, %v13792_v56, %v6113_v39 }
 0x2dc   :  { %11320 = vmatmul.mubr.msk.bf16.vlgmr.msra.gmra.mrb[136].mxu0 %vm2182_vm10, %v13805_v25  ;;  %v6386_v11 = vsel %vm1206_vm7, %v13800_v57, %v13734_v60 }
 0x2dd   :  { %v4330_v53 = vpop.f32.mrb[64].mxu0  ;;  %v3361_v18 = vpop.f32.mrb[36].mxu1  ;;  %6798 = vmatprep.mubr.bf16.mxu0 %v15063_v0 }
 0x2de   :  { %v13812_v22 = vpop.permute.xlu0 %6379  ;;  %v13814_v19 = vadd.f32 %v4330_v53, %v4187_v50  ;;  %v4332_v13 = vpop.f32.mrb[65].mxu0  ;;  %v13816_v42 = vadd.f32 %v3361_v18, %v3137_v9  ;;  %v15100_v53 = vld [vmem:[#allocation18_spill] sm:$0xff] }
 0x2df   :  { %v4461_v47 = vadd.f32 %v4332_v13, %v4188_v29  ;;  %v6382_v6 = vpop.permute.xlu1 %6381  ;;  %v3363_v15 = vpop.f32.mrb[37].mxu1  ;;  %v6389_v60 = vsel %vm1206_vm7, %v13747_v43, %v13812_v22  ;;  %v15098_v43 = vld [vmem:[#allocation10_spill] sm:$0xff] }
 0x2e0   :  { %11295 = vmatmul.mubr.msk.bf16.vlgmr.msra.gmra.mrb[112].mxu1 %vm2182_vm10, %v13647_v3  ;;  %v13821_v34 = vadd.f32 %v3363_v15, %v3138_v36  ;;  %v3365_v35 = vpop.f32.mrb[38].mxu1  ;;  %v4334_v44 = vpop.f32.mrb[66].mxu0  ;;  %v6410_v23 = vsel %vm2186_vm9, %v6389_v60, 0 }
 0x2e1   :  { %6001 = vmatpush1.bf16.msra.mxu1 %v5872_v14  ;;  %v3366_v50 = vpop.f32.mrb[39].mxu1  ;;  %v4335_v24 = vpop.f32.mrb[67].mxu0  ;;  %6032 = vmatprep.mubr.bf16.mxu1 %v15063_v0 }
 0x2e2   :  { %11303 = vmatprep.subr.msk.bf16.mxu1 %vm2186_vm9, %v6117_v40  ;;  %v13827_v9 = vpop.permute.xlu0 %6640 }
 0x2e3   :  { %v6643_v29 = vpop.permute.xlu1 %6642  ;;  %v6654_v15 = vsel %vm1357_vm8, %v13769_v5, %v13827_v9 }
 0x2e4   :  { %v6655_v13 = vsel %vm1357_vm8, %v13827_v9, %v6643_v29  ;;  %v6667_v35 = vsel %vm2186_vm9, %v6654_v15, 0 }
 0x2e5   :  { %v3552_v63 = vpop.f32.mrb[40].mxu1  ;;  %v4412_v17 = vpop.f32.mrb[68].mxu0 }
 0x2e6   :  { %v6645_v46 = vpop.permute.xlu0 %6644  ;;  %v13831_v48 = vadd.f32 %v3552_v63, %v3370_v10  ;;  %v4464_v54 = vadd.f32 %v4412_v17, %v4191_v58  ;;  %v3554_v27 = vpop.f32.mrb[41].mxu1 }
 0x2e7   :  { %v6656_v30 = vsel %vm1357_vm8, %v6643_v29, %v6645_v46  ;;  %v13834_v4 = vadd.f32 %v3554_v27, %v3371_v38  ;;  %v4414_v61 = vpop.f32.mrb[69].mxu0  ;;  %v13836_v36 = vpop.permute.xlu1 %6646 }
 0x2e8   :  { %v4465_v41 = vadd.f32 %v4414_v61, %v4192_v62  ;;  %11299 = vmatmul.mubr.msk.bf16.vlgmr.msra.gmra.mrb[116].mxu1 %vm2182_vm10, %v13647_v3  ;;  %v6657_v49 = vsel %vm1357_vm8, %v6645_v46, %v13836_v36  ;;  %v3556_v45 = vpop.f32.mrb[42].mxu1  ;;  %v4416_v28 = vpop.f32.mrb[70].mxu0  ;;  %v6673_v55 = vsel %vm2186_vm9, %v6656_v30, 0  ;;  %v6120_v3 = vsel %vm1055_vm6, %v13684_v21, %v13792_v56 }
 0x2e9   :  { %6188 = vmatpush1.bf16.msra.mxu1 %v6129_v7  ;;  %11323 = vmatprep.subr.msk.bf16.mxu0 %vm2186_vm9, %v6657_v49  ;;  %v3557_v16 = vpop.f32.mrb[43].mxu1  ;;  %v4417_v51 = vpop.f32.mrb[71].mxu0  ;;  %v6141_v58 = vsel %vm2186_vm9, %v6120_v3, 0  ;;  %v6385_v21 = vsel %vm1206_vm7, %v13730_v8, %v13800_v57  ;;  %v6390_v56 = vsel %vm1206_vm7, %v13812_v22, %v6382_v6  ;;  %v15099_v57 = vld [vmem:[#allocation11_spill] sm:$0xff] }
 0x2ea   :  { %11307 = vmatprep.subr.msk.bf16.mxu1 %vm2186_vm9, %v6121_v1  ;;  %6767 = vmatpush1.bf16.msra.mxu0 %v6673_v55  ;;  %v6649_v10 = vpop.permute.xlu0 %6648  ;;  %v6398_v62 = vsel %vm2186_vm9, %v6385_v21, 0  ;;  %v15101_v22 = vld [vmem:[#allocation19_spill] sm:$0xff] }
 0x2eb   :  { %6219 = vmatprep.mubr.bf16.mxu1 %v15063_v0  ;;  %v6651_v14 = vpop.permute.xlu1 %6650  ;;  %v6658_v5 = vsel %vm1357_vm8, %v13836_v36, %v6649_v10 }
 0x2ec   :  { %v6659_v44 = vsel %vm1357_vm8, %v6649_v10, %v6651_v14 }
 0x2ed   :  { %11324 = vmatmul.mubr.msk.bf16.vlgmr.msra.gmra.mrb[140].mxu0 %vm2182_vm10, %v13805_v25 }
 0x2ee   :  { %7048 = vmatprep.mubr.bf16.mxu0 %v15063_v0 }
 0x2f0   :  { %11304 = vmatmul.mubr.msk.bf16.vlgmr.msra.gmra.mrb[120].mxu1 %vm2182_vm10, %v13702_v59 }
 0x2f1   :  { %6270 = vmatpush1.bf16.msra.mxu1 %v6141_v58  ;;  %6301 = vmatprep.mubr.bf16.mxu1 %v15063_v0 }
 0x2f2   :  { %11312 = vmatprep.subr.msk.bf16.mxu1 %vm2186_vm9, %v6386_v11 }
 0x2f8   :  { %11308 = vmatmul.mubr.msk.bf16.vlgmr.msra.gmra.mrb[124].mxu1 %vm2182_vm10, %v13702_v59 }
 0x2f9   :  { %6457 = vmatpush1.bf16.msra.mxu1 %v6398_v62  ;;  %6488 = vmatprep.mubr.bf16.mxu1 %v15063_v0 }
 0x2fa   :  { %11316 = vmatprep.subr.msk.bf16.mxu1 %vm2186_vm9, %v6390_v56 }
 0x2fb   :  { %v13876_v52 = vpop.permute.xlu0 %4470 }
 0x2fc   :  { %v4473_v8 = vadd.f32 %v13876_v52, %v13814_v19  ;;  %v4474_v59 = vadd.f32 %v13876_v52, %v4461_v47  ;;  %v4477_v31 = vadd.f32 %v13876_v52, %v4464_v54  ;;  %v4478_v38 = vadd.f32 %v13876_v52, %v4465_v41 }
 0x2fe   :  { %v4481_v37 = vmax.f32 %v4473_v8, 0.0  ;;  %v4482_v12 = vmax.f32 %v4474_v59, 0.0  ;;  %v4485_v26 = vmax.f32 %v4477_v31, 0.0  ;;  %v4486_v2 = vmax.f32 %v4478_v38, 0.0 }
 0x300   :  { %11313 = vmatmul.mubr.msk.bf16.vlgmr.msra.gmra.mrb[128].mxu1 %vm2182_vm10, %v13763_v33  ;;  %v13887_v39 = vmul.f32 %v4481_v37, %v15098_v43  ;;  %v13890_v20 = vmul.f32 %v4482_v12, %v15099_v57  ;;  %v13893_v18 = vmul.f32 %v4485_v26, %v15100_v53  ;;  %v13896_v19 = vmul.f32 %v4486_v2, %v15101_v22 }
 0x301   :  { %6539 = vmatpush1.bf16.msra.mxu1 %v6410_v23  ;;  %6570 = vmatprep.mubr.bf16.mxu1 %v15063_v0 }
 0x302   :  { %11321 = vmatprep.subr.msk.bf16.mxu1 %vm2186_vm9, %v6655_v13  ;;  %v11535_v47 = vpack.c.bf16 %v13890_v20, %v13887_v39  ;;  %v11537_v6 = vpack.c.bf16 %v13896_v19, %v13893_v18 }
 0x304   :  { %4529 = vst [vmem:[#allocation3 + $0x4] sm:$0xff] %v11535_v47  ;;  %4531 = vst [vmem:[#allocation3 + $0x14] sm:$0xff] %v11537_v6 }
 0x308   :  { %11317 = vmatmul.mubr.msk.bf16.vlgmr.msra.gmra.mrb[132].mxu1 %vm2182_vm10, %v13763_v33  ;;  %v6679_v33 = vsel %vm2186_vm9, %v6658_v5, 0 }
 0x309   :  { %6726 = vmatpush1.bf16.msra.mxu1 %v6667_v35  ;;  %6757 = vmatprep.mubr.bf16.mxu1 %v15063_v0 }
 0x30a   :  { %11325 = vmatprep.subr.msk.bf16.mxu1 %vm2186_vm9, %v6659_v44 }
 0x30b   :  { %v6934_v40 = vld [vmem:[#allocation3] sm:$0xff] }
 0x30c   :  { %v13915_v50 = vcombine.high %v6934_v40, %v6934_v40  ;;  %v13917_v24 = vcombine.low %v6934_v40, %v6934_v40 }
 0x30e   :  { %6964 = vrot.lane.b32.xlu0 %v13915_v50, %s11673_s20  ;;  %6962 = vrot.lane.b32.xlu1 %v13917_v24, %s11673_s20 }
 0x310   :  { %11322 = vmatmul.mubr.msk.bf16.vlgmr.msra.gmra.mrb[136].mxu1 %vm2182_vm10, %v13805_v25 }
 0x311   :  { %6808 = vmatpush1.bf16.msra.mxu1 %v6679_v33  ;;  %v3634_v9 = vpop.f32.mrb[44].mxu1  ;;  %6839 = vmatprep.mubr.bf16.mxu1 %v15063_v0 }
 0x312   :  { %7180 = vrot.lane.b32.xlu0 %v13917_v24, %s11672_s19  ;;  %7182 = vrot.lane.b32.xlu1 %v13915_v50, %s11672_s19  ;;  %v3647_v29 = vadd.f32 %v3634_v9, %v13816_v42  ;;  %v3636_v32 = vpop.f32.mrb[45].mxu1 }
 0x313   :  { %v3648_v63 = vadd.f32 %v3636_v32, %v13821_v34  ;;  %v3638_v17 = vpop.f32.mrb[46].mxu1 }
 0x314   :  { %v3639_v46 = vpop.f32.mrb[47].mxu1 }
 0x318   :  { %11326 = vmatmul.mubr.msk.bf16.vlgmr.msra.gmra.mrb[140].mxu1 %vm2182_vm10, %v13805_v25  ;;  %v4664_v54 = vpop.f32.mrb[72].mxu0 }
 0x319   :  { %v4666_v27 = vpop.f32.mrb[73].mxu0  ;;  %7089 = vmatprep.mubr.bf16.mxu1 %v15063_v0 }
 0x31a   :  { %v3825_v30 = vpop.f32.mrb[48].mxu1  ;;  %v4668_v61 = vpop.f32.mrb[74].mxu0 }
 0x31b   :  { %v3916_v36 = vadd.f32 %v3825_v30, %v13831_v48  ;;  %v3827_v41 = vpop.f32.mrb[49].mxu1  ;;  %v4669_v7 = vpop.f32.mrb[75].mxu0 }
 0x31c   :  { %v3917_v42 = vadd.f32 %v3827_v41, %v13834_v4  ;;  %v3829_v49 = vpop.f32.mrb[50].mxu1 }
 0x31d   :  { %v3830_v45 = vpop.f32.mrb[51].mxu1 }
 0x31e   :  { %v15102_v45 = vld [vmem:[#allocation14_spill] sm:$0xff] }
 0x331   :  { %v4746_v34 = vpop.f32.mrb[76].mxu0 }
 0x332   :  { %v4748_v28 = vpop.f32.mrb[77].mxu0 }
 0x333   :  { %v3907_v1 = vpop.f32.mrb[52].mxu1  ;;  %v4750_v55 = vpop.f32.mrb[78].mxu0 }
 0x334   :  { %v3920_v16 = vadd.f32 %v3907_v1, %v3647_v29  ;;  %v3909_v25 = vpop.f32.mrb[53].mxu1  ;;  %v4751_v51 = vpop.f32.mrb[79].mxu0  ;;  %v15103_v55 = vld [vmem:[#allocation15_spill] sm:$0xff] }
 0x335   :  { %v3921_v3 = vadd.f32 %v3909_v25, %v3648_v63  ;;  %v3911_v58 = vpop.f32.mrb[54].mxu1 }
 0x336   :  { %v3912_v11 = vpop.f32.mrb[55].mxu1 }
 0x339   :  { %v4878_v21 = vpop.f32.mrb[80].mxu0 }
 0x33a   :  { %v4879_v10 = vadd.f32 %v4878_v21, %v4664_v54  ;;  %v4880_v62 = vpop.f32.mrb[81].mxu0 }
 0x33b   :  { %v4881_v48 = vadd.f32 %v4880_v62, %v4666_v27  ;;  %v4098_v56 = vpop.f32.mrb[56].mxu1  ;;  %v4882_v60 = vpop.f32.mrb[82].mxu0 }
 0x33c   :  { %v4189_v8 = vadd.f32 %v4098_v56, %v3916_v36  ;;  %v4100_v4 = vpop.f32.mrb[57].mxu1  ;;  %v4883_v59 = vpop.f32.mrb[83].mxu0 }
 0x33d   :  { %v4190_v31 = vadd.f32 %v4100_v4, %v3917_v42  ;;  %v4102_v38 = vpop.f32.mrb[58].mxu1 }
 0x33e   :  { %v4103_v37 = vpop.f32.mrb[59].mxu1 }
 0x341   :  { %v4960_v12 = vpop.f32.mrb[84].mxu0 }
 0x342   :  { %v4961_v26 = vadd.f32 %v4960_v12, %v4746_v34  ;;  %v4962_v2 = vpop.f32.mrb[85].mxu0  ;;  %v15105_v12 = vld [vmem:[#allocation22_spill] sm:$0xff] }
 0x343   :  { %v4963_v23 = vadd.f32 %v4962_v2, %v4748_v28  ;;  %v4964_v13 = vpop.f32.mrb[86].mxu0 }
 0x344   :  { %v4965_v47 = vpop.f32.mrb[87].mxu0 }
 0x346   :  { %v4180_v6 = vpop.f32.mrb[60].mxu1 }
 0x347   :  { %v4193_v15 = vadd.f32 %v4180_v6, %v3920_v16  ;;  %v4182_v14 = vpop.f32.mrb[61].mxu1 }
 0x348   :  { %v4194_v35 = vadd.f32 %v4182_v14, %v3921_v3  ;;  %v4184_v44 = vpop.f32.mrb[62].mxu1 }
 0x349   :  { %v4185_v40 = vpop.f32.mrb[63].mxu1 }
 0x34d   :  { %v5139_v5 = vpop.f32.mrb[88].mxu0 }
 0x34e   :  { %v5269_v33 = vadd.f32 %v5139_v5, %v4879_v10  ;;  %v5141_v9 = vpop.f32.mrb[89].mxu0 }
 0x34f   :  { %v5270_v29 = vadd.f32 %v5141_v9, %v4881_v48  ;;  %v4371_v32 = vpop.f32.mrb[64].mxu1  ;;  %v5143_v63 = vpop.f32.mrb[90].mxu0 }
 0x350   :  { %v4462_v17 = vadd.f32 %v4371_v32, %v4189_v8  ;;  %v4373_v46 = vpop.f32.mrb[65].mxu1  ;;  %v5144_v54 = vpop.f32.mrb[91].mxu0 }
 0x351   :  { %v4463_v27 = vadd.f32 %v4373_v46, %v4190_v31  ;;  %v4375_v30 = vpop.f32.mrb[66].mxu1  ;;  %v15104_v31 = vld [vmem:[#allocation21_spill] sm:$0xff] }
 0x352   :  { %v4475_v61 = vadd.f32 %v13876_v52, %v4462_v17  ;;  %v4376_v36 = vpop.f32.mrb[67].mxu1 }
 0x353   :  { %v4476_v41 = vadd.f32 %v13876_v52, %v4463_v27 }
 0x354   :  { %v4483_v7 = vmax.f32 %v4475_v61, 0.0 }
 0x355   :  { %v4484_v42 = vmax.f32 %v4476_v41, 0.0  ;;  %v5221_v49 = vpop.f32.mrb[92].mxu0 }
 0x356   :  { %v13943_v34 = vmul.f32 %v4483_v7, %v15102_v45  ;;  %v5273_v28 = vadd.f32 %v5221_v49, %v4961_v26  ;;  %v5223_v1 = vpop.f32.mrb[93].mxu0 }
 0x357   :  { %v13946_v16 = vmul.f32 %v4484_v42, %v15103_v55  ;;  %v5274_v25 = vadd.f32 %v5223_v1, %v4963_v23  ;;  %v5225_v51 = vpop.f32.mrb[94].mxu0 }
 0x358   :  { %v5226_v3 = vpop.f32.mrb[95].mxu0  ;;  %v4453_v58 = vpop.f32.mrb[68].mxu1 }
 0x359   :  { %v11536_v11 = vpack.c.bf16 %v13946_v16, %v13943_v34  ;;  %v4466_v21 = vadd.f32 %v4453_v58, %v4193_v15  ;;  %v4455_v10 = vpop.f32.mrb[69].mxu1 }
 0x35a   :  { %v4467_v62 = vadd.f32 %v4455_v10, %v4194_v35  ;;  %v4457_v48 = vpop.f32.mrb[70].mxu1 }
 0x35b   :  { %4530 = vst [vmem:[#allocation3 + $0xc] sm:$0xff] %v11536_v11  ;;  %v4479_v56 = vadd.f32 %v13876_v52, %v4466_v21  ;;  %v4458_v60 = vpop.f32.mrb[71].mxu1 }
 0x35c   :  { %v4480_v8 = vadd.f32 %v13876_v52, %v4467_v62 }
 0x35d   :  { %v4487_v4 = vmax.f32 %v4479_v56, 0.0 }
 0x35e   :  { %v4488_v59 = vmax.f32 %v4480_v8, 0.0 }
 0x35f   :  { %v13953_v38 = vmul.f32 %v4487_v4, %v15104_v31  ;;  %v5408_v37 = vpop.f32.mrb[96].mxu0 }
 0x360   :  { %v13956_v26 = vmul.f32 %v4488_v59, %v15105_v12  ;;  %v5538_v2 = vadd.f32 %v5408_v37, %v5269_v33  ;;  %v5410_v23 = vpop.f32.mrb[97].mxu0  ;;  %v4705_v13 = vpop.f32.mrb[72].mxu1 }
 0x361   :  { %v5539_v47 = vadd.f32 %v5410_v23, %v5270_v29  ;;  %v5412_v6 = vpop.f32.mrb[98].mxu0  ;;  %v4707_v15 = vpop.f32.mrb[73].mxu1 }
 0x362   :  { %v11538_v14 = vpack.c.bf16 %v13956_v26, %v13953_v38  ;;  %v5413_v35 = vpop.f32.mrb[99].mxu0  ;;  %v4709_v44 = vpop.f32.mrb[74].mxu1  ;;  %v6935_v40 = vld [vmem:[#allocation3 + $0x8] sm:$0xff]  ;;  %v6936_v63 = vld [vmem:[#allocation3 + $0x10] sm:$0xff] }
 0x363   :  { %v4710_v5 = vpop.f32.mrb[75].mxu1  ;;  %v13960_v9 = vcombine.high %v6935_v40, %v6935_v40  ;;  %v13962_v32 = vcombine.low %v6935_v40, %v6935_v40  ;;  %v13968_v29 = vcombine.low %v6936_v63, %v6936_v63  ;;  %v13974_v36 = vcombine.high %v6936_v63, %v6936_v63 }
 0x364   :  { %4532 = vst [vmem:[#allocation3 + $0x1c] sm:$0xff] %v11538_v14 }
 0x365   :  { %6968 = vrot.lane.b32.xlu0 %v13960_v9, %s11673_s20  ;;  %6966 = vrot.lane.b32.xlu1 %v13962_v32, %s11673_s20 }
 0x367   :  { %v5490_v33 = vpop.f32.mrb[100].mxu0 }
 0x368   :  { %v5542_v17 = vadd.f32 %v5490_v33, %v5273_v28  ;;  %v5492_v46 = vpop.f32.mrb[101].mxu0 }
 0x369   :  { %v5543_v54 = vadd.f32 %v5492_v46, %v5274_v25  ;;  %7184 = vrot.lane.b32.xlu0 %v13962_v32, %s11672_s19  ;;  %6970 = vrot.lane.b32.xlu1 %v13968_v29, %s11673_s20  ;;  %v5494_v27 = vpop.f32.mrb[102].mxu0 }
 0x36a   :  { %v5495_v30 = vpop.f32.mrb[103].mxu0 }
 0x36b   :  { %v4787_v61 = vpop.f32.mrb[76].mxu1  ;;  %v6937_v41 = vld [vmem:[#allocation3 + $0x18] sm:$0xff]  ;;  %v13984_v58 = vld [vmem:[#allocation3 + $0x20] ss:$0 sps:$4 sm:$0xff]  }
 0x36c   :  { %v4789_v7 = vpop.f32.mrb[77].mxu1  ;;  %v13976_v42 = vcombine.low %v6937_v41, %v6937_v41  ;;  %v13982_v25 = vcombine.high %v6937_v41, %v6937_v41 }
 0x36d   :  { %6972 = vrot.lane.b32.xlu0 %v13974_v36, %s11673_s20  ;;  %v4791_v49 = vpop.f32.mrb[78].mxu1 }
 0x36e   :  { %v4792_v28 = vpop.f32.mrb[79].mxu1  ;;  %6974 = vrot.lane.b32.xlu1 %v13976_v42, %s11673_s20 }
 0x36f   :  { %v5642_v1 = vpop.f32.mrb[104].mxu0 }
 0x370   :  { %v5772_v51 = vadd.f32 %v5642_v1, %v5538_v2  ;;  %v5644_v3 = vpop.f32.mrb[105].mxu0 }
 0x371   :  { %v5773_v11 = vadd.f32 %v5644_v3, %v5539_v47  ;;  %6976 = vrot.lane.b32.xlu0 %v13982_v25, %s11673_s20  ;;  %v5646_v21 = vpop.f32.mrb[106].mxu0 }
 0x372   :  { %v5647_v10 = vpop.f32.mrb[107].mxu0  ;;  %6978 = vrot.lane.b32.xlu1 %v13984_v58, %s11673_s20 }
 0x373   :  { %v4919_v62 = vpop.f32.mrb[80].mxu1 }
 0x374   :  { %v4920_v48 = vadd.f32 %v4919_v62, %v4705_v13  ;;  %v4921_v56 = vpop.f32.mrb[81].mxu1 }
 0x375   :  { %v4922_v60 = vadd.f32 %v4921_v56, %v4707_v15  ;;  %7188 = vrot.lane.b32.xlu0 %v13968_v29, %s11672_s19  ;;  %v4923_v8 = vpop.f32.mrb[82].mxu1 }
 0x376   :  { %v4924_v4 = vpop.f32.mrb[83].mxu1  ;;  %7186 = vrot.lane.b32.xlu1 %v13960_v9, %s11672_s19 }
 0x377   :  { %v5724_v59 = vpop.f32.mrb[108].mxu0 }
 0x378   :  { %v5776_v37 = vadd.f32 %v5724_v59, %v5542_v17  ;;  %v5726_v2 = vpop.f32.mrb[109].mxu0 }
 0x379   :  { %v5777_v23 = vadd.f32 %v5726_v2, %v5543_v54  ;;  %7399 = vrot.lane.b32.xlu0 %v13915_v50, %s11674_s21  ;;  %v5728_v47 = vpop.f32.mrb[110].mxu0 }
 0x37a   :  { %v5729_v6 = vpop.f32.mrb[111].mxu0  ;;  %7190 = vrot.lane.b32.xlu1 %v13974_v36, %s11672_s19 }
 0x37b   :  { %v5001_v13 = vpop.f32.mrb[84].mxu1 }
 0x37c   :  { %v5002_v15 = vadd.f32 %v5001_v13, %v4787_v61  ;;  %v5003_v14 = vpop.f32.mrb[85].mxu1 }
 0x37d   :  { %v5004_v35 = vadd.f32 %v5003_v14, %v4789_v7  ;;  %7192 = vrot.lane.b32.xlu0 %v13976_v42, %s11672_s19  ;;  %v5005_v44 = vpop.f32.mrb[86].mxu1 }
 0x37e   :  { %v5006_v40 = vpop.f32.mrb[87].mxu1  ;;  %7397 = vrot.lane.b32.xlu1 %v13917_v24, %s11674_s21 }
 0x37f   :  { %v5911_v5 = vpop.f32.mrb[112].mxu0 }
 0x380   :  { %v6041_v63 = vadd.f32 %v5911_v5, %v5772_v51  ;;  %v5913_v33 = vpop.f32.mrb[113].mxu0 }
 0x381   :  { %v6042_v17 = vadd.f32 %v5913_v33, %v5773_v11  ;;  %7196 = vrot.lane.b32.xlu0 %v13984_v58, %s11672_s19  ;;  %v5915_v46 = vpop.f32.mrb[114].mxu0 }
 0x382   :  { %v5916_v54 = vpop.f32.mrb[115].mxu0  ;;  %7194 = vrot.lane.b32.xlu1 %v13982_v25, %s11672_s19 }
 0x383   :  { %v5180_v27 = vpop.f32.mrb[88].mxu1 }
 0x384   :  { %v5271_v30 = vadd.f32 %v5180_v27, %v4920_v48  ;;  %v5182_v61 = vpop.f32.mrb[89].mxu1 }
 0x385   :  { %v5272_v41 = vadd.f32 %v5182_v61, %v4922_v60  ;;  %7403 = vrot.lane.b32.xlu0 %v13960_v9, %s11674_s21  ;;  %v5184_v7 = vpop.f32.mrb[90].mxu1 }
 0x386   :  { %v5185_v49 = vpop.f32.mrb[91].mxu1  ;;  %7401 = vrot.lane.b32.xlu1 %v13962_v32, %s11674_s21 }
 0x387   :  { %v5993_v28 = vpop.f32.mrb[116].mxu0 }
 0x388   :  { %v6045_v1 = vadd.f32 %v5993_v28, %v5776_v37  ;;  %v5995_v51 = vpop.f32.mrb[117].mxu0 }
 0x389   :  { %v6046_v3 = vadd.f32 %v5995_v51, %v5777_v23  ;;  %7407 = vrot.lane.b32.xlu0 %v13974_v36, %s11674_s21  ;;  %v5997_v11 = vpop.f32.mrb[118].mxu0 }
 0x38a   :  { %v5998_v21 = vpop.f32.mrb[119].mxu0  ;;  %7405 = vrot.lane.b32.xlu1 %v13968_v29, %s11674_s21 }
 0x38b   :  { %v5262_v10 = vpop.f32.mrb[92].mxu1 }
 0x38c   :  { %v5275_v62 = vadd.f32 %v5262_v10, %v5002_v15  ;;  %v5264_v48 = vpop.f32.mrb[93].mxu1 }
 0x38d   :  { %v5276_v56 = vadd.f32 %v5264_v48, %v5004_v35  ;;  %7622 = vrot.lane.b32.xlu0 %v13917_v24, %s11675_s24  ;;  %v5266_v60 = vpop.f32.mrb[94].mxu1 }
 0x38e   :  { %v5267_v8 = vpop.f32.mrb[95].mxu1  ;;  %7409 = vrot.lane.b32.xlu1 %v13976_v42, %s11674_s21 }
 0x38f   :  { %v6180_v4 = vpop.f32.mrb[120].mxu0 }
 0x390   :  { %v6310_v59 = vadd.f32 %v6180_v4, %v6041_v63  ;;  %v6182_v37 = vpop.f32.mrb[121].mxu0 }
 0x391   :  { %v6311_v2 = vadd.f32 %v6182_v37, %v6042_v17  ;;  %7411 = vrot.lane.b32.xlu0 %v13982_v25, %s11674_s21  ;;  %v6184_v23 = vpop.f32.mrb[122].mxu0 }
 0x392   :  { %v6185_v47 = vpop.f32.mrb[123].mxu0  ;;  %7413 = vrot.lane.b32.xlu1 %v13984_v58, %s11674_s21 }
 0x393   :  { %v5449_v6 = vpop.f32.mrb[96].mxu1 }
 0x394   :  { %v5540_v13 = vadd.f32 %v5449_v6, %v5271_v30  ;;  %v5451_v24 = vpop.f32.mrb[97].mxu1 }
 0x395   :  { %v5541_v15 = vadd.f32 %v5451_v24, %v5272_v41  ;;  %7626 = vrot.lane.b32.xlu0 %v13962_v32, %s11675_s24  ;;  %v5453_v14 = vpop.f32.mrb[98].mxu1 }
 0x396   :  { %v5454_v35 = vpop.f32.mrb[99].mxu1  ;;  %7624 = vrot.lane.b32.xlu1 %v13915_v50, %s11675_s24 }
 0x397   :  { %v6262_v44 = vpop.f32.mrb[124].mxu0 }
 0x398   :  { %v6314_v40 = vadd.f32 %v6262_v44, %v6045_v1  ;;  %v6264_v5 = vpop.f32.mrb[125].mxu0 }
 0x399   :  { %v6315_v63 = vadd.f32 %v6264_v5, %v6046_v3  ;;  %7630 = vrot.lane.b32.xlu0 %v13968_v29, %s11675_s24  ;;  %v6266_v33 = vpop.f32.mrb[126].mxu0 }
 0x39a   :  { %v6267_v17 = vpop.f32.mrb[127].mxu0  ;;  %7628 = vrot.lane.b32.xlu1 %v13960_v9, %s11675_s24 }
 0x39b   :  { %v5531_v46 = vpop.f32.mrb[100].mxu1 }
 0x39c   :  { %v5544_v54 = vadd.f32 %v5531_v46, %v5275_v62  ;;  %v5533_v32 = vpop.f32.mrb[101].mxu1 }
 0x39d   :  { %v5545_v27 = vadd.f32 %v5533_v32, %v5276_v56  ;;  %7634 = vrot.lane.b32.xlu0 %v13976_v42, %s11675_s24  ;;  %v5535_v50 = vpop.f32.mrb[102].mxu1  ;;  %v14040_v42 = vpack.c.bf16 %v13890_v20, %v13890_v20  ;;  %v14052_v20 = vpack.c.bf16 %v13946_v16, %v13946_v16  ;;  %v14064_v16 = vpack.c.bf16 %v13896_v19, %v13896_v19 }
 0x39e   :  { %v5536_v30 = vpop.f32.mrb[103].mxu1  ;;  %7632 = vrot.lane.b32.xlu1 %v13974_v36, %s11675_s24  ;;  %v14044_v36 = vpack.c.bf16 %v13887_v39, %v13887_v39  ;;  %v14056_v39 = vpack.c.bf16 %v13943_v34, %v13943_v34  ;;  %v14068_v34 = vpack.c.bf16 %v13893_v18, %v13893_v18  ;;  %v14098_v50 = vpack.c.bf16 %v13956_v26, %v13956_v26 }
 0x39f   :  { %v6449_v61 = vpop.f32.mrb[128].mxu0 }
 0x3a0   :  { %v6579_v41 = vadd.f32 %v6449_v61, %v6310_v59  ;;  %v6451_v29 = vpop.f32.mrb[129].mxu0 }
 0x3a1   :  { %v6580_v7 = vadd.f32 %v6451_v29, %v6311_v2  ;;  %7638 = vrot.lane.b32.xlu0 %v13984_v58, %s11675_s24  ;;  %v6453_v9 = vpop.f32.mrb[130].mxu0 }
 0x3a2   :  { %v6454_v49 = vpop.f32.mrb[131].mxu0  ;;  %7636 = vrot.lane.b32.xlu1 %v13982_v25, %s11675_s24 }
 0x3a3   :  { %v5683_v28 = vpop.f32.mrb[104].mxu1 }
 0x3a4   :  { %v5774_v1 = vadd.f32 %v5683_v28, %v5540_v13  ;;  %v5685_v51 = vpop.f32.mrb[105].mxu1 }
 0x3a5   :  { %v5775_v3 = vadd.f32 %v5685_v51, %v5541_v15  ;;  %8100 = vrot.lane.b32.xlu0 %v14040_v42, %s11676_s11  ;;  %v5687_v58 = vpop.f32.mrb[106].mxu1 }
 0x3a6   :  { %v5688_v11 = vpop.f32.mrb[107].mxu1  ;;  %8098 = vrot.lane.b32.xlu1 %v14044_v36, %s11676_s11 }
 0x3a7   :  { %v6531_v25 = vpop.f32.mrb[132].mxu0 }
 0x3a8   :  { %v6583_v21 = vadd.f32 %v6531_v25, %v6314_v40  ;;  %v6533_v10 = vpop.f32.mrb[133].mxu0 }
 0x3a9   :  { %v6584_v62 = vadd.f32 %v6533_v10, %v6315_v63  ;;  %8104 = vrot.lane.b32.xlu0 %v14052_v20, %s11676_s11  ;;  %v6535_v48 = vpop.f32.mrb[134].mxu0 }
 0x3aa   :  { %v6536_v56 = vpop.f32.mrb[135].mxu0  ;;  %8102 = vrot.lane.b32.xlu1 %v14056_v39, %s11676_s11 }
 0x3ab   :  { %v5765_v60 = vpop.f32.mrb[108].mxu1 }
 0x3ac   :  { %v5778_v8 = vadd.f32 %v5765_v60, %v5544_v54  ;;  %v5767_v4 = vpop.f32.mrb[109].mxu1 }
 0x3ad   :  { %v5779_v59 = vadd.f32 %v5767_v4, %v5545_v27  ;;  %8108 = vrot.lane.b32.xlu0 %v14064_v16, %s11676_s11  ;;  %v5769_v37 = vpop.f32.mrb[110].mxu1 }
 0x3ae   :  { %v5770_v2 = vpop.f32.mrb[111].mxu1  ;;  %8106 = vrot.lane.b32.xlu1 %v14068_v34, %s11676_s11 }
 0x3af   :  { %v6718_v23 = vpop.f32.mrb[136].mxu0 }
 0x3b0   :  { %v6848_v47 = vadd.f32 %v6718_v23, %v6579_v41  ;;  %v6720_v6 = vpop.f32.mrb[137].mxu0  ;;  %v14102_v41 = vpack.c.bf16 %v13953_v38, %v13953_v38  ;;  %v6965_v23 = vpop.permute.xlu0 %6964 }
 0x3b1   :  { %v6849_v19 = vadd.f32 %v6720_v6, %v6580_v7  ;;  %8323 = vrot.lane.b32.xlu0 %v14044_v36, %s11677_s18  ;;  %v6722_v13 = vpop.f32.mrb[138].mxu0 }
 0x3b2   :  { %v6856_v18 = vadd.f32 %v6848_v47, %v13876_v52  ;;  %v6723_v24 = vpop.f32.mrb[139].mxu0  ;;  %8325 = vrot.lane.b32.xlu1 %v14040_v42, %s11677_s18 }
 0x3b3   :  { %v6857_v15 = vadd.f32 %v6849_v19, %v13876_v52  ;;  %v5952_v14 = vpop.f32.mrb[112].mxu1  ;;  %v6963_v19 = vpop.permute.xlu1 %6962 }
 0x3b4   :  { %v6864_v35 = vmax.f32 %v6856_v18, 0.0  ;;  %v6043_v44 = vadd.f32 %v5952_v14, %v5774_v1  ;;  %v5954_v40 = vpop.f32.mrb[113].mxu1 }
 0x3b5   :  { %v6865_v5 = vmax.f32 %v6857_v15, 0.0  ;;  %v6044_v63 = vadd.f32 %v5954_v40, %v5775_v3  ;;  %8327 = vrot.lane.b32.xlu0 %v14056_v39, %s11677_s18  ;;  %v5956_v33 = vpop.f32.mrb[114].mxu1  ;;  %v7181_v15 = vpop.permute.xlu0 %7180 }
 0x3b6   :  { %v14083_v17 = vmul.f32 %v6864_v35, %v15098_v43  ;;  %v5957_v46 = vpop.f32.mrb[115].mxu1  ;;  %8329 = vrot.lane.b32.xlu1 %v14052_v20, %s11677_s18  ;;  %v6980_v33 = vsel %vm337_vm2, %v6963_v19, %v6965_v23 }
 0x3b7   :  { %v14088_v54 = vmul.f32 %v6865_v5, %v15099_v57  ;;  %v7183_v14 = vpop.permute.xlu1 %7182 }
 0x3b9   :  { %v11539_v32 = vpack.c.bf16 %v14088_v54, %v14083_v17  ;;  %8331 = vrot.lane.b32.xlu0 %v14068_v34, %s11677_s18 }
 0x3ba   :  { %8333 = vrot.lane.b32.xlu1 %v14064_v16, %s11677_s18 }
 0x3bb   :  { %6912 = vst [vmem:[#allocation3 + $0x24] sm:$0xff] %v11539_v32  ;;  %v6034_v27 = vpop.f32.mrb[116].mxu1 }
 0x3bc   :  { %v6047_v30 = vadd.f32 %v6034_v27, %v5778_v8  ;;  %v6036_v61 = vpop.f32.mrb[117].mxu1 }
 0x3bd   :  { %v6048_v29 = vadd.f32 %v6036_v61, %v5779_v59  ;;  %8112 = vrot.lane.b32.xlu0 %v14098_v50, %s11676_s11  ;;  %v6038_v7 = vpop.f32.mrb[118].mxu1  ;;  %v6993_v61 = vsel %vm184_vm0, %v6980_v33, 0 }
 0x3be   :  { %v6039_v9 = vpop.f32.mrb[119].mxu1  ;;  %8110 = vrot.lane.b32.xlu1 %v14102_v41, %s11676_s11 }
 0x3c0   :  { %v6800_v49 = vpop.f32.mrb[140].mxu0 }
 0x3c1   :  { %8335 = vrot.lane.b32.xlu0 %v14102_v41, %s11677_s18  ;;  %v6852_v26 = vadd.f32 %v6800_v49, %v6583_v21  ;;  %v6802_v28 = vpop.f32.mrb[141].mxu0 }
 0x3c2   :  { %v6853_v1 = vadd.f32 %v6802_v28, %v6584_v62  ;;  %v14110_v51 = vld [vmem:[#allocation3 + $0x24] ss:$0 sps:$4 sm:$0xff]   ;;  %v6804_v38 = vpop.f32.mrb[142].mxu0 }
 0x3c3   :  { %v6860_v3 = vadd.f32 %v6852_v26, %v13876_v52  ;;  %v6221_v58 = vpop.f32.mrb[120].mxu1  ;;  %v6805_v11 = vpop.f32.mrb[143].mxu0  ;;  %8114 = vrot.lane.b32.xlu1 %v14110_v51, %s11676_s11 }
 0x3c4   :  { %v6861_v25 = vadd.f32 %v6853_v1, %v13876_v52  ;;  %v6312_v10 = vadd.f32 %v6221_v58, %v6043_v44  ;;  %v6223_v48 = vpop.f32.mrb[121].mxu1 }
 0x3c5   :  { %v6868_v56 = vmax.f32 %v6860_v3, 0.0  ;;  %v6313_v60 = vadd.f32 %v6223_v48, %v6044_v63  ;;  %8550 = vrot.lane.b32.xlu0 %v14040_v42, %s11678_s2  ;;  %v6225_v21 = vpop.f32.mrb[122].mxu1 }
 0x3c6   :  { %v6869_v62 = vmax.f32 %v6861_v25, 0.0  ;;  %v6226_v8 = vpop.f32.mrb[123].mxu1 }
 0x3c7   :  { %v14119_v4 = vmul.f32 %v6868_v56, %v15100_v53  ;;  %8337 = vrot.lane.b32.xlu1 %v14098_v50, %s11677_s18  ;;  %v7198_v56 = vsel %vm186_vm1, %v7181_v15, %v7183_v14 }
 0x3c8   :  { %v14122_v59 = vmul.f32 %v6869_v62, %v15101_v22 }
 0x3c9   :  { %8554 = vrot.lane.b32.xlu0 %v14052_v20, %s11678_s2 }
 0x3ca   :  { %v11541_v37 = vpack.c.bf16 %v14122_v59, %v14119_v4 }
 0x3cb   :  { %v6303_v2 = vpop.f32.mrb[124].mxu1  ;;  %8548 = vrot.lane.b32.xlu1 %v14044_v36, %s11678_s2 }
 0x3cc   :  { %6914 = vst [vmem:[#allocation3 + $0x34] sm:$0xff] %v11541_v37  ;;  %v6316_v47 = vadd.f32 %v6303_v2, %v6047_v30  ;;  %v6305_v6 = vpop.f32.mrb[125].mxu1 }
 0x3cd   :  { %v6317_v13 = vadd.f32 %v6305_v6, %v6048_v29  ;;  %8558 = vrot.lane.b32.xlu0 %v14064_v16, %s11678_s2  ;;  %v6307_v18 = vpop.f32.mrb[126].mxu1  ;;  %v14153_v29 = vld [vmem:[%s14977_s6 + $0x2] sm:$0x3] }
 0x3ce   :  { %v6308_v24 = vpop.f32.mrb[127].mxu1 }
 0x3cf   :  { %8552 = vrot.lane.b32.xlu1 %v14056_v39, %s11678_s2  ;;  %v7210_v24 = vsel %vm184_vm0, %v7198_v56, 0 }
 0x3d1   :  { %8339 = vrot.lane.b32.xlu0 %v14110_v51, %s11677_s18 }
 0x3d3   :  { %v6490_v35 = vpop.f32.mrb[128].mxu1  ;;  %8556 = vrot.lane.b32.xlu1 %v14068_v34, %s11678_s2 }
 0x3d4   :  { %v6581_v44 = vadd.f32 %v6490_v35, %v6312_v10  ;;  %v6492_v40 = vpop.f32.mrb[129].mxu1 }
 0x3d5   :  { %v6582_v5 = vadd.f32 %v6492_v40, %v6313_v60  ;;  %8562 = vrot.lane.b32.xlu0 %v14098_v50, %s11678_s2  ;;  %v6494_v63 = vpop.f32.mrb[130].mxu1 }
 0x3d6   :  { %v6495_v46 = vpop.f32.mrb[131].mxu1 }
 0x3d7   :  { %v6969_v32 = vpop.permute.xlu0 %6968  ;;  %v6967_v27 = vpop.permute.xlu1 %6966  ;;  %8560 = vrot.lane.b32.xlu1 %v14102_v41, %s11678_s2 }
 0x3d8   :  { %v6981_v30 = vsel %vm337_vm2, %v6965_v23, %v6967_v27  ;;  %v6982_v7 = vsel %vm337_vm2, %v6967_v27, %v6969_v32 }
 0x3d9   :  { %8773 = vrot.lane.b32.xlu0 %v14044_v36, %s11679_s27  ;;  %11348 = vmatprep.subr.msk.bf16.mxu0 %vm184_vm0, %v6981_v30  ;;  %v6999_v11 = vsel %vm184_vm0, %v6982_v7, 0 }
 0x3da   :  { %7017 = vmatpush1.bf16.msra.mxu0 %v6993_v61  ;;  %v14219_v61 = vld [vmem:[%s14977_s6] sm:$0x3] }
 0x3db   :  { %v7185_v9 = vpop.permute.xlu0 %7184  ;;  %v6572_v49 = vpop.f32.mrb[132].mxu1  ;;  %8775 = vrot.lane.b32.xlu1 %v14040_v42, %s11679_s27 }
 0x3dc   :  { %v14156_v26 = vadd.f32 %v6572_v49, %v6316_v47  ;;  %v6971_v28 = vpop.permute.xlu1 %6970  ;;  %v6574_v1 = vpop.f32.mrb[133].mxu1 }
 0x3dd   :  { %v14160_v36 = vadd.f32 %v6574_v1, %v6317_v13  ;;  %8777 = vrot.lane.b32.xlu0 %v14056_v39, %s11679_s27  ;;  %v6576_v38 = vpop.f32.mrb[134].mxu1  ;;  %v6983_v3 = vsel %vm337_vm2, %v6969_v32, %v6971_v28  ;;  %11349 = vmatmul.mubr.msk.bf16.vlgmr.msra.gmra.mrb[144].mxu0 %vm6988_vm11, %v14153_v29 }
 0x3de   :  { %11350 = vmatprep.subr.msk.bf16.mxu1 %vm184_vm0, %v6983_v3  ;;  %v6577_v58 = vpop.f32.mrb[135].mxu1  ;;  %7130 = vmatprep.mubr.bf16.mxu0 %v15063_v0 }
 0x3df   :  { %7058 = vmatpush1.bf16.msra.mxu1 %v6999_v11  ;;  %v6973_v42 = vpop.permute.xlu0 %6972  ;;  %8779 = vrot.lane.b32.xlu1 %v14052_v20, %s11679_s27  ;;  %v7199_v20 = vsel %vm186_vm1, %v7183_v14, %v7185_v9 }
 0x3e0   :  { %v6984_v25 = vsel %vm337_vm2, %v6971_v28, %v6973_v42  ;;  %v6975_v39 = vpop.permute.xlu1 %6974 }
 0x3e1   :  { %8781 = vrot.lane.b32.xlu0 %v14068_v34, %s11679_s27  ;;  %v6985_v10 = vsel %vm337_vm2, %v6973_v42, %v6975_v39  ;;  %v7005_v48 = vsel %vm184_vm0, %v6984_v25, 0 }
 0x3e2   :  { %11351 = vmatmul.mubr.msk.bf16.vlgmr.msra.gmra.mrb[144].mxu1 %vm6988_vm11, %v14153_v29  ;;  %11352 = vmatprep.subr.msk.bf16.mxu0 %vm184_vm0, %v6985_v10 }
 0x3e3   :  { %v6977_v60 = vpop.permute.xlu0 %6976  ;;  %v6759_v21 = vpop.f32.mrb[136].mxu1  ;;  %7099 = vmatpush1.bf16.msra.mxu0 %v7005_v48  ;;  %7171 = vmatprep.mubr.bf16.mxu1 %v15063_v0 }
 0x3e4   :  { %v6986_v62 = vsel %vm337_vm2, %v6975_v39, %v6977_v60  ;;  %v6850_v8 = vadd.f32 %v6759_v21, %v6581_v44  ;;  %v6761_v37 = vpop.f32.mrb[137].mxu1  ;;  %8564 = vrot.lane.b32.xlu1 %v14110_v51, %s11678_s2  ;;  %11356 = vmatprep.subr.msk.bf16.mxu0 %vm184_vm0, %v7199_v20  ;;  %v6979_v2 = vpop.permute.xlu1 %6978  ;;  %v9047_v44 = vld [vmem:[#allocation3 + $0x20] sm:$0xff] }
 0x3e5   :  { %v6851_v23 = vadd.f32 %v6761_v37, %v6582_v5  ;;  %8785 = vrot.lane.b32.xlu0 %v14102_v41, %s11679_s27  ;;  %v6763_v47 = vpop.f32.mrb[138].mxu1  ;;  %v6987_v6 = vsel %vm337_vm2, %v6977_v60, %v6979_v2  ;;  %v7011_v18 = vsel %vm184_vm0, %v6986_v62, 0 }
 0x3e6   :  { %v6858_v19 = vadd.f32 %v6850_v8, %v13876_v52  ;;  %v6764_v13 = vpop.f32.mrb[139].mxu1  ;;  %11353 = vmatmul.mubr.msk.bf16.vlgmr.msra.gmra.mrb[148].mxu0 %vm6988_vm11, %v14153_v29  ;;  %11354 = vmatprep.subr.msk.bf16.mxu1 %vm184_vm0, %v6987_v6 }
 0x3e7   :  { %v6859_v15 = vadd.f32 %v6851_v23, %v13876_v52  ;;  %v7189_v14 = vpop.permute.xlu0 %7188  ;;  %7140 = vmatpush1.bf16.msra.mxu1 %v7011_v18  ;;  %7234 = vmatpush1.bf16.msra.mxu0 %v7210_v24 }
 0x3e8   :  { %v6866_v41 = vmax.f32 %v6858_v19, 0.0  ;;  %8783 = vrot.lane.b32.xlu1 %v14064_v16, %s11679_s27  ;;  %v7187_v35 = vpop.permute.xlu1 %7186  ;;  %7265 = vmatprep.mubr.bf16.mxu0 %v15063_v0 }
 0x3e9   :  { %v6867_v40 = vmax.f32 %v6859_v15, 0.0  ;;  %8789 = vrot.lane.b32.xlu0 %v14110_v51, %s11679_s27  ;;  %v7200_v5 = vsel %vm186_vm1, %v7185_v9, %v7187_v35  ;;  %v7201_v63 = vsel %vm186_vm1, %v7187_v35, %v7189_v14  ;;  %v14214_v51 = vcombine.high %v9047_v44, %v9047_v44 }
 0x3ea   :  { %v14205_v33 = vmul.f32 %v6866_v41, %v15102_v45  ;;  %11355 = vmatmul.mubr.msk.bf16.vlgmr.msra.gmra.mrb[148].mxu1 %vm6988_vm11, %v14153_v29  ;;  %11358 = vmatprep.subr.msk.bf16.mxu1 %vm184_vm0, %v7201_v63  ;;  %v7216_v46 = vsel %vm184_vm0, %v7200_v5, 0 }
 0x3eb   :  { %v14212_v32 = vmul.f32 %v6867_v40, %v15103_v55  ;;  %v7400_v27 = vpop.permute.xlu0 %7399  ;;  %v6841_v30 = vpop.f32.mrb[140].mxu1  ;;  %7275 = vmatpush1.bf16.msra.mxu1 %v7216_v46  ;;  %7306 = vmatprep.mubr.bf16.mxu1 %v15063_v0 }
 0x3ec   :  { %v6854_v7 = vadd.f32 %v6841_v30, %v14156_v26  ;;  %v6843_v9 = vpop.f32.mrb[141].mxu1  ;;  %8787 = vrot.lane.b32.xlu1 %v14098_v50, %s11679_s27  ;;  %v7191_v49 = vpop.permute.xlu1 %7190  ;;  %v14234_v26 = vcombine.low %v9047_v44, %v9047_v44  ;;  %v14285_v44 = vld [vmem:[%s14977_s6 + $0x4] sm:$0x3] }
 0x3ed   :  { %v11540_v28 = vpack.c.bf16 %v14212_v32, %v14205_v33  ;;  %v6855_v1 = vadd.f32 %v6843_v9, %v14160_v36  ;;  %9077 = vrot.lane.b32.xlu0 %v14214_v51, %s11673_s20  ;;  %v6845_v38 = vpop.f32.mrb[142].mxu1  ;;  %v7202_v58 = vsel %vm186_vm1, %v7189_v14, %v7191_v49 }
 0x3ee   :  { %v6862_v3 = vadd.f32 %v6854_v7, %v13876_v52  ;;  %v6846_v11 = vpop.f32.mrb[143].mxu1  ;;  %11357 = vmatmul.mubr.msk.bf16.vlgmr.msra.gmra.mrb[152].mxu0 %vm6988_vm11, %v14219_v61  ;;  %v7222_v48 = vsel %vm184_vm0, %v7202_v58, 0 }
 0x3ef   :  { %6913 = vst [vmem:[#allocation3 + $0x2c] sm:$0xff] %v11540_v28  ;;  %v6863_v50 = vadd.f32 %v6855_v1, %v13876_v52  ;;  %v7193_v42 = vpop.permute.xlu0 %7192  ;;  %7347 = vmatprep.mubr.bf16.mxu0 %v15063_v0 }
 0x3f0   :  { %v6870_v36 = vmax.f32 %v6862_v3, 0.0  ;;  %9075 = vrot.lane.b32.xlu1 %v14234_v26, %s11673_s20  ;;  %v7203_v25 = vsel %vm186_vm1, %v7191_v49, %v7193_v42  ;;  %v7398_v39 = vpop.permute.xlu1 %7397 }
 0x3f1   :  { %v6871_v10 = vmax.f32 %v6863_v50, 0.0  ;;  %9289 = vrot.lane.b32.xlu0 %v14234_v26, %s11672_s19  ;;  %11360 = vmatprep.subr.msk.bf16.mxu0 %vm184_vm0, %v7203_v25  ;;  %v7415_v23 = vsel %vm488_vm3, %v7398_v39, %v7400_v27 }
 0x3f2   :  { %v14246_v52 = vmul.f32 %v6870_v36, %v15104_v31  ;;  %7316 = vmatpush1.bf16.msra.mxu0 %v7222_v48  ;;  %11359 = vmatmul.mubr.msk.bf16.vlgmr.msra.gmra.mrb[152].mxu1 %vm6988_vm11, %v14219_v61  ;;  %v7427_v15 = vsel %vm184_vm0, %v7415_v23, 0 }
 0x3f3   :  { %v14251_v56 = vmul.f32 %v6871_v10, %v15105_v12  ;;  %v7197_v60 = vpop.permute.xlu0 %7196  ;;  %7388 = vmatprep.mubr.bf16.mxu1 %v15063_v0 }
 0x3f4   :  { %9291 = vrot.lane.b32.xlu1 %v14214_v51, %s11672_s19  ;;  %v7195_v21 = vpop.permute.xlu1 %7194 }
 0x3f5   :  { %v11542_v20 = vpack.c.bf16 %v14251_v56, %v14246_v52  ;;  %v7204_v62 = vsel %vm186_vm1, %v7193_v42, %v7195_v21  ;;  %v7205_v8 = vsel %vm186_vm1, %v7195_v21, %v7197_v60 }
 0x3f6   :  { %11361 = vmatmul.mubr.msk.bf16.vlgmr.msra.gmra.mrb[156].mxu0 %vm6988_vm11, %v14219_v61  ;;  %11362 = vmatprep.subr.msk.bf16.mxu1 %vm184_vm0, %v7205_v8  ;;  %v7228_v37 = vsel %vm184_vm0, %v7204_v62, 0  ;;  %v9048_v2 = vld [vmem:[#allocation3 + $0x28] sm:$0xff]  ;;  %v9049_v18 = vld [vmem:[#allocation3 + $0x30] sm:$0xff] }
 0x3f7   :  { %6915 = vst [vmem:[#allocation3 + $0x3c] sm:$0xff] %v11542_v20  ;;  %v7404_v47 = vpop.permute.xlu0 %7403  ;;  %7357 = vmatpush1.bf16.msra.mxu1 %v7228_v37  ;;  %v14265_v6 = vcombine.high %v9048_v2, %v9048_v2  ;;  %v14267_v19 = vcombine.low %v9048_v2, %v9048_v2  ;;  %7482 = vmatprep.mubr.bf16.mxu0 %v15063_v0  ;;  %v14341_v20 = vld [vmem:[%s14977_s6 + $0x6] sm:$0x3] }
 0x3f8   :  { %v7402_v13 = vpop.permute.xlu1 %7401  ;;  %v14280_v35 = vcombine.low %v9049_v18, %v9049_v18  ;;  %v14298_v7 = vcombine.high %v9049_v18, %v9049_v18 }
 0x3f9   :  { %9081 = vrot.lane.b32.xlu0 %v14265_v6, %s11673_s20  ;;  %9079 = vrot.lane.b32.xlu1 %v14267_v19, %s11673_s20  ;;  %v7416_v24 = vsel %vm488_vm3, %v7400_v27, %v7402_v13  ;;  %v7417_v14 = vsel %vm488_vm3, %v7402_v13, %v7404_v47 }
 0x3fa   :  { %11363 = vmatmul.mubr.msk.bf16.vlgmr.msra.gmra.mrb[156].mxu1 %vm6988_vm11, %v14219_v61  ;;  %11364 = vmatprep.subr.msk.bf16.mxu0 %vm184_vm0, %v7416_v24  ;;  %v7433_v63 = vsel %vm184_vm0, %v7417_v14, 0 }
 0x3fb   :  { %v7408_v41 = vpop.permute.xlu0 %7407  ;;  %7451 = vmatpush1.bf16.msra.mxu0 %v7427_v15  ;;  %7523 = vmatprep.mubr.bf16.mxu1 %v15063_v0 }
 0x3fc   :  { %v7406_v40 = vpop.permute.xlu1 %7405 }
 0x3fd   :  { %9293 = vrot.lane.b32.xlu0 %v14267_v19, %s11672_s19  ;;  %9083 = vrot.lane.b32.xlu1 %v14280_v35, %s11673_s20  ;;  %v7418_v5 = vsel %vm488_vm3, %v7404_v47, %v7406_v40  ;;  %v7419_v27 = vsel %vm488_vm3, %v7406_v40, %v7408_v41  ;;  %v7847_v47 = vld [vmem:[#allocation3 + $0x4] sm:$0xff] }
 0x3fe   :  { %11365 = vmatmul.mubr.msk.bf16.vlgmr.msra.gmra.mrb[160].mxu0 %vm6988_vm11, %v14285_v44  ;;  %11366 = vmatprep.subr.msk.bf16.mxu1 %vm184_vm0, %v7418_v5  ;;  %v9050_v46 = vld [vmem:[#allocation3 + $0x38] sm:$0xff]  ;;  %v7439_v1 = vsel %vm184_vm0, %v7419_v27, 0  ;;  %v14314_v58 = vld [vmem:[#allocation3 + $0x40] ss:$0 sps:$4 sm:$0xff]   ;;  %v11381_v14 = vcombine.high %v7847_v47, %v7847_v47  ;;  %v7848_v5 = vld [vmem:[#allocation3 + $0xc] sm:$0xff] }
 0x3ff   :  { %v7623_v30 = vpop.permute.xlu0 %7622  ;;  %7492 = vmatpush1.bf16.msra.mxu1 %v7433_v63  ;;  %v14300_v9 = vcombine.low %v9050_v46, %v9050_v46  ;;  %7564 = vmatprep.mubr.bf16.mxu0 %v15063_v0  ;;  %v14312_v3 = vcombine.high %v9050_v46, %v9050_v46 }
 0x400   :  { %v7410_v49 = vpop.permute.xlu1 %7409 }
 0x401   :  { %9085 = vrot.lane.b32.xlu0 %v14298_v7, %s11673_s20  ;;  %9087 = vrot.lane.b32.xlu1 %v14300_v9, %s11673_s20  ;;  %v7420_v28 = vsel %vm488_vm3, %v7408_v41, %v7410_v49  ;;  %v11380_v41 = vcombine.low %v7847_v47, %v7847_v47 }
 0x402   :  { %11367 = vmatmul.mubr.msk.bf16.vlgmr.msra.gmra.mrb[160].mxu1 %vm6988_vm11, %v14285_v44  ;;  %11368 = vmatprep.subr.msk.bf16.mxu0 %vm184_vm0, %v7420_v28  ;;  %v11383_v28 = vcombine.high %v7848_v5, %v7848_v5 }
 0x403   :  { %v7412_v38 = vpop.permute.xlu0 %7411  ;;  %7533 = vmatpush1.bf16.msra.mxu0 %v7439_v1  ;;  %7605 = vmatprep.mubr.bf16.mxu1 %v15063_v0  ;;  %v11382_v1 = vcombine.low %v7848_v5, %v7848_v5 }
 0x404   :  { %v7421_v11 = vsel %vm488_vm3, %v7410_v49, %v7412_v38  ;;  %v7414_v50 = vpop.permute.xlu1 %7413  ;;  %v7875_v49 = vsel %vm184_vm0, %v11380_v41, 0 }
 0x405   :  { %9089 = vrot.lane.b32.xlu0 %v14312_v3, %s11673_s20  ;;  %9091 = vrot.lane.b32.xlu1 %v14314_v58, %s11673_s20  ;;  %v7422_v42 = vsel %vm488_vm3, %v7412_v38, %v7414_v50  ;;  %v7445_v36 = vsel %vm184_vm0, %v7421_v11, 0  ;;  %v7850_v11 = vld [vmem:[#allocation3 + $0x1c] sm:$0xff] }
 0x406   :  { %11369 = vmatmul.mubr.msk.bf16.vlgmr.msra.gmra.mrb[164].mxu0 %vm6988_vm11, %v14285_v44  ;;  %11370 = vmatprep.subr.msk.bf16.mxu1 %vm184_vm0, %v7422_v42  ;;  %v7881_v42 = vsel %vm184_vm0, %v11382_v1, 0 }
 0x407   :  { %v7627_v25 = vpop.permute.xlu0 %7626  ;;  %7574 = vmatpush1.bf16.msra.mxu1 %v7445_v36  ;;  %7707 = vmatprep.mubr.bf16.mxu0 %v15063_v0  ;;  %v11387_v36 = vcombine.high %v7850_v11, %v7850_v11 }
 0x408   :  { %v7625_v39 = vpop.permute.xlu1 %7624 }
 0x409   :  { %9297 = vrot.lane.b32.xlu0 %v14280_v35, %s11672_s19  ;;  %9295 = vrot.lane.b32.xlu1 %v14265_v6, %s11672_s19  ;;  %v7640_v10 = vsel %vm639_vm4, %v7623_v30, %v7625_v39  ;;  %v7641_v48 = vsel %vm639_vm4, %v7625_v39, %v7627_v25 }
 0x40a   :  { %11371 = vmatmul.mubr.msk.bf16.vlgmr.msra.gmra.mrb[164].mxu1 %vm6988_vm11, %v14285_v44  ;;  %11372 = vmatprep.subr.msk.bf16.mxu0 %vm184_vm0, %v7641_v48  ;;  %v7652_v60 = vsel %vm184_vm0, %v7640_v10, 0  ;;  %v7887_v48 = vsel %vm184_vm0, %v14068_v34, 0 }
 0x40b   :  { %v7631_v21 = vpop.permute.xlu0 %7630  ;;  %7676 = vmatpush1.bf16.msra.mxu0 %v7652_v60  ;;  %7748 = vmatprep.mubr.bf16.mxu1 %v15063_v0  ;;  %v11386_v60 = vcombine.low %v7850_v11, %v7850_v11 }
 0x40c   :  { %v7629_v62 = vpop.permute.xlu1 %7628 }
 0x40d   :  { %9505 = vrot.lane.b32.xlu0 %v14214_v51, %s11674_s21  ;;  %9299 = vrot.lane.b32.xlu1 %v14298_v7, %s11672_s19  ;;  %v7642_v8 = vsel %vm639_vm4, %v7627_v25, %v7629_v62  ;;  %v7643_v37 = vsel %vm639_vm4, %v7629_v62, %v7631_v21  ;;  %v7893_v34 = vsel %vm184_vm0, %v11386_v60, 0  ;;  %v14520_v60 = vpack.c.bf16 %v14119_v4, %v14119_v4 }
 0x40e   :  { %11373 = vmatmul.mubr.msk.bf16.vlgmr.msra.gmra.mrb[168].mxu0 %vm6988_vm11, %v14341_v20  ;;  %11374 = vmatprep.subr.msk.bf16.mxu1 %vm184_vm0, %v7643_v37  ;;  %v7658_v2 = vsel %vm184_vm0, %v7642_v8, 0 }
 0x40f   :  { %v7635_v23 = vpop.permute.xlu0 %7634  ;;  %7717 = vmatpush1.bf16.msra.mxu1 %v7658_v2  ;;  %7789 = vmatprep.mubr.bf16.mxu0 %v15063_v0 }
 0x410   :  { %v7633_v13 = vpop.permute.xlu1 %7632 }
 0x411   :  { %9301 = vrot.lane.b32.xlu0 %v14300_v9, %s11672_s19  ;;  %9503 = vrot.lane.b32.xlu1 %v14234_v26, %s11674_s21  ;;  %v7644_v18 = vsel %vm639_vm4, %v7631_v21, %v7633_v13  ;;  %v7645_v24 = vsel %vm639_vm4, %v7633_v13, %v7635_v23 }
 0x412   :  { %11375 = vmatmul.mubr.msk.bf16.vlgmr.msra.gmra.mrb[168].mxu1 %vm6988_vm11, %v14341_v20  ;;  %11376 = vmatprep.subr.msk.bf16.mxu0 %vm184_vm0, %v7645_v24  ;;  %v7664_v15 = vsel %vm184_vm0, %v7644_v18, 0 }
 0x413   :  { %v7639_v40 = vpop.permute.xlu0 %7638  ;;  %7758 = vmatpush1.bf16.msra.mxu0 %v7664_v15  ;;  %7830 = vmatprep.mubr.bf16.mxu1 %v15063_v0 }
 0x414   :  { %11388 = vmatprep.subr.msk.bf16.mxu0 %vm184_vm0, %v11381_v14  ;;  %v7637_v63 = vpop.permute.xlu1 %7636  ;;  %v14437_v14 = vld [vmem:[%s14977_s6 + $0xa] sm:$0x3] }
 0x415   :  { %9305 = vrot.lane.b32.xlu0 %v14314_v58, %s11672_s19  ;;  %9303 = vrot.lane.b32.xlu1 %v14312_v3, %s11672_s19  ;;  %v7646_v46 = vsel %vm639_vm4, %v7635_v23, %v7637_v63  ;;  %v7647_v27 = vsel %vm639_vm4, %v7637_v63, %v7639_v40 }
 0x416   :  { %11377 = vmatmul.mubr.msk.bf16.vlgmr.msra.gmra.mrb[172].mxu0 %vm6988_vm11, %v14341_v20  ;;  %11378 = vmatprep.subr.msk.bf16.mxu1 %vm184_vm0, %v7647_v27  ;;  %v7670_v30 = vsel %vm184_vm0, %v7646_v46, 0 }
 0x417   :  { %v8101_v38 = vpop.permute.xlu0 %8100  ;;  %7799 = vmatpush1.bf16.msra.mxu1 %v7670_v30  ;;  %7899 = vmatpush1.bf16.msra.mxu0 %v7875_v49  ;;  %v14471_v30 = vpack.c.bf16 %v14088_v54, %v14088_v54 }
 0x418   :  { %11390 = vmatprep.subr.msk.bf16.mxu1 %vm184_vm0, %v11383_v28  ;;  %11392 = vmatprep.subr.msk.bf16.mxu0 %vm184_vm0, %v14064_v16  ;;  %v8099_v50 = vpop.permute.xlu1 %8098  ;;  %v14392_v16 = vld [vmem:[%s14977_s6 + $0x8] sm:$0x3] }
 0x419   :  { %9509 = vrot.lane.b32.xlu0 %v14265_v6, %s11674_s21  ;;  %9507 = vrot.lane.b32.xlu1 %v14267_v19, %s11674_s21  ;;  %v8116_v37 = vsel %vm904_vm5, %v8099_v50, %v8101_v38 }
 0x41a   :  { %11379 = vmatmul.mubr.msk.bf16.vlgmr.msra.gmra.mrb[172].mxu1 %vm6988_vm11, %v14341_v20  ;;  %7930 = vmatprep.mubr.bf16.mxu0 %v15063_v0 }
 0x41b   :  { %v8105_v25 = vpop.permute.xlu0 %8104  ;;  %7940 = vmatpush1.bf16.msra.mxu1 %v7881_v42  ;;  %7971 = vmatprep.mubr.bf16.mxu1 %v15063_v0  ;;  %v14493_v42 = vpack.c.bf16 %v14212_v32, %v14212_v32 }
 0x41c   :  { %11394 = vmatprep.subr.msk.bf16.mxu1 %vm184_vm0, %v11387_v36  ;;  %v8103_v39 = vpop.permute.xlu1 %8102  ;;  %v14497_v36 = vpack.c.bf16 %v14205_v33, %v14205_v33 }
 0x41d   :  { %9513 = vrot.lane.b32.xlu0 %v14298_v7, %s11674_s21  ;;  %9511 = vrot.lane.b32.xlu1 %v14280_v35, %s11674_s21  ;;  %v8117_v10 = vsel %vm904_vm5, %v8101_v38, %v8103_v39  ;;  %v8118_v47 = vsel %vm904_vm5, %v8103_v39, %v8105_v25 }
 0x41e   :  { %11389 = vmatmul.mubr.msk.bf16.vlgmr.msra.gmra.mrb[176].mxu0 %vm6988_vm11, %v14392_v16  ;;  %v8134_v24 = vsel %vm184_vm0, %v8118_v47, 0 }
 0x41f   :  { %v8109_v21 = vpop.permute.xlu0 %8108  ;;  %7981 = vmatpush1.bf16.msra.mxu0 %v7887_v48  ;;  %8012 = vmatprep.mubr.bf16.mxu0 %v15063_v0  ;;  %v14516_v48 = vpack.c.bf16 %v14122_v59, %v14122_v59 }
 0x420   :  { %11405 = vmatprep.subr.msk.bf16.mxu0 %vm184_vm0, %v8117_v10  ;;  %v8107_v62 = vpop.permute.xlu1 %8106 }
 0x421   :  { %9725 = vrot.lane.b32.xlu0 %v14234_v26, %s11675_s24  ;;  %9515 = vrot.lane.b32.xlu1 %v14300_v9, %s11674_s21  ;;  %v8119_v8 = vsel %vm904_vm5, %v8105_v25, %v8107_v62  ;;  %v8128_v26 = vsel %vm184_vm0, %v8116_v37, 0  ;;  %v14502_v25 = vld [vmem:[%s14977_s6 + $0xc] sm:$0x3] }
 0x422   :  { %11391 = vmatmul.mubr.msk.bf16.vlgmr.msra.gmra.mrb[176].mxu1 %vm6988_vm11, %v14392_v16 }
 0x423   :  { %v8324_v2 = vpop.permute.xlu0 %8323  ;;  %8022 = vmatpush1.bf16.msra.mxu1 %v7893_v34  ;;  %8053 = vmatprep.mubr.bf16.mxu1 %v15063_v0 }
 0x424   :  { %11407 = vmatprep.subr.msk.bf16.mxu1 %vm184_vm0, %v8119_v8  ;;  %v8326_v23 = vpop.permute.xlu1 %8325 }
 0x425   :  { %9517 = vrot.lane.b32.xlu0 %v14312_v3, %s11674_s21  ;;  %9519 = vrot.lane.b32.xlu1 %v14314_v58, %s11674_s21  ;;  %v8341_v5 = vsel %vm1055_vm6, %v8324_v2, %v8326_v23 }
 0x426   :  { %11393 = vmatmul.mubr.msk.bf16.vlgmr.msra.gmra.mrb[180].mxu0 %vm6988_vm11, %v14392_v16  ;;  %v8353_v27 = vsel %vm184_vm0, %v8341_v5, 0 }
 0x427   :  { %v8328_v13 = vpop.permute.xlu0 %8327  ;;  %8152 = vmatpush1.bf16.msra.mxu0 %v8128_v26  ;;  %8183 = vmatprep.mubr.bf16.mxu0 %v15063_v0 }
 0x428   :  { %v8330_v18 = vpop.permute.xlu1 %8329  ;;  %v8342_v46 = vsel %vm1055_vm6, %v8326_v23, %v8328_v13 }
 0x429   :  { %9729 = vrot.lane.b32.xlu0 %v14267_v19, %s11675_s24  ;;  %9727 = vrot.lane.b32.xlu1 %v14214_v51, %s11675_s24  ;;  %v8120_v51 = vsel %vm904_vm5, %v8107_v62, %v8109_v21 }
 0x42a   :  { %11395 = vmatmul.mubr.msk.bf16.vlgmr.msra.gmra.mrb[180].mxu1 %vm6988_vm11, %v14392_v16 }
 0x42b   :  { %v8332_v15 = vpop.permute.xlu0 %8331  ;;  %8193 = vmatpush1.bf16.msra.mxu1 %v8134_v24  ;;  %8224 = vmatprep.mubr.bf16.mxu1 %v15063_v0 }
 0x42c   :  { %v8334_v41 = vpop.permute.xlu1 %8333  ;;  %v8344_v54 = vsel %vm1055_vm6, %v8330_v18, %v8332_v15 }
 0x42d   :  { %9733 = vrot.lane.b32.xlu0 %v14280_v35, %s11675_s24  ;;  %9731 = vrot.lane.b32.xlu1 %v14265_v6, %s11675_s24  ;;  %v8140_v6 = vsel %vm184_vm0, %v8120_v51, 0  ;;  %v8345_v11 = vsel %vm1055_vm6, %v8332_v15, %v8334_v41  ;;  %v14558_v51 = vpack.c.bf16 %v14251_v56, %v14251_v56 }
 0x42e   :  { %11406 = vmatmul.mubr.msk.bf16.vlgmr.msra.gmra.mrb[184].mxu0 %vm6988_vm11, %v14437_v14  ;;  %v8365_v33 = vsel %vm184_vm0, %v8345_v11, 0 }
 0x42f   :  { %v8113_v19 = vpop.permute.xlu0 %8112  ;;  %8265 = vmatprep.mubr.bf16.mxu0 %v15063_v0 }
 0x430   :  { %v8111_v40 = vpop.permute.xlu1 %8110 }
 0x431   :  { %9737 = vrot.lane.b32.xlu0 %v14300_v9, %s11675_s24  ;;  %9735 = vrot.lane.b32.xlu1 %v14298_v7, %s11675_s24  ;;  %v8121_v35 = vsel %vm904_vm5, %v8109_v21, %v8111_v40  ;;  %v8122_v7 = vsel %vm904_vm5, %v8111_v40, %v8113_v19  ;;  %v14528_v21 = vld [vmem:[#allocation3 + $0x44] ss:$0 sps:$4 sm:$0xff]  }
 0x432   :  { %11408 = vmatmul.mubr.msk.bf16.vlgmr.msra.gmra.mrb[184].mxu1 %vm6988_vm11, %v14437_v14  ;;  %11409 = vmatprep.subr.msk.bf16.mxu0 %vm184_vm0, %v8121_v35  ;;  %v8146_v1 = vsel %vm184_vm0, %v8122_v7, 0  ;;  %v14569_v35 = vld [vmem:[%s14977_s6 + $0xe] sm:$0x3] }
 0x433   :  { %v8336_v63 = vpop.permute.xlu0 %8335  ;;  %8234 = vmatpush1.bf16.msra.mxu0 %v8140_v6  ;;  %8306 = vmatprep.mubr.bf16.mxu1 %v15063_v0 }
 0x434   :  { %11413 = vmatprep.subr.msk.bf16.mxu0 %vm184_vm0, %v8342_v46  ;;  %v8346_v49 = vsel %vm1055_vm6, %v8334_v41, %v8336_v63 }
 0x435   :  { %9741 = vrot.lane.b32.xlu0 %v14314_v58, %s11675_s24  ;;  %9739 = vrot.lane.b32.xlu1 %v14312_v3, %s11675_s24  ;;  %v8115_v9 = vpop.permute.xlu1 %8114  ;;  %v14477_v3 = vpack.c.bf16 %v14083_v17, %v14083_v17  ;;  %v8343_v17 = vsel %vm1055_vm6, %v8328_v13, %v8330_v18 }
 0x436   :  { %11410 = vmatmul.mubr.msk.bf16.vlgmr.msra.gmra.mrb[188].mxu0 %vm6988_vm11, %v14437_v14  ;;  %v8123_v58 = vsel %vm904_vm5, %v8113_v19, %v8115_v9  ;;  %v8359_v32 = vsel %vm184_vm0, %v8343_v17, 0  ;;  %v14562_v19 = vpack.c.bf16 %v14246_v52, %v14246_v52 }
 0x437   :  { %v8551_v28 = vpop.permute.xlu0 %8550  ;;  %8377 = vmatpush1.bf16.msra.mxu0 %v8353_v27  ;;  %8408 = vmatprep.mubr.bf16.mxu0 %v15063_v0 }
 0x438   :  { %11411 = vmatprep.subr.msk.bf16.mxu1 %vm184_vm0, %v8123_v58  ;;  %11417 = vmatprep.subr.msk.bf16.mxu0 %vm184_vm0, %v8346_v49 }
 0x439   :  { %10197 = vrot.lane.b32.xlu0 %v14471_v30, %s11676_s11  ;;  %10195 = vrot.lane.b32.xlu1 %v14477_v3, %s11676_s11  ;;  %v8338_v38 = vpop.permute.xlu1 %8337 }
 0x43a   :  { %8275 = vmatpush1.bf16.msra.mxu1 %v8146_v1  ;;  %v8347_v59 = vsel %vm1055_vm6, %v8336_v63, %v8338_v38 }
 0x43b   :  { %v8555_v50 = vpop.permute.xlu0 %8554  ;;  %11415 = vmatprep.subr.msk.bf16.mxu1 %vm184_vm0, %v8344_v54  ;;  %v8371_v2 = vsel %vm184_vm0, %v8347_v59, 0 }
 0x43d   :  { %10201 = vrot.lane.b32.xlu0 %v14493_v42, %s11676_s11  ;;  %10199 = vrot.lane.b32.xlu1 %v14497_v36, %s11676_s11  ;;  %v8549_v39 = vpop.permute.xlu1 %8548 }
 0x43e   :  { %11412 = vmatmul.mubr.msk.bf16.vlgmr.msra.gmra.mrb[188].mxu1 %vm6988_vm11, %v14437_v14  ;;  %11414 = vmatmul.mubr.msk.bf16.vlgmr.msra.gmra.mrb[192].mxu0 %vm6988_vm11, %v14502_v25  ;;  %v8566_v4 = vsel %vm1206_vm7, %v8549_v39, %v8551_v28  ;;  %v14618_v39 = vld [vmem:[%s14977_s6 + $0x10] sm:$0x3] }
 0x43f   :  { %8418 = vmatpush1.bf16.msra.mxu1 %v8359_v32  ;;  %v8559_v10 = vpop.permute.xlu0 %8558  ;;  %8459 = vmatpush1.bf16.msra.mxu0 %v8365_v33  ;;  %v8578_v26 = vsel %vm184_vm0, %v8566_v4, 0 }
 0x440   :  { %8449 = vmatprep.mubr.bf16.mxu1 %v15063_v0  ;;  %8490 = vmatprep.mubr.bf16.mxu0 %v15063_v0 }
 0x441   :  { %10205 = vrot.lane.b32.xlu0 %v14516_v48, %s11676_s11  ;;  %10203 = vrot.lane.b32.xlu1 %v14520_v60, %s11676_s11  ;;  %v8553_v62 = vpop.permute.xlu1 %8552 }
 0x442   :  { %v8567_v34 = vsel %vm1206_vm7, %v8551_v28, %v8553_v62  ;;  %v8568_v24 = vsel %vm1206_vm7, %v8553_v62, %v8555_v50 }
 0x443   :  { %v8340_v8 = vpop.permute.xlu0 %8339  ;;  %11421 = vmatprep.subr.msk.bf16.mxu0 %vm184_vm0, %v8567_v34  ;;  %v8584_v56 = vsel %vm184_vm0, %v8568_v24, 0 }
 0x444   :  { %v8348_v37 = vsel %vm1055_vm6, %v8338_v38, %v8340_v8 }
 0x445   :  { %10417 = vrot.lane.b32.xlu0 %v14477_v3, %s11677_s18  ;;  %10211 = vrot.lane.b32.xlu1 %v14528_v21, %s11676_s11  ;;  %v8557_v23 = vpop.permute.xlu1 %8556 }
 0x446   :  { %11416 = vmatmul.mubr.msk.bf16.vlgmr.msra.gmra.mrb[192].mxu1 %vm6988_vm11, %v14502_v25  ;;  %11419 = vmatprep.subr.msk.bf16.mxu1 %vm184_vm0, %v8348_v37  ;;  %v8569_v13 = vsel %vm1206_vm7, %v8555_v50, %v8557_v23  ;;  %v8570_v40 = vsel %vm1206_vm7, %v8557_v23, %v8559_v10 }
 0x447   :  { %8500 = vmatpush1.bf16.msra.mxu1 %v8371_v2  ;;  %v8563_v47 = vpop.permute.xlu0 %8562  ;;  %11418 = vmatmul.mubr.msk.bf16.vlgmr.msra.gmra.mrb[196].mxu0 %vm6988_vm11, %v14502_v25  ;;  %v8590_v6 = vsel %vm184_vm0, %v8570_v40, 0 }
 0x448   :  { %8602 = vmatpush1.bf16.msra.mxu0 %v8578_v26  ;;  %11423 = vmatprep.subr.msk.bf16.mxu1 %vm184_vm0, %v8569_v13 }
 0x449   :  { %10421 = vrot.lane.b32.xlu0 %v14497_v36, %s11677_s18  ;;  %10419 = vrot.lane.b32.xlu1 %v14471_v30, %s11677_s18  ;;  %v8561_v18 = vpop.permute.xlu1 %8560 }
 0x44a   :  { %8531 = vmatprep.mubr.bf16.mxu1 %v15063_v0  ;;  %8633 = vmatprep.mubr.bf16.mxu0 %v15063_v0  ;;  %v8571_v41 = vsel %vm1206_vm7, %v8559_v10, %v8561_v18  ;;  %v8572_v27 = vsel %vm1206_vm7, %v8561_v18, %v8563_v47 }
 0x44b   :  { %v8774_v15 = vpop.permute.xlu0 %8773  ;;  %11425 = vmatprep.subr.msk.bf16.mxu0 %vm184_vm0, %v8571_v41  ;;  %v8596_v54 = vsel %vm184_vm0, %v8572_v27, 0 }
 0x44d   :  { %10209 = vrot.lane.b32.xlu0 %v14558_v51, %s11676_s11  ;;  %10207 = vrot.lane.b32.xlu1 %v14562_v19, %s11676_s11  ;;  %v8776_v52 = vpop.permute.xlu1 %8775 }
 0x44e   :  { %11420 = vmatmul.mubr.msk.bf16.vlgmr.msra.gmra.mrb[196].mxu1 %vm6988_vm11, %v14502_v25  ;;  %v8791_v9 = vsel %vm1357_vm8, %v8774_v15, %v8776_v52 }
 0x44f   :  { %8643 = vmatpush1.bf16.msra.mxu1 %v8584_v56  ;;  %v8778_v5 = vpop.permute.xlu0 %8777  ;;  %11422 = vmatmul.mubr.msk.bf16.vlgmr.msra.gmra.mrb[200].mxu0 %vm6988_vm11, %v14569_v35  ;;  %v8803_v28 = vsel %vm184_vm0, %v8791_v9, 0 }
 0x450   :  { %8684 = vmatpush1.bf16.msra.mxu0 %v8590_v6  ;;  %v8792_v63 = vsel %vm1357_vm8, %v8776_v52, %v8778_v5  ;;  %8674 = vmatprep.mubr.bf16.mxu1 %v15063_v0 }
 0x451   :  { %10425 = vrot.lane.b32.xlu0 %v14520_v60, %s11677_s18  ;;  %10423 = vrot.lane.b32.xlu1 %v14493_v42, %s11677_s18  ;;  %v8780_v46 = vpop.permute.xlu1 %8779 }
 0x452   :  { %11429 = vmatprep.subr.msk.bf16.mxu0 %vm184_vm0, %v8792_v63  ;;  %8715 = vmatprep.mubr.bf16.mxu0 %v15063_v0  ;;  %v8793_v11 = vsel %vm1357_vm8, %v8778_v5, %v8780_v46 }
 0x453   :  { %v8782_v7 = vpop.permute.xlu0 %8781  ;;  %v8809_v10 = vsel %vm184_vm0, %v8793_v11, 0 }
 0x454   :  { %v8794_v38 = vsel %vm1357_vm8, %v8780_v46, %v8782_v7 }
 0x455   :  { %10433 = vrot.lane.b32.xlu0 %v14528_v21, %s11677_s18  ;;  %10427 = vrot.lane.b32.xlu1 %v14516_v48, %s11677_s18 }
 0x456   :  { %11424 = vmatmul.mubr.msk.bf16.vlgmr.msra.gmra.mrb[200].mxu1 %vm6988_vm11, %v14569_v35  ;;  %v8565_v49 = vpop.permute.xlu1 %8564 }
 0x457   :  { %v8786_v58 = vpop.permute.xlu0 %8785  ;;  %11426 = vmatmul.mubr.msk.bf16.vlgmr.msra.gmra.mrb[204].mxu0 %vm6988_vm11, %v14569_v35  ;;  %v8573_v1 = vsel %vm1206_vm7, %v8563_v47, %v8565_v49  ;;  %8756 = vmatprep.mubr.bf16.mxu1 %v15063_v0 }
 0x458   :  { %8827 = vmatpush1.bf16.msra.mxu0 %v8803_v28  ;;  %11427 = vmatprep.subr.msk.bf16.mxu1 %vm184_vm0, %v8573_v1 }
 0x459   :  { %10641 = vrot.lane.b32.xlu0 %v14471_v30, %s11678_s2  ;;  %10639 = vrot.lane.b32.xlu1 %v14477_v3, %s11678_s2 }
 0x45a   :  { %8725 = vmatpush1.bf16.msra.mxu1 %v8596_v54  ;;  %v8784_v17 = vpop.permute.xlu1 %8783  ;;  %8858 = vmatprep.mubr.bf16.mxu0 %v15063_v0 }
 0x45b   :  { %v8790_v50 = vpop.permute.xlu0 %8789  ;;  %11431 = vmatprep.subr.msk.bf16.mxu1 %vm184_vm0, %v8794_v38  ;;  %v8796_v32 = vsel %vm1357_vm8, %v8784_v17, %v8786_v58  ;;  %v8795_v33 = vsel %vm1357_vm8, %v8782_v7, %v8784_v17 }
 0x45c   :  { %11433 = vmatprep.subr.msk.bf16.mxu0 %vm184_vm0, %v8796_v32  ;;  %v8815_v59 = vsel %vm184_vm0, %v8795_v33, 0 }
 0x45d   :  { %10429 = vrot.lane.b32.xlu0 %v14562_v19, %s11677_s18  ;;  %10431 = vrot.lane.b32.xlu1 %v14558_v51, %s11677_s18 }
 0x45e   :  { %11428 = vmatmul.mubr.msk.bf16.vlgmr.msra.gmra.mrb[204].mxu1 %vm6988_vm11, %v14569_v35  ;;  %v8788_v62 = vpop.permute.xlu1 %8787 }
 0x45f   :  { %8868 = vmatpush1.bf16.msra.mxu1 %v8809_v10  ;;  %11430 = vmatmul.mubr.msk.bf16.vlgmr.msra.gmra.mrb[208].mxu0 %vm6988_vm11, %v14618_v39  ;;  %v8798_v8 = vsel %vm1357_vm8, %v8788_v62, %v8790_v50  ;;  %v9078_v34 = vpop.permute.xlu0 %9077  ;;  %v8797_v37 = vsel %vm1357_vm8, %v8786_v58, %v8788_v62 }
 0x460   :  { %8909 = vmatpush1.bf16.msra.mxu0 %v8815_v59  ;;  %11435 = vmatprep.subr.msk.bf16.mxu1 %vm184_vm0, %v8798_v8  ;;  %v8821_v2 = vsel %vm184_vm0, %v8797_v37, 0 }
 0x461   :  { %10645 = vrot.lane.b32.xlu0 %v14493_v42, %s11678_s2  ;;  %10643 = vrot.lane.b32.xlu1 %v14497_v36, %s11678_s2 }
 0x462   :  { %v9076_v4 = vpop.permute.xlu1 %9075  ;;  %8899 = vmatprep.mubr.bf16.mxu1 %v15063_v0  ;;  %8940 = vmatprep.mubr.bf16.mxu0 %v15063_v0 }
 0x463   :  { %v9290_v26 = vpop.permute.xlu0 %9289  ;;  %v9093_v47 = vsel %vm337_vm2, %v9076_v4, %v9078_v34 }
 0x464   :  { %v9102_v15 = vsel %vm184_vm0, %v9093_v47, 0 }
 0x465   :  { %10649 = vrot.lane.b32.xlu0 %v14516_v48, %s11678_s2  ;;  %10647 = vrot.lane.b32.xlu1 %v14520_v60, %s11678_s2 }
 0x466   :  { %11432 = vmatmul.mubr.msk.bf16.vlgmr.msra.gmra.mrb[208].mxu1 %vm6988_vm11, %v14618_v39  ;;  %v9292_v23 = vpop.permute.xlu1 %9291 }
 0x467   :  { %8950 = vmatpush1.bf16.msra.mxu1 %v8821_v2  ;;  %11434 = vmatmul.mubr.msk.bf16.vlgmr.msra.gmra.mrb[212].mxu0 %vm6988_vm11, %v14618_v39 }
 0x468   :  { %8981 = vmatprep.mubr.bf16.mxu1 %v15063_v0  ;;  %9157 = vmatprep.mubr.bf16.mxu0 %v15063_v0 }
 0x469   :  { %10861 = vrot.lane.b32.xlu0 %v14477_v3, %s11679_s27  ;;  %10655 = vrot.lane.b32.xlu1 %v14528_v21, %s11678_s2 }
 0x46b   :  { %v9082_v13 = vpop.permute.xlu0 %9081  ;;  %v9080_v18 = vpop.permute.xlu1 %9079 }
 0x46c   :  { %v9094_v24 = vsel %vm337_vm2, %v9078_v34, %v9080_v18  ;;  %v9095_v3 = vsel %vm337_vm2, %v9080_v18, %v9082_v13 }
 0x46d   :  { %10653 = vrot.lane.b32.xlu0 %v14558_v51, %s11678_s2  ;;  %10651 = vrot.lane.b32.xlu1 %v14562_v19, %s11678_s2  ;;  %v9108_v52 = vsel %vm184_vm0, %v9095_v3, 0 }
 0x46e   :  { %11436 = vmatmul.mubr.msk.bf16.vlgmr.msra.gmra.mrb[212].mxu1 %vm6988_vm11, %v14618_v39  ;;  %11446 = vmatprep.subr.msk.bf16.mxu0 %vm184_vm0, %v9094_v24 }
 0x46f   :  { %9126 = vmatpush1.bf16.msra.mxu0 %v9102_v15  ;;  %v9294_v41 = vpop.permute.xlu0 %9293  ;;  %v9084_v40 = vpop.permute.xlu1 %9083  ;;  %9198 = vmatprep.mubr.bf16.mxu1 %v15063_v0 }
 0x470   :  { %v9096_v56 = vsel %vm337_vm2, %v9082_v13, %v9084_v40  ;;  %v9308_v7 = vsel %vm186_vm1, %v9292_v23, %v9294_v41 }
 0x471   :  { %10865 = vrot.lane.b32.xlu0 %v14497_v36, %s11679_s27  ;;  %10863 = vrot.lane.b32.xlu1 %v14471_v30, %s11679_s27  ;;  %v9307_v30 = vsel %vm186_vm1, %v9290_v26, %v9292_v23 }
 0x472   :  { %11447 = vmatmul.mubr.msk.bf16.vlgmr.msra.gmra.mrb[216].mxu0 %vm6988_vm11, %v14153_v29  ;;  %11448 = vmatprep.subr.msk.bf16.mxu1 %vm184_vm0, %v9096_v56  ;;  %v9316_v28 = vsel %vm184_vm0, %v9307_v30, 0 }
 0x473   :  { %9167 = vmatpush1.bf16.msra.mxu1 %v9108_v52  ;;  %v9086_v6 = vpop.permute.xlu0 %9085  ;;  %v9088_v5 = vpop.permute.xlu1 %9087  ;;  %9239 = vmatprep.mubr.bf16.mxu0 %v15063_v0 }
 0x474   :  { %v9097_v63 = vsel %vm337_vm2, %v9084_v40, %v9086_v6  ;;  %v9098_v46 = vsel %vm337_vm2, %v9086_v6, %v9088_v5 }
 0x475   :  { %v9114_v36 = vsel %vm184_vm0, %v9097_v63, 0  ;;  %10869 = vrot.lane.b32.xlu0 %v14520_v60, %s11679_s27  ;;  %10867 = vrot.lane.b32.xlu1 %v14493_v42, %s11679_s27 }
 0x476   :  { %11449 = vmatmul.mubr.msk.bf16.vlgmr.msra.gmra.mrb[216].mxu1 %vm6988_vm11, %v14153_v29  ;;  %11450 = vmatprep.subr.msk.bf16.mxu0 %vm184_vm0, %v9098_v46 }
 0x477   :  { %9208 = vmatpush1.bf16.msra.mxu0 %v9114_v36  ;;  %v9090_v9 = vpop.permute.xlu0 %9089  ;;  %v9092_v27 = vpop.permute.xlu1 %9091  ;;  %9280 = vmatprep.mubr.bf16.mxu1 %v15063_v0 }
 0x478   :  { %v9099_v49 = vsel %vm337_vm2, %v9088_v5, %v9090_v9  ;;  %11454 = vmatprep.subr.msk.bf16.mxu0 %vm184_vm0, %v9308_v7  ;;  %v9100_v42 = vsel %vm337_vm2, %v9090_v9, %v9092_v27 }
 0x479   :  { %v9120_v60 = vsel %vm184_vm0, %v9099_v49, 0  ;;  %10873 = vrot.lane.b32.xlu0 %v14562_v19, %s11679_s27  ;;  %10871 = vrot.lane.b32.xlu1 %v14516_v48, %s11679_s27  ;;  %v6933_v48 = vld [vmem:[%s14978_s7] sm:$0xf]  ;;  %s11682_s7 = smov [#allocation4]  }
 0x47a   :  { %11451 = vmatmul.mubr.msk.bf16.vlgmr.msra.gmra.mrb[220].mxu0 %vm6988_vm11, %v14153_v29  ;;  %11452 = vmatprep.subr.msk.bf16.mxu1 %vm184_vm0, %v9100_v42  ;;  %s11133_s2 = sshll.u32 %s11682_s7, 4  ;;  %s11134_s2 = int_to_ptr.vmem [resolvable:$true] %s11133_s2 }
 0x47b   :  { %9249 = vmatpush1.bf16.msra.mxu1 %v9120_v60  ;;  %9340 = vmatpush1.bf16.msra.mxu0 %v9316_v28  ;;  %v9298_v58 = vpop.permute.xlu0 %9297  ;;  %v9296_v1 = vpop.permute.xlu1 %9295  ;;  %p11652_p1 = scmp.lt.s32.totalorder %s11134_s2, %s11134_s2 }
 0x47c   :  { %v9309_v54 = vsel %vm186_vm1, %v9294_v41, %v9296_v1  ;;  %v9310_v38 = vsel %vm186_vm1, %v9296_v1, %v9298_v58  ;;  %9371 = vmatprep.mubr.bf16.mxu0 %v15063_v0 }
 0x47d   :  { %v9322_v19 = vsel %vm184_vm0, %v9309_v54, 0  ;;  %10877 = vrot.lane.b32.xlu0 %v14528_v21, %s11679_s27  ;;  %10875 = vrot.lane.b32.xlu1 %v14558_v51, %s11679_s27  ;;  %s11647_s27 = scalar_lea.vmem %s11134_s2, 1024 }
 0x47e   :  { %11453 = vmatmul.mubr.msk.bf16.vlgmr.msra.gmra.mrb[220].mxu1 %vm6988_vm11, %v14153_v29  ;;  %11456 = vmatprep.subr.msk.bf16.mxu1 %vm184_vm0, %v9310_v38  ;;  %p11648_p0 = scmp.ne.s32.totalorder %s11134_s2, %s11647_s27  ;;  %p11653_p2 = scmp.lt.s32.totalorder %s11647_s27, %s11647_s27 }
 0x47f   :  { %9381 = vmatpush1.bf16.msra.mxu1 %v9322_v19  ;;  %v9506_v17 = vpop.permute.xlu0 %9505  ;;  %v9300_v11 = vpop.permute.xlu1 %9299  ;;  %9412 = vmatprep.mubr.bf16.mxu1 %v15063_v0 }
 0x480   :  { %v9311_v21 = vsel %vm186_vm1, %v9298_v58, %v9300_v11  ;;  %v9947_v58 = vld [vmem:[#allocation3 + $0x24] sm:$0xff]  ;;  %p11654_p3 = por %p11653_p2, %p11652_p1 }
 0x481   :  { %9000 = vperm.xlu1 %11571, %v6933_v48   ;;  %v9328_v32 = vsel %vm184_vm0, %v9311_v21, 0  ;;  %v11479_v48 = vcombine.high %v9947_v58, %v9947_v58 }
 0x482   :  { %11455 = vmatmul.mubr.msk.bf16.vlgmr.msra.gmra.mrb[224].mxu0 %vm6988_vm11, %v14219_v61  ;;  %p11655_p4 = pnand %p11654_p3, %p11648_p0 }
 0x483   :  { %v9302_v51 = vpop.permute.xlu0 %9301  ;;  %v9504_v50 = vpop.permute.xlu1 %9503  ;;  %9453 = vmatprep.mubr.bf16.mxu0 %v15063_v0 }
 0x484   :  { %v9312_v29 = vsel %vm186_vm1, %v9300_v11, %v9302_v51  ;;  %v9521_v34 = vsel %vm488_vm3, %v9504_v50, %v9506_v17  ;;  %v9948_v11 = vld [vmem:[#allocation3 + $0x2c] sm:$0xff]  ;;  %v9949_v50 = vld [vmem:[#allocation3 + $0x34] sm:$0xff] }
 0x485   :  { %11458 = vmatprep.subr.msk.bf16.mxu0 %vm184_vm0, %v9312_v29  ;;  %v9530_v23 = vsel %vm184_vm0, %v9521_v34, 0 }
 0x486   :  { %11457 = vmatmul.mubr.msk.bf16.vlgmr.msra.gmra.mrb[224].mxu1 %vm6988_vm11, %v14219_v61  ;;  %9422 = vmatpush1.bf16.msra.mxu0 %v9328_v32 }
 0x487   :  { %v9306_v33 = vpop.permute.xlu0 %9305  ;;  %v9304_v10 = vpop.permute.xlu1 %9303  ;;  %9494 = vmatprep.mubr.bf16.mxu1 %v15063_v0 }
 0x488   :  { %v9313_v62 = vsel %vm186_vm1, %v9302_v51, %v9304_v10  ;;  %v9314_v59 = vsel %vm186_vm1, %v9304_v10, %v9306_v33  ;;  %v11481_v10 = vcombine.high %v9948_v11, %v9948_v11 }
 0x489   :  { %v9334_v8 = vsel %vm184_vm0, %v9313_v62, 0  ;;  %11460 = vmatprep.subr.msk.bf16.mxu1 %vm184_vm0, %v9314_v59  ;;  %v11483_v59 = vcombine.high %v9949_v50, %v9949_v50 }
 0x48a   :  { %11459 = vmatmul.mubr.msk.bf16.vlgmr.msra.gmra.mrb[228].mxu0 %vm6988_vm11, %v14219_v61  ;;  %9463 = vmatpush1.bf16.msra.mxu1 %v9334_v8  ;;  %v11480_v8 = vcombine.low %v9948_v11, %v9948_v11 }
 0x48b   :  { %v9510_v4 = vpop.permute.xlu0 %9509  ;;  %v9508_v37 = vpop.permute.xlu1 %9507  ;;  %9585 = vmatprep.mubr.bf16.mxu0 %v15063_v0 }
 0x48c   :  { %v9522_v2 = vsel %vm488_vm3, %v9506_v17, %v9508_v37  ;;  %v9523_v26 = vsel %vm488_vm3, %v9508_v37, %v9510_v4  ;;  %v11478_v17 = vcombine.low %v9947_v58, %v9947_v58  ;;  %v9950_v37 = vld [vmem:[#allocation3 + $0x3c] sm:$0xff] }
 0x48d   :  { %11462 = vmatprep.subr.msk.bf16.mxu0 %vm184_vm0, %v9522_v2  ;;  %v9536_v24 = vsel %vm184_vm0, %v9523_v26, 0  ;;  %v9978_v2 = vsel %vm184_vm0, %v11480_v8, 0  ;;  %v11482_v26 = vcombine.low %v9949_v50, %v9949_v50 }
 0x48e   :  { %11461 = vmatmul.mubr.msk.bf16.vlgmr.msra.gmra.mrb[228].mxu1 %vm6988_vm11, %v14219_v61  ;;  %9554 = vmatpush1.bf16.msra.mxu0 %v9530_v23  ;;  %v9972_v62 = vsel %vm184_vm0, %v11478_v17, 0  ;;  %v11485_v23 = vcombine.high %v9950_v37, %v9950_v37 }
 0x48f   :  { %v9514_v47 = vpop.permute.xlu0 %9513  ;;  %v9512_v13 = vpop.permute.xlu1 %9511  ;;  %9626 = vmatprep.mubr.bf16.mxu1 %v15063_v0 }
 0x490   :  { %v9524_v18 = vsel %vm488_vm3, %v9510_v4, %v9512_v13  ;;  %v9525_v15 = vsel %vm488_vm3, %v9512_v13, %v9514_v47 }
 0x491   :  { %11464 = vmatprep.subr.msk.bf16.mxu1 %vm184_vm0, %v9524_v18  ;;  %v9542_v40 = vsel %vm184_vm0, %v9525_v15, 0 }
 0x492   :  { %11463 = vmatmul.mubr.msk.bf16.vlgmr.msra.gmra.mrb[232].mxu0 %vm6988_vm11, %v14285_v44  ;;  %9595 = vmatpush1.bf16.msra.mxu1 %v9536_v24 }
 0x493   :  { %v9726_v3 = vpop.permute.xlu0 %9725  ;;  %v9516_v41 = vpop.permute.xlu1 %9515  ;;  %9667 = vmatprep.mubr.bf16.mxu0 %v15063_v0 }
 0x494   :  { %v9526_v61 = vsel %vm488_vm3, %v9514_v47, %v9516_v41 }
 0x495   :  { %11466 = vmatprep.subr.msk.bf16.mxu0 %vm184_vm0, %v9526_v61 }
 0x496   :  { %11465 = vmatmul.mubr.msk.bf16.vlgmr.msra.gmra.mrb[232].mxu1 %vm6988_vm11, %v14285_v44  ;;  %9636 = vmatpush1.bf16.msra.mxu0 %v9542_v40 }
 0x497   :  { %v9518_v56 = vpop.permute.xlu0 %9517  ;;  %v9520_v52 = vpop.permute.xlu1 %9519  ;;  %9708 = vmatprep.mubr.bf16.mxu1 %v15063_v0 }
 0x498   :  { %v9527_v6 = vsel %vm488_vm3, %v9516_v41, %v9518_v56  ;;  %v9528_v5 = vsel %vm488_vm3, %v9518_v56, %v9520_v52 }
 0x499   :  { %v9548_v63 = vsel %vm184_vm0, %v9527_v6, 0  ;;  %11468 = vmatprep.subr.msk.bf16.mxu1 %vm184_vm0, %v9528_v5 }
 0x49a   :  { %11467 = vmatmul.mubr.msk.bf16.vlgmr.msra.gmra.mrb[236].mxu0 %vm6988_vm11, %v14285_v44  ;;  %9677 = vmatpush1.bf16.msra.mxu1 %v9548_v63 }
 0x49b   :  { %v9730_v46 = vpop.permute.xlu0 %9729  ;;  %v9728_v36 = vpop.permute.xlu1 %9727  ;;  %9807 = vmatprep.mubr.bf16.mxu0 %v15063_v0 }
 0x49c   :  { %v9743_v30 = vsel %vm639_vm4, %v9726_v3, %v9728_v36  ;;  %v9744_v7 = vsel %vm639_vm4, %v9728_v36, %v9730_v46  ;;  %v11484_v3 = vcombine.low %v9950_v37, %v9950_v37 }
 0x49d   :  { %v9752_v9 = vsel %vm184_vm0, %v9743_v30, 0  ;;  %11470 = vmatprep.subr.msk.bf16.mxu0 %vm184_vm0, %v9744_v7 }
 0x49e   :  { %11469 = vmatmul.mubr.msk.bf16.vlgmr.msra.gmra.mrb[236].mxu1 %vm6988_vm11, %v14285_v44  ;;  %9776 = vmatpush1.bf16.msra.mxu0 %v9752_v9  ;;  %v9990_v5 = vsel %vm184_vm0, %v11484_v3, 0 }
 0x49f   :  { %v9734_v27 = vpop.permute.xlu0 %9733  ;;  %v9732_v49 = vpop.permute.xlu1 %9731  ;;  %9848 = vmatprep.mubr.bf16.mxu1 %v15063_v0 }
 0x4a0   :  { %v9745_v42 = vsel %vm639_vm4, %v9730_v46, %v9732_v49  ;;  %v9746_v60 = vsel %vm639_vm4, %v9732_v49, %v9734_v27 }
 0x4a1   :  { %v9758_v28 = vsel %vm184_vm0, %v9745_v42, 0  ;;  %11472 = vmatprep.subr.msk.bf16.mxu1 %vm184_vm0, %v9746_v60 }
 0x4a2   :  { %11471 = vmatmul.mubr.msk.bf16.vlgmr.msra.gmra.mrb[240].mxu0 %vm6988_vm11, %v14341_v20  ;;  %9817 = vmatpush1.bf16.msra.mxu1 %v9758_v28 }
 0x4a3   :  { %v9738_v1 = vpop.permute.xlu0 %9737  ;;  %v9736_v44 = vpop.permute.xlu1 %9735  ;;  %9889 = vmatprep.mubr.bf16.mxu0 %v15063_v0 }
 0x4a4   :  { %v9747_v54 = vsel %vm639_vm4, %v9734_v27, %v9736_v44  ;;  %v9748_v38 = vsel %vm639_vm4, %v9736_v44, %v9738_v1 }
 0x4a5   :  { %v9764_v19 = vsel %vm184_vm0, %v9747_v54, 0  ;;  %11474 = vmatprep.subr.msk.bf16.mxu0 %vm184_vm0, %v9748_v38 }
 0x4a6   :  { %11473 = vmatmul.mubr.msk.bf16.vlgmr.msra.gmra.mrb[240].mxu1 %vm6988_vm11, %v14341_v20  ;;  %9858 = vmatpush1.bf16.msra.mxu0 %v9764_v19 }
 0x4a7   :  { %v9742_v21 = vpop.permute.xlu0 %9741  ;;  %11486 = vmatprep.subr.msk.bf16.mxu0 %vm184_vm0, %v11479_v48  ;;  %v9740_v51 = vpop.permute.xlu1 %9739  ;;  %9930 = vmatprep.mubr.bf16.mxu1 %v15063_v0 }
 0x4a8   :  { %v9749_v29 = vsel %vm639_vm4, %v9738_v1, %v9740_v51  ;;  %v9750_v32 = vsel %vm639_vm4, %v9740_v51, %v9742_v21 }
 0x4a9   :  { %v9770_v33 = vsel %vm184_vm0, %v9749_v29, 0  ;;  %11476 = vmatprep.subr.msk.bf16.mxu1 %vm184_vm0, %v9750_v32 }
 0x4aa   :  { %11475 = vmatmul.mubr.msk.bf16.vlgmr.msra.gmra.mrb[244].mxu0 %vm6988_vm11, %v14341_v20  ;;  %9899 = vmatpush1.bf16.msra.mxu1 %v9770_v33 }
 0x4ab   :  { %9996 = vmatpush1.bf16.msra.mxu0 %v9972_v62  ;;  %v10198_v34 = vpop.permute.xlu0 %10197  ;;  %11488 = vmatprep.subr.msk.bf16.mxu1 %vm184_vm0, %v11481_v10  ;;  %v10196_v4 = vpop.permute.xlu1 %10195 }
 0x4ac   :  { %11490 = vmatprep.subr.msk.bf16.mxu0 %vm184_vm0, %v11483_v59  ;;  %10027 = vmatprep.mubr.bf16.mxu0 %v15063_v0  ;;  %v10213_v46 = vsel %vm904_vm5, %v10196_v4, %v10198_v34 }
 0x4ad   :  { %v10222_v49 = vsel %vm184_vm0, %v10213_v46, 0 }
 0x4ae   :  { %11477 = vmatmul.mubr.msk.bf16.vlgmr.msra.gmra.mrb[244].mxu1 %vm6988_vm11, %v14341_v20  ;;  %v9984_v20 = vsel %vm184_vm0, %v11482_v26, 0 }
 0x4af   :  { %10037 = vmatpush1.bf16.msra.mxu1 %v9978_v2  ;;  %v10202_v47 = vpop.permute.xlu0 %10201  ;;  %v10200_v13 = vpop.permute.xlu1 %10199  ;;  %10068 = vmatprep.mubr.bf16.mxu1 %v15063_v0 }
 0x4b0   :  { %11492 = vmatprep.subr.msk.bf16.mxu1 %vm184_vm0, %v11485_v23  ;;  %v7050_v18 = vpop.f32.mrb[144].mxu0  ;;  %v10214_v24 = vsel %vm904_vm5, %v10198_v34, %v10200_v13  ;;  %v10215_v60 = vsel %vm904_vm5, %v10200_v13, %v10202_v47 }
 0x4b1   :  { %v7052_v15 = vpop.f32.mrb[145].mxu0  ;;  %v10228_v38 = vsel %vm184_vm0, %v10215_v60, 0 }
 0x4b2   :  { %11487 = vmatmul.mubr.msk.bf16.vlgmr.msra.gmra.mrb[248].mxu0 %vm6988_vm11, %v14392_v16  ;;  %v7054_v41 = vpop.f32.mrb[146].mxu0 }
 0x4b3   :  { %10078 = vmatpush1.bf16.msra.mxu0 %v9984_v20  ;;  %v10206_v61 = vpop.permute.xlu0 %10205  ;;  %v10204_v40 = vpop.permute.xlu1 %10203  ;;  %10109 = vmatprep.mubr.bf16.mxu0 %v15063_v0 }
 0x4b4   :  { %11503 = vmatprep.subr.msk.bf16.mxu0 %vm184_vm0, %v10214_v24  ;;  %v7055_v56 = vpop.f32.mrb[147].mxu0  ;;  %v10216_v52 = vsel %vm904_vm5, %v10202_v47, %v10204_v40  ;;  %v10217_v48 = vsel %vm904_vm5, %v10204_v40, %v10206_v61 }
 0x4b5   :  { %v7091_v6 = vpop.f32.mrb[144].mxu1  ;;  %v10234_v32 = vsel %vm184_vm0, %v10217_v48, 0 }
 0x4b6   :  { %11489 = vmatmul.mubr.msk.bf16.vlgmr.msra.gmra.mrb[248].mxu1 %vm6988_vm11, %v14392_v16  ;;  %v7093_v63 = vpop.f32.mrb[145].mxu1 }
 0x4b7   :  { %10119 = vmatpush1.bf16.msra.mxu1 %v9990_v5  ;;  %v10418_v36 = vpop.permute.xlu0 %10417  ;;  %v10212_v30 = vpop.permute.xlu1 %10211  ;;  %10150 = vmatprep.mubr.bf16.mxu1 %v15063_v0 }
 0x4b8   :  { %11505 = vmatprep.subr.msk.bf16.mxu1 %vm184_vm0, %v10216_v52  ;;  %v7095_v7 = vpop.f32.mrb[146].mxu1 }
 0x4b9   :  { %v7096_v9 = vpop.f32.mrb[147].mxu1  ;;  %v7132_v27 = vpop.f32.mrb[148].mxu0 }
 0x4ba   :  { %11491 = vmatmul.mubr.msk.bf16.vlgmr.msra.gmra.mrb[252].mxu0 %vm6988_vm11, %v14392_v16  ;;  %v7134_v42 = vpop.f32.mrb[149].mxu0 }
 0x4bb   :  { %10246 = vmatpush1.bf16.msra.mxu0 %v10222_v49  ;;  %v10422_v28 = vpop.permute.xlu0 %10421  ;;  %v10420_v58 = vpop.permute.xlu1 %10419  ;;  %10277 = vmatprep.mubr.bf16.mxu0 %v15063_v0 }
 0x4bc   :  { %v7136_v1 = vpop.f32.mrb[150].mxu0  ;;  %v10436_v62 = vsel %vm1055_vm6, %v10420_v58, %v10422_v28  ;;  %v10435_v24 = vsel %vm1055_vm6, %v10418_v36, %v10420_v58 }
 0x4bd   :  { %v7137_v44 = vpop.f32.mrb[151].mxu0  ;;  %v7173_v54 = vpop.f32.mrb[148].mxu1  ;;  %v10444_v56 = vsel %vm184_vm0, %v10435_v24, 0 }
 0x4be   :  { %11493 = vmatmul.mubr.msk.bf16.vlgmr.msra.gmra.mrb[252].mxu1 %vm6988_vm11, %v14392_v16  ;;  %v14819_v19 = vpop.f32.mrb[149].mxu1 }
 0x4bf   :  { %10287 = vmatpush1.bf16.msra.mxu1 %v10228_v38  ;;  %v10210_v17 = vpop.permute.xlu0 %10209  ;;  %v10208_v11 = vpop.permute.xlu1 %10207  ;;  %10318 = vmatprep.mubr.bf16.mxu1 %v15063_v0 }
 0x4c0   :  { %v10220_v21 = vsel %vm904_vm5, %v10210_v17, %v10212_v30  ;;  %v10218_v51 = vsel %vm904_vm5, %v10206_v61, %v10208_v11  ;;  %v7177_v50 = vpop.f32.mrb[150].mxu1  ;;  %v10219_v59 = vsel %vm904_vm5, %v10208_v11, %v10210_v17 }
 0x4c1   :  { %11507 = vmatprep.subr.msk.bf16.mxu0 %vm184_vm0, %v10218_v51  ;;  %11509 = vmatprep.subr.msk.bf16.mxu1 %vm184_vm0, %v10220_v21  ;;  %v7267_v29 = vpop.f32.mrb[152].mxu0  ;;  %v7178_v16 = vpop.f32.mrb[151].mxu1  ;;  %v10240_v47 = vsel %vm184_vm0, %v10219_v59, 0 }
 0x4c2   :  { %11504 = vmatmul.mubr.msk.bf16.vlgmr.msra.gmra.mrb[0].mxu0 %vm6988_vm11, %v14437_v14  ;;  %v7268_v33 = vadd.f32 %v7267_v29, %v7050_v18  ;;  %v7269_v10 = vpop.f32.mrb[153].mxu0 }
 0x4c3   :  { %10328 = vmatpush1.bf16.msra.mxu0 %v10234_v32  ;;  %v10426_v8 = vpop.permute.xlu0 %10425  ;;  %v7270_v34 = vadd.f32 %v7269_v10, %v7052_v15  ;;  %v10424_v4 = vpop.permute.xlu1 %10423  ;;  %10359 = vmatprep.mubr.bf16.mxu0 %v15063_v0 }
 0x4c4   :  { %11511 = vmatprep.subr.msk.bf16.mxu0 %vm184_vm0, %v10436_v62  ;;  %v7271_v37 = vpop.f32.mrb[154].mxu0  ;;  %v10438_v2 = vsel %vm1055_vm6, %v10424_v4, %v10426_v8  ;;  %v10437_v5 = vsel %vm1055_vm6, %v10422_v28, %v10424_v4 }
 0x4c5   :  { %v7308_v23 = vpop.f32.mrb[152].mxu1  ;;  %v7272_v26 = vpop.f32.mrb[155].mxu0  ;;  %v10450_v49 = vsel %vm184_vm0, %v10437_v5, 0 }
 0x4c6   :  { %11506 = vmatmul.mubr.msk.bf16.vlgmr.msra.gmra.mrb[0].mxu1 %vm6988_vm11, %v14437_v14  ;;  %v7309_v13 = vadd.f32 %v7308_v23, %v7091_v6  ;;  %v7310_v18 = vpop.f32.mrb[153].mxu1 }
 0x4c7   :  { %10369 = vmatpush1.bf16.msra.mxu1 %v10240_v47  ;;  %v10434_v15 = vpop.permute.xlu0 %10433  ;;  %v7311_v20 = vadd.f32 %v7310_v18, %v7093_v63  ;;  %v10428_v3 = vpop.permute.xlu1 %10427  ;;  %10400 = vmatprep.mubr.bf16.mxu1 %v15063_v0 }
 0x4c8   :  { %11513 = vmatprep.subr.msk.bf16.mxu1 %vm184_vm0, %v10438_v2  ;;  %v7312_v41 = vpop.f32.mrb[154].mxu1 }
 0x4c9   :  { %v7349_v61 = vpop.f32.mrb[156].mxu0  ;;  %v7313_v40 = vpop.f32.mrb[155].mxu1 }
 0x4ca   :  { %11508 = vmatmul.mubr.msk.bf16.vlgmr.msra.gmra.mrb[4].mxu0 %vm6988_vm11, %v14437_v14  ;;  %v7350_v52 = vadd.f32 %v7349_v61, %v7132_v27  ;;  %v7351_v6 = vpop.f32.mrb[157].mxu0  ;;  %v10439_v27 = vsel %vm1055_vm6, %v10426_v8, %v10428_v3 }
 0x4cb   :  { %10468 = vmatpush1.bf16.msra.mxu0 %v10444_v56  ;;  %v10642_v46 = vpop.permute.xlu0 %10641  ;;  %v7352_v63 = vadd.f32 %v7351_v6, %v7134_v42  ;;  %v10640_v36 = vpop.permute.xlu1 %10639  ;;  %10499 = vmatprep.mubr.bf16.mxu0 %v15063_v0  ;;  %v10456_v17 = vsel %vm184_vm0, %v10439_v27, 0 }
 0x4cc   :  { %v7353_v30 = vpop.f32.mrb[158].mxu0  ;;  %v10657_v4 = vsel %vm1206_vm7, %v10640_v36, %v10642_v46 }
 0x4cd   :  { %v7390_v7 = vpop.f32.mrb[156].mxu1  ;;  %v7354_v9 = vpop.f32.mrb[159].mxu0  ;;  %v10666_v24 = vsel %vm184_vm0, %v10657_v4, 0 }
 0x4ce   :  { %11510 = vmatmul.mubr.msk.bf16.vlgmr.msra.gmra.mrb[4].mxu1 %vm6988_vm11, %v14437_v14  ;;  %v7391_v60 = vadd.f32 %v7390_v7, %v7173_v54  ;;  %v7392_v58 = vpop.f32.mrb[157].mxu1 }
 0x4cf   :  { %10509 = vmatpush1.bf16.msra.mxu1 %v10450_v49  ;;  %v10430_v28 = vpop.permute.xlu0 %10429  ;;  %v7393_v1 = vadd.f32 %v7392_v58, %v14819_v19  ;;  %v10432_v42 = vpop.permute.xlu1 %10431  ;;  %10540 = vmatprep.mubr.bf16.mxu1 %v15063_v0 }
 0x4d0   :  { %v10440_v44 = vsel %vm1055_vm6, %v10428_v3, %v10430_v28  ;;  %v10442_v38 = vsel %vm1055_vm6, %v10432_v42, %v10434_v15  ;;  %v7394_v48 = vpop.f32.mrb[158].mxu1  ;;  %v10441_v21 = vsel %vm1055_vm6, %v10430_v28, %v10432_v42 }
 0x4d1   :  { %11515 = vmatprep.subr.msk.bf16.mxu0 %vm184_vm0, %v10440_v44  ;;  %11517 = vmatprep.subr.msk.bf16.mxu1 %vm184_vm0, %v10442_v38  ;;  %v7484_v14 = vpop.f32.mrb[160].mxu0  ;;  %v7395_v54 = vpop.f32.mrb[159].mxu1  ;;  %v10462_v59 = vsel %vm184_vm0, %v10441_v21, 0 }
 0x4d2   :  { %11512 = vmatmul.mubr.msk.bf16.vlgmr.msra.gmra.mrb[8].mxu0 %vm6988_vm11, %v14502_v25  ;;  %v7614_v19 = vadd.f32 %v7484_v14, %v7268_v33  ;;  %v7486_v11 = vpop.f32.mrb[161].mxu0 }
 0x4d3   :  { %10550 = vmatpush1.bf16.msra.mxu0 %v10456_v17  ;;  %v10646_v51 = vpop.permute.xlu0 %10645  ;;  %v7615_v50 = vadd.f32 %v7486_v11, %v7270_v34  ;;  %v10644_v29 = vpop.permute.xlu1 %10643  ;;  %10581 = vmatprep.mubr.bf16.mxu0 %v15063_v0 }
 0x4d4   :  { %v10658_v16 = vsel %vm1206_vm7, %v10642_v46, %v10644_v29  ;;  %v7488_v32 = vpop.f32.mrb[162].mxu0  ;;  %v10659_v3 = vsel %vm1206_vm7, %v10644_v29, %v10646_v51 }
 0x4d5   :  { %11519 = vmatprep.subr.msk.bf16.mxu0 %vm184_vm0, %v10658_v16  ;;  %v7525_v10 = vpop.f32.mrb[160].mxu1  ;;  %v7489_v62 = vpop.f32.mrb[163].mxu0  ;;  %v10672_v5 = vsel %vm184_vm0, %v10659_v3, 0 }
 0x4d6   :  { %11514 = vmatmul.mubr.msk.bf16.vlgmr.msra.gmra.mrb[8].mxu1 %vm6988_vm11, %v14502_v25  ;;  %v7616_v33 = vadd.f32 %v7525_v10, %v7309_v13  ;;  %v7527_v8 = vpop.f32.mrb[161].mxu1 }
 0x4d7   :  { %10591 = vmatpush1.bf16.msra.mxu1 %v10462_v59  ;;  %v10650_v34 = vpop.permute.xlu0 %10649  ;;  %v7617_v37 = vadd.f32 %v7527_v8, %v7311_v20  ;;  %v10648_v2 = vpop.permute.xlu1 %10647  ;;  %10622 = vmatprep.mubr.bf16.mxu1 %v15063_v0 }
 0x4d8   :  { %v10660_v23 = vsel %vm1206_vm7, %v10646_v51, %v10648_v2  ;;  %v7529_v26 = vpop.f32.mrb[162].mxu1 }
 0x4d9   :  { %11521 = vmatprep.subr.msk.bf16.mxu1 %vm184_vm0, %v10660_v23  ;;  %v7566_v47 = vpop.f32.mrb[164].mxu0  ;;  %v7530_v18 = vpop.f32.mrb[163].mxu1 }
 0x4da   :  { %11516 = vmatmul.mubr.msk.bf16.vlgmr.msra.gmra.mrb[12].mxu0 %vm6988_vm11, %v14502_v25  ;;  %v7618_v13 = vadd.f32 %v7566_v47, %v7350_v52  ;;  %v7568_v15 = vpop.f32.mrb[165].mxu0  ;;  %v10661_v52 = vsel %vm1206_vm7, %v10648_v2, %v10650_v34 }
 0x4db   :  { %10690 = vmatpush1.bf16.msra.mxu0 %v10666_v24  ;;  %v10862_v20 = vpop.permute.xlu0 %10861  ;;  %v7619_v41 = vadd.f32 %v7568_v15, %v7352_v63  ;;  %v10656_v61 = vpop.permute.xlu1 %10655  ;;  %10721 = vmatprep.mubr.bf16.mxu0 %v15063_v0  ;;  %v10678_v27 = vsel %vm184_vm0, %v10661_v52, 0 }
 0x4dc   :  { %v7570_v40 = vpop.f32.mrb[166].mxu0 }
 0x4dd   :  { %v7607_v56 = vpop.f32.mrb[164].mxu1  ;;  %v7571_v6 = vpop.f32.mrb[167].mxu0 }
 0x4de   :  { %11518 = vmatmul.mubr.msk.bf16.vlgmr.msra.gmra.mrb[12].mxu1 %vm6988_vm11, %v14502_v25  ;;  %v7620_v46 = vadd.f32 %v7607_v56, %v7391_v60  ;;  %v7609_v36 = vpop.f32.mrb[165].mxu1 }
 0x4df   :  { %10731 = vmatpush1.bf16.msra.mxu1 %v10672_v5  ;;  %v10654_v30 = vpop.permute.xlu0 %10653  ;;  %v7621_v7 = vadd.f32 %v7609_v36, %v7393_v1  ;;  %v10652_v9 = vpop.permute.xlu1 %10651  ;;  %10762 = vmatprep.mubr.bf16.mxu1 %v15063_v0 }
 0x4e0   :  { %v10664_v63 = vsel %vm1206_vm7, %v10654_v30, %v10656_v61  ;;  %v10662_v49 = vsel %vm1206_vm7, %v10650_v34, %v10652_v9  ;;  %v7611_v58 = vpop.f32.mrb[166].mxu1  ;;  %v10663_v42 = vsel %vm1206_vm7, %v10652_v9, %v10654_v30 }
 0x4e1   :  { %11523 = vmatprep.subr.msk.bf16.mxu0 %vm184_vm0, %v10662_v49  ;;  %11525 = vmatprep.subr.msk.bf16.mxu1 %vm184_vm0, %v10664_v63  ;;  %v7709_v25 = vpop.f32.mrb[168].mxu0  ;;  %v7612_v60 = vpop.f32.mrb[167].mxu1  ;;  %v10684_v21 = vsel %vm184_vm0, %v10663_v42, 0 }
 0x4e2   :  { %11520 = vmatmul.mubr.msk.bf16.vlgmr.msra.gmra.mrb[16].mxu0 %vm6988_vm11, %v14569_v35  ;;  %v7839_v28 = vadd.f32 %v7709_v25, %v7614_v19  ;;  %v7711_v1 = vpop.f32.mrb[169].mxu0 }
 0x4e3   :  { %10772 = vmatpush1.bf16.msra.mxu0 %v10678_v27  ;;  %v10866_v44 = vpop.permute.xlu0 %10865  ;;  %v7840_v38 = vadd.f32 %v7711_v1, %v7615_v50  ;;  %v10864_v48 = vpop.permute.xlu1 %10863  ;;  %10803 = vmatprep.mubr.bf16.mxu0 %v15063_v0 }
 0x4e4   :  { %v10880_v14 = vsel %vm1357_vm8, %v10864_v48, %v10866_v44  ;;  %v7713_v54 = vpop.f32.mrb[170].mxu0  ;;  %v10879_v29 = vsel %vm1357_vm8, %v10862_v20, %v10864_v48 }
 0x4e5   :  { %11527 = vmatprep.subr.msk.bf16.mxu0 %vm184_vm0, %v10880_v14  ;;  %v7750_v17 = vpop.f32.mrb[168].mxu1  ;;  %v7714_v11 = vpop.f32.mrb[171].mxu0  ;;  %v10888_v4 = vsel %vm184_vm0, %v10879_v29, 0 }
 0x4e6   :  { %11522 = vmatmul.mubr.msk.bf16.vlgmr.msra.gmra.mrb[16].mxu1 %vm6988_vm11, %v14569_v35  ;;  %v7841_v19 = vadd.f32 %v7750_v17, %v7616_v33  ;;  %v7752_v51 = vpop.f32.mrb[169].mxu1 }
 0x4e7   :  { %10813 = vmatpush1.bf16.msra.mxu1 %v10684_v21  ;;  %v10870_v50 = vpop.permute.xlu0 %10869  ;;  %v7842_v16 = vadd.f32 %v7752_v51, %v7617_v37  ;;  %v10868_v32 = vpop.permute.xlu1 %10867  ;;  %10844 = vmatprep.mubr.bf16.mxu1 %v15063_v0 }
 0x4e8   :  { %v10882_v10 = vsel %vm1357_vm8, %v10868_v32, %v10870_v50  ;;  %v7754_v62 = vpop.f32.mrb[170].mxu1  ;;  %v10881_v2 = vsel %vm1357_vm8, %v10866_v44, %v10868_v32 }
 0x4e9   :  { %11529 = vmatprep.subr.msk.bf16.mxu1 %vm184_vm0, %v10882_v10  ;;  %v7791_v59 = vpop.f32.mrb[172].mxu0  ;;  %v7755_v8 = vpop.f32.mrb[171].mxu1  ;;  %v10894_v3 = vsel %vm184_vm0, %v10881_v2, 0 }
 0x4ea   :  { %11524 = vmatmul.mubr.msk.bf16.vlgmr.msra.gmra.mrb[20].mxu0 %vm6988_vm11, %v14569_v35  ;;  %v7843_v33 = vadd.f32 %v7791_v59, %v7618_v13  ;;  %v7793_v34 = vpop.f32.mrb[173].mxu0 }
 0x4eb   :  { %10912 = vmatpush1.bf16.msra.mxu0 %v10888_v4  ;;  %v10874_v37 = vpop.permute.xlu0 %10873  ;;  %v7844_v23 = vadd.f32 %v7793_v34, %v7619_v41  ;;  %v10872_v26 = vpop.permute.xlu1 %10871  ;;  %10943 = vmatprep.mubr.bf16.mxu0 %v15063_v0 }
 0x4ec   :  { %v10884_v47 = vsel %vm1357_vm8, %v10872_v26, %v10874_v37  ;;  %v7795_v18 = vpop.f32.mrb[174].mxu0  ;;  %v10883_v61 = vsel %vm1357_vm8, %v10870_v50, %v10872_v26 }
 0x4ed   :  { %11531 = vmatprep.subr.msk.bf16.mxu0 %vm184_vm0, %v10884_v47  ;;  %v7832_v24 = vpop.f32.mrb[172].mxu1  ;;  %v7796_v15 = vpop.f32.mrb[175].mxu0  ;;  %v10900_v30 = vsel %vm184_vm0, %v10883_v61, 0 }
 0x4ee   :  { %11526 = vmatmul.mubr.msk.bf16.vlgmr.msra.gmra.mrb[20].mxu1 %vm6988_vm11, %v14569_v35  ;;  %v7845_v13 = vadd.f32 %v7832_v24, %v7620_v46  ;;  %v7834_v20 = vpop.f32.mrb[173].mxu1 }
 0x4ef   :  { %10953 = vmatpush1.bf16.msra.mxu1 %v10894_v3  ;;  %v10878_v41 = vpop.permute.xlu0 %10877  ;;  %v7846_v40 = vadd.f32 %v7834_v20, %v7621_v7  ;;  %v10876_v56 = vpop.permute.xlu1 %10875  ;;  %10984 = vmatprep.mubr.bf16.mxu1 %v15063_v0 }
 0x4f0   :  { %v10886_v6 = vsel %vm1357_vm8, %v10876_v56, %v10878_v41  ;;  %v7836_v5 = vpop.f32.mrb[174].mxu1  ;;  %v10885_v9 = vsel %vm1357_vm8, %v10874_v37, %v10876_v56 }
 0x4f1   :  { %11533 = vmatprep.subr.msk.bf16.mxu1 %vm184_vm0, %v10886_v6  ;;  %v7932_v36 = vpop.f32.mrb[176].mxu0  ;;  %v7837_v52 = vpop.f32.mrb[175].mxu1  ;;  %v10906_v25 = vsel %vm184_vm0, %v10885_v9, 0 }
 0x4f2   :  { %11528 = vmatmul.mubr.msk.bf16.vlgmr.msra.gmra.mrb[24].mxu0 %vm6988_vm11, %v14618_v39  ;;  %v8062_v35 = vadd.f32 %v7932_v36, %v7839_v28  ;;  %v7934_v46 = vpop.f32.mrb[177].mxu0 }
 0x4f3   :  { %10994 = vmatpush1.bf16.msra.mxu0 %v10900_v30  ;;  %v8063_v7 = vadd.f32 %v7934_v46, %v7840_v38  ;;  %v7936_v63 = vpop.f32.mrb[178].mxu0  ;;  %11025 = vmatprep.mubr.bf16.mxu0 %v15063_v0 }
 0x4f4   :  { %v7937_v49 = vpop.f32.mrb[179].mxu0 }
 0x4f5   :  { %v7973_v58 = vpop.f32.mrb[176].mxu1 }
 0x4f6   :  { %11530 = vmatmul.mubr.msk.bf16.vlgmr.msra.gmra.mrb[24].mxu1 %vm6988_vm11, %v14618_v39  ;;  %v8064_v60 = vadd.f32 %v7973_v58, %v7841_v19  ;;  %v7975_v27 = vpop.f32.mrb[177].mxu1 }
 0x4f7   :  { %11035 = vmatpush1.bf16.msra.mxu1 %v10906_v25  ;;  %v8065_v1 = vadd.f32 %v7975_v27, %v7842_v16  ;;  %v7977_v28 = vpop.f32.mrb[178].mxu1  ;;  %11066 = vmatprep.mubr.bf16.mxu1 %v15063_v0 }
 0x4f8   :  { %v7978_v42 = vpop.f32.mrb[179].mxu1 }
 0x4f9   :  { %v8014_v44 = vpop.f32.mrb[180].mxu0 }
 0x4fa   :  { %11532 = vmatmul.mubr.msk.bf16.vlgmr.msra.gmra.mrb[28].mxu0 %vm6988_vm11, %v14618_v39  ;;  %v8066_v38 = vadd.f32 %v8014_v44, %v7843_v33  ;;  %v8016_v48 = vpop.f32.mrb[181].mxu0 }
 0x4fb   :  { %v8067_v14 = vadd.f32 %v8016_v48, %v7844_v23  ;;  %v8018_v54 = vpop.f32.mrb[182].mxu0 }
 0x4fc   :  { %v8019_v17 = vpop.f32.mrb[183].mxu0 }
 0x4fd   :  { %v8055_v11 = vpop.f32.mrb[180].mxu1 }
 0x4fe   :  { %11534 = vmatmul.mubr.msk.bf16.vlgmr.msra.gmra.mrb[28].mxu1 %vm6988_vm11, %v14618_v39  ;;  %v8068_v21 = vadd.f32 %v8055_v11, %v7845_v13  ;;  %v8057_v19 = vpop.f32.mrb[181].mxu1 }
 0x4ff   :  { %v8069_v51 = vadd.f32 %v8057_v19, %v7846_v40  ;;  %v8059_v29 = vpop.f32.mrb[182].mxu1 }
 0x500   :  { %v8060_v50 = vpop.f32.mrb[183].mxu1 }
 0x501   :  { %v8185_v0 = vpop.f32.mrb[184].mxu0 }
 0x502   :  { %v8315_v16 = vadd.f32 %v8185_v0, %v8062_v35  ;;  %v8187_v32 = vpop.f32.mrb[185].mxu0 }
 0x503   :  { %v8316_v10 = vadd.f32 %v8187_v32, %v8063_v7  ;;  %v8189_v62 = vpop.f32.mrb[186].mxu0 }
 0x504   :  { %v8190_v59 = vpop.f32.mrb[187].mxu0 }
 0x505   :  { %v8226_v8 = vpop.f32.mrb[184].mxu1 }
 0x506   :  { %v8317_v4 = vadd.f32 %v8226_v8, %v8064_v60  ;;  %v8228_v33 = vpop.f32.mrb[185].mxu1 }
 0x507   :  { %v8318_v34 = vadd.f32 %v8228_v33, %v8065_v1  ;;  %v8230_v2 = vpop.f32.mrb[186].mxu1 }
 0x508   :  { %v8231_v37 = vpop.f32.mrb[187].mxu1  ;;  %v14925_v2 = vpop.permute.xlu1 %9000 }
 0x509   :  { %v8267_v23 = vpop.f32.mrb[188].mxu0 }
 0x50a   :  { %v8319_v26 = vadd.f32 %v8267_v23, %v8066_v38  ;;  %v8269_v39 = vpop.f32.mrb[189].mxu0 }
 0x50b   :  { %v8320_v47 = vadd.f32 %v8269_v39, %v8067_v14  ;;  %v8271_v18 = vpop.f32.mrb[190].mxu0 }
 0x50c   :  { %v8272_v24 = vpop.f32.mrb[191].mxu0 }
 0x511   :  { %v8308_v15 = vpop.f32.mrb[188].mxu1  ;;  %v8410_v3 = vpop.f32.mrb[192].mxu0 }
 0x512   :  { %v8321_v13 = vadd.f32 %v8308_v15, %v8068_v21  ;;  %v8310_v20 = vpop.f32.mrb[189].mxu1  ;;  %v8540_v61 = vadd.f32 %v8410_v3, %v8315_v16  ;;  %v8412_v41 = vpop.f32.mrb[193].mxu0 }
 0x513   :  { %v8322_v40 = vadd.f32 %v8310_v20, %v8069_v51  ;;  %v8541_v56 = vadd.f32 %v8412_v41, %v8316_v10  ;;  %v8312_v6 = vpop.f32.mrb[190].mxu1  ;;  %v8414_v5 = vpop.f32.mrb[194].mxu0 }
 0x514   :  { %v8313_v36 = vpop.f32.mrb[191].mxu1  ;;  %v8415_v52 = vpop.f32.mrb[195].mxu0 }
 0x519   :  { %v8451_v30 = vpop.f32.mrb[192].mxu1 }
 0x51a   :  { %v8542_v35 = vadd.f32 %v8451_v30, %v8317_v4  ;;  %v8453_v46 = vpop.f32.mrb[193].mxu1  ;;  %v8492_v9 = vpop.f32.mrb[196].mxu0 }
 0x51b   :  { %v8543_v7 = vadd.f32 %v8453_v46, %v8318_v34  ;;  %v8544_v63 = vadd.f32 %v8492_v9, %v8319_v26  ;;  %v8494_v49 = vpop.f32.mrb[197].mxu0  ;;  %v8455_v58 = vpop.f32.mrb[194].mxu1 }
 0x51c   :  { %v8545_v25 = vadd.f32 %v8494_v49, %v8320_v47  ;;  %v8456_v60 = vpop.f32.mrb[195].mxu1  ;;  %v8496_v27 = vpop.f32.mrb[198].mxu0 }
 0x51d   :  { %v8497_v1 = vpop.f32.mrb[199].mxu0 }
 0x521   :  { %v8533_v28 = vpop.f32.mrb[196].mxu1 }
 0x522   :  { %v8546_v42 = vadd.f32 %v8533_v28, %v8321_v13  ;;  %v8535_v44 = vpop.f32.mrb[197].mxu1  ;;  %v8635_v38 = vpop.f32.mrb[200].mxu0 }
 0x523   :  { %v8547_v48 = vadd.f32 %v8535_v44, %v8322_v40  ;;  %v8765_v14 = vadd.f32 %v8635_v38, %v8540_v61  ;;  %v8637_v54 = vpop.f32.mrb[201].mxu0  ;;  %v8537_v17 = vpop.f32.mrb[198].mxu1 }
 0x524   :  { %v8766_v11 = vadd.f32 %v8637_v54, %v8541_v56  ;;  %v8538_v21 = vpop.f32.mrb[199].mxu1  ;;  %v8639_v19 = vpop.f32.mrb[202].mxu0 }
 0x525   :  { %v8640_v51 = vpop.f32.mrb[203].mxu0 }
 0x529   :  { %v8676_v29 = vpop.f32.mrb[200].mxu1 }
 0x52a   :  { %v8767_v50 = vadd.f32 %v8676_v29, %v8542_v35  ;;  %v8678_v0 = vpop.f32.mrb[201].mxu1  ;;  %v8717_v16 = vpop.f32.mrb[204].mxu0 }
 0x52b   :  { %v8768_v32 = vadd.f32 %v8678_v0, %v8543_v7  ;;  %v8769_v10 = vadd.f32 %v8717_v16, %v8544_v63  ;;  %v8719_v62 = vpop.f32.mrb[205].mxu0  ;;  %v8680_v59 = vpop.f32.mrb[202].mxu1 }
 0x52c   :  { %v8770_v8 = vadd.f32 %v8719_v62, %v8545_v25  ;;  %v8681_v4 = vpop.f32.mrb[203].mxu1  ;;  %v8721_v33 = vpop.f32.mrb[206].mxu0 }
 0x52d   :  { %v8722_v34 = vpop.f32.mrb[207].mxu0 }
 0x531   :  { %v8758_v37 = vpop.f32.mrb[204].mxu1 }
 0x532   :  { %v8771_v23 = vadd.f32 %v8758_v37, %v8546_v42  ;;  %v8760_v26 = vpop.f32.mrb[205].mxu1  ;;  %v8860_v39 = vpop.f32.mrb[208].mxu0 }
 0x533   :  { %v8772_v47 = vadd.f32 %v8760_v26, %v8547_v48  ;;  %v8990_v18 = vadd.f32 %v8860_v39, %v8765_v14  ;;  %v8862_v24 = vpop.f32.mrb[209].mxu0  ;;  %v8762_v15 = vpop.f32.mrb[206].mxu1 }
 0x534   :  { %v8991_v3 = vadd.f32 %v8862_v24, %v8766_v11  ;;  %v8763_v13 = vpop.f32.mrb[207].mxu1  ;;  %v8864_v20 = vpop.f32.mrb[210].mxu0 }
 0x535   :  { %v9003_v61 = vadd.f32 %v14925_v2, %v8990_v18  ;;  %v8865_v41 = vpop.f32.mrb[211].mxu0 }
 0x536   :  { %v9004_v40 = vadd.f32 %v14925_v2, %v8991_v3 }
 0x537   :  { %v9011_v56 = vmax.f32 %v9003_v61, 0.0 }
 0x538   :  { %v9012_v6 = vmax.f32 %v9004_v40, 0.0 }
 0x539   :  { %v9019_v5 = vmul.f32 %v9011_v56, %v15098_v43  ;;  %v8901_v36 = vpop.f32.mrb[208].mxu1 }
 0x53a   :  { %v9020_v52 = vmul.f32 %v9012_v6, %v15099_v57  ;;  %v8992_v30 = vadd.f32 %v8901_v36, %v8767_v50  ;;  %v8903_v35 = vpop.f32.mrb[209].mxu1  ;;  %v8942_v46 = vpop.f32.mrb[212].mxu0 }
 0x53b   :  { %v8993_v9 = vadd.f32 %v8903_v35, %v8768_v32  ;;  %v8994_v7 = vadd.f32 %v8942_v46, %v8769_v10  ;;  %v8944_v63 = vpop.f32.mrb[213].mxu0  ;;  %v8905_v49 = vpop.f32.mrb[210].mxu1 }
 0x53c   :  { %v9035_v58 = vcombine.low %v9019_v5, %v9020_v52  ;;  %v9005_v25 = vadd.f32 %v14925_v2, %v8992_v30  ;;  %v8995_v60 = vadd.f32 %v8944_v63, %v8770_v8  ;;  %v8906_v27 = vpop.f32.mrb[211].mxu1  ;;  %v8946_v1 = vpop.f32.mrb[214].mxu0 }
 0x53d   :  { %v9006_v28 = vadd.f32 %v14925_v2, %v8993_v9  ;;  %v9007_v42 = vadd.f32 %v14925_v2, %v8994_v7  ;;  %v8947_v44 = vpop.f32.mrb[215].mxu0 }
 0x53e   :  { %9043 = vst [vmem:[#allocation4] sm:$0xff] %v9035_v58  ;;  %v9013_v38 = vmax.f32 %v9005_v25, 0.0  ;;  %v9008_v48 = vadd.f32 %v14925_v2, %v8995_v60 }
 0x53f   :  { %v9014_v14 = vmax.f32 %v9006_v28, 0.0  ;;  %v9015_v54 = vmax.f32 %v9007_v42, 0.0 }
 0x540   :  { %v9021_v17 = vmul.f32 %v9013_v38, %v15102_v45  ;;  %v9016_v11 = vmax.f32 %v9008_v48, 0.0 }
 0x541   :  { %v9022_v21 = vmul.f32 %v9014_v14, %v15103_v55  ;;  %v9023_v19 = vmul.f32 %v9015_v54, %v15100_v53  ;;  %v8983_v51 = vpop.f32.mrb[212].mxu1 }
 0x542   :  { %v9024_v29 = vmul.f32 %v9016_v11, %v15101_v22  ;;  %v8996_v50 = vadd.f32 %v8983_v51, %v8771_v23  ;;  %v8985_v0 = vpop.f32.mrb[213].mxu1 }
 0x543   :  { %v9036_v16 = vcombine.low %v9021_v17, %v9022_v21  ;;  %v8997_v32 = vadd.f32 %v8985_v0, %v8772_v47  ;;  %v8987_v10 = vpop.f32.mrb[214].mxu1 }
 0x544   :  { %v9037_v62 = vcombine.low %v9023_v19, %v9024_v29  ;;  %v9009_v59 = vadd.f32 %v14925_v2, %v8996_v50  ;;  %v8988_v8 = vpop.f32.mrb[215].mxu1 }
 0x545   :  { %9044 = vst [vmem:[#allocation4 + $0x8] sm:$0xff] %v9036_v16  ;;  %v9010_v4 = vadd.f32 %v14925_v2, %v8997_v32  ;;  %v9159_v33 = vpop.f32.mrb[216].mxu0 }
 0x546   :  { %9045 = vst [vmem:[#allocation4 + $0x10] sm:$0xff] %v9037_v62  ;;  %v9017_v34 = vmax.f32 %v9009_v59, 0.0  ;;  %v9161_v37 = vpop.f32.mrb[217].mxu0 }
 0x547   :  { %v9018_v26 = vmax.f32 %v9010_v4, 0.0  ;;  %v9163_v39 = vpop.f32.mrb[218].mxu0 }
 0x548   :  { %v9025_v18 = vmul.f32 %v9017_v34, %v15104_v31  ;;  %v9164_v23 = vpop.f32.mrb[219].mxu0 }
 0x549   :  { %v9026_v24 = vmul.f32 %v9018_v26, %v15105_v12  ;;  %v9200_v47 = vpop.f32.mrb[216].mxu1 }
 0x54a   :  { %v9202_v15 = vpop.f32.mrb[217].mxu1 }
 0x54b   :  { %v9038_v3 = vcombine.low %v9025_v18, %v9026_v24  ;;  %v9204_v13 = vpop.f32.mrb[218].mxu1 }
 0x54c   :  { %v9205_v20 = vpop.f32.mrb[219].mxu1 }
 0x54d   :  { %9046 = vst [vmem:[#allocation4 + $0x18] sm:$0xff] %v9038_v3  ;;  %v9241_v61 = vpop.f32.mrb[220].mxu0 }
 0x54e   :  { %v9243_v41 = vpop.f32.mrb[221].mxu0 }
 0x54f   :  { %v9245_v40 = vpop.f32.mrb[222].mxu0 }
 0x550   :  { %v9246_v56 = vpop.f32.mrb[223].mxu0 }
 0x551   :  { %v9282_v6 = vpop.f32.mrb[220].mxu1 }
 0x552   :  { %v9284_v5 = vpop.f32.mrb[221].mxu1 }
 0x553   :  { %v9286_v36 = vpop.f32.mrb[222].mxu1 }
 0x554   :  { %v9287_v52 = vpop.f32.mrb[223].mxu1 }
 0x555   :  { %v9373_v30 = vpop.f32.mrb[224].mxu0 }
 0x556   :  { %v9374_v35 = vadd.f32 %v9373_v30, %v9159_v33  ;;  %v9375_v46 = vpop.f32.mrb[225].mxu0 }
 0x557   :  { %v9376_v9 = vadd.f32 %v9375_v46, %v9161_v37  ;;  %v9377_v7 = vpop.f32.mrb[226].mxu0 }
 0x558   :  { %v9378_v63 = vpop.f32.mrb[227].mxu0 }
 0x559   :  { %v9414_v49 = vpop.f32.mrb[224].mxu1 }
 0x55a   :  { %v9415_v58 = vadd.f32 %v9414_v49, %v9200_v47  ;;  %v9416_v25 = vpop.f32.mrb[225].mxu1 }
 0x55b   :  { %v9417_v60 = vadd.f32 %v9416_v25, %v9202_v15  ;;  %v9418_v27 = vpop.f32.mrb[226].mxu1 }
 0x55c   :  { %v9419_v1 = vpop.f32.mrb[227].mxu1 }
 0x55d   :  { %v9455_v28 = vpop.f32.mrb[228].mxu0 }
 0x55e   :  { %v9456_v42 = vadd.f32 %v9455_v28, %v9241_v61  ;;  %v9457_v44 = vpop.f32.mrb[229].mxu0 }
 0x55f   :  { %v9458_v38 = vadd.f32 %v9457_v44, %v9243_v41  ;;  %v9459_v48 = vpop.f32.mrb[230].mxu0 }
 0x560   :  { %v9460_v14 = vpop.f32.mrb[231].mxu0 }
 0x561   :  { %v9496_v54 = vpop.f32.mrb[228].mxu1 }
 0x562   :  { %v9497_v17 = vadd.f32 %v9496_v54, %v9282_v6  ;;  %v9498_v11 = vpop.f32.mrb[229].mxu1 }
 0x563   :  { %v9499_v21 = vadd.f32 %v9498_v11, %v9284_v5  ;;  %v9500_v19 = vpop.f32.mrb[230].mxu1 }
 0x564   :  { %v9501_v51 = vpop.f32.mrb[231].mxu1 }
 0x565   :  { %v9587_v29 = vpop.f32.mrb[232].mxu0 }
 0x566   :  { %v9717_v50 = vadd.f32 %v9587_v29, %v9374_v35  ;;  %v9589_v0 = vpop.f32.mrb[233].mxu0 }
 0x567   :  { %v9718_v16 = vadd.f32 %v9589_v0, %v9376_v9  ;;  %v9591_v32 = vpop.f32.mrb[234].mxu0 }
 0x568   :  { %v9592_v10 = vpop.f32.mrb[235].mxu0 }
 0x569   :  { %v9628_v62 = vpop.f32.mrb[232].mxu1 }
 0x56a   :  { %v9719_v59 = vadd.f32 %v9628_v62, %v9415_v58  ;;  %v9630_v8 = vpop.f32.mrb[233].mxu1 }
 0x56b   :  { %v9720_v4 = vadd.f32 %v9630_v8, %v9417_v60  ;;  %v9632_v33 = vpop.f32.mrb[234].mxu1 }
 0x56c   :  { %v9633_v34 = vpop.f32.mrb[235].mxu1 }
 0x56d   :  { %v9669_v37 = vpop.f32.mrb[236].mxu0 }
 0x56e   :  { %v9721_v26 = vadd.f32 %v9669_v37, %v9456_v42  ;;  %v9671_v39 = vpop.f32.mrb[237].mxu0 }
 0x56f   :  { %v9722_v18 = vadd.f32 %v9671_v39, %v9458_v38  ;;  %v9673_v23 = vpop.f32.mrb[238].mxu0 }
 0x570   :  { %v9674_v24 = vpop.f32.mrb[239].mxu0 }
 0x571   :  { %v9710_v47 = vpop.f32.mrb[236].mxu1 }
 0x572   :  { %v9723_v15 = vadd.f32 %v9710_v47, %v9497_v17  ;;  %v9712_v3 = vpop.f32.mrb[237].mxu1 }
 0x573   :  { %v9724_v13 = vadd.f32 %v9712_v3, %v9499_v21  ;;  %v9714_v20 = vpop.f32.mrb[238].mxu1 }
 0x574   :  { %v9715_v61 = vpop.f32.mrb[239].mxu1 }
 0x575   :  { %v9809_v41 = vpop.f32.mrb[240].mxu0 }
 0x576   :  { %v9939_v40 = vadd.f32 %v9809_v41, %v9717_v50  ;;  %v9811_v56 = vpop.f32.mrb[241].mxu0 }
 0x577   :  { %v9940_v6 = vadd.f32 %v9811_v56, %v9718_v16  ;;  %v9813_v5 = vpop.f32.mrb[242].mxu0 }
 0x578   :  { %v9814_v36 = vpop.f32.mrb[243].mxu0 }
 0x579   :  { %v9850_v52 = vpop.f32.mrb[240].mxu1 }
 0x57a   :  { %v9941_v30 = vadd.f32 %v9850_v52, %v9719_v59  ;;  %v9852_v35 = vpop.f32.mrb[241].mxu1 }
 0x57b   :  { %v9942_v46 = vadd.f32 %v9852_v35, %v9720_v4  ;;  %v9854_v9 = vpop.f32.mrb[242].mxu1 }
 0x57c   :  { %v9855_v7 = vpop.f32.mrb[243].mxu1 }
 0x57d   :  { %v9891_v63 = vpop.f32.mrb[244].mxu0 }
 0x57e   :  { %v9943_v49 = vadd.f32 %v9891_v63, %v9721_v26  ;;  %v9893_v58 = vpop.f32.mrb[245].mxu0 }
 0x57f   :  { %v9944_v25 = vadd.f32 %v9893_v58, %v9722_v18  ;;  %v9895_v60 = vpop.f32.mrb[246].mxu0 }
 0x580   :  { %v9896_v27 = vpop.f32.mrb[247].mxu0 }
 0x581   :  { %v9932_v1 = vpop.f32.mrb[244].mxu1 }
 0x582   :  { %v9945_v28 = vadd.f32 %v9932_v1, %v9723_v15  ;;  %v9934_v42 = vpop.f32.mrb[245].mxu1 }
 0x583   :  { %v9946_v44 = vadd.f32 %v9934_v42, %v9724_v13  ;;  %v9936_v38 = vpop.f32.mrb[246].mxu1 }
 0x584   :  { %v9937_v48 = vpop.f32.mrb[247].mxu1 }
 0x585   :  { %v10029_v14 = vpop.f32.mrb[248].mxu0 }
 0x586   :  { %v10159_v54 = vadd.f32 %v10029_v14, %v9939_v40  ;;  %v10031_v17 = vpop.f32.mrb[249].mxu0 }
 0x587   :  { %v10160_v11 = vadd.f32 %v10031_v17, %v9940_v6  ;;  %v10033_v21 = vpop.f32.mrb[250].mxu0 }
 0x588   :  { %v10034_v19 = vpop.f32.mrb[251].mxu0 }
 0x589   :  { %v10070_v51 = vpop.f32.mrb[248].mxu1 }
 0x58a   :  { %v10161_v29 = vadd.f32 %v10070_v51, %v9941_v30  ;;  %v10072_v50 = vpop.f32.mrb[249].mxu1 }
 0x58b   :  { %v10162_v0 = vadd.f32 %v10072_v50, %v9942_v46  ;;  %v10074_v16 = vpop.f32.mrb[250].mxu1 }
 0x58c   :  { %v10075_v32 = vpop.f32.mrb[251].mxu1 }
 0x58d   :  { %v10111_v10 = vpop.f32.mrb[252].mxu0 }
 0x58e   :  { %v10163_v62 = vadd.f32 %v10111_v10, %v9943_v49  ;;  %v10113_v59 = vpop.f32.mrb[253].mxu0 }
 0x58f   :  { %v10164_v8 = vadd.f32 %v10113_v59, %v9944_v25  ;;  %v10115_v4 = vpop.f32.mrb[254].mxu0 }
 0x590   :  { %v10116_v33 = vpop.f32.mrb[255].mxu0 }
 0x591   :  { %v10152_v34 = vpop.f32.mrb[252].mxu1 }
 0x592   :  { %v10165_v37 = vadd.f32 %v10152_v34, %v9945_v28  ;;  %v10154_v26 = vpop.f32.mrb[253].mxu1 }
 0x593   :  { %v10166_v39 = vadd.f32 %v10154_v26, %v9946_v44  ;;  %v10156_v18 = vpop.f32.mrb[254].mxu1 }
 0x594   :  { %v10157_v23 = vpop.f32.mrb[255].mxu1 }
 0x595   :  { %v10279_v24 = vpop.f32.mrb[0].mxu0 }
 0x596   :  { %v10409_v47 = vadd.f32 %v10279_v24, %v10159_v54  ;;  %v10281_v15 = vpop.f32.mrb[1].mxu0 }
 0x597   :  { %v10410_v3 = vadd.f32 %v10281_v15, %v10160_v11  ;;  %v10283_v13 = vpop.f32.mrb[2].mxu0 }
 0x598   :  { %v10284_v20 = vpop.f32.mrb[3].mxu0 }
 0x599   :  { %v10320_v61 = vpop.f32.mrb[0].mxu1 }
 0x59a   :  { %v10411_v41 = vadd.f32 %v10320_v61, %v10161_v29  ;;  %v10322_v40 = vpop.f32.mrb[1].mxu1 }
 0x59b   :  { %v10412_v56 = vadd.f32 %v10322_v40, %v10162_v0  ;;  %v10324_v6 = vpop.f32.mrb[2].mxu1 }
 0x59c   :  { %v10325_v5 = vpop.f32.mrb[3].mxu1 }
 0x59d   :  { %v10361_v36 = vpop.f32.mrb[4].mxu0 }
 0x59e   :  { %v10413_v52 = vadd.f32 %v10361_v36, %v10163_v62  ;;  %v10363_v30 = vpop.f32.mrb[5].mxu0 }
 0x59f   :  { %v10414_v35 = vadd.f32 %v10363_v30, %v10164_v8  ;;  %v10365_v46 = vpop.f32.mrb[6].mxu0 }
 0x5a0   :  { %v10366_v9 = vpop.f32.mrb[7].mxu0 }
 0x5a1   :  { %v10402_v7 = vpop.f32.mrb[4].mxu1 }
 0x5a2   :  { %v10415_v63 = vadd.f32 %v10402_v7, %v10165_v37  ;;  %v10404_v49 = vpop.f32.mrb[5].mxu1 }
 0x5a3   :  { %v10416_v58 = vadd.f32 %v10404_v49, %v10166_v39  ;;  %v10406_v25 = vpop.f32.mrb[6].mxu1 }
 0x5a4   :  { %v10407_v60 = vpop.f32.mrb[7].mxu1 }
 0x5a5   :  { %v10501_v27 = vpop.f32.mrb[8].mxu0 }
 0x5a6   :  { %v10631_v1 = vadd.f32 %v10501_v27, %v10409_v47  ;;  %v10503_v28 = vpop.f32.mrb[9].mxu0 }
 0x5a7   :  { %v10632_v42 = vadd.f32 %v10503_v28, %v10410_v3  ;;  %v10505_v44 = vpop.f32.mrb[10].mxu0 }
 0x5a8   :  { %v10506_v38 = vpop.f32.mrb[11].mxu0 }
 0x5a9   :  { %v10542_v48 = vpop.f32.mrb[8].mxu1 }
 0x5aa   :  { %v10633_v14 = vadd.f32 %v10542_v48, %v10411_v41  ;;  %v10544_v54 = vpop.f32.mrb[9].mxu1 }
 0x5ab   :  { %v10634_v17 = vadd.f32 %v10544_v54, %v10412_v56  ;;  %v10546_v11 = vpop.f32.mrb[10].mxu1 }
 0x5ac   :  { %v10547_v21 = vpop.f32.mrb[11].mxu1 }
 0x5ad   :  { %v10583_v19 = vpop.f32.mrb[12].mxu0 }
 0x5ae   :  { %v10635_v51 = vadd.f32 %v10583_v19, %v10413_v52  ;;  %v10585_v29 = vpop.f32.mrb[13].mxu0 }
 0x5af   :  { %v10636_v50 = vadd.f32 %v10585_v29, %v10414_v35  ;;  %v10587_v0 = vpop.f32.mrb[14].mxu0 }
 0x5b0   :  { %v10588_v16 = vpop.f32.mrb[15].mxu0 }
 0x5b1   :  { %v10624_v32 = vpop.f32.mrb[12].mxu1 }
 0x5b2   :  { %v10637_v10 = vadd.f32 %v10624_v32, %v10415_v63  ;;  %v10626_v62 = vpop.f32.mrb[13].mxu1 }
 0x5b3   :  { %v10638_v59 = vadd.f32 %v10626_v62, %v10416_v58  ;;  %v10628_v8 = vpop.f32.mrb[14].mxu1 }
 0x5b4   :  { %v10629_v4 = vpop.f32.mrb[15].mxu1 }
 0x5b5   :  { %v10723_v33 = vpop.f32.mrb[16].mxu0 }
 0x5b6   :  { %v10853_v34 = vadd.f32 %v10723_v33, %v10631_v1  ;;  %v10725_v37 = vpop.f32.mrb[17].mxu0 }
 0x5b7   :  { %v10854_v26 = vadd.f32 %v10725_v37, %v10632_v42  ;;  %v10727_v39 = vpop.f32.mrb[18].mxu0 }
 0x5b8   :  { %v10728_v18 = vpop.f32.mrb[19].mxu0 }
 0x5b9   :  { %v10764_v23 = vpop.f32.mrb[16].mxu1 }
 0x5ba   :  { %v10855_v24 = vadd.f32 %v10764_v23, %v10633_v14  ;;  %v10766_v47 = vpop.f32.mrb[17].mxu1 }
 0x5bb   :  { %v10856_v15 = vadd.f32 %v10766_v47, %v10634_v17  ;;  %v10768_v3 = vpop.f32.mrb[18].mxu1 }
 0x5bc   :  { %v10769_v13 = vpop.f32.mrb[19].mxu1 }
 0x5bd   :  { %v10805_v20 = vpop.f32.mrb[20].mxu0 }
 0x5be   :  { %v10857_v61 = vadd.f32 %v10805_v20, %v10635_v51  ;;  %v10807_v41 = vpop.f32.mrb[21].mxu0 }
 0x5bf   :  { %v10858_v40 = vadd.f32 %v10807_v41, %v10636_v50  ;;  %v10809_v56 = vpop.f32.mrb[22].mxu0 }
 0x5c0   :  { %v10810_v6 = vpop.f32.mrb[23].mxu0 }
 0x5c1   :  { %v10846_v5 = vpop.f32.mrb[20].mxu1 }
 0x5c2   :  { %v10859_v36 = vadd.f32 %v10846_v5, %v10637_v10  ;;  %v10848_v52 = vpop.f32.mrb[21].mxu1 }
 0x5c3   :  { %v10860_v30 = vadd.f32 %v10848_v52, %v10638_v59  ;;  %v10850_v35 = vpop.f32.mrb[22].mxu1 }
 0x5c4   :  { %v10851_v46 = vpop.f32.mrb[23].mxu1 }
 0x5c5   :  { %v10945_v9 = vpop.f32.mrb[24].mxu0 }
 0x5c6   :  { %v11075_v7 = vadd.f32 %v10945_v9, %v10853_v34  ;;  %v10947_v63 = vpop.f32.mrb[25].mxu0 }
 0x5c7   :  { %v11076_v49 = vadd.f32 %v10947_v63, %v10854_v26  ;;  %v10949_v58 = vpop.f32.mrb[26].mxu0 }
 0x5c8   :  { %v11083_v25 = vadd.f32 %v11075_v7, %v14925_v2  ;;  %v10950_v60 = vpop.f32.mrb[27].mxu0 }
 0x5c9   :  { %v11084_v27 = vadd.f32 %v11076_v49, %v14925_v2  ;;  %v10986_v1 = vpop.f32.mrb[24].mxu1 }
 0x5ca   :  { %v11091_v28 = vmax.f32 %v11083_v25, 0.0  ;;  %v11077_v42 = vadd.f32 %v10986_v1, %v10855_v24  ;;  %v10988_v44 = vpop.f32.mrb[25].mxu1 }
 0x5cb   :  { %v11092_v38 = vmax.f32 %v11084_v27, 0.0  ;;  %v11078_v48 = vadd.f32 %v10988_v44, %v10856_v15  ;;  %v10990_v14 = vpop.f32.mrb[26].mxu1 }
 0x5cc   :  { %v11099_v54 = vmul.f32 %v11091_v28, %v15098_v43  ;;  %v11085_v17 = vadd.f32 %v11077_v42, %v14925_v2  ;;  %v10991_v11 = vpop.f32.mrb[27].mxu1 }
 0x5cd   :  { %v11100_v21 = vmul.f32 %v11092_v38, %v15099_v57  ;;  %v11086_v19 = vadd.f32 %v11078_v48, %v14925_v2  ;;  %v11027_v51 = vpop.f32.mrb[28].mxu0 }
 0x5ce   :  { %v11093_v29 = vmax.f32 %v11085_v17, 0.0  ;;  %v11079_v50 = vadd.f32 %v11027_v51, %v10857_v61  ;;  %v11029_v0 = vpop.f32.mrb[29].mxu0 }
 0x5cf   :  { %v11115_v16 = vcombine.low %v11099_v54, %v11100_v21  ;;  %v11094_v32 = vmax.f32 %v11086_v19, 0.0  ;;  %v11080_v10 = vadd.f32 %v11029_v0, %v10858_v40  ;;  %v11031_v62 = vpop.f32.mrb[30].mxu0 }
 0x5d0   :  { %v11101_v59 = vmul.f32 %v11093_v29, %v15102_v45  ;;  %v11087_v8 = vadd.f32 %v11079_v50, %v14925_v2  ;;  %v11032_v43 = vpop.f32.mrb[31].mxu0 }
 0x5d1   :  { %11123 = vst [vmem:[#allocation4 + $0x20] sm:$0xff] %v11115_v16  ;;  %v11102_v4 = vmul.f32 %v11094_v32, %v15103_v55  ;;  %v11088_v57 = vadd.f32 %v11080_v10, %v14925_v2  ;;  %v11068_v33 = vpop.f32.mrb[28].mxu1 }
 0x5d2   :  { %v11095_v34 = vmax.f32 %v11087_v8, 0.0  ;;  %v11081_v37 = vadd.f32 %v11068_v33, %v10859_v36  ;;  %v11070_v26 = vpop.f32.mrb[29].mxu1 }
 0x5d3   :  { %v11116_v39 = vcombine.low %v11101_v59, %v11102_v4  ;;  %v11096_v18 = vmax.f32 %v11088_v57, 0.0  ;;  %v11082_v23 = vadd.f32 %v11070_v26, %v10860_v30  ;;  %v11072_v24 = vpop.f32.mrb[30].mxu1 }
 0x5d4   :  { %v11103_v47 = vmul.f32 %v11095_v34, %v15100_v53  ;;  %v11089_v45 = vadd.f32 %v11081_v37, %v14925_v2  ;;  %v11073_v15 = vpop.f32.mrb[31].mxu1 }
 0x5d5   :  { %11124 = vst [vmem:[#allocation4 + $0x28] sm:$0xff] %v11116_v39  ;;  %v11104_v3 = vmul.f32 %v11096_v18, %v15101_v22  ;;  %v11090_v55 = vadd.f32 %v11082_v23, %v14925_v2 }
 0x5d6   :  { %v11097_v13 = vmax.f32 %v11089_v45, 0.0 }
 0x5d7   :  { %v11117_v20 = vcombine.low %v11103_v47, %v11104_v3  ;;  %v11098_v61 = vmax.f32 %v11090_v55, 0.0 }
 0x5d8   :  { %v11105_v41 = vmul.f32 %v11097_v13, %v15104_v31 }
 0x5d9   :  { %11125 = vst [vmem:[#allocation4 + $0x30] sm:$0xff] %v11117_v20  ;;  %v11106_v40 = vmul.f32 %v11098_v61, %v15105_v12 }
 0x5db   :  { %v11118_v56 = vcombine.low %v11105_v41, %v11106_v40 }
 0x5dd   :  { %11126 = vst [vmem:[#allocation4 + $0x38] sm:$0xff] %v11118_v56 }
 0x5de   :  { %11658 = shalt.err (!%p11655_p4)
}
 0x5df   :  { %s11659_s22 = scalar_lea.hbm %s14979_s8, 1024 }
 0x5e0   :  { %p11660_p5 = scmp.ne.s32.totalorder %s14979_s8, %s11659_s22  ;;  %p11663_p6 = scmp.lt.u32.totalorder %s11659_s22, %s14979_s8 }
 0x5e2   :  { %p11665_p7 = pnand %p11663_p6, %p11660_p5 }
 0x5e4   :  { %11668 = shalt.err (!%p11665_p7)
}
 0x5e5   :  { %11136 = dma.vmem_to_hbm [thread:$0]  %s11134_s2, 1024, %s14979_s8, [#allocation5]  }
 0x5e6   :  { %11669 = dma.done.wait [#allocation5], 1024  }
 0x5e7   :  { %11670 = vsyncadd [#allocation5], 4294966272 }
 0x5e8   :  { %11140 = vsyncpa [#allocation5], 1 }

</bundles_post_ra>
